<compile_context>
chip_gen: v7x
topology: tpu7x:2x2x1
jax: 0.10.0
libtpu: 0.0.40
codegen_flags: <defaults>
</compile_context>

<pallas_src>
import functools

import jax
import jax.numpy as jnp
from jax.experimental import pallas as pl
from jax.experimental.pallas import tpu as pltpu

Z_DIM = 2
BN_EPS = 1e-5
FEAT = 16 * 7 * 7

_VMEM = pl.BlockSpec(memory_space=pltpu.MemorySpace.VMEM)
_COMPILER_PARAMS = pltpu.CompilerParams(vmem_limit_bytes=32 * 1024 * 1024)


# ----------------------------- Pallas kernels -----------------------------

def _conv_kernel(phases, l_eff, count, act, bn, x_ref, w_ref, b_ref, *rest):
    """Fused conv / conv-transpose-phase matmuls + bias + BatchNorm + activation.

    x_ref : (C_in, L)        bf16  padded input flattened to one lane axis
    w_ref : (T, C_out, C_in) bf16  per-tap weight matrices
    b_ref : (C_out, 1)       f32
    rest  : bn  -> (mask (1, L_eff) f32, gamma (C_out,1) f32, beta (C_out,1) f32, out)
            else -> (out,)
    out   : (n_phases, C_out, L_eff)   lane-dense (L_eff = B*Hp*Wp - max_tap_offset)

    `phases` is a static tuple; each phase is a tuple of (lane_offset, weight_idx)
    taps.  Taps are static lane-offset slices of the flat input, so the k*k
    im2col expansion never exists in HBM.  BN statistics are taken over the
    valid output anchors only (via `mask`), divided by the static `count`.
    """
    if bn:
        mask_ref, g_ref, beta_ref, o_ref = rest
    else:
        (o_ref,) = rest

    x = x_ref[...]            # (C_in, L) bf16
    w = w_ref[...]            # (T, C_out, C_in) bf16
    bias = b_ref[...]         # (C_out, 1) f32

    ys = []
    for taps in phases:
        acc = None
        for off, wi in taps:
            xt = x[:, off:off + l_eff]                                 # (C_in, L_eff) bf16
            part = jnp.dot(w[wi], xt, preferred_element_type=jnp.float32)
            acc = part if acc is None else acc + part
        ys.append(acc + bias)                                          # (C_out, L_eff) f32

    if bn:
        m = mask_ref[...]                                              # (1, L_eff)
        s = None
        for y in ys:
            ps = jnp.sum(y * m, axis=1, keepdims=True)                 # (C_out, 1)
            s = ps if s is None else s + ps
        mean = s / count
        v = None
        for y in ys:
            d = (y - mean) * m
            pv = jnp.sum(d * d, axis=1, keepdims=True)
            v = pv if v is None else v + pv
        inv = jax.lax.rsqrt(v / count + BN_EPS)
        scale = inv * g_ref[...]
        shift = beta_ref[...] - mean * scale
        ys = [y * scale + shift for y in ys]

    if act == "relu":
        ys = [jnp.maximum(y, 0.0) for y in ys]
    elif act == "tanh":
        ys = [jnp.tanh(y) for y in ys]
    elif act == "sigmoid":
        # numerically stable sigmoid (no exp overflow); tanh runs on the EUP.
        ys = [0.5 * (jnp.tanh(0.5 * y) + 1.0) for y in ys]

    for p, y in enumerate(ys):
        o_ref[p] = y.astype(o_ref.dtype)


def _fc_kernel(x_ref, w1_ref, b1_ref, w2_ref, b2_ref, code_ref, h_ref):
    """Fused encoder_fc + decoder_fc (both are tiny and launch/HBM bound)."""
    x = x_ref[...]                                                     # (Bp, 784) bf16
    code = jnp.dot(x, w1_ref[...], preferred_element_type=jnp.float32) + b1_ref[...]
    code_ref[...] = code                                               # (Bp, 8) f32
    h = jnp.dot(code, w2_ref[...], preferred_element_type=jnp.float32) + b2_ref[...]
    h_ref[...] = h.astype(h_ref.dtype)                                 # (Bp, 784) bf16


# ------------------------- static tap descriptions -------------------------

def conv_taps(k, wp):
    """k x k conv taps: flat offset i*wp + j, weight index i*k + j (one phase)."""
    return (tuple((i * wp + j, i * k + j) for i in range(k) for j in range(k)),)


def convt_taps(wp):
    """Sub-pixel decomposition of ConvTranspose2d(k=4, stride=2, pad=1).

    Output phase (r, c), r,c in {0,1}, is a stride-1 2x2 conv of the pad-1
    padded *undilated* input: out[2t+r, 2u+c] = sum_{a,b in {0,1}}
        W[:, :, 3-2a-r, 3-2b-c] . xpad[:, t+a+r, u+b+c]
    """
    phases = []
    for r in range(2):
        for c in range(2):
            taps = []
            for a in range(2):
                for b in range(2):
                    off = (a + r) * wp + (b + c)
                    wi = (3 - 2 * a - r) * 4 + (3 - 2 * b - c)
                    taps.append((off, wi))
            phases.append(tuple(taps))
    return tuple(phases)


# ------------------------------ layer wrappers ------------------------------

def _conv_call(x_flat, w, b, mask, gamma, beta, phases, l_eff, count, act, bn, out_dtype):
    n_ph = len(phases)
    c_out = w.shape[1]
    kern = functools.partial(_conv_kernel, phases, l_eff, count, act, bn)
    args = (x_flat, w, b) + ((mask, gamma, beta) if bn else ())
    return pl.pallas_call(
        kern,
        out_shape=jax.ShapeDtypeStruct((n_ph, c_out, l_eff), out_dtype),
        in_specs=[_VMEM] * len(args),
        out_specs=_VMEM,
        compiler_params=_COMPILER_PARAMS,
    )(*args)


def conv_block(x, lp, k, s, act, bn=True, cin_pad=None, out_dtype=jnp.bfloat16):
    """(C_in, B, H, W) -> (C_out, B, oh, ow): Conv2d(k, stride=s, pad=1) + BN + act."""
    c_in, B, H, W = x.shape
    if cin_pad is not None and cin_pad > c_in:
        x = jnp.pad(x, ((0, cin_pad - c_in), (0, 0), (0, 0), (0, 0)))
    xp = jnp.pad(x, ((0, 0), (0, 0), (1, 1), (1, 1)))
    cp = xp.shape[0]
    Hp, Wp = H + 2, W + 2
    oh = (H + 2 - k) // s + 1
    ow = (W + 2 - k) // s + 1
    L = B * Hp * Wp
    l_eff = L - ((k - 1) * Wp + (k - 1))
    x_flat = xp.reshape(cp, L).astype(jnp.bfloat16)

    mask = gamma = beta = None
    if bn:
        m = jnp.zeros((B, Hp, Wp), jnp.float32)
        m = m.at[:, 0:s * oh:s, 0:s * ow:s].set(1.0)       # valid output anchors
        mask = m.reshape(1, L)[:, :l_eff]
        gamma, beta = lp["g"], lp["beta"]

    y = _conv_call(x_flat, lp["w"], lp["b"], mask, gamma, beta,
                   conv_taps(k, Wp), l_eff, float(B * oh * ow), act, bn, out_dtype)
    c_out = y.shape[1]
    y = jnp.pad(y, ((0, 0), (0, 0), (0, L - l_eff)))
    y = y.reshape(1, c_out, B, Hp, Wp)[0, :, :, 0:s * oh:s, 0:s * ow:s]
    return y                                               # (C_out, B, oh, ow)


def convt_block(x, lp, act, bn=True, out_dtype=jnp.bfloat16):
    """(C_in, B, H, W) -> (C_out, B, 2H, 2W): ConvTranspose2d(4, 2, 1) + [BN] + act."""
    c_in, B, H, W = x.shape
    xp = jnp.pad(x, ((0, 0), (0, 0), (1, 1), (1, 1)))
    Hp, Wp = H + 2, W + 2
    L = B * Hp * Wp
    l_eff = L - (2 * Wp + 2)
    x_flat = xp.reshape(c_in, L).astype(jnp.bfloat16)

    mask = gamma = beta = None
    if bn:
        m = jnp.zeros((B, Hp, Wp), jnp.float32)
        m = m.at[:, 0:H, 0:W].set(1.0)
        mask = m.reshape(1, L)[:, :l_eff]
        gamma, beta = lp["g"], lp["beta"]

    y = _conv_call(x_flat, lp["w"], lp["b"], mask, gamma, beta,
                   convt_taps(Wp), l_eff, float(4 * B * H * W), act, bn, out_dtype)
    c_out = y.shape[1]
    y = jnp.pad(y, ((0, 0), (0, 0), (0, L - l_eff)))
    y = y.reshape(4, c_out, B, Hp, Wp)[:, :, :, :H, :W]    # (4, C_out, B, H, W)
    # interleave the 4 sub-pixel phases: out[2t+r, 2u+c] = phase[r*2+c][t, u]
    y = y.reshape(2, 2, c_out, B, H, W)
    y = jnp.transpose(y, (2, 3, 4, 0, 5, 1)).reshape(c_out, B, 2 * H, 2 * W)
    return y


def fc_call(flat, fcp):
    bp = flat.shape[0]
    code, h = pl.pallas_call(
        _fc_kernel,
        out_shape=(jax.ShapeDtypeStruct((bp, 8), jnp.float32),
                   jax.ShapeDtypeStruct((bp, FEAT), jnp.bfloat16)),
        in_specs=[_VMEM] * 5,
        out_specs=(_VMEM, _VMEM),
        compiler_params=_COMPILER_PARAMS,
    )(flat, fcp["w1"], fcp["b1"], fcp["w2"], fcp["b2"])
    return code, h


# ------------------------------- parameters --------------------------------

def _uniform(key, shape, fan_in):
    bound = 1.0 / (fan_in ** 0.5)
    return jax.random.uniform(key, shape, jnp.float32, -bound, bound)


def conv_w_to_taps(w):
    """Conv2d weight (C_out, C_in, k, k) -> per-tap mats (k*k, C_out, C_in)."""
    cout, cin, kh, kw = w.shape
    return jnp.transpose(w, (2, 3, 0, 1)).reshape(kh * kw, cout, cin)


def convt_w_to_taps(w):
    """ConvTranspose2d weight (C_in, C_out, k, k) -> (k*k, C_out, C_in), indexed
    by kernel position ky*4 + kx as used directly by the sub-pixel taps."""
    cin, cout, kh, kw = w.shape
    return jnp.transpose(w, (2, 3, 1, 0)).reshape(kh * kw, cout, cin)


def init_params(key):
    ks = jax.random.split(key, 14)
    bf = jnp.bfloat16

    def bn_params(c):
        return jnp.ones((c, 1), jnp.float32), jnp.zeros((c, 1), jnp.float32)

    p = {}
    # encoder convs (weights stored as bf16 per-tap matrices -> bf16 MXU inputs)
    w = conv_w_to_taps(_uniform(ks[0], (16, 1, 3, 3), 1 * 9))
    w = jnp.pad(w, ((0, 0), (0, 0), (0, 7)))                  # pad C_in 1 -> 8 (MXU-friendly K)
    g, bta = bn_params(16)
    p["c1"] = dict(w=w.astype(bf), b=_uniform(ks[1], (16, 1), 1 * 9), g=g, beta=bta)

    w = conv_w_to_taps(_uniform(ks[2], (32, 16, 3, 3), 16 * 9))
    g, bta = bn_params(32)
    p["c2"] = dict(w=w.astype(bf), b=_uniform(ks[3], (32, 1), 16 * 9), g=g, beta=bta)

    w = conv_w_to_taps(_uniform(ks[4], (16, 32, 3, 3), 32 * 9))
    g, bta = bn_params(16)
    p["c3"] = dict(w=w.astype(bf), b=_uniform(ks[5], (16, 1), 32 * 9), g=g, beta=bta)

    # fc pair (zero-padded to 8 so every matmul dim is >= 8; padding is exact)
    w1 = _uniform(ks[6], (Z_DIM, FEAT), FEAT)                 # Linear(784, 2).weight
    b1 = _uniform(ks[7], (1, Z_DIM), FEAT)
    w2 = _uniform(ks[8], (FEAT, Z_DIM), Z_DIM)                # Linear(2, 784).weight
    b2 = _uniform(ks[9], (1, FEAT), Z_DIM)
    p["fc"] = dict(
        w1=jnp.pad(w1.T, ((0, 0), (0, 8 - Z_DIM))).astype(bf),   # (784, 8) bf16
        b1=jnp.pad(b1, ((0, 0), (0, 8 - Z_DIM))),                # (1, 8) f32
        w2=jnp.pad(w2.T, ((0, 8 - Z_DIM), (0, 0))),              # (8, 784) f32 (K=2 dot kept f32)
        b2=b2,                                                   # (1, 784) f32
    )

    # decoder conv-transposes
    w = convt_w_to_taps(_uniform(ks[10], (16, 16, 4, 4), 16 * 16))
    g, bta = bn_params(16)
    p["d1"] = dict(w=w.astype(bf), b=_uniform(ks[11], (16, 1), 16 * 16), g=g, beta=bta)

    w = convt_w_to_taps(_uniform(ks[12], (16, 1, 4, 4), 1 * 16))
    w = jnp.pad(w, ((0, 0), (0, 7), (0, 0)))                  # pad C_out 1 -> 8
    b = jnp.pad(_uniform(ks[13], (1, 1), 1 * 16), ((0, 7), (0, 0)))
    p["d2"] = dict(w=w.astype(bf), b=b)
    return p


# --------------------------------- forward ---------------------------------

def forward(params, x_nchw):
    B = x_nchw.shape[0]
    x = jnp.transpose(x_nchw, (1, 0, 2, 3)).astype(jnp.float32)          # (1, B, 28, 28)

    # encoder: Conv(1->16,s2)+BN+ReLU -> Conv(16->32,s2)+BN+ReLU -> Conv(32->16,s1)+BN+ReLU
    x = conv_block(x, params["c1"], k=3, s=2, act="relu", cin_pad=8)     # (16, B, 14, 14)
    x = conv_block(x, params["c2"], k=3, s=2, act="relu")                # (32, B, 7, 7)
    x = conv_block(x, params["c3"], k=3, s=1, act="relu")                # (16, B, 7, 7)

    # PyTorch NCHW .view(B, -1) flatten (channel-major), pad rows to >= 8
    flat = jnp.transpose(x, (1, 0, 2, 3)).reshape(B, FEAT)
    flat = jnp.pad(flat, ((0, max(0, 8 - B)), (0, 0))).astype(jnp.bfloat16)
    code, h = fc_call(flat, params["fc"])
    code = code[:B, :Z_DIM]                                              # (B, 2) f32
    h = h[:B]                                                            # (B, 784) bf16

    x = jnp.transpose(h.reshape(B, 16, 7, 7), (1, 0, 2, 3))              # (16, B, 7, 7)

    # decoder: ConvT(16->16,4,2,1)+BN+Tanh -> ConvT(16->1,4,2,1)+Sigmoid
    x = convt_block(x, params["d1"], act="tanh", bn=True)                # (16, B, 14, 14)
    y = convt_block(x, params["d2"], act="sigmoid", bn=False,
                    out_dtype=jnp.float32)                               # (8, B, 28, 28); ch 0 valid
    decode = jnp.transpose(y[:1], (1, 0, 2, 3))                          # (B, 1, 28, 28)
    return code, decode


if __name__ == "__main__":
    key = jax.random.PRNGKey(0)
    pkey, xkey = jax.random.split(key)
    params = init_params(pkey)
    # The FC layer (16*7*7) pins the spatial size to 28x28 (MNIST-like), batch=2.
    x = jax.random.uniform(xkey, (2, 1, 28, 28), jnp.float32)

    code, decode = jax.jit(forward)(params, x)
    jax.block_until_ready((code, decode))

    assert code.shape == (2, Z_DIM)
    assert decode.shape == (2, 1, 28, 28)
    assert bool(jnp.all(jnp.isfinite(code))) and bool(jnp.all(jnp.isfinite(decode)))
    assert bool(jnp.all((decode >= 0.0) & (decode <= 1.0)))   # decoder ends in a sigmoid
    print("KERNEL_OK")
</pallas_src>

<mosaic_0001>
module attributes {stable_mosaic.version = 11 : i64} {
  func.func @_conv_kernel(%arg0: memref<8x1800xbf16, #tpu.memory_space<vmem>>, %arg1: memref<9x16x8xbf16, #tpu.memory_space<vmem>>, %arg2: memref<16x1xf32, #tpu.memory_space<vmem>>, %arg3: memref<1x1738xf32, #tpu.memory_space<vmem>>, %arg4: memref<16x1xf32, #tpu.memory_space<vmem>>, %arg5: memref<16x1xf32, #tpu.memory_space<vmem>>, %arg6: memref<1x16x1738xbf16, #tpu.memory_space<vmem>>) attributes {dimension_semantics = [], scalar_prefetch = 0 : i64, scratch_operands = 0 : i64, tpu.core_type = #tpu.core_type<tc>} {
    %c0 = arith.constant 0 : index
    %c0_0 = arith.constant 0 : index
    %0 = vector.load %arg0[%c0, %c0_0] : memref<8x1800xbf16, #tpu.memory_space<vmem>>, vector<8x1800xbf16>
    %c0_1 = arith.constant 0 : index
    %c0_2 = arith.constant 0 : index
    %c0_3 = arith.constant 0 : index
    %1 = vector.load %arg1[%c0_1, %c0_2, %c0_3] : memref<9x16x8xbf16, #tpu.memory_space<vmem>>, vector<9x16x8xbf16>
    %c0_4 = arith.constant 0 : index
    %c0_5 = arith.constant 0 : index
    %2 = vector.load %arg2[%c0_4, %c0_5] : memref<16x1xf32, #tpu.memory_space<vmem>>, vector<16x1xf32>
    %3 = vector.extract_strided_slice %0 {offsets = [0, 0], sizes = [8, 1738], strides = [1, 1]} : vector<8x1800xbf16> to vector<8x1738xbf16>
    %4 = vector.extract_strided_slice %1 {offsets = [0, 0, 0], sizes = [1, 16, 8], strides = [1, 1, 1]} : vector<9x16x8xbf16> to vector<1x16x8xbf16>
    %5 = vector.shape_cast %4 : vector<1x16x8xbf16> to vector<16x8xbf16>
    %cst = arith.constant dense<0.000000e+00> : vector<16x1738xf32>
    %6 = tpu.matmul %5, %3, %cst {dimension_numbers = #tpu.dot_dimension_numbers<[1], [0], [0], [1], [0, 0, 1, 1], [], []>} : vector<16x8xbf16>, vector<8x1738xbf16>, vector<16x1738xf32> -> vector<16x1738xf32>
    %7 = vector.extract_strided_slice %0 {offsets = [0, 1], sizes = [8, 1738], strides = [1, 1]} : vector<8x1800xbf16> to vector<8x1738xbf16>
    %8 = vector.extract_strided_slice %1 {offsets = [1, 0, 0], sizes = [1, 16, 8], strides = [1, 1, 1]} : vector<9x16x8xbf16> to vector<1x16x8xbf16>
    %9 = vector.shape_cast %8 : vector<1x16x8xbf16> to vector<16x8xbf16>
    %cst_6 = arith.constant dense<0.000000e+00> : vector<16x1738xf32>
    %10 = tpu.matmul %9, %7, %cst_6 {dimension_numbers = #tpu.dot_dimension_numbers<[1], [0], [0], [1], [0, 0, 1, 1], [], []>} : vector<16x8xbf16>, vector<8x1738xbf16>, vector<16x1738xf32> -> vector<16x1738xf32>
    %11 = arith.addf %6, %10 : vector<16x1738xf32>
    %12 = vector.extract_strided_slice %0 {offsets = [0, 2], sizes = [8, 1738], strides = [1, 1]} : vector<8x1800xbf16> to vector<8x1738xbf16>
    %13 = vector.extract_strided_slice %1 {offsets = [2, 0, 0], sizes = [1, 16, 8], strides = [1, 1, 1]} : vector<9x16x8xbf16> to vector<1x16x8xbf16>
    %14 = vector.shape_cast %13 : vector<1x16x8xbf16> to vector<16x8xbf16>
    %cst_7 = arith.constant dense<0.000000e+00> : vector<16x1738xf32>
    %15 = tpu.matmul %14, %12, %cst_7 {dimension_numbers = #tpu.dot_dimension_numbers<[1], [0], [0], [1], [0, 0, 1, 1], [], []>} : vector<16x8xbf16>, vector<8x1738xbf16>, vector<16x1738xf32> -> vector<16x1738xf32>
    %16 = arith.addf %11, %15 : vector<16x1738xf32>
    %17 = vector.extract_strided_slice %0 {offsets = [0, 30], sizes = [8, 1738], strides = [1, 1]} : vector<8x1800xbf16> to vector<8x1738xbf16>
    %18 = vector.extract_strided_slice %1 {offsets = [3, 0, 0], sizes = [1, 16, 8], strides = [1, 1, 1]} : vector<9x16x8xbf16> to vector<1x16x8xbf16>
    %19 = vector.shape_cast %18 : vector<1x16x8xbf16> to vector<16x8xbf16>
    %cst_8 = arith.constant dense<0.000000e+00> : vector<16x1738xf32>
    %20 = tpu.matmul %19, %17, %cst_8 {dimension_numbers = #tpu.dot_dimension_numbers<[1], [0], [0], [1], [0, 0, 1, 1], [], []>} : vector<16x8xbf16>, vector<8x1738xbf16>, vector<16x1738xf32> -> vector<16x1738xf32>
    %21 = arith.addf %16, %20 : vector<16x1738xf32>
    %22 = vector.extract_strided_slice %0 {offsets = [0, 31], sizes = [8, 1738], strides = [1, 1]} : vector<8x1800xbf16> to vector<8x1738xbf16>
    %23 = vector.extract_strided_slice %1 {offsets = [4, 0, 0], sizes = [1, 16, 8], strides = [1, 1, 1]} : vector<9x16x8xbf16> to vector<1x16x8xbf16>
    %24 = vector.shape_cast %23 : vector<1x16x8xbf16> to vector<16x8xbf16>
    %cst_9 = arith.constant dense<0.000000e+00> : vector<16x1738xf32>
    %25 = tpu.matmul %24, %22, %cst_9 {dimension_numbers = #tpu.dot_dimension_numbers<[1], [0], [0], [1], [0, 0, 1, 1], [], []>} : vector<16x8xbf16>, vector<8x1738xbf16>, vector<16x1738xf32> -> vector<16x1738xf32>
    %26 = arith.addf %21, %25 : vector<16x1738xf32>
    %27 = vector.extract_strided_slice %0 {offsets = [0, 32], sizes = [8, 1738], strides = [1, 1]} : vector<8x1800xbf16> to vector<8x1738xbf16>
    %28 = vector.extract_strided_slice %1 {offsets = [5, 0, 0], sizes = [1, 16, 8], strides = [1, 1, 1]} : vector<9x16x8xbf16> to vector<1x16x8xbf16>
    %29 = vector.shape_cast %28 : vector<1x16x8xbf16> to vector<16x8xbf16>
    %cst_10 = arith.constant dense<0.000000e+00> : vector<16x1738xf32>
    %30 = tpu.matmul %29, %27, %cst_10 {dimension_numbers = #tpu.dot_dimension_numbers<[1], [0], [0], [1], [0, 0, 1, 1], [], []>} : vector<16x8xbf16>, vector<8x1738xbf16>, vector<16x1738xf32> -> vector<16x1738xf32>
    %31 = arith.addf %26, %30 : vector<16x1738xf32>
    %32 = vector.extract_strided_slice %0 {offsets = [0, 60], sizes = [8, 1738], strides = [1, 1]} : vector<8x1800xbf16> to vector<8x1738xbf16>
    %33 = vector.extract_strided_slice %1 {offsets = [6, 0, 0], sizes = [1, 16, 8], strides = [1, 1, 1]} : vector<9x16x8xbf16> to vector<1x16x8xbf16>
    %34 = vector.shape_cast %33 : vector<1x16x8xbf16> to vector<16x8xbf16>
    %cst_11 = arith.constant dense<0.000000e+00> : vector<16x1738xf32>
    %35 = tpu.matmul %34, %32, %cst_11 {dimension_numbers = #tpu.dot_dimension_numbers<[1], [0], [0], [1], [0, 0, 1, 1], [], []>} : vector<16x8xbf16>, vector<8x1738xbf16>, vector<16x1738xf32> -> vector<16x1738xf32>
    %36 = arith.addf %31, %35 : vector<16x1738xf32>
    %37 = vector.extract_strided_slice %0 {offsets = [0, 61], sizes = [8, 1738], strides = [1, 1]} : vector<8x1800xbf16> to vector<8x1738xbf16>
    %38 = vector.extract_strided_slice %1 {offsets = [7, 0, 0], sizes = [1, 16, 8], strides = [1, 1, 1]} : vector<9x16x8xbf16> to vector<1x16x8xbf16>
    %39 = vector.shape_cast %38 : vector<1x16x8xbf16> to vector<16x8xbf16>
    %cst_12 = arith.constant dense<0.000000e+00> : vector<16x1738xf32>
    %40 = tpu.matmul %39, %37, %cst_12 {dimension_numbers = #tpu.dot_dimension_numbers<[1], [0], [0], [1], [0, 0, 1, 1], [], []>} : vector<16x8xbf16>, vector<8x1738xbf16>, vector<16x1738xf32> -> vector<16x1738xf32>
    %41 = arith.addf %36, %40 : vector<16x1738xf32>
    %42 = vector.extract_strided_slice %0 {offsets = [0, 62], sizes = [8, 1738], strides = [1, 1]} : vector<8x1800xbf16> to vector<8x1738xbf16>
    %43 = vector.extract_strided_slice %1 {offsets = [8, 0, 0], sizes = [1, 16, 8], strides = [1, 1, 1]} : vector<9x16x8xbf16> to vector<1x16x8xbf16>
    %44 = vector.shape_cast %43 : vector<1x16x8xbf16> to vector<16x8xbf16>
    %cst_13 = arith.constant dense<0.000000e+00> : vector<16x1738xf32>
    %45 = tpu.matmul %44, %42, %cst_13 {dimension_numbers = #tpu.dot_dimension_numbers<[1], [0], [0], [1], [0, 0, 1, 1], [], []>} : vector<16x8xbf16>, vector<8x1738xbf16>, vector<16x1738xf32> -> vector<16x1738xf32>
    %46 = arith.addf %41, %45 : vector<16x1738xf32>
    %47 = vector.broadcast %2 : vector<16x1xf32> to vector<16x1738xf32>
    %48 = arith.addf %46, %47 : vector<16x1738xf32>
    %c0_14 = arith.constant 0 : index
    %c0_15 = arith.constant 0 : index
    %49 = vector.load %arg3[%c0_14, %c0_15] : memref<1x1738xf32, #tpu.memory_space<vmem>>, vector<1x1738xf32>
    %50 = vector.broadcast %49 : vector<1x1738xf32> to vector<16x1738xf32>
    %51 = arith.mulf %48, %50 : vector<16x1738xf32>
    %cst_16 = arith.constant dense<0.000000e+00> : vector<16xf32>
    %52 = vector.multi_reduction <add>, %51, %cst_16 [1] : vector<16x1738xf32> to vector<16xf32>
    %53 = vector.shape_cast %52 : vector<16xf32> to vector<16x1xf32>
    %cst_17 = arith.constant 3.920000e+02 : f32
    %54 = vector.broadcast %cst_17 : f32 to vector<16x1xf32>
    %55 = arith.divf %53, %54 : vector<16x1xf32>
    %56 = vector.broadcast %55 : vector<16x1xf32> to vector<16x1738xf32>
    %57 = arith.subf %48, %56 : vector<16x1738xf32>
    %58 = vector.broadcast %49 : vector<1x1738xf32> to vector<16x1738xf32>
    %59 = arith.mulf %57, %58 : vector<16x1738xf32>
    %60 = arith.mulf %59, %59 : vector<16x1738xf32>
    %cst_18 = arith.constant dense<0.000000e+00> : vector<16xf32>
    %61 = vector.multi_reduction <add>, %60, %cst_18 [1] : vector<16x1738xf32> to vector<16xf32>
    %62 = vector.shape_cast %61 : vector<16xf32> to vector<16x1xf32>
    %cst_19 = arith.constant 3.920000e+02 : f32
    %63 = vector.broadcast %cst_19 : f32 to vector<16x1xf32>
    %64 = arith.divf %62, %63 : vector<16x1xf32>
    %cst_20 = arith.constant 9.99999974E-6 : f32
    %65 = vector.broadcast %cst_20 : f32 to vector<16x1xf32>
    %66 = arith.addf %64, %65 : vector<16x1xf32>
    %67 = math.rsqrt %66 : vector<16x1xf32>
    %c0_21 = arith.constant 0 : index
    %c0_22 = arith.constant 0 : index
    %68 = vector.load %arg4[%c0_21, %c0_22] : memref<16x1xf32, #tpu.memory_space<vmem>>, vector<16x1xf32>
    %69 = arith.mulf %67, %68 : vector<16x1xf32>
    %c0_23 = arith.constant 0 : index
    %c0_24 = arith.constant 0 : index
    %70 = vector.load %arg5[%c0_23, %c0_24] : memref<16x1xf32, #tpu.memory_space<vmem>>, vector<16x1xf32>
    %71 = arith.mulf %55, %69 : vector<16x1xf32>
    %72 = arith.subf %70, %71 : vector<16x1xf32>
    %73 = vector.broadcast %69 : vector<16x1xf32> to vector<16x1738xf32>
    %74 = arith.mulf %48, %73 : vector<16x1738xf32>
    %75 = vector.broadcast %72 : vector<16x1xf32> to vector<16x1738xf32>
    %76 = arith.addf %74, %75 : vector<16x1738xf32>
    %cst_25 = arith.constant 0.000000e+00 : f32
    %77 = vector.broadcast %cst_25 : f32 to vector<16x1738xf32>
    %78 = arith.maximumf %76, %77 : vector<16x1738xf32>
    %79 = arith.truncf %78 : vector<16x1738xf32> to vector<16x1738xbf16>
    %c0_26 = arith.constant 0 : index
    %c0_27 = arith.constant 0 : index
    %c0_28 = arith.constant 0 : index
    %80 = vector.load %arg6[%c0_26, %c0_27, %c0_28] : memref<1x16x1738xbf16, #tpu.memory_space<vmem>>, vector<1x16x1738xbf16>
    %81 = vector.shape_cast %80 : vector<1x16x1738xbf16> to vector<16x1738xbf16>
    %82 = vector.shape_cast %79 : vector<16x1738xbf16> to vector<1x16x1738xbf16>
    tpu.vector_store %arg6[%c0_26, %c0_27, %c0_28], %82 {strides = array<i32>} : memref<1x16x1738xbf16, #tpu.memory_space<vmem>>, vector<1x16x1738xbf16>,
    return
  }
}

module attributes {stable_mosaic.version = 11 : i64} {
  func.func @_conv_kernel(%arg0: memref<16x512xbf16, #tpu.memory_space<vmem>>, %arg1: memref<9x32x16xbf16, #tpu.memory_space<vmem>>, %arg2: memref<32x1xf32, #tpu.memory_space<vmem>>, %arg3: memref<1x478xf32, #tpu.memory_space<vmem>>, %arg4: memref<32x1xf32, #tpu.memory_space<vmem>>, %arg5: memref<32x1xf32, #tpu.memory_space<vmem>>, %arg6: memref<1x32x478xbf16, #tpu.memory_space<vmem>>) attributes {dimension_semantics = [], scalar_prefetch = 0 : i64, scratch_operands = 0 : i64, tpu.core_type = #tpu.core_type<tc>} {
    %c0 = arith.constant 0 : index
    %c0_0 = arith.constant 0 : index
    %0 = vector.load %arg0[%c0, %c0_0] : memref<16x512xbf16, #tpu.memory_space<vmem>>, vector<16x512xbf16>
    %c0_1 = arith.constant 0 : index
    %c0_2 = arith.constant 0 : index
    %c0_3 = arith.constant 0 : index
    %1 = vector.load %arg1[%c0_1, %c0_2, %c0_3] : memref<9x32x16xbf16, #tpu.memory_space<vmem>>, vector<9x32x16xbf16>
    %c0_4 = arith.constant 0 : index
    %c0_5 = arith.constant 0 : index
    %2 = vector.load %arg2[%c0_4, %c0_5] : memref<32x1xf32, #tpu.memory_space<vmem>>, vector<32x1xf32>
    %3 = vector.extract_strided_slice %0 {offsets = [0, 0], sizes = [16, 478], strides = [1, 1]} : vector<16x512xbf16> to vector<16x478xbf16>
    %4 = vector.extract_strided_slice %1 {offsets = [0, 0, 0], sizes = [1, 32, 16], strides = [1, 1, 1]} : vector<9x32x16xbf16> to vector<1x32x16xbf16>
    %5 = vector.shape_cast %4 : vector<1x32x16xbf16> to vector<32x16xbf16>
    %cst = arith.constant dense<0.000000e+00> : vector<32x478xf32>
    %6 = tpu.matmul %5, %3, %cst {dimension_numbers = #tpu.dot_dimension_numbers<[1], [0], [0], [1], [0, 0, 1, 1], [], []>} : vector<32x16xbf16>, vector<16x478xbf16>, vector<32x478xf32> -> vector<32x478xf32>
    %7 = vector.extract_strided_slice %0 {offsets = [0, 1], sizes = [16, 478], strides = [1, 1]} : vector<16x512xbf16> to vector<16x478xbf16>
    %8 = vector.extract_strided_slice %1 {offsets = [1, 0, 0], sizes = [1, 32, 16], strides = [1, 1, 1]} : vector<9x32x16xbf16> to vector<1x32x16xbf16>
    %9 = vector.shape_cast %8 : vector<1x32x16xbf16> to vector<32x16xbf16>
    %cst_6 = arith.constant dense<0.000000e+00> : vector<32x478xf32>
    %10 = tpu.matmul %9, %7, %cst_6 {dimension_numbers = #tpu.dot_dimension_numbers<[1], [0], [0], [1], [0, 0, 1, 1], [], []>} : vector<32x16xbf16>, vector<16x478xbf16>, vector<32x478xf32> -> vector<32x478xf32>
    %11 = arith.addf %6, %10 : vector<32x478xf32>
    %12 = vector.extract_strided_slice %0 {offsets = [0, 2], sizes = [16, 478], strides = [1, 1]} : vector<16x512xbf16> to vector<16x478xbf16>
    %13 = vector.extract_strided_slice %1 {offsets = [2, 0, 0], sizes = [1, 32, 16], strides = [1, 1, 1]} : vector<9x32x16xbf16> to vector<1x32x16xbf16>
    %14 = vector.shape_cast %13 : vector<1x32x16xbf16> to vector<32x16xbf16>
    %cst_7 = arith.constant dense<0.000000e+00> : vector<32x478xf32>
    %15 = tpu.matmul %14, %12, %cst_7 {dimension_numbers = #tpu.dot_dimension_numbers<[1], [0], [0], [1], [0, 0, 1, 1], [], []>} : vector<32x16xbf16>, vector<16x478xbf16>, vector<32x478xf32> -> vector<32x478xf32>
    %16 = arith.addf %11, %15 : vector<32x478xf32>
    %17 = vector.extract_strided_slice %0 {offsets = [0, 16], sizes = [16, 478], strides = [1, 1]} : vector<16x512xbf16> to vector<16x478xbf16>
    %18 = vector.extract_strided_slice %1 {offsets = [3, 0, 0], sizes = [1, 32, 16], strides = [1, 1, 1]} : vector<9x32x16xbf16> to vector<1x32x16xbf16>
    %19 = vector.shape_cast %18 : vector<1x32x16xbf16> to vector<32x16xbf16>
    %cst_8 = arith.constant dense<0.000000e+00> : vector<32x478xf32>
    %20 = tpu.matmul %19, %17, %cst_8 {dimension_numbers = #tpu.dot_dimension_numbers<[1], [0], [0], [1], [0, 0, 1, 1], [], []>} : vector<32x16xbf16>, vector<16x478xbf16>, vector<32x478xf32> -> vector<32x478xf32>
    %21 = arith.addf %16, %20 : vector<32x478xf32>
    %22 = vector.extract_strided_slice %0 {offsets = [0, 17], sizes = [16, 478], strides = [1, 1]} : vector<16x512xbf16> to vector<16x478xbf16>
    %23 = vector.extract_strided_slice %1 {offsets = [4, 0, 0], sizes = [1, 32, 16], strides = [1, 1, 1]} : vector<9x32x16xbf16> to vector<1x32x16xbf16>
    %24 = vector.shape_cast %23 : vector<1x32x16xbf16> to vector<32x16xbf16>
    %cst_9 = arith.constant dense<0.000000e+00> : vector<32x478xf32>
    %25 = tpu.matmul %24, %22, %cst_9 {dimension_numbers = #tpu.dot_dimension_numbers<[1], [0], [0], [1], [0, 0, 1, 1], [], []>} : vector<32x16xbf16>, vector<16x478xbf16>, vector<32x478xf32> -> vector<32x478xf32>
    %26 = arith.addf %21, %25 : vector<32x478xf32>
    %27 = vector.extract_strided_slice %0 {offsets = [0, 18], sizes = [16, 478], strides = [1, 1]} : vector<16x512xbf16> to vector<16x478xbf16>
    %28 = vector.extract_strided_slice %1 {offsets = [5, 0, 0], sizes = [1, 32, 16], strides = [1, 1, 1]} : vector<9x32x16xbf16> to vector<1x32x16xbf16>
    %29 = vector.shape_cast %28 : vector<1x32x16xbf16> to vector<32x16xbf16>
    %cst_10 = arith.constant dense<0.000000e+00> : vector<32x478xf32>
    %30 = tpu.matmul %29, %27, %cst_10 {dimension_numbers = #tpu.dot_dimension_numbers<[1], [0], [0], [1], [0, 0, 1, 1], [], []>} : vector<32x16xbf16>, vector<16x478xbf16>, vector<32x478xf32> -> vector<32x478xf32>
    %31 = arith.addf %26, %30 : vector<32x478xf32>
    %32 = vector.extract_strided_slice %0 {offsets = [0, 32], sizes = [16, 478], strides = [1, 1]} : vector<16x512xbf16> to vector<16x478xbf16>
    %33 = vector.extract_strided_slice %1 {offsets = [6, 0, 0], sizes = [1, 32, 16], strides = [1, 1, 1]} : vector<9x32x16xbf16> to vector<1x32x16xbf16>
    %34 = vector.shape_cast %33 : vector<1x32x16xbf16> to vector<32x16xbf16>
    %cst_11 = arith.constant dense<0.000000e+00> : vector<32x478xf32>
    %35 = tpu.matmul %34, %32, %cst_11 {dimension_numbers = #tpu.dot_dimension_numbers<[1], [0], [0], [1], [0, 0, 1, 1], [], []>} : vector<32x16xbf16>, vector<16x478xbf16>, vector<32x478xf32> -> vector<32x478xf32>
    %36 = arith.addf %31, %35 : vector<32x478xf32>
    %37 = vector.extract_strided_slice %0 {offsets = [0, 33], sizes = [16, 478], strides = [1, 1]} : vector<16x512xbf16> to vector<16x478xbf16>
    %38 = vector.extract_strided_slice %1 {offsets = [7, 0, 0], sizes = [1, 32, 16], strides = [1, 1, 1]} : vector<9x32x16xbf16> to vector<1x32x16xbf16>
    %39 = vector.shape_cast %38 : vector<1x32x16xbf16> to vector<32x16xbf16>
    %cst_12 = arith.constant dense<0.000000e+00> : vector<32x478xf32>
    %40 = tpu.matmul %39, %37, %cst_12 {dimension_numbers = #tpu.dot_dimension_numbers<[1], [0], [0], [1], [0, 0, 1, 1], [], []>} : vector<32x16xbf16>, vector<16x478xbf16>, vector<32x478xf32> -> vector<32x478xf32>
    %41 = arith.addf %36, %40 : vector<32x478xf32>
    %42 = vector.extract_strided_slice %0 {offsets = [0, 34], sizes = [16, 478], strides = [1, 1]} : vector<16x512xbf16> to vector<16x478xbf16>
    %43 = vector.extract_strided_slice %1 {offsets = [8, 0, 0], sizes = [1, 32, 16], strides = [1, 1, 1]} : vector<9x32x16xbf16> to vector<1x32x16xbf16>
    %44 = vector.shape_cast %43 : vector<1x32x16xbf16> to vector<32x16xbf16>
    %cst_13 = arith.constant dense<0.000000e+00> : vector<32x478xf32>
    %45 = tpu.matmul %44, %42, %cst_13 {dimension_numbers = #tpu.dot_dimension_numbers<[1], [0], [0], [1], [0, 0, 1, 1], [], []>} : vector<32x16xbf16>, vector<16x478xbf16>, vector<32x478xf32> -> vector<32x478xf32>
    %46 = arith.addf %41, %45 : vector<32x478xf32>
    %47 = vector.broadcast %2 : vector<32x1xf32> to vector<32x478xf32>
    %48 = arith.addf %46, %47 : vector<32x478xf32>
    %c0_14 = arith.constant 0 : index
    %c0_15 = arith.constant 0 : index
    %49 = vector.load %arg3[%c0_14, %c0_15] : memref<1x478xf32, #tpu.memory_space<vmem>>, vector<1x478xf32>
    %50 = vector.broadcast %49 : vector<1x478xf32> to vector<32x478xf32>
    %51 = arith.mulf %48, %50 : vector<32x478xf32>
    %cst_16 = arith.constant dense<0.000000e+00> : vector<32xf32>
    %52 = vector.multi_reduction <add>, %51, %cst_16 [1] : vector<32x478xf32> to vector<32xf32>
    %53 = vector.shape_cast %52 : vector<32xf32> to vector<32x1xf32>
    %cst_17 = arith.constant 9.800000e+01 : f32
    %54 = vector.broadcast %cst_17 : f32 to vector<32x1xf32>
    %55 = arith.divf %53, %54 : vector<32x1xf32>
    %56 = vector.broadcast %55 : vector<32x1xf32> to vector<32x478xf32>
    %57 = arith.subf %48, %56 : vector<32x478xf32>
    %58 = vector.broadcast %49 : vector<1x478xf32> to vector<32x478xf32>
    %59 = arith.mulf %57, %58 : vector<32x478xf32>
    %60 = arith.mulf %59, %59 : vector<32x478xf32>
    %cst_18 = arith.constant dense<0.000000e+00> : vector<32xf32>
    %61 = vector.multi_reduction <add>, %60, %cst_18 [1] : vector<32x478xf32> to vector<32xf32>
    %62 = vector.shape_cast %61 : vector<32xf32> to vector<32x1xf32>
    %cst_19 = arith.constant 9.800000e+01 : f32
    %63 = vector.broadcast %cst_19 : f32 to vector<32x1xf32>
    %64 = arith.divf %62, %63 : vector<32x1xf32>
    %cst_20 = arith.constant 9.99999974E-6 : f32
    %65 = vector.broadcast %cst_20 : f32 to vector<32x1xf32>
    %66 = arith.addf %64, %65 : vector<32x1xf32>
    %67 = math.rsqrt %66 : vector<32x1xf32>
    %c0_21 = arith.constant 0 : index
    %c0_22 = arith.constant 0 : index
    %68 = vector.load %arg4[%c0_21, %c0_22] : memref<32x1xf32, #tpu.memory_space<vmem>>, vector<32x1xf32>
    %69 = arith.mulf %67, %68 : vector<32x1xf32>
    %c0_23 = arith.constant 0 : index
    %c0_24 = arith.constant 0 : index
    %70 = vector.load %arg5[%c0_23, %c0_24] : memref<32x1xf32, #tpu.memory_space<vmem>>, vector<32x1xf32>
    %71 = arith.mulf %55, %69 : vector<32x1xf32>
    %72 = arith.subf %70, %71 : vector<32x1xf32>
    %73 = vector.broadcast %69 : vector<32x1xf32> to vector<32x478xf32>
    %74 = arith.mulf %48, %73 : vector<32x478xf32>
    %75 = vector.broadcast %72 : vector<32x1xf32> to vector<32x478xf32>
    %76 = arith.addf %74, %75 : vector<32x478xf32>
    %cst_25 = arith.constant 0.000000e+00 : f32
    %77 = vector.broadcast %cst_25 : f32 to vector<32x478xf32>
    %78 = arith.maximumf %76, %77 : vector<32x478xf32>
    %79 = arith.truncf %78 : vector<32x478xf32> to vector<32x478xbf16>
    %c0_26 = arith.constant 0 : index
    %c0_27 = arith.constant 0 : index
    %c0_28 = arith.constant 0 : index
    %80 = vector.load %arg6[%c0_26, %c0_27, %c0_28] : memref<1x32x478xbf16, #tpu.memory_space<vmem>>, vector<1x32x478xbf16>
    %81 = vector.shape_cast %80 : vector<1x32x478xbf16> to vector<32x478xbf16>
    %82 = vector.shape_cast %79 : vector<32x478xbf16> to vector<1x32x478xbf16>
    tpu.vector_store %arg6[%c0_26, %c0_27, %c0_28], %82 {strides = array<i32>} : memref<1x32x478xbf16, #tpu.memory_space<vmem>>, vector<1x32x478xbf16>,
    return
  }
}

module attributes {stable_mosaic.version = 11 : i64} {
  func.func @_conv_kernel(%arg0: memref<32x162xbf16, #tpu.memory_space<vmem>>, %arg1: memref<9x16x32xbf16, #tpu.memory_space<vmem>>, %arg2: memref<16x1xf32, #tpu.memory_space<vmem>>, %arg3: memref<1x142xf32, #tpu.memory_space<vmem>>, %arg4: memref<16x1xf32, #tpu.memory_space<vmem>>, %arg5: memref<16x1xf32, #tpu.memory_space<vmem>>, %arg6: memref<1x16x142xbf16, #tpu.memory_space<vmem>>) attributes {dimension_semantics = [], scalar_prefetch = 0 : i64, scratch_operands = 0 : i64, tpu.core_type = #tpu.core_type<tc>} {
    %c0 = arith.constant 0 : index
    %c0_0 = arith.constant 0 : index
    %0 = vector.load %arg0[%c0, %c0_0] : memref<32x162xbf16, #tpu.memory_space<vmem>>, vector<32x162xbf16>
    %c0_1 = arith.constant 0 : index
    %c0_2 = arith.constant 0 : index
    %c0_3 = arith.constant 0 : index
    %1 = vector.load %arg1[%c0_1, %c0_2, %c0_3] : memref<9x16x32xbf16, #tpu.memory_space<vmem>>, vector<9x16x32xbf16>
    %c0_4 = arith.constant 0 : index
    %c0_5 = arith.constant 0 : index
    %2 = vector.load %arg2[%c0_4, %c0_5] : memref<16x1xf32, #tpu.memory_space<vmem>>, vector<16x1xf32>
    %3 = vector.extract_strided_slice %0 {offsets = [0, 0], sizes = [32, 142], strides = [1, 1]} : vector<32x162xbf16> to vector<32x142xbf16>
    %4 = vector.extract_strided_slice %1 {offsets = [0, 0, 0], sizes = [1, 16, 32], strides = [1, 1, 1]} : vector<9x16x32xbf16> to vector<1x16x32xbf16>
    %5 = vector.shape_cast %4 : vector<1x16x32xbf16> to vector<16x32xbf16>
    %cst = arith.constant dense<0.000000e+00> : vector<16x142xf32>
    %6 = tpu.matmul %5, %3, %cst {dimension_numbers = #tpu.dot_dimension_numbers<[1], [0], [0], [1], [0, 0, 1, 1], [], []>} : vector<16x32xbf16>, vector<32x142xbf16>, vector<16x142xf32> -> vector<16x142xf32>
    %7 = vector.extract_strided_slice %0 {offsets = [0, 1], sizes = [32, 142], strides = [1, 1]} : vector<32x162xbf16> to vector<32x142xbf16>
    %8 = vector.extract_strided_slice %1 {offsets = [1, 0, 0], sizes = [1, 16, 32], strides = [1, 1, 1]} : vector<9x16x32xbf16> to vector<1x16x32xbf16>
    %9 = vector.shape_cast %8 : vector<1x16x32xbf16> to vector<16x32xbf16>
    %cst_6 = arith.constant dense<0.000000e+00> : vector<16x142xf32>
    %10 = tpu.matmul %9, %7, %cst_6 {dimension_numbers = #tpu.dot_dimension_numbers<[1], [0], [0], [1], [0, 0, 1, 1], [], []>} : vector<16x32xbf16>, vector<32x142xbf16>, vector<16x142xf32> -> vector<16x142xf32>
    %11 = arith.addf %6, %10 : vector<16x142xf32>
    %12 = vector.extract_strided_slice %0 {offsets = [0, 2], sizes = [32, 142], strides = [1, 1]} : vector<32x162xbf16> to vector<32x142xbf16>
    %13 = vector.extract_strided_slice %1 {offsets = [2, 0, 0], sizes = [1, 16, 32], strides = [1, 1, 1]} : vector<9x16x32xbf16> to vector<1x16x32xbf16>
    %14 = vector.shape_cast %13 : vector<1x16x32xbf16> to vector<16x32xbf16>
    %cst_7 = arith.constant dense<0.000000e+00> : vector<16x142xf32>
    %15 = tpu.matmul %14, %12, %cst_7 {dimension_numbers = #tpu.dot_dimension_numbers<[1], [0], [0], [1], [0, 0, 1, 1], [], []>} : vector<16x32xbf16>, vector<32x142xbf16>, vector<16x142xf32> -> vector<16x142xf32>
    %16 = arith.addf %11, %15 : vector<16x142xf32>
    %17 = vector.extract_strided_slice %0 {offsets = [0, 9], sizes = [32, 142], strides = [1, 1]} : vector<32x162xbf16> to vector<32x142xbf16>
    %18 = vector.extract_strided_slice %1 {offsets = [3, 0, 0], sizes = [1, 16, 32], strides = [1, 1, 1]} : vector<9x16x32xbf16> to vector<1x16x32xbf16>
    %19 = vector.shape_cast %18 : vector<1x16x32xbf16> to vector<16x32xbf16>
    %cst_8 = arith.constant dense<0.000000e+00> : vector<16x142xf32>
    %20 = tpu.matmul %19, %17, %cst_8 {dimension_numbers = #tpu.dot_dimension_numbers<[1], [0], [0], [1], [0, 0, 1, 1], [], []>} : vector<16x32xbf16>, vector<32x142xbf16>, vector<16x142xf32> -> vector<16x142xf32>
    %21 = arith.addf %16, %20 : vector<16x142xf32>
    %22 = vector.extract_strided_slice %0 {offsets = [0, 10], sizes = [32, 142], strides = [1, 1]} : vector<32x162xbf16> to vector<32x142xbf16>
    %23 = vector.extract_strided_slice %1 {offsets = [4, 0, 0], sizes = [1, 16, 32], strides = [1, 1, 1]} : vector<9x16x32xbf16> to vector<1x16x32xbf16>
    %24 = vector.shape_cast %23 : vector<1x16x32xbf16> to vector<16x32xbf16>
    %cst_9 = arith.constant dense<0.000000e+00> : vector<16x142xf32>
    %25 = tpu.matmul %24, %22, %cst_9 {dimension_numbers = #tpu.dot_dimension_numbers<[1], [0], [0], [1], [0, 0, 1, 1], [], []>} : vector<16x32xbf16>, vector<32x142xbf16>, vector<16x142xf32> -> vector<16x142xf32>
    %26 = arith.addf %21, %25 : vector<16x142xf32>
    %27 = vector.extract_strided_slice %0 {offsets = [0, 11], sizes = [32, 142], strides = [1, 1]} : vector<32x162xbf16> to vector<32x142xbf16>
    %28 = vector.extract_strided_slice %1 {offsets = [5, 0, 0], sizes = [1, 16, 32], strides = [1, 1, 1]} : vector<9x16x32xbf16> to vector<1x16x32xbf16>
    %29 = vector.shape_cast %28 : vector<1x16x32xbf16> to vector<16x32xbf16>
    %cst_10 = arith.constant dense<0.000000e+00> : vector<16x142xf32>
    %30 = tpu.matmul %29, %27, %cst_10 {dimension_numbers = #tpu.dot_dimension_numbers<[1], [0], [0], [1], [0, 0, 1, 1], [], []>} : vector<16x32xbf16>, vector<32x142xbf16>, vector<16x142xf32> -> vector<16x142xf32>
    %31 = arith.addf %26, %30 : vector<16x142xf32>
    %32 = vector.extract_strided_slice %0 {offsets = [0, 18], sizes = [32, 142], strides = [1, 1]} : vector<32x162xbf16> to vector<32x142xbf16>
    %33 = vector.extract_strided_slice %1 {offsets = [6, 0, 0], sizes = [1, 16, 32], strides = [1, 1, 1]} : vector<9x16x32xbf16> to vector<1x16x32xbf16>
    %34 = vector.shape_cast %33 : vector<1x16x32xbf16> to vector<16x32xbf16>
    %cst_11 = arith.constant dense<0.000000e+00> : vector<16x142xf32>
    %35 = tpu.matmul %34, %32, %cst_11 {dimension_numbers = #tpu.dot_dimension_numbers<[1], [0], [0], [1], [0, 0, 1, 1], [], []>} : vector<16x32xbf16>, vector<32x142xbf16>, vector<16x142xf32> -> vector<16x142xf32>
    %36 = arith.addf %31, %35 : vector<16x142xf32>
    %37 = vector.extract_strided_slice %0 {offsets = [0, 19], sizes = [32, 142], strides = [1, 1]} : vector<32x162xbf16> to vector<32x142xbf16>
    %38 = vector.extract_strided_slice %1 {offsets = [7, 0, 0], sizes = [1, 16, 32], strides = [1, 1, 1]} : vector<9x16x32xbf16> to vector<1x16x32xbf16>
    %39 = vector.shape_cast %38 : vector<1x16x32xbf16> to vector<16x32xbf16>
    %cst_12 = arith.constant dense<0.000000e+00> : vector<16x142xf32>
    %40 = tpu.matmul %39, %37, %cst_12 {dimension_numbers = #tpu.dot_dimension_numbers<[1], [0], [0], [1], [0, 0, 1, 1], [], []>} : vector<16x32xbf16>, vector<32x142xbf16>, vector<16x142xf32> -> vector<16x142xf32>
    %41 = arith.addf %36, %40 : vector<16x142xf32>
    %42 = vector.extract_strided_slice %0 {offsets = [0, 20], sizes = [32, 142], strides = [1, 1]} : vector<32x162xbf16> to vector<32x142xbf16>
    %43 = vector.extract_strided_slice %1 {offsets = [8, 0, 0], sizes = [1, 16, 32], strides = [1, 1, 1]} : vector<9x16x32xbf16> to vector<1x16x32xbf16>
    %44 = vector.shape_cast %43 : vector<1x16x32xbf16> to vector<16x32xbf16>
    %cst_13 = arith.constant dense<0.000000e+00> : vector<16x142xf32>
    %45 = tpu.matmul %44, %42, %cst_13 {dimension_numbers = #tpu.dot_dimension_numbers<[1], [0], [0], [1], [0, 0, 1, 1], [], []>} : vector<16x32xbf16>, vector<32x142xbf16>, vector<16x142xf32> -> vector<16x142xf32>
    %46 = arith.addf %41, %45 : vector<16x142xf32>
    %47 = vector.broadcast %2 : vector<16x1xf32> to vector<16x142xf32>
    %48 = arith.addf %46, %47 : vector<16x142xf32>
    %c0_14 = arith.constant 0 : index
    %c0_15 = arith.constant 0 : index
    %49 = vector.load %arg3[%c0_14, %c0_15] : memref<1x142xf32, #tpu.memory_space<vmem>>, vector<1x142xf32>
    %50 = vector.broadcast %49 : vector<1x142xf32> to vector<16x142xf32>
    %51 = arith.mulf %48, %50 : vector<16x142xf32>
    %cst_16 = arith.constant dense<0.000000e+00> : vector<16xf32>
    %52 = vector.multi_reduction <add>, %51, %cst_16 [1] : vector<16x142xf32> to vector<16xf32>
    %53 = vector.shape_cast %52 : vector<16xf32> to vector<16x1xf32>
    %cst_17 = arith.constant 9.800000e+01 : f32
    %54 = vector.broadcast %cst_17 : f32 to vector<16x1xf32>
    %55 = arith.divf %53, %54 : vector<16x1xf32>
    %56 = vector.broadcast %55 : vector<16x1xf32> to vector<16x142xf32>
    %57 = arith.subf %48, %56 : vector<16x142xf32>
    %58 = vector.broadcast %49 : vector<1x142xf32> to vector<16x142xf32>
    %59 = arith.mulf %57, %58 : vector<16x142xf32>
    %60 = arith.mulf %59, %59 : vector<16x142xf32>
    %cst_18 = arith.constant dense<0.000000e+00> : vector<16xf32>
    %61 = vector.multi_reduction <add>, %60, %cst_18 [1] : vector<16x142xf32> to vector<16xf32>
    %62 = vector.shape_cast %61 : vector<16xf32> to vector<16x1xf32>
    %cst_19 = arith.constant 9.800000e+01 : f32
    %63 = vector.broadcast %cst_19 : f32 to vector<16x1xf32>
    %64 = arith.divf %62, %63 : vector<16x1xf32>
    %cst_20 = arith.constant 9.99999974E-6 : f32
    %65 = vector.broadcast %cst_20 : f32 to vector<16x1xf32>
    %66 = arith.addf %64, %65 : vector<16x1xf32>
    %67 = math.rsqrt %66 : vector<16x1xf32>
    %c0_21 = arith.constant 0 : index
    %c0_22 = arith.constant 0 : index
    %68 = vector.load %arg4[%c0_21, %c0_22] : memref<16x1xf32, #tpu.memory_space<vmem>>, vector<16x1xf32>
    %69 = arith.mulf %67, %68 : vector<16x1xf32>
    %c0_23 = arith.constant 0 : index
    %c0_24 = arith.constant 0 : index
    %70 = vector.load %arg5[%c0_23, %c0_24] : memref<16x1xf32, #tpu.memory_space<vmem>>, vector<16x1xf32>
    %71 = arith.mulf %55, %69 : vector<16x1xf32>
    %72 = arith.subf %70, %71 : vector<16x1xf32>
    %73 = vector.broadcast %69 : vector<16x1xf32> to vector<16x142xf32>
    %74 = arith.mulf %48, %73 : vector<16x142xf32>
    %75 = vector.broadcast %72 : vector<16x1xf32> to vector<16x142xf32>
    %76 = arith.addf %74, %75 : vector<16x142xf32>
    %cst_25 = arith.constant 0.000000e+00 : f32
    %77 = vector.broadcast %cst_25 : f32 to vector<16x142xf32>
    %78 = arith.maximumf %76, %77 : vector<16x142xf32>
    %79 = arith.truncf %78 : vector<16x142xf32> to vector<16x142xbf16>
    %c0_26 = arith.constant 0 : index
    %c0_27 = arith.constant 0 : index
    %c0_28 = arith.constant 0 : index
    %80 = vector.load %arg6[%c0_26, %c0_27, %c0_28] : memref<1x16x142xbf16, #tpu.memory_space<vmem>>, vector<1x16x142xbf16>
    %81 = vector.shape_cast %80 : vector<1x16x142xbf16> to vector<16x142xbf16>
    %82 = vector.shape_cast %79 : vector<16x142xbf16> to vector<1x16x142xbf16>
    tpu.vector_store %arg6[%c0_26, %c0_27, %c0_28], %82 {strides = array<i32>} : memref<1x16x142xbf16, #tpu.memory_space<vmem>>, vector<1x16x142xbf16>,
    return
  }
}

module attributes {stable_mosaic.version = 11 : i64} {
  func.func @_fc_kernel(%arg0: memref<8x784xbf16, #tpu.memory_space<vmem>>, %arg1: memref<784x8xbf16, #tpu.memory_space<vmem>>, %arg2: memref<1x8xf32, #tpu.memory_space<vmem>>, %arg3: memref<8x784xf32, #tpu.memory_space<vmem>>, %arg4: memref<1x784xf32, #tpu.memory_space<vmem>>, %arg5: memref<8x8xf32, #tpu.memory_space<vmem>>, %arg6: memref<8x784xbf16, #tpu.memory_space<vmem>>) attributes {dimension_semantics = [], scalar_prefetch = 0 : i64, scratch_operands = 0 : i64, tpu.core_type = #tpu.core_type<tc>} {
    %c0 = arith.constant 0 : index
    %c0_0 = arith.constant 0 : index
    %0 = vector.load %arg0[%c0, %c0_0] : memref<8x784xbf16, #tpu.memory_space<vmem>>, vector<8x784xbf16>
    %c0_1 = arith.constant 0 : index
    %c0_2 = arith.constant 0 : index
    %1 = vector.load %arg1[%c0_1, %c0_2] : memref<784x8xbf16, #tpu.memory_space<vmem>>, vector<784x8xbf16>
    %cst = arith.constant dense<0.000000e+00> : vector<8x8xf32>
    %2 = tpu.matmul %0, %1, %cst {dimension_numbers = #tpu.dot_dimension_numbers<[1], [0], [0], [1], [0, 0, 1, 1], [], []>} : vector<8x784xbf16>, vector<784x8xbf16>, vector<8x8xf32> -> vector<8x8xf32>
    %c0_3 = arith.constant 0 : index
    %c0_4 = arith.constant 0 : index
    %3 = vector.load %arg2[%c0_3, %c0_4] : memref<1x8xf32, #tpu.memory_space<vmem>>, vector<1x8xf32>
    %4 = vector.broadcast %3 : vector<1x8xf32> to vector<8x8xf32>
    %5 = arith.addf %2, %4 : vector<8x8xf32>
    %c0_5 = arith.constant 0 : index
    %c0_6 = arith.constant 0 : index
    %6 = vector.load %arg5[%c0_5, %c0_6] : memref<8x8xf32, #tpu.memory_space<vmem>>, vector<8x8xf32>
    tpu.vector_store %arg5[%c0_5, %c0_6], %5 {strides = array<i32>} : memref<8x8xf32, #tpu.memory_space<vmem>>, vector<8x8xf32>,
    %c0_7 = arith.constant 0 : index
    %c0_8 = arith.constant 0 : index
    %7 = vector.load %arg3[%c0_7, %c0_8] : memref<8x784xf32, #tpu.memory_space<vmem>>, vector<8x784xf32>
    %cst_9 = arith.constant dense<0.000000e+00> : vector<8x784xf32>
    %8 = tpu.matmul %5, %7, %cst_9 {dimension_numbers = #tpu.dot_dimension_numbers<[1], [0], [0], [1], [0, 0, 1, 1], [], []>} : vector<8x8xf32>, vector<8x784xf32>, vector<8x784xf32> -> vector<8x784xf32>
    %c0_10 = arith.constant 0 : index
    %c0_11 = arith.constant 0 : index
    %9 = vector.load %arg4[%c0_10, %c0_11] : memref<1x784xf32, #tpu.memory_space<vmem>>, vector<1x784xf32>
    %10 = vector.broadcast %9 : vector<1x784xf32> to vector<8x784xf32>
    %11 = arith.addf %8, %10 : vector<8x784xf32>
    %12 = arith.truncf %11 : vector<8x784xf32> to vector<8x784xbf16>
    %c0_12 = arith.constant 0 : index
    %c0_13 = arith.constant 0 : index
    %13 = vector.load %arg6[%c0_12, %c0_13] : memref<8x784xbf16, #tpu.memory_space<vmem>>, vector<8x784xbf16>
    tpu.vector_store %arg6[%c0_12, %c0_13], %12 {strides = array<i32>} : memref<8x784xbf16, #tpu.memory_space<vmem>>, vector<8x784xbf16>,
    return
  }
}

module attributes {stable_mosaic.version = 11 : i64} {
  func.func @_conv_kernel(%arg0: memref<16x162xbf16, #tpu.memory_space<vmem>>, %arg1: memref<16x16x16xbf16, #tpu.memory_space<vmem>>, %arg2: memref<16x1xf32, #tpu.memory_space<vmem>>, %arg3: memref<1x142xf32, #tpu.memory_space<vmem>>, %arg4: memref<16x1xf32, #tpu.memory_space<vmem>>, %arg5: memref<16x1xf32, #tpu.memory_space<vmem>>, %arg6: memref<4x16x142xbf16, #tpu.memory_space<vmem>>) attributes {dimension_semantics = [], scalar_prefetch = 0 : i64, scratch_operands = 0 : i64, tpu.core_type = #tpu.core_type<tc>} {
    %c0 = arith.constant 0 : index
    %c0_0 = arith.constant 0 : index
    %0 = vector.load %arg0[%c0, %c0_0] : memref<16x162xbf16, #tpu.memory_space<vmem>>, vector<16x162xbf16>
    %c0_1 = arith.constant 0 : index
    %c0_2 = arith.constant 0 : index
    %c0_3 = arith.constant 0 : index
    %1 = vector.load %arg1[%c0_1, %c0_2, %c0_3] : memref<16x16x16xbf16, #tpu.memory_space<vmem>>, vector<16x16x16xbf16>
    %c0_4 = arith.constant 0 : index
    %c0_5 = arith.constant 0 : index
    %2 = vector.load %arg2[%c0_4, %c0_5] : memref<16x1xf32, #tpu.memory_space<vmem>>, vector<16x1xf32>
    %3 = vector.extract_strided_slice %0 {offsets = [0, 0], sizes = [16, 142], strides = [1, 1]} : vector<16x162xbf16> to vector<16x142xbf16>
    %4 = vector.extract_strided_slice %1 {offsets = [15, 0, 0], sizes = [1, 16, 16], strides = [1, 1, 1]} : vector<16x16x16xbf16> to vector<1x16x16xbf16>
    %5 = vector.shape_cast %4 : vector<1x16x16xbf16> to vector<16x16xbf16>
    %cst = arith.constant dense<0.000000e+00> : vector<16x142xf32>
    %6 = tpu.matmul %5, %3, %cst {dimension_numbers = #tpu.dot_dimension_numbers<[1], [0], [0], [1], [0, 0, 1, 1], [], []>} : vector<16x16xbf16>, vector<16x142xbf16>, vector<16x142xf32> -> vector<16x142xf32>
    %7 = vector.extract_strided_slice %0 {offsets = [0, 1], sizes = [16, 142], strides = [1, 1]} : vector<16x162xbf16> to vector<16x142xbf16>
    %8 = vector.extract_strided_slice %1 {offsets = [13, 0, 0], sizes = [1, 16, 16], strides = [1, 1, 1]} : vector<16x16x16xbf16> to vector<1x16x16xbf16>
    %9 = vector.shape_cast %8 : vector<1x16x16xbf16> to vector<16x16xbf16>
    %cst_6 = arith.constant dense<0.000000e+00> : vector<16x142xf32>
    %10 = tpu.matmul %9, %7, %cst_6 {dimension_numbers = #tpu.dot_dimension_numbers<[1], [0], [0], [1], [0, 0, 1, 1], [], []>} : vector<16x16xbf16>, vector<16x142xbf16>, vector<16x142xf32> -> vector<16x142xf32>
    %11 = arith.addf %6, %10 : vector<16x142xf32>
    %12 = vector.extract_strided_slice %0 {offsets = [0, 9], sizes = [16, 142], strides = [1, 1]} : vector<16x162xbf16> to vector<16x142xbf16>
    %13 = vector.extract_strided_slice %1 {offsets = [7, 0, 0], sizes = [1, 16, 16], strides = [1, 1, 1]} : vector<16x16x16xbf16> to vector<1x16x16xbf16>
    %14 = vector.shape_cast %13 : vector<1x16x16xbf16> to vector<16x16xbf16>
    %cst_7 = arith.constant dense<0.000000e+00> : vector<16x142xf32>
    %15 = tpu.matmul %14, %12, %cst_7 {dimension_numbers = #tpu.dot_dimension_numbers<[1], [0], [0], [1], [0, 0, 1, 1], [], []>} : vector<16x16xbf16>, vector<16x142xbf16>, vector<16x142xf32> -> vector<16x142xf32>
    %16 = arith.addf %11, %15 : vector<16x142xf32>
    %17 = vector.extract_strided_slice %0 {offsets = [0, 10], sizes = [16, 142], strides = [1, 1]} : vector<16x162xbf16> to vector<16x142xbf16>
    %18 = vector.extract_strided_slice %1 {offsets = [5, 0, 0], sizes = [1, 16, 16], strides = [1, 1, 1]} : vector<16x16x16xbf16> to vector<1x16x16xbf16>
    %19 = vector.shape_cast %18 : vector<1x16x16xbf16> to vector<16x16xbf16>
    %cst_8 = arith.constant dense<0.000000e+00> : vector<16x142xf32>
    %20 = tpu.matmul %19, %17, %cst_8 {dimension_numbers = #tpu.dot_dimension_numbers<[1], [0], [0], [1], [0, 0, 1, 1], [], []>} : vector<16x16xbf16>, vector<16x142xbf16>, vector<16x142xf32> -> vector<16x142xf32>
    %21 = arith.addf %16, %20 : vector<16x142xf32>
    %22 = vector.broadcast %2 : vector<16x1xf32> to vector<16x142xf32>
    %23 = arith.addf %21, %22 : vector<16x142xf32>
    %24 = vector.extract_strided_slice %0 {offsets = [0, 1], sizes = [16, 142], strides = [1, 1]} : vector<16x162xbf16> to vector<16x142xbf16>
    %25 = vector.extract_strided_slice %1 {offsets = [14, 0, 0], sizes = [1, 16, 16], strides = [1, 1, 1]} : vector<16x16x16xbf16> to vector<1x16x16xbf16>
    %26 = vector.shape_cast %25 : vector<1x16x16xbf16> to vector<16x16xbf16>
    %cst_9 = arith.constant dense<0.000000e+00> : vector<16x142xf32>
    %27 = tpu.matmul %26, %24, %cst_9 {dimension_numbers = #tpu.dot_dimension_numbers<[1], [0], [0], [1], [0, 0, 1, 1], [], []>} : vector<16x16xbf16>, vector<16x142xbf16>, vector<16x142xf32> -> vector<16x142xf32>
    %28 = vector.extract_strided_slice %0 {offsets = [0, 2], sizes = [16, 142], strides = [1, 1]} : vector<16x162xbf16> to vector<16x142xbf16>
    %29 = vector.extract_strided_slice %1 {offsets = [12, 0, 0], sizes = [1, 16, 16], strides = [1, 1, 1]} : vector<16x16x16xbf16> to vector<1x16x16xbf16>
    %30 = vector.shape_cast %29 : vector<1x16x16xbf16> to vector<16x16xbf16>
    %cst_10 = arith.constant dense<0.000000e+00> : vector<16x142xf32>
    %31 = tpu.matmul %30, %28, %cst_10 {dimension_numbers = #tpu.dot_dimension_numbers<[1], [0], [0], [1], [0, 0, 1, 1], [], []>} : vector<16x16xbf16>, vector<16x142xbf16>, vector<16x142xf32> -> vector<16x142xf32>
    %32 = arith.addf %27, %31 : vector<16x142xf32>
    %33 = vector.extract_strided_slice %0 {offsets = [0, 10], sizes = [16, 142], strides = [1, 1]} : vector<16x162xbf16> to vector<16x142xbf16>
    %34 = vector.extract_strided_slice %1 {offsets = [6, 0, 0], sizes = [1, 16, 16], strides = [1, 1, 1]} : vector<16x16x16xbf16> to vector<1x16x16xbf16>
    %35 = vector.shape_cast %34 : vector<1x16x16xbf16> to vector<16x16xbf16>
    %cst_11 = arith.constant dense<0.000000e+00> : vector<16x142xf32>
    %36 = tpu.matmul %35, %33, %cst_11 {dimension_numbers = #tpu.dot_dimension_numbers<[1], [0], [0], [1], [0, 0, 1, 1], [], []>} : vector<16x16xbf16>, vector<16x142xbf16>, vector<16x142xf32> -> vector<16x142xf32>
    %37 = arith.addf %32, %36 : vector<16x142xf32>
    %38 = vector.extract_strided_slice %0 {offsets = [0, 11], sizes = [16, 142], strides = [1, 1]} : vector<16x162xbf16> to vector<16x142xbf16>
    %39 = vector.extract_strided_slice %1 {offsets = [4, 0, 0], sizes = [1, 16, 16], strides = [1, 1, 1]} : vector<16x16x16xbf16> to vector<1x16x16xbf16>
    %40 = vector.shape_cast %39 : vector<1x16x16xbf16> to vector<16x16xbf16>
    %cst_12 = arith.constant dense<0.000000e+00> : vector<16x142xf32>
    %41 = tpu.matmul %40, %38, %cst_12 {dimension_numbers = #tpu.dot_dimension_numbers<[1], [0], [0], [1], [0, 0, 1, 1], [], []>} : vector<16x16xbf16>, vector<16x142xbf16>, vector<16x142xf32> -> vector<16x142xf32>
    %42 = arith.addf %37, %41 : vector<16x142xf32>
    %43 = vector.broadcast %2 : vector<16x1xf32> to vector<16x142xf32>
    %44 = arith.addf %42, %43 : vector<16x142xf32>
    %45 = vector.extract_strided_slice %0 {offsets = [0, 9], sizes = [16, 142], strides = [1, 1]} : vector<16x162xbf16> to vector<16x142xbf16>
    %46 = vector.extract_strided_slice %1 {offsets = [11, 0, 0], sizes = [1, 16, 16], strides = [1, 1, 1]} : vector<16x16x16xbf16> to vector<1x16x16xbf16>
    %47 = vector.shape_cast %46 : vector<1x16x16xbf16> to vector<16x16xbf16>
    %cst_13 = arith.constant dense<0.000000e+00> : vector<16x142xf32>
    %48 = tpu.matmul %47, %45, %cst_13 {dimension_numbers = #tpu.dot_dimension_numbers<[1], [0], [0], [1], [0, 0, 1, 1], [], []>} : vector<16x16xbf16>, vector<16x142xbf16>, vector<16x142xf32> -> vector<16x142xf32>
    %49 = vector.extract_strided_slice %0 {offsets = [0, 10], sizes = [16, 142], strides = [1, 1]} : vector<16x162xbf16> to vector<16x142xbf16>
    %50 = vector.extract_strided_slice %1 {offsets = [9, 0, 0], sizes = [1, 16, 16], strides = [1, 1, 1]} : vector<16x16x16xbf16> to vector<1x16x16xbf16>
    %51 = vector.shape_cast %50 : vector<1x16x16xbf16> to vector<16x16xbf16>
    %cst_14 = arith.constant dense<0.000000e+00> : vector<16x142xf32>
    %52 = tpu.matmul %51, %49, %cst_14 {dimension_numbers = #tpu.dot_dimension_numbers<[1], [0], [0], [1], [0, 0, 1, 1], [], []>} : vector<16x16xbf16>, vector<16x142xbf16>, vector<16x142xf32> -> vector<16x142xf32>
    %53 = arith.addf %48, %52 : vector<16x142xf32>
    %54 = vector.extract_strided_slice %0 {offsets = [0, 18], sizes = [16, 142], strides = [1, 1]} : vector<16x162xbf16> to vector<16x142xbf16>
    %55 = vector.extract_strided_slice %1 {offsets = [3, 0, 0], sizes = [1, 16, 16], strides = [1, 1, 1]} : vector<16x16x16xbf16> to vector<1x16x16xbf16>
    %56 = vector.shape_cast %55 : vector<1x16x16xbf16> to vector<16x16xbf16>
    %cst_15 = arith.constant dense<0.000000e+00> : vector<16x142xf32>
    %57 = tpu.matmul %56, %54, %cst_15 {dimension_numbers = #tpu.dot_dimension_numbers<[1], [0], [0], [1], [0, 0, 1, 1], [], []>} : vector<16x16xbf16>, vector<16x142xbf16>, vector<16x142xf32> -> vector<16x142xf32>
    %58 = arith.addf %53, %57 : vector<16x142xf32>
    %59 = vector.extract_strided_slice %0 {offsets = [0, 19], sizes = [16, 142], strides = [1, 1]} : vector<16x162xbf16> to vector<16x142xbf16>
    %60 = vector.extract_strided_slice %1 {offsets = [1, 0, 0], sizes = [1, 16, 16], strides = [1, 1, 1]} : vector<16x16x16xbf16> to vector<1x16x16xbf16>
    %61 = vector.shape_cast %60 : vector<1x16x16xbf16> to vector<16x16xbf16>
    %cst_16 = arith.constant dense<0.000000e+00> : vector<16x142xf32>
    %62 = tpu.matmul %61, %59, %cst_16 {dimension_numbers = #tpu.dot_dimension_numbers<[1], [0], [0], [1], [0, 0, 1, 1], [], []>} : vector<16x16xbf16>, vector<16x142xbf16>, vector<16x142xf32> -> vector<16x142xf32>
    %63 = arith.addf %58, %62 : vector<16x142xf32>
    %64 = vector.broadcast %2 : vector<16x1xf32> to vector<16x142xf32>
    %65 = arith.addf %63, %64 : vector<16x142xf32>
    %66 = vector.extract_strided_slice %0 {offsets = [0, 10], sizes = [16, 142], strides = [1, 1]} : vector<16x162xbf16> to vector<16x142xbf16>
    %67 = vector.extract_strided_slice %1 {offsets = [10, 0, 0], sizes = [1, 16, 16], strides = [1, 1, 1]} : vector<16x16x16xbf16> to vector<1x16x16xbf16>
    %68 = vector.shape_cast %67 : vector<1x16x16xbf16> to vector<16x16xbf16>
    %cst_17 = arith.constant dense<0.000000e+00> : vector<16x142xf32>
    %69 = tpu.matmul %68, %66, %cst_17 {dimension_numbers = #tpu.dot_dimension_numbers<[1], [0], [0], [1], [0, 0, 1, 1], [], []>} : vector<16x16xbf16>, vector<16x142xbf16>, vector<16x142xf32> -> vector<16x142xf32>
    %70 = vector.extract_strided_slice %0 {offsets = [0, 11], sizes = [16, 142], strides = [1, 1]} : vector<16x162xbf16> to vector<16x142xbf16>
    %71 = vector.extract_strided_slice %1 {offsets = [8, 0, 0], sizes = [1, 16, 16], strides = [1, 1, 1]} : vector<16x16x16xbf16> to vector<1x16x16xbf16>
    %72 = vector.shape_cast %71 : vector<1x16x16xbf16> to vector<16x16xbf16>
    %cst_18 = arith.constant dense<0.000000e+00> : vector<16x142xf32>
    %73 = tpu.matmul %72, %70, %cst_18 {dimension_numbers = #tpu.dot_dimension_numbers<[1], [0], [0], [1], [0, 0, 1, 1], [], []>} : vector<16x16xbf16>, vector<16x142xbf16>, vector<16x142xf32> -> vector<16x142xf32>
    %74 = arith.addf %69, %73 : vector<16x142xf32>
    %75 = vector.extract_strided_slice %0 {offsets = [0, 19], sizes = [16, 142], strides = [1, 1]} : vector<16x162xbf16> to vector<16x142xbf16>
    %76 = vector.extract_strided_slice %1 {offsets = [2, 0, 0], sizes = [1, 16, 16], strides = [1, 1, 1]} : vector<16x16x16xbf16> to vector<1x16x16xbf16>
    %77 = vector.shape_cast %76 : vector<1x16x16xbf16> to vector<16x16xbf16>
    %cst_19 = arith.constant dense<0.000000e+00> : vector<16x142xf32>
    %78 = tpu.matmul %77, %75, %cst_19 {dimension_numbers = #tpu.dot_dimension_numbers<[1], [0], [0], [1], [0, 0, 1, 1], [], []>} : vector<16x16xbf16>, vector<16x142xbf16>, vector<16x142xf32> -> vector<16x142xf32>
    %79 = arith.addf %74, %78 : vector<16x142xf32>
    %80 = vector.extract_strided_slice %0 {offsets = [0, 20], sizes = [16, 142], strides = [1, 1]} : vector<16x162xbf16> to vector<16x142xbf16>
    %81 = vector.extract_strided_slice %1 {offsets = [0, 0, 0], sizes = [1, 16, 16], strides = [1, 1, 1]} : vector<16x16x16xbf16> to vector<1x16x16xbf16>
    %82 = vector.shape_cast %81 : vector<1x16x16xbf16> to vector<16x16xbf16>
    %cst_20 = arith.constant dense<0.000000e+00> : vector<16x142xf32>
    %83 = tpu.matmul %82, %80, %cst_20 {dimension_numbers = #tpu.dot_dimension_numbers<[1], [0], [0], [1], [0, 0, 1, 1], [], []>} : vector<16x16xbf16>, vector<16x142xbf16>, vector<16x142xf32> -> vector<16x142xf32>
    %84 = arith.addf %79, %83 : vector<16x142xf32>
    %85 = vector.broadcast %2 : vector<16x1xf32> to vector<16x142xf32>
    %86 = arith.addf %84, %85 : vector<16x142xf32>
    %c0_21 = arith.constant 0 : index
    %c0_22 = arith.constant 0 : index
    %87 = vector.load %arg3[%c0_21, %c0_22] : memref<1x142xf32, #tpu.memory_space<vmem>>, vector<1x142xf32>
    %88 = vector.broadcast %87 : vector<1x142xf32> to vector<16x142xf32>
    %89 = arith.mulf %23, %88 : vector<16x142xf32>
    %cst_23 = arith.constant dense<0.000000e+00> : vector<16xf32>
    %90 = vector.multi_reduction <add>, %89, %cst_23 [1] : vector<16x142xf32> to vector<16xf32>
    %91 = vector.shape_cast %90 : vector<16xf32> to vector<16x1xf32>
    %92 = vector.broadcast %87 : vector<1x142xf32> to vector<16x142xf32>
    %93 = arith.mulf %44, %92 : vector<16x142xf32>
    %cst_24 = arith.constant dense<0.000000e+00> : vector<16xf32>
    %94 = vector.multi_reduction <add>, %93, %cst_24 [1] : vector<16x142xf32> to vector<16xf32>
    %95 = vector.shape_cast %94 : vector<16xf32> to vector<16x1xf32>
    %96 = arith.addf %91, %95 : vector<16x1xf32>
    %97 = vector.broadcast %87 : vector<1x142xf32> to vector<16x142xf32>
    %98 = arith.mulf %65, %97 : vector<16x142xf32>
    %cst_25 = arith.constant dense<0.000000e+00> : vector<16xf32>
    %99 = vector.multi_reduction <add>, %98, %cst_25 [1] : vector<16x142xf32> to vector<16xf32>
    %100 = vector.shape_cast %99 : vector<16xf32> to vector<16x1xf32>
    %101 = arith.addf %96, %100 : vector<16x1xf32>
    %102 = vector.broadcast %87 : vector<1x142xf32> to vector<16x142xf32>
    %103 = arith.mulf %86, %102 : vector<16x142xf32>
    %cst_26 = arith.constant dense<0.000000e+00> : vector<16xf32>
    %104 = vector.multi_reduction <add>, %103, %cst_26 [1] : vector<16x142xf32> to vector<16xf32>
    %105 = vector.shape_cast %104 : vector<16xf32> to vector<16x1xf32>
    %106 = arith.addf %101, %105 : vector<16x1xf32>
    %cst_27 = arith.constant 3.920000e+02 : f32
    %107 = vector.broadcast %cst_27 : f32 to vector<16x1xf32>
    %108 = arith.divf %106, %107 : vector<16x1xf32>
    %109 = vector.broadcast %108 : vector<16x1xf32> to vector<16x142xf32>
    %110 = arith.subf %23, %109 : vector<16x142xf32>
    %111 = vector.broadcast %87 : vector<1x142xf32> to vector<16x142xf32>
    %112 = arith.mulf %110, %111 : vector<16x142xf32>
    %113 = arith.mulf %112, %112 : vector<16x142xf32>
    %cst_28 = arith.constant dense<0.000000e+00> : vector<16xf32>
    %114 = vector.multi_reduction <add>, %113, %cst_28 [1] : vector<16x142xf32> to vector<16xf32>
    %115 = vector.shape_cast %114 : vector<16xf32> to vector<16x1xf32>
    %116 = vector.broadcast %108 : vector<16x1xf32> to vector<16x142xf32>
    %117 = arith.subf %44, %116 : vector<16x142xf32>
    %118 = vector.broadcast %87 : vector<1x142xf32> to vector<16x142xf32>
    %119 = arith.mulf %117, %118 : vector<16x142xf32>
    %120 = arith.mulf %119, %119 : vector<16x142xf32>
    %cst_29 = arith.constant dense<0.000000e+00> : vector<16xf32>
    %121 = vector.multi_reduction <add>, %120, %cst_29 [1] : vector<16x142xf32> to vector<16xf32>
    %122 = vector.shape_cast %121 : vector<16xf32> to vector<16x1xf32>
    %123 = arith.addf %115, %122 : vector<16x1xf32>
    %124 = vector.broadcast %108 : vector<16x1xf32> to vector<16x142xf32>
    %125 = arith.subf %65, %124 : vector<16x142xf32>
    %126 = vector.broadcast %87 : vector<1x142xf32> to vector<16x142xf32>
    %127 = arith.mulf %125, %126 : vector<16x142xf32>
    %128 = arith.mulf %127, %127 : vector<16x142xf32>
    %cst_30 = arith.constant dense<0.000000e+00> : vector<16xf32>
    %129 = vector.multi_reduction <add>, %128, %cst_30 [1] : vector<16x142xf32> to vector<16xf32>
    %130 = vector.shape_cast %129 : vector<16xf32> to vector<16x1xf32>
    %131 = arith.addf %123, %130 : vector<16x1xf32>
    %132 = vector.broadcast %108 : vector<16x1xf32> to vector<16x142xf32>
    %133 = arith.subf %86, %132 : vector<16x142xf32>
    %134 = vector.broadcast %87 : vector<1x142xf32> to vector<16x142xf32>
    %135 = arith.mulf %133, %134 : vector<16x142xf32>
    %136 = arith.mulf %135, %135 : vector<16x142xf32>
    %cst_31 = arith.constant dense<0.000000e+00> : vector<16xf32>
    %137 = vector.multi_reduction <add>, %136, %cst_31 [1] : vector<16x142xf32> to vector<16xf32>
    %138 = vector.shape_cast %137 : vector<16xf32> to vector<16x1xf32>
    %139 = arith.addf %131, %138 : vector<16x1xf32>
    %cst_32 = arith.constant 3.920000e+02 : f32
    %140 = vector.broadcast %cst_32 : f32 to vector<16x1xf32>
    %141 = arith.divf %139, %140 : vector<16x1xf32>
    %cst_33 = arith.constant 9.99999974E-6 : f32
    %142 = vector.broadcast %cst_33 : f32 to vector<16x1xf32>
    %143 = arith.addf %141, %142 : vector<16x1xf32>
    %144 = math.rsqrt %143 : vector<16x1xf32>
    %c0_34 = arith.constant 0 : index
    %c0_35 = arith.constant 0 : index
    %145 = vector.load %arg4[%c0_34, %c0_35] : memref<16x1xf32, #tpu.memory_space<vmem>>, vector<16x1xf32>
    %146 = arith.mulf %144, %145 : vector<16x1xf32>
    %c0_36 = arith.constant 0 : index
    %c0_37 = arith.constant 0 : index
    %147 = vector.load %arg5[%c0_36, %c0_37] : memref<16x1xf32, #tpu.memory_space<vmem>>, vector<16x1xf32>
    %148 = arith.mulf %108, %146 : vector<16x1xf32>
    %149 = arith.subf %147, %148 : vector<16x1xf32>
    %150 = vector.broadcast %146 : vector<16x1xf32> to vector<16x142xf32>
    %151 = arith.mulf %23, %150 : vector<16x142xf32>
    %152 = vector.broadcast %149 : vector<16x1xf32> to vector<16x142xf32>
    %153 = arith.addf %151, %152 : vector<16x142xf32>
    %154 = vector.broadcast %146 : vector<16x1xf32> to vector<16x142xf32>
    %155 = arith.mulf %44, %154 : vector<16x142xf32>
    %156 = vector.broadcast %149 : vector<16x1xf32> to vector<16x142xf32>
    %157 = arith.addf %155, %156 : vector<16x142xf32>
    %158 = vector.broadcast %146 : vector<16x1xf32> to vector<16x142xf32>
    %159 = arith.mulf %65, %158 : vector<16x142xf32>
    %160 = vector.broadcast %149 : vector<16x1xf32> to vector<16x142xf32>
    %161 = arith.addf %159, %160 : vector<16x142xf32>
    %162 = vector.broadcast %146 : vector<16x1xf32> to vector<16x142xf32>
    %163 = arith.mulf %86, %162 : vector<16x142xf32>
    %164 = vector.broadcast %149 : vector<16x1xf32> to vector<16x142xf32>
    %165 = arith.addf %163, %164 : vector<16x142xf32>
    %166 = math.tanh %153 : vector<16x142xf32>
    %167 = math.tanh %157 : vector<16x142xf32>
    %168 = math.tanh %161 : vector<16x142xf32>
    %169 = math.tanh %165 : vector<16x142xf32>
    %170 = arith.truncf %166 : vector<16x142xf32> to vector<16x142xbf16>
    %c0_38 = arith.constant 0 : index
    %c0_39 = arith.constant 0 : index
    %c0_40 = arith.constant 0 : index
    %171 = vector.load %arg6[%c0_38, %c0_39, %c0_40] : memref<4x16x142xbf16, #tpu.memory_space<vmem>>, vector<1x16x142xbf16>
    %172 = vector.shape_cast %171 : vector<1x16x142xbf16> to vector<16x142xbf16>
    %173 = vector.shape_cast %170 : vector<16x142xbf16> to vector<1x16x142xbf16>
    tpu.vector_store %arg6[%c0_38, %c0_39, %c0_40], %173 {strides = array<i32>} : memref<4x16x142xbf16, #tpu.memory_space<vmem>>, vector<1x16x142xbf16>,
    %174 = arith.truncf %167 : vector<16x142xf32> to vector<16x142xbf16>
    %c1 = arith.constant 1 : index
    %c0_41 = arith.constant 0 : index
    %c0_42 = arith.constant 0 : index
    %175 = vector.load %arg6[%c1, %c0_41, %c0_42] : memref<4x16x142xbf16, #tpu.memory_space<vmem>>, vector<1x16x142xbf16>
    %176 = vector.shape_cast %175 : vector<1x16x142xbf16> to vector<16x142xbf16>
    %177 = vector.shape_cast %174 : vector<16x142xbf16> to vector<1x16x142xbf16>
    tpu.vector_store %arg6[%c1, %c0_41, %c0_42], %177 {strides = array<i32>} : memref<4x16x142xbf16, #tpu.memory_space<vmem>>, vector<1x16x142xbf16>,
    %178 = arith.truncf %168 : vector<16x142xf32> to vector<16x142xbf16>
    %c2 = arith.constant 2 : index
    %c0_43 = arith.constant 0 : index
    %c0_44 = arith.constant 0 : index
    %179 = vector.load %arg6[%c2, %c0_43, %c0_44] : memref<4x16x142xbf16, #tpu.memory_space<vmem>>, vector<1x16x142xbf16>
    %180 = vector.shape_cast %179 : vector<1x16x142xbf16> to vector<16x142xbf16>
    %181 = vector.shape_cast %178 : vector<16x142xbf16> to vector<1x16x142xbf16>
    tpu.vector_store %arg6[%c2, %c0_43, %c0_44], %181 {strides = array<i32>} : memref<4x16x142xbf16, #tpu.memory_space<vmem>>, vector<1x16x142xbf16>,
    %182 = arith.truncf %169 : vector<16x142xf32> to vector<16x142xbf16>
    %c3 = arith.constant 3 : index
    %c0_45 = arith.constant 0 : index
    %c0_46 = arith.constant 0 : index
    %183 = vector.load %arg6[%c3, %c0_45, %c0_46] : memref<4x16x142xbf16, #tpu.memory_space<vmem>>, vector<1x16x142xbf16>
    %184 = vector.shape_cast %183 : vector<1x16x142xbf16> to vector<16x142xbf16>
    %185 = vector.shape_cast %182 : vector<16x142xbf16> to vector<1x16x142xbf16>
    tpu.vector_store %arg6[%c3, %c0_45, %c0_46], %185 {strides = array<i32>} : memref<4x16x142xbf16, #tpu.memory_space<vmem>>, vector<1x16x142xbf16>,
    return
  }
}

module attributes {stable_mosaic.version = 11 : i64} {
  func.func @_conv_kernel(%arg0: memref<16x512xbf16, #tpu.memory_space<vmem>>, %arg1: memref<16x8x16xbf16, #tpu.memory_space<vmem>>, %arg2: memref<8x1xf32, #tpu.memory_space<vmem>>, %arg3: memref<4x8x478xf32, #tpu.memory_space<vmem>>) attributes {dimension_semantics = [], scalar_prefetch = 0 : i64, scratch_operands = 0 : i64, tpu.core_type = #tpu.core_type<tc>} {
    %c0 = arith.constant 0 : index
    %c0_0 = arith.constant 0 : index
    %0 = vector.load %arg0[%c0, %c0_0] : memref<16x512xbf16, #tpu.memory_space<vmem>>, vector<16x512xbf16>
    %c0_1 = arith.constant 0 : index
    %c0_2 = arith.constant 0 : index
    %c0_3 = arith.constant 0 : index
    %1 = vector.load %arg1[%c0_1, %c0_2, %c0_3] : memref<16x8x16xbf16, #tpu.memory_space<vmem>>, vector<16x8x16xbf16>
    %c0_4 = arith.constant 0 : index
    %c0_5 = arith.constant 0 : index
    %2 = vector.load %arg2[%c0_4, %c0_5] : memref<8x1xf32, #tpu.memory_space<vmem>>, vector<8x1xf32>
    %3 = vector.extract_strided_slice %0 {offsets = [0, 0], sizes = [16, 478], strides = [1, 1]} : vector<16x512xbf16> to vector<16x478xbf16>
    %4 = vector.extract_strided_slice %1 {offsets = [15, 0, 0], sizes = [1, 8, 16], strides = [1, 1, 1]} : vector<16x8x16xbf16> to vector<1x8x16xbf16>
    %5 = vector.shape_cast %4 : vector<1x8x16xbf16> to vector<8x16xbf16>
    %cst = arith.constant dense<0.000000e+00> : vector<8x478xf32>
    %6 = tpu.matmul %5, %3, %cst {dimension_numbers = #tpu.dot_dimension_numbers<[1], [0], [0], [1], [0, 0, 1, 1], [], []>} : vector<8x16xbf16>, vector<16x478xbf16>, vector<8x478xf32> -> vector<8x478xf32>
    %7 = vector.extract_strided_slice %0 {offsets = [0, 1], sizes = [16, 478], strides = [1, 1]} : vector<16x512xbf16> to vector<16x478xbf16>
    %8 = vector.extract_strided_slice %1 {offsets = [13, 0, 0], sizes = [1, 8, 16], strides = [1, 1, 1]} : vector<16x8x16xbf16> to vector<1x8x16xbf16>
    %9 = vector.shape_cast %8 : vector<1x8x16xbf16> to vector<8x16xbf16>
    %cst_6 = arith.constant dense<0.000000e+00> : vector<8x478xf32>
    %10 = tpu.matmul %9, %7, %cst_6 {dimension_numbers = #tpu.dot_dimension_numbers<[1], [0], [0], [1], [0, 0, 1, 1], [], []>} : vector<8x16xbf16>, vector<16x478xbf16>, vector<8x478xf32> -> vector<8x478xf32>
    %11 = arith.addf %6, %10 : vector<8x478xf32>
    %12 = vector.extract_strided_slice %0 {offsets = [0, 16], sizes = [16, 478], strides = [1, 1]} : vector<16x512xbf16> to vector<16x478xbf16>
    %13 = vector.extract_strided_slice %1 {offsets = [7, 0, 0], sizes = [1, 8, 16], strides = [1, 1, 1]} : vector<16x8x16xbf16> to vector<1x8x16xbf16>
    %14 = vector.shape_cast %13 : vector<1x8x16xbf16> to vector<8x16xbf16>
    %cst_7 = arith.constant dense<0.000000e+00> : vector<8x478xf32>
    %15 = tpu.matmul %14, %12, %cst_7 {dimension_numbers = #tpu.dot_dimension_numbers<[1], [0], [0], [1], [0, 0, 1, 1], [], []>} : vector<8x16xbf16>, vector<16x478xbf16>, vector<8x478xf32> -> vector<8x478xf32>
    %16 = arith.addf %11, %15 : vector<8x478xf32>
    %17 = vector.extract_strided_slice %0 {offsets = [0, 17], sizes = [16, 478], strides = [1, 1]} : vector<16x512xbf16> to vector<16x478xbf16>
    %18 = vector.extract_strided_slice %1 {offsets = [5, 0, 0], sizes = [1, 8, 16], strides = [1, 1, 1]} : vector<16x8x16xbf16> to vector<1x8x16xbf16>
    %19 = vector.shape_cast %18 : vector<1x8x16xbf16> to vector<8x16xbf16>
    %cst_8 = arith.constant dense<0.000000e+00> : vector<8x478xf32>
    %20 = tpu.matmul %19, %17, %cst_8 {dimension_numbers = #tpu.dot_dimension_numbers<[1], [0], [0], [1], [0, 0, 1, 1], [], []>} : vector<8x16xbf16>, vector<16x478xbf16>, vector<8x478xf32> -> vector<8x478xf32>
    %21 = arith.addf %16, %20 : vector<8x478xf32>
    %22 = vector.broadcast %2 : vector<8x1xf32> to vector<8x478xf32>
    %23 = arith.addf %21, %22 : vector<8x478xf32>
    %24 = vector.extract_strided_slice %0 {offsets = [0, 1], sizes = [16, 478], strides = [1, 1]} : vector<16x512xbf16> to vector<16x478xbf16>
    %25 = vector.extract_strided_slice %1 {offsets = [14, 0, 0], sizes = [1, 8, 16], strides = [1, 1, 1]} : vector<16x8x16xbf16> to vector<1x8x16xbf16>
    %26 = vector.shape_cast %25 : vector<1x8x16xbf16> to vector<8x16xbf16>
    %cst_9 = arith.constant dense<0.000000e+00> : vector<8x478xf32>
    %27 = tpu.matmul %26, %24, %cst_9 {dimension_numbers = #tpu.dot_dimension_numbers<[1], [0], [0], [1], [0, 0, 1, 1], [], []>} : vector<8x16xbf16>, vector<16x478xbf16>, vector<8x478xf32> -> vector<8x478xf32>
    %28 = vector.extract_strided_slice %0 {offsets = [0, 2], sizes = [16, 478], strides = [1, 1]} : vector<16x512xbf16> to vector<16x478xbf16>
    %29 = vector.extract_strided_slice %1 {offsets = [12, 0, 0], sizes = [1, 8, 16], strides = [1, 1, 1]} : vector<16x8x16xbf16> to vector<1x8x16xbf16>
    %30 = vector.shape_cast %29 : vector<1x8x16xbf16> to vector<8x16xbf16>
    %cst_10 = arith.constant dense<0.000000e+00> : vector<8x478xf32>
    %31 = tpu.matmul %30, %28, %cst_10 {dimension_numbers = #tpu.dot_dimension_numbers<[1], [0], [0], [1], [0, 0, 1, 1], [], []>} : vector<8x16xbf16>, vector<16x478xbf16>, vector<8x478xf32> -> vector<8x478xf32>
    %32 = arith.addf %27, %31 : vector<8x478xf32>
    %33 = vector.extract_strided_slice %0 {offsets = [0, 17], sizes = [16, 478], strides = [1, 1]} : vector<16x512xbf16> to vector<16x478xbf16>
    %34 = vector.extract_strided_slice %1 {offsets = [6, 0, 0], sizes = [1, 8, 16], strides = [1, 1, 1]} : vector<16x8x16xbf16> to vector<1x8x16xbf16>
    %35 = vector.shape_cast %34 : vector<1x8x16xbf16> to vector<8x16xbf16>
    %cst_11 = arith.constant dense<0.000000e+00> : vector<8x478xf32>
    %36 = tpu.matmul %35, %33, %cst_11 {dimension_numbers = #tpu.dot_dimension_numbers<[1], [0], [0], [1], [0, 0, 1, 1], [], []>} : vector<8x16xbf16>, vector<16x478xbf16>, vector<8x478xf32> -> vector<8x478xf32>
    %37 = arith.addf %32, %36 : vector<8x478xf32>
    %38 = vector.extract_strided_slice %0 {offsets = [0, 18], sizes = [16, 478], strides = [1, 1]} : vector<16x512xbf16> to vector<16x478xbf16>
    %39 = vector.extract_strided_slice %1 {offsets = [4, 0, 0], sizes = [1, 8, 16], strides = [1, 1, 1]} : vector<16x8x16xbf16> to vector<1x8x16xbf16>
    %40 = vector.shape_cast %39 : vector<1x8x16xbf16> to vector<8x16xbf16>
    %cst_12 = arith.constant dense<0.000000e+00> : vector<8x478xf32>
    %41 = tpu.matmul %40, %38, %cst_12 {dimension_numbers = #tpu.dot_dimension_numbers<[1], [0], [0], [1], [0, 0, 1, 1], [], []>} : vector<8x16xbf16>, vector<16x478xbf16>, vector<8x478xf32> -> vector<8x478xf32>
    %42 = arith.addf %37, %41 : vector<8x478xf32>
    %43 = vector.broadcast %2 : vector<8x1xf32> to vector<8x478xf32>
    %44 = arith.addf %42, %43 : vector<8x478xf32>
    %45 = vector.extract_strided_slice %0 {offsets = [0, 16], sizes = [16, 478], strides = [1, 1]} : vector<16x512xbf16> to vector<16x478xbf16>
    %46 = vector.extract_strided_slice %1 {offsets = [11, 0, 0], sizes = [1, 8, 16], strides = [1, 1, 1]} : vector<16x8x16xbf16> to vector<1x8x16xbf16>
    %47 = vector.shape_cast %46 : vector<1x8x16xbf16> to vector<8x16xbf16>
    %cst_13 = arith.constant dense<0.000000e+00> : vector<8x478xf32>
    %48 = tpu.matmul %47, %45, %cst_13 {dimension_numbers = #tpu.dot_dimension_numbers<[1], [0], [0], [1], [0, 0, 1, 1], [], []>} : vector<8x16xbf16>, vector<16x478xbf16>, vector<8x478xf32> -> vector<8x478xf32>
    %49 = vector.extract_strided_slice %0 {offsets = [0, 17], sizes = [16, 478], strides = [1, 1]} : vector<16x512xbf16> to vector<16x478xbf16>
    %50 = vector.extract_strided_slice %1 {offsets = [9, 0, 0], sizes = [1, 8, 16], strides = [1, 1, 1]} : vector<16x8x16xbf16> to vector<1x8x16xbf16>
    %51 = vector.shape_cast %50 : vector<1x8x16xbf16> to vector<8x16xbf16>
    %cst_14 = arith.constant dense<0.000000e+00> : vector<8x478xf32>
    %52 = tpu.matmul %51, %49, %cst_14 {dimension_numbers = #tpu.dot_dimension_numbers<[1], [0], [0], [1], [0, 0, 1, 1], [], []>} : vector<8x16xbf16>, vector<16x478xbf16>, vector<8x478xf32> -> vector<8x478xf32>
    %53 = arith.addf %48, %52 : vector<8x478xf32>
    %54 = vector.extract_strided_slice %0 {offsets = [0, 32], sizes = [16, 478], strides = [1, 1]} : vector<16x512xbf16> to vector<16x478xbf16>
    %55 = vector.extract_strided_slice %1 {offsets = [3, 0, 0], sizes = [1, 8, 16], strides = [1, 1, 1]} : vector<16x8x16xbf16> to vector<1x8x16xbf16>
    %56 = vector.shape_cast %55 : vector<1x8x16xbf16> to vector<8x16xbf16>
    %cst_15 = arith.constant dense<0.000000e+00> : vector<8x478xf32>
    %57 = tpu.matmul %56, %54, %cst_15 {dimension_numbers = #tpu.dot_dimension_numbers<[1], [0], [0], [1], [0, 0, 1, 1], [], []>} : vector<8x16xbf16>, vector<16x478xbf16>, vector<8x478xf32> -> vector<8x478xf32>
    %58 = arith.addf %53, %57 : vector<8x478xf32>
    %59 = vector.extract_strided_slice %0 {offsets = [0, 33], sizes = [16, 478], strides = [1, 1]} : vector<16x512xbf16> to vector<16x478xbf16>
    %60 = vector.extract_strided_slice %1 {offsets = [1, 0, 0], sizes = [1, 8, 16], strides = [1, 1, 1]} : vector<16x8x16xbf16> to vector<1x8x16xbf16>
    %61 = vector.shape_cast %60 : vector<1x8x16xbf16> to vector<8x16xbf16>
    %cst_16 = arith.constant dense<0.000000e+00> : vector<8x478xf32>
    %62 = tpu.matmul %61, %59, %cst_16 {dimension_numbers = #tpu.dot_dimension_numbers<[1], [0], [0], [1], [0, 0, 1, 1], [], []>} : vector<8x16xbf16>, vector<16x478xbf16>, vector<8x478xf32> -> vector<8x478xf32>
    %63 = arith.addf %58, %62 : vector<8x478xf32>
    %64 = vector.broadcast %2 : vector<8x1xf32> to vector<8x478xf32>
    %65 = arith.addf %63, %64 : vector<8x478xf32>
    %66 = vector.extract_strided_slice %0 {offsets = [0, 17], sizes = [16, 478], strides = [1, 1]} : vector<16x512xbf16> to vector<16x478xbf16>
    %67 = vector.extract_strided_slice %1 {offsets = [10, 0, 0], sizes = [1, 8, 16], strides = [1, 1, 1]} : vector<16x8x16xbf16> to vector<1x8x16xbf16>
    %68 = vector.shape_cast %67 : vector<1x8x16xbf16> to vector<8x16xbf16>
    %cst_17 = arith.constant dense<0.000000e+00> : vector<8x478xf32>
    %69 = tpu.matmul %68, %66, %cst_17 {dimension_numbers = #tpu.dot_dimension_numbers<[1], [0], [0], [1], [0, 0, 1, 1], [], []>} : vector<8x16xbf16>, vector<16x478xbf16>, vector<8x478xf32> -> vector<8x478xf32>
    %70 = vector.extract_strided_slice %0 {offsets = [0, 18], sizes = [16, 478], strides = [1, 1]} : vector<16x512xbf16> to vector<16x478xbf16>
    %71 = vector.extract_strided_slice %1 {offsets = [8, 0, 0], sizes = [1, 8, 16], strides = [1, 1, 1]} : vector<16x8x16xbf16> to vector<1x8x16xbf16>
    %72 = vector.shape_cast %71 : vector<1x8x16xbf16> to vector<8x16xbf16>
    %cst_18 = arith.constant dense<0.000000e+00> : vector<8x478xf32>
    %73 = tpu.matmul %72, %70, %cst_18 {dimension_numbers = #tpu.dot_dimension_numbers<[1], [0], [0], [1], [0, 0, 1, 1], [], []>} : vector<8x16xbf16>, vector<16x478xbf16>, vector<8x478xf32> -> vector<8x478xf32>
    %74 = arith.addf %69, %73 : vector<8x478xf32>
    %75 = vector.extract_strided_slice %0 {offsets = [0, 33], sizes = [16, 478], strides = [1, 1]} : vector<16x512xbf16> to vector<16x478xbf16>
    %76 = vector.extract_strided_slice %1 {offsets = [2, 0, 0], sizes = [1, 8, 16], strides = [1, 1, 1]} : vector<16x8x16xbf16> to vector<1x8x16xbf16>
    %77 = vector.shape_cast %76 : vector<1x8x16xbf16> to vector<8x16xbf16>
    %cst_19 = arith.constant dense<0.000000e+00> : vector<8x478xf32>
    %78 = tpu.matmul %77, %75, %cst_19 {dimension_numbers = #tpu.dot_dimension_numbers<[1], [0], [0], [1], [0, 0, 1, 1], [], []>} : vector<8x16xbf16>, vector<16x478xbf16>, vector<8x478xf32> -> vector<8x478xf32>
    %79 = arith.addf %74, %78 : vector<8x478xf32>
    %80 = vector.extract_strided_slice %0 {offsets = [0, 34], sizes = [16, 478], strides = [1, 1]} : vector<16x512xbf16> to vector<16x478xbf16>
    %81 = vector.extract_strided_slice %1 {offsets = [0, 0, 0], sizes = [1, 8, 16], strides = [1, 1, 1]} : vector<16x8x16xbf16> to vector<1x8x16xbf16>
    %82 = vector.shape_cast %81 : vector<1x8x16xbf16> to vector<8x16xbf16>
    %cst_20 = arith.constant dense<0.000000e+00> : vector<8x478xf32>
    %83 = tpu.matmul %82, %80, %cst_20 {dimension_numbers = #tpu.dot_dimension_numbers<[1], [0], [0], [1], [0, 0, 1, 1], [], []>} : vector<8x16xbf16>, vector<16x478xbf16>, vector<8x478xf32> -> vector<8x478xf32>
    %84 = arith.addf %79, %83 : vector<8x478xf32>
    %85 = vector.broadcast %2 : vector<8x1xf32> to vector<8x478xf32>
    %86 = arith.addf %84, %85 : vector<8x478xf32>
    %cst_21 = arith.constant 5.000000e-01 : f32
    %87 = vector.broadcast %cst_21 : f32 to vector<8x478xf32>
    %88 = arith.mulf %87, %23 : vector<8x478xf32>
    %89 = math.tanh %88 : vector<8x478xf32>
    %cst_22 = arith.constant 1.000000e+00 : f32
    %90 = vector.broadcast %cst_22 : f32 to vector<8x478xf32>
    %91 = arith.addf %89, %90 : vector<8x478xf32>
    %cst_23 = arith.constant 5.000000e-01 : f32
    %92 = vector.broadcast %cst_23 : f32 to vector<8x478xf32>
    %93 = arith.mulf %92, %91 : vector<8x478xf32>
    %cst_24 = arith.constant 5.000000e-01 : f32
    %94 = vector.broadcast %cst_24 : f32 to vector<8x478xf32>
    %95 = arith.mulf %94, %44 : vector<8x478xf32>
    %96 = math.tanh %95 : vector<8x478xf32>
    %cst_25 = arith.constant 1.000000e+00 : f32
    %97 = vector.broadcast %cst_25 : f32 to vector<8x478xf32>
    %98 = arith.addf %96, %97 : vector<8x478xf32>
    %cst_26 = arith.constant 5.000000e-01 : f32
    %99 = vector.broadcast %cst_26 : f32 to vector<8x478xf32>
    %100 = arith.mulf %99, %98 : vector<8x478xf32>
    %cst_27 = arith.constant 5.000000e-01 : f32
    %101 = vector.broadcast %cst_27 : f32 to vector<8x478xf32>
    %102 = arith.mulf %101, %65 : vector<8x478xf32>
    %103 = math.tanh %102 : vector<8x478xf32>
    %cst_28 = arith.constant 1.000000e+00 : f32
    %104 = vector.broadcast %cst_28 : f32 to vector<8x478xf32>
    %105 = arith.addf %103, %104 : vector<8x478xf32>
    %cst_29 = arith.constant 5.000000e-01 : f32
    %106 = vector.broadcast %cst_29 : f32 to vector<8x478xf32>
    %107 = arith.mulf %106, %105 : vector<8x478xf32>
    %cst_30 = arith.constant 5.000000e-01 : f32
    %108 = vector.broadcast %cst_30 : f32 to vector<8x478xf32>
    %109 = arith.mulf %108, %86 : vector<8x478xf32>
    %110 = math.tanh %109 : vector<8x478xf32>
    %cst_31 = arith.constant 1.000000e+00 : f32
    %111 = vector.broadcast %cst_31 : f32 to vector<8x478xf32>
    %112 = arith.addf %110, %111 : vector<8x478xf32>
    %cst_32 = arith.constant 5.000000e-01 : f32
    %113 = vector.broadcast %cst_32 : f32 to vector<8x478xf32>
    %114 = arith.mulf %113, %112 : vector<8x478xf32>
    %c0_33 = arith.constant 0 : index
    %c0_34 = arith.constant 0 : index
    %c0_35 = arith.constant 0 : index
    %115 = vector.load %arg3[%c0_33, %c0_34, %c0_35] : memref<4x8x478xf32, #tpu.memory_space<vmem>>, vector<1x8x478xf32>
    %116 = vector.shape_cast %115 : vector<1x8x478xf32> to vector<8x478xf32>
    %117 = vector.shape_cast %93 : vector<8x478xf32> to vector<1x8x478xf32>
    tpu.vector_store %arg3[%c0_33, %c0_34, %c0_35], %117 {strides = array<i32>} : memref<4x8x478xf32, #tpu.memory_space<vmem>>, vector<1x8x478xf32>,
    %c1 = arith.constant 1 : index
    %c0_36 = arith.constant 0 : index
    %c0_37 = arith.constant 0 : index
    %118 = vector.load %arg3[%c1, %c0_36, %c0_37] : memref<4x8x478xf32, #tpu.memory_space<vmem>>, vector<1x8x478xf32>
    %119 = vector.shape_cast %118 : vector<1x8x478xf32> to vector<8x478xf32>
    %120 = vector.shape_cast %100 : vector<8x478xf32> to vector<1x8x478xf32>
    tpu.vector_store %arg3[%c1, %c0_36, %c0_37], %120 {strides = array<i32>} : memref<4x8x478xf32, #tpu.memory_space<vmem>>, vector<1x8x478xf32>,
    %c2 = arith.constant 2 : index
    %c0_38 = arith.constant 0 : index
    %c0_39 = arith.constant 0 : index
    %121 = vector.load %arg3[%c2, %c0_38, %c0_39] : memref<4x8x478xf32, #tpu.memory_space<vmem>>, vector<1x8x478xf32>
    %122 = vector.shape_cast %121 : vector<1x8x478xf32> to vector<8x478xf32>
    %123 = vector.shape_cast %107 : vector<8x478xf32> to vector<1x8x478xf32>
    tpu.vector_store %arg3[%c2, %c0_38, %c0_39], %123 {strides = array<i32>} : memref<4x8x478xf32, #tpu.memory_space<vmem>>, vector<1x8x478xf32>,
    %c3 = arith.constant 3 : index
    %c0_40 = arith.constant 0 : index
    %c0_41 = arith.constant 0 : index
    %124 = vector.load %arg3[%c3, %c0_40, %c0_41] : memref<4x8x478xf32, #tpu.memory_space<vmem>>, vector<1x8x478xf32>
    %125 = vector.shape_cast %124 : vector<1x8x478xf32> to vector<8x478xf32>
    %126 = vector.shape_cast %114 : vector<8x478xf32> to vector<1x8x478xf32>
    tpu.vector_store %arg3[%c3, %c0_40, %c0_41], %126 {strides = array<i32>} : memref<4x8x478xf32, #tpu.memory_space<vmem>>, vector<1x8x478xf32>,
    return
  }
}

</mosaic_0001>

<bundles_post_ra>
// kernel: forward.6
= control target key start
LH: loop header
LB: loop body
LE: loop exit
PB: predicated region body
PF: predicated region fallthrough
CT: control target
= control target key end

     0   :  { %vm138_vm0 = vcmask 1043456   ;;  %v4749_v3 = vmov 0   ;;  %s4750_s27 = smov 127   ;;  %vm134_vm1 = vcmask 64512   ;;  %s4751_s12 = smov 126   ;;  %vm120_vm2 = vcmask 1039360   ;;  %s6105_s0 = inlined_call_operand.vmem [shape: bf16[8,1800], index: 0, kind: input, shape index: {}]   ;;  %s6106_s1 = inlined_call_operand.vmem [shape: bf16[9,16,8], index: 1, kind: input, shape index: {}]   ;;  %s6107_s2 = inlined_call_operand.vmem [shape: f32[16,1], index: 2, kind: input, shape index: {}]   ;;  %s6108_s3 = inlined_call_operand.vmem [shape: f32[1,1738], index: 3, kind: input, shape index: {}]   ;;  %s6109_s4 = inlined_call_operand.vmem [shape: f32[16,1], index: 4, kind: input, shape index: {}]   ;;  %s6110_s5 = inlined_call_operand.vmem [shape: f32[16,1], index: 5, kind: input, shape index: {}]   ;;  %s6111_s6 = inlined_call_operand.vmem [shape: bf16[1,16,1738], index: 6, kind: output, shape index: {}]  }
   0x1   :  { %v25_v0 = vld [vmem:[%s6105_s0 + $0x8] sm:$0xff]  ;;  %v24_v1 = vld [vmem:[%s6105_s0] sm:$0xff]  ;;  %v26_v2 = vld [vmem:[%s6105_s0 + $0x10] sm:$0xff]  ;;  %564 = vmatprep.mubr.bf16.mxu0 %v4749_v3  ;;  %213 = vmatprep.mubr.bf16.mxu1 %v4749_v3  ;;  %s4752_s15 = smov 98   ;;  %s4753_s16 = smov 97   ;;  %vm866_vm3 = vcmask 1031168  }
   0x2   :  { %v4804_v4 = vcombine.low %v25_v0, %v25_v0  ;;  %v4806_v5 = vcombine.low %v24_v1, %v24_v1  ;;  %4719 = vset.pattern.permute.xlu1 %v4749_v3  ;;  %v4809_v6 = vcombine.high %v24_v1, %v24_v1  ;;  %4720 = vset.pattern.permute.xlu0 %v4749_v3  ;;  %v4829_v11 = vld [vmem:[%s6106_s1] sm:$0xff]   ;;  %v27_v14 = vld [vmem:[%s6105_s0 + $0x18] sm:$0xff]  ;;  %v30_v20 = vld [vmem:[%s6105_s0 + $0x30] sm:$0xff]  ;;  %s4754_s17 = smov 96   ;;  %s4755_s20 = smov 68   ;;  %vm1287_vm4 = vcmask 801792  }
   0x3   :  { %v4816_v7 = vcombine.high %v25_v0, %v25_v0  ;;  %v4818_v8 = vcombine.low %v26_v2, %v26_v2  ;;  %v4822_v10 = vcombine.high %v26_v2, %v26_v2  ;;  %v28_v12 = vld [vmem:[%s6105_s0 + $0x20] sm:$0xff]  ;;  %v4856_v16 = vcombine.high %v27_v14, %v27_v14  ;;  %v29_v22 = vld [vmem:[%s6105_s0 + $0x28] sm:$0xff]  ;;  %v5052_v53 = vld [vmem:[%s6106_s1 + $0x10] sm:$0xff]  }
   0x4   :  { %96 = vrot.lane.b32.xlu1 %v4804_v4, %s4750_s27  ;;  %92 = vrot.lane.b32.xlu0 %v4806_v5, %s4750_s27  ;;  %v491_v9 = vsel %vm138_vm0, %v4806_v5, 0  ;;  %v4845_v15 = vcombine.high %v28_v12, %v28_v12  ;;  %v4858_v17 = vcombine.low %v27_v14, %v27_v14  ;;  %v4860_v18 = vcombine.low %v28_v12, %v28_v12  ;;  %v5010_v34 = vld [vmem:[%s6106_s1 + $0x8] sm:$0xff]  }
   0x5   :  { %4338 = vmatprep.subr.msk.bf16.mxu0 %vm138_vm0, %v4809_v6  ;;  %v503_v13 = vsel %vm138_vm0, %v4818_v8, 0  ;;  %v4871_v21 = vcombine.high %v30_v20, %v30_v20  ;;  %v4885_v23 = vcombine.low %v30_v20, %v30_v20  ;;  %v4893_v25 = vcombine.low %v29_v22, %v29_v22 }
   0x6   :  { %533 = vmatpush1.bf16.msra.mxu0 %v491_v9  ;;  %v515_v19 = vsel %vm138_vm0, %v4860_v18, 0  ;;  %v4906_v26 = vcombine.high %v29_v22, %v29_v22  ;;  %vm1708_vm5 = vcmask 793600   ;;  %vm2129_vm6 = vcmask 785408  }
   0x7   :  { %4342 = vmatprep.subr.msk.bf16.mxu0 %vm138_vm0, %v4822_v10  ;;  %v527_v24 = vsel %vm138_vm0, %v4885_v23, 0  ;;  %vm2555_vm7 = vcmask 556032   ;;  %vm2979_vm8 = vcmask 547840   ;;  %vm3403_vm9 = vcmask 539648  }
   0x8   :  { %98 = vrot.lane.b32.xlu1 %v4816_v7, %s4750_s27  ;;  %94 = vrot.lane.b32.xlu0 %v4809_v6, %s4750_s27  ;;  %vm3944_vm10 = vcmask 605184   ;;  %vm4294_vm11 = vcmask 605188  }
   0x9   :  { %4339 = vmatmul.mubr.msk.bf16.vlgmr.msra.gmra.mrb[0].mxu0 %vm134_vm1, %v4829_v11  ;;  %vm6041_vm12 = vmor %vm4294_vm11, %vm138_vm0 }
   0xa   :  { %619 = vmatpush1.bf16.msra.mxu0 %v503_v13  ;;  %650 = vmatprep.mubr.bf16.mxu0 %v4749_v3 }
   0xb   :  { %4346 = vmatprep.subr.msk.bf16.mxu0 %vm138_vm0, %v4845_v15 }
   0xc   :  { %102 = vrot.lane.b32.xlu1 %v4822_v10, %s4750_s27  ;;  %100 = vrot.lane.b32.xlu0 %v4818_v8, %s4750_s27 }
  0x10   :  { %106 = vrot.lane.b32.xlu1 %v4856_v16, %s4750_s27  ;;  %104 = vrot.lane.b32.xlu0 %v4858_v17, %s4750_s27 }
  0x11   :  { %4343 = vmatmul.mubr.msk.bf16.vlgmr.msra.gmra.mrb[4].mxu0 %vm134_vm1, %v4829_v11 }
  0x12   :  { %705 = vmatpush1.bf16.msra.mxu0 %v515_v19  ;;  %736 = vmatprep.mubr.bf16.mxu0 %v4749_v3 }
  0x13   :  { %4350 = vmatprep.subr.msk.bf16.mxu0 %vm138_vm0, %v4871_v21 }
  0x14   :  { %838 = vrot.lane.b32.xlu1 %v4806_v5, %s4751_s12  ;;  %108 = vrot.lane.b32.xlu0 %v4860_v18, %s4750_s27 }
  0x18   :  { %842 = vrot.lane.b32.xlu1 %v4804_v4, %s4751_s12  ;;  %840 = vrot.lane.b32.xlu0 %v4809_v6, %s4751_s12 }
  0x19   :  { %4347 = vmatmul.mubr.msk.bf16.vlgmr.msra.gmra.mrb[8].mxu0 %vm134_vm1, %v4829_v11 }
  0x1a   :  { %791 = vmatpush1.bf16.msra.mxu0 %v527_v24  ;;  %822 = vmatprep.mubr.bf16.mxu0 %v4749_v3 }
  0x1c   :  { %112 = vrot.lane.b32.xlu1 %v4893_v25, %s4750_s27  ;;  %110 = vrot.lane.b32.xlu0 %v4845_v15, %s4750_s27 }
  0x20   :  { %848 = vrot.lane.b32.xlu1 %v4822_v10, %s4751_s12  ;;  %846 = vrot.lane.b32.xlu0 %v4818_v8, %s4751_s12 }
  0x21   :  { %4351 = vmatmul.mubr.msk.bf16.vlgmr.msra.gmra.mrb[12].mxu0 %vm134_vm1, %v4829_v11 }
  0x22   :  { %957 = vmatprep.mubr.bf16.mxu0 %v4749_v3 }
  0x24   :  { %114 = vrot.lane.b32.xlu1 %v4906_v26, %s4750_s27  ;;  %850 = vrot.lane.b32.xlu0 %v4858_v17, %s4751_s12 }
  0x28   :  { %854 = vrot.lane.b32.xlu1 %v4860_v18, %s4751_s12  ;;  %116 = vrot.lane.b32.xlu0 %v4885_v23, %s4750_s27 }
  0x2c   :  { %858 = vrot.lane.b32.xlu1 %v4893_v25, %s4751_s12  ;;  %856 = vrot.lane.b32.xlu0 %v4845_v15, %s4751_s12 }
  0x30   :  { %862 = vrot.lane.b32.xlu1 %v4885_v23, %s4751_s12  ;;  %118 = vrot.lane.b32.xlu0 %v4871_v21, %s4750_s27  ;;  %s4757_s27 = smov 66  }
  0x34   :  { %1259 = vrot.lane.b32.xlu1 %v4806_v5, %s4752_s15  ;;  %864 = vrot.lane.b32.xlu0 %v4871_v21, %s4751_s12 }
  0x38   :  { %1263 = vrot.lane.b32.xlu1 %v4804_v4, %s4752_s15  ;;  %1261 = vrot.lane.b32.xlu0 %v4809_v6, %s4752_s15 }
  0x3c   :  { %1269 = vrot.lane.b32.xlu1 %v4822_v10, %s4752_s15  ;;  %1267 = vrot.lane.b32.xlu0 %v4818_v8, %s4752_s15 }
  0x40   :  { %1275 = vrot.lane.b32.xlu1 %v4860_v18, %s4752_s15  ;;  %1271 = vrot.lane.b32.xlu0 %v4858_v17, %s4752_s15 }
  0x44   :  { %1279 = vrot.lane.b32.xlu1 %v4893_v25, %s4752_s15  ;;  %1277 = vrot.lane.b32.xlu0 %v4845_v15, %s4752_s15 }
  0x48   :  { %1283 = vrot.lane.b32.xlu1 %v4885_v23, %s4752_s15  ;;  %844 = vrot.lane.b32.xlu0 %v4816_v7, %s4751_s12 }
  0x4c   :  { %852 = vrot.lane.b32.xlu1 %v4856_v16, %s4751_s12  ;;  %1285 = vrot.lane.b32.xlu0 %v4871_v21, %s4752_s15 }
  0x50   :  { %1682 = vrot.lane.b32.xlu1 %v4809_v6, %s4753_s16  ;;  %1680 = vrot.lane.b32.xlu0 %v4806_v5, %s4753_s16 }
  0x54   :  { %860 = vrot.lane.b32.xlu1 %v4906_v26, %s4751_s12  ;;  %1684 = vrot.lane.b32.xlu0 %v4804_v4, %s4753_s16 }
  0x58   :  { %1690 = vrot.lane.b32.xlu1 %v4822_v10, %s4753_s16  ;;  %1688 = vrot.lane.b32.xlu0 %v4818_v8, %s4753_s16 }
  0x5c   :  { %1265 = vrot.lane.b32.xlu1 %v4816_v7, %s4752_s15  ;;  %1692 = vrot.lane.b32.xlu0 %v4858_v17, %s4753_s16 }
  0x60   :  { %1698 = vrot.lane.b32.xlu1 %v4845_v15, %s4753_s16  ;;  %1696 = vrot.lane.b32.xlu0 %v4860_v18, %s4753_s16 }
  0x64   :  { %1273 = vrot.lane.b32.xlu1 %v4856_v16, %s4752_s15  ;;  %1700 = vrot.lane.b32.xlu0 %v4893_v25, %s4753_s16 }
  0x68   :  { %1706 = vrot.lane.b32.xlu1 %v4871_v21, %s4753_s16  ;;  %1704 = vrot.lane.b32.xlu0 %v4885_v23, %s4753_s16 }
  0x6c   :  { %2101 = vrot.lane.b32.xlu1 %v4806_v5, %s4754_s17  ;;  %1281 = vrot.lane.b32.xlu0 %v4906_v26, %s4752_s15 }
  0x70   :  { %2105 = vrot.lane.b32.xlu1 %v4804_v4, %s4754_s17  ;;  %2103 = vrot.lane.b32.xlu0 %v4809_v6, %s4754_s17 }
  0x74   :  { %2109 = vrot.lane.b32.xlu1 %v4818_v8, %s4754_s17  ;;  %1686 = vrot.lane.b32.xlu0 %v4816_v7, %s4753_s16 }
  0x76   :  { %v97_v27 = vpop.permute.xlu1 %96  ;;  %v93_v28 = vpop.permute.xlu0 %92 }
  0x78   :  { %2113 = vrot.lane.b32.xlu1 %v4858_v17, %s4754_s17  ;;  %2111 = vrot.lane.b32.xlu0 %v4822_v10, %s4754_s17 }
  0x7a   :  { %v99_v29 = vpop.permute.xlu1 %98  ;;  %v95_v30 = vpop.permute.xlu0 %94 }
  0x7b   :  { %v122_v31 = vsel %vm120_vm2, %v95_v30, %v97_v27  ;;  %v121_v32 = vsel %vm120_vm2, %v93_v28, %v95_v30  ;;  %v123_v35 = vsel %vm120_vm2, %v97_v27, %v99_v29 }
  0x7c   :  { %2117 = vrot.lane.b32.xlu1 %v4860_v18, %s4754_s17  ;;  %1694 = vrot.lane.b32.xlu0 %v4856_v16, %s4753_s16  ;;  %v140_v33 = vsel %vm138_vm0, %v121_v32, 0  ;;  %v146_v39 = vsel %vm138_vm0, %v123_v35, 0 }
  0x7d   :  { %4323 = vmatprep.subr.msk.bf16.mxu1 %vm138_vm0, %v122_v31 }
  0x7e   :  { %182 = vmatpush1.bf16.msra.mxu1 %v140_v33  ;;  %v103_v36 = vpop.permute.xlu1 %102  ;;  %v101_v37 = vpop.permute.xlu0 %100 }
  0x7f   :  { %v124_v38 = vsel %vm120_vm2, %v99_v29, %v101_v37  ;;  %v125_v43 = vsel %vm120_vm2, %v101_v37, %v103_v36  ;;  %v5138_v37 = vld [vmem:[%s6105_s0 + $0x38] ss:$0 sps:$4 sm:$0xff]   ;;  %s4756_s0 = smov 67  }
  0x80   :  { %2121 = vrot.lane.b32.xlu1 %v4893_v25, %s4754_s17  ;;  %2119 = vrot.lane.b32.xlu0 %v4845_v15, %s4754_s17  ;;  %v152_v47 = vsel %vm138_vm0, %v125_v43, 0 }
  0x81   :  { %4324 = vmatmul.mubr.msk.bf16.vlgmr.msra.gmra.mrb[0].mxu1 %vm134_vm1, %v5010_v34  ;;  %4325 = vmatprep.subr.msk.bf16.mxu1 %vm138_vm0, %v124_v38 }
  0x82   :  { %225 = vmatpush1.bf16.msra.mxu1 %v146_v39  ;;  %v107_v40 = vpop.permute.xlu1 %106  ;;  %v105_v41 = vpop.permute.xlu0 %104  ;;  %256 = vmatprep.mubr.bf16.mxu1 %v4749_v3 }
  0x83   :  { %v126_v42 = vsel %vm120_vm2, %v103_v36, %v105_v41  ;;  %v127_v54 = vsel %vm120_vm2, %v105_v41, %v107_v40 }
  0x84   :  { %2125 = vrot.lane.b32.xlu1 %v4885_v23, %s4754_s17  ;;  %1702 = vrot.lane.b32.xlu0 %v4906_v26, %s4753_s16  ;;  %v158_v58 = vsel %vm138_vm0, %v127_v54, 0 }
  0x85   :  { %4327 = vmatprep.subr.msk.bf16.mxu1 %vm138_vm0, %v126_v42 }
  0x86   :  { %v839_v44 = vpop.permute.xlu1 %838  ;;  %v109_v45 = vpop.permute.xlu0 %108 }
  0x87   :  { %v128_v46 = vsel %vm120_vm2, %v107_v40, %v109_v45 }
  0x88   :  { %2107 = vrot.lane.b32.xlu1 %v4816_v7, %s4754_s17  ;;  %2127 = vrot.lane.b32.xlu0 %v4871_v21, %s4754_s17 }
  0x89   :  { %4326 = vmatmul.mubr.msk.bf16.vlgmr.msra.gmra.mrb[4].mxu1 %vm134_vm1, %v5010_v34 }
  0x8a   :  { %268 = vmatpush1.bf16.msra.mxu1 %v152_v47  ;;  %v5038_v48 = vpop.permute.xlu1 %842  ;;  %v841_v49 = vpop.permute.xlu0 %840  ;;  %299 = vmatprep.mubr.bf16.mxu1 %v4749_v3  ;;  %v497_v47 = vsel %vm138_vm0, %v4804_v4, 0 }
  0x8b   :  { %4329 = vmatprep.subr.msk.bf16.mxu1 %vm138_vm0, %v128_v46  ;;  %v867_v50 = vsel %vm866_vm3, %v839_v44, %v841_v49  ;;  %v868_v51 = vsel %vm866_vm3, %v841_v49, %v5038_v48 }
  0x8c   :  { %2527 = vrot.lane.b32.xlu1 %v4809_v6, %s4755_s20  ;;  %4353 = vmatprep.subr.msk.bf16.mxu0 %vm138_vm0, %v868_v51  ;;  %v884_v52 = vsel %vm138_vm0, %v867_v50, 0  ;;  %v5178_v50 = vld [vmem:[%s6106_s1 + $0x18] sm:$0xff]  }
  0x8d   :  { %926 = vmatpush1.bf16.msra.mxu0 %v884_v52  ;;  %2525 = vrot.lane.b32.xlu0 %v4806_v5, %s4755_s20 }
  0x8e   :  { %v113_v55 = vpop.permute.xlu1 %112  ;;  %v111_v56 = vpop.permute.xlu0 %110 }
  0x8f   :  { %v130_v57 = vsel %vm120_vm2, %v111_v56, %v113_v55  ;;  %v129_v62 = vsel %vm120_vm2, %v109_v45, %v111_v56 }
  0x90   :  { %2115 = vrot.lane.b32.xlu1 %v4856_v16, %s4754_s17  ;;  %4354 = vmatmul.mubr.msk.bf16.vlgmr.msra.gmra.mrb[0].mxu0 %vm134_vm1, %v5052_v53  ;;  %v164_v9 = vsel %vm138_vm0, %v129_v62, 0 }
  0x91   :  { %4328 = vmatmul.mubr.msk.bf16.vlgmr.msra.gmra.mrb[8].mxu1 %vm134_vm1, %v5010_v34  ;;  %2529 = vrot.lane.b32.xlu0 %v4804_v4, %s4755_s20 }
  0x92   :  { %311 = vmatpush1.bf16.msra.mxu1 %v158_v58  ;;  %v849_v59 = vpop.permute.xlu1 %848  ;;  %v5067_v60 = vpop.permute.xlu0 %846  ;;  %342 = vmatprep.mubr.bf16.mxu1 %v4749_v3  ;;  %v509_v58 = vsel %vm138_vm0, %v4858_v17, 0 }
  0x93   :  { %4331 = vmatprep.subr.msk.bf16.mxu1 %vm138_vm0, %v130_v57  ;;  %v871_v61 = vsel %vm866_vm3, %v5067_v60, %v849_v59  ;;  %1043 = vmatprep.mubr.bf16.mxu0 %v4749_v3 }
  0x94   :  { %2535 = vrot.lane.b32.xlu1 %v4822_v10, %s4755_s20  ;;  %v896_v1 = vsel %vm138_vm0, %v871_v61, 0 }
  0x95   :  { %2533 = vrot.lane.b32.xlu0 %v4818_v8, %s4755_s20 }
  0x96   :  { %v115_v63 = vpop.permute.xlu1 %114  ;;  %v5079_v0 = vpop.permute.xlu0 %850 }
  0x97   :  { %v872_v2 = vsel %vm866_vm3, %v849_v59, %v5079_v0  ;;  %v131_v19 = vsel %vm120_vm2, %v113_v55, %v115_v63 }
  0x98   :  { %2123 = vrot.lane.b32.xlu1 %v4906_v26, %s4754_s17  ;;  %4357 = vmatprep.subr.msk.bf16.mxu0 %vm138_vm0, %v872_v2  ;;  %v170_v29 = vsel %vm138_vm0, %v131_v19, 0 }
  0x99   :  { %4330 = vmatmul.mubr.msk.bf16.vlgmr.msra.gmra.mrb[12].mxu1 %vm134_vm1, %v5010_v34  ;;  %1012 = vmatpush1.bf16.msra.mxu0 %v896_v1 }
  0x9a   :  { %354 = vmatpush1.bf16.msra.mxu1 %v164_v9  ;;  %v5090_v12 = vpop.permute.xlu1 %854  ;;  %v117_v13 = vpop.permute.xlu0 %116  ;;  %385 = vmatprep.mubr.bf16.mxu1 %v4749_v3  ;;  %v521_v9 = vsel %vm138_vm0, %v4893_v25, 0 }
  0x9b   :  { %v132_v14 = vsel %vm120_vm2, %v115_v63, %v117_v13  ;;  %2537 = vrot.lane.b32.xlu0 %v4858_v17, %s4755_s20 }
  0x9c   :  { %2543 = vrot.lane.b32.xlu1 %v4845_v15, %s4755_s20  ;;  %4333 = vmatprep.subr.msk.bf16.mxu1 %vm138_vm0, %v132_v14 }
  0x9d   :  { %4358 = vmatmul.mubr.msk.bf16.vlgmr.msra.gmra.mrb[4].mxu0 %vm134_vm1, %v5052_v53 }
  0x9e   :  { %v5102_v20 = vpop.permute.xlu1 %858  ;;  %v857_v22 = vpop.permute.xlu0 %856  ;;  %1129 = vmatprep.mubr.bf16.mxu0 %v4749_v3 }
  0x9f   :  { %v875_v24 = vsel %vm866_vm3, %v5090_v12, %v857_v22  ;;  %v876_v27 = vsel %vm866_vm3, %v857_v22, %v5102_v20  ;;  %2541 = vrot.lane.b32.xlu0 %v4860_v18, %s4755_s20 }
  0xa0   :  { %2531 = vrot.lane.b32.xlu1 %v4816_v7, %s4755_s20  ;;  %4361 = vmatprep.subr.msk.bf16.mxu0 %vm138_vm0, %v876_v27  ;;  %v908_v28 = vsel %vm138_vm0, %v875_v24, 0 }
  0xa1   :  { %4332 = vmatmul.mubr.msk.bf16.vlgmr.msra.gmra.mrb[16].mxu1 %vm134_vm1, %v5010_v34  ;;  %1098 = vmatpush1.bf16.msra.mxu0 %v908_v28 }
  0xa2   :  { %397 = vmatpush1.bf16.msra.mxu1 %v170_v29  ;;  %v5118_v30 = vpop.permute.xlu1 %862  ;;  %v119_v31 = vpop.permute.xlu0 %118  ;;  %428 = vmatprep.mubr.bf16.mxu1 %v4749_v3 }
  0xa3   :  { %4335 = vmatprep.subr.msk.bf16.mxu1 %vm138_vm0, %v119_v31  ;;  %2545 = vrot.lane.b32.xlu0 %v4893_v25, %s4755_s20  ;;  %v133_v32 = vsel %vm120_vm2, %v117_v13, %v119_v31 }
  0xa4   :  { %2551 = vrot.lane.b32.xlu1 %v4871_v21, %s4755_s20  ;;  %v176_v39 = vsel %vm138_vm0, %v133_v32, 0 }
  0xa5   :  { %4362 = vmatmul.mubr.msk.bf16.vlgmr.msra.gmra.mrb[8].mxu0 %vm134_vm1, %v5052_v53 }
  0xa6   :  { %v1260_v33 = vpop.permute.xlu1 %1259  ;;  %v865_v35 = vpop.permute.xlu0 %864  ;;  %1215 = vmatprep.mubr.bf16.mxu0 %v4749_v3 }
  0xa7   :  { %v879_v36 = vsel %vm866_vm3, %v5118_v30, %v865_v35  ;;  %4365 = vmatprep.subr.msk.bf16.mxu0 %vm138_vm0, %v865_v35  ;;  %2549 = vrot.lane.b32.xlu0 %v4885_v23, %s4755_s20 }
  0xa8   :  { %2539 = vrot.lane.b32.xlu1 %v4856_v16, %s4755_s20  ;;  %v920_v38 = vsel %vm138_vm0, %v879_v36, 0 }
  0xa9   :  { %4334 = vmatmul.mubr.msk.bf16.vlgmr.msra.gmra.mrb[20].mxu1 %vm134_vm1, %v5010_v34  ;;  %1184 = vmatpush1.bf16.msra.mxu0 %v920_v38 }
  0xaa   :  { %440 = vmatpush1.bf16.msra.mxu1 %v176_v39  ;;  %v5146_v40 = vpop.permute.xlu1 %1263  ;;  %v1262_v41 = vpop.permute.xlu0 %1261  ;;  %471 = vmatprep.mubr.bf16.mxu1 %v4749_v3 }
  0xab   :  { %v1288_v42 = vsel %vm1287_vm4, %v1260_v33, %v1262_v41  ;;  %v1289_v43 = vsel %vm1287_vm4, %v1262_v41, %v5146_v40  ;;  %4340 = vmatprep.subr.msk.bf16.mxu1 %vm138_vm0, %v4816_v7  ;;  %2553 = vrot.lane.b32.xlu0 %v5138_v37, %s4755_s20  ;;  %v5297_v41 = vld [vmem:[%s6106_s1 + $0x20] sm:$0xff]  }
  0xac   :  { %v1305_v44 = vsel %vm138_vm0, %v1288_v42, 0  ;;  %2951 = vrot.lane.b32.xlu1 %v4809_v6, %s4756_s0  ;;  %4368 = vmatprep.subr.msk.bf16.mxu0 %vm138_vm0, %v1289_v43 }
  0xad   :  { %4366 = vmatmul.mubr.msk.bf16.vlgmr.msra.gmra.mrb[12].mxu0 %vm134_vm1, %v5052_v53 }
  0xae   :  { %v1270_v45 = vpop.permute.xlu1 %1269  ;;  %v5162_v46 = vpop.permute.xlu0 %1267  ;;  %1347 = vmatpush1.bf16.msra.mxu0 %v1305_v44  ;;  %1378 = vmatprep.mubr.bf16.mxu0 %v4749_v3 }
  0xaf   :  { %2949 = vrot.lane.b32.xlu0 %v4806_v5, %s4756_s0  ;;  %v1292_v49 = vsel %vm1287_vm4, %v5162_v46, %v1270_v45 }
  0xb0   :  { %2547 = vrot.lane.b32.xlu1 %v4906_v26, %s4755_s20  ;;  %v1317_v54 = vsel %vm138_vm0, %v1292_v49, 0 }
  0xb1   :  { %4336 = vmatmul.mubr.msk.bf16.vlgmr.msra.gmra.mrb[24].mxu1 %vm134_vm1, %v5010_v34 }
  0xb2   :  { %576 = vmatpush1.bf16.msra.mxu1 %v497_v47  ;;  %v5180_v51 = vpop.permute.xlu1 %1275  ;;  %v5182_v52 = vpop.permute.xlu0 %1271  ;;  %607 = vmatprep.mubr.bf16.mxu1 %v4749_v3 }
  0xb3   :  { %v1293_v55 = vsel %vm1287_vm4, %v1270_v45, %v5182_v52  ;;  %4344 = vmatprep.subr.msk.bf16.mxu1 %vm138_vm0, %v4856_v16  ;;  %2953 = vrot.lane.b32.xlu0 %v4804_v4, %s4756_s0 }
  0xb4   :  { %4372 = vmatprep.subr.msk.bf16.mxu0 %vm138_vm0, %v1293_v55  ;;  %2959 = vrot.lane.b32.xlu1 %v4822_v10, %s4756_s0 }
  0xb5   :  { %4369 = vmatmul.mubr.msk.bf16.vlgmr.msra.gmra.mrb[0].mxu0 %vm134_vm1, %v5178_v50 }
  0xb6   :  { %v5197_v34 = vpop.permute.xlu1 %1279  ;;  %v1278_v56 = vpop.permute.xlu0 %1277  ;;  %1433 = vmatpush1.bf16.msra.mxu0 %v1317_v54  ;;  %1464 = vmatprep.mubr.bf16.mxu0 %v4749_v3 }
  0xb7   :  { %v1297_v57 = vsel %vm1287_vm4, %v1278_v56, %v5197_v34  ;;  %2957 = vrot.lane.b32.xlu0 %v4818_v8, %s4756_s0  ;;  %v1296_v59 = vsel %vm1287_vm4, %v5180_v51, %v1278_v56 }
  0xb8   :  { %2955 = vrot.lane.b32.xlu1 %v4816_v7, %s4756_s0  ;;  %4376 = vmatprep.subr.msk.bf16.mxu0 %vm138_vm0, %v1297_v57  ;;  %v1329_v63 = vsel %vm138_vm0, %v1296_v59, 0 }
  0xb9   :  { %4341 = vmatmul.mubr.msk.bf16.vlgmr.msra.gmra.mrb[4].mxu1 %vm134_vm1, %v4829_v11 }
  0xba   :  { %662 = vmatpush1.bf16.msra.mxu1 %v509_v58  ;;  %v5213_v61 = vpop.permute.xlu1 %1283  ;;  %v845_v62 = vpop.permute.xlu0 %844  ;;  %693 = vmatprep.mubr.bf16.mxu1 %v4749_v3 }
  0xbb   :  { %4348 = vmatprep.subr.msk.bf16.mxu1 %vm138_vm0, %v4906_v26  ;;  %2961 = vrot.lane.b32.xlu0 %v4858_v17, %s4756_s0  ;;  %v870_v14 = vsel %vm866_vm3, %v845_v62, %v5067_v60  ;;  %v869_v60 = vsel %vm866_vm3, %v5038_v48, %v845_v62 }
  0xbc   :  { %2967 = vrot.lane.b32.xlu1 %v4845_v15, %s4756_s0  ;;  %v890_v48 = vsel %vm138_vm0, %v869_v60, 0 }
  0xbd   :  { %4373 = vmatmul.mubr.msk.bf16.vlgmr.msra.gmra.mrb[4].mxu0 %vm134_vm1, %v5178_v50 }
  0xbe   :  { %v853_v1 = vpop.permute.xlu1 %852  ;;  %v1286_v2 = vpop.permute.xlu0 %1285  ;;  %1519 = vmatpush1.bf16.msra.mxu0 %v1329_v63  ;;  %1550 = vmatprep.mubr.bf16.mxu0 %v4749_v3 }
  0xbf   :  { %2965 = vrot.lane.b32.xlu0 %v4860_v18, %s4756_s0  ;;  %4380 = vmatprep.subr.msk.bf16.mxu0 %vm138_vm0, %v1286_v2  ;;  %v1300_v13 = vsel %vm1287_vm4, %v5213_v61, %v1286_v2  ;;  %v874_v32 = vsel %vm866_vm3, %v853_v1, %v5090_v12 }
  0xc0   :  { %2963 = vrot.lane.b32.xlu1 %v4856_v16, %s4756_s0  ;;  %v1341_v24 = vsel %vm138_vm0, %v1300_v13, 0 }
  0xc1   :  { %4345 = vmatmul.mubr.msk.bf16.vlgmr.msra.gmra.mrb[12].mxu1 %vm134_vm1, %v4829_v11 }
  0xc2   :  { %748 = vmatpush1.bf16.msra.mxu1 %v521_v9  ;;  %v1683_v19 = vpop.permute.xlu1 %1682  ;;  %v1681_v22 = vpop.permute.xlu0 %1680  ;;  %779 = vmatprep.mubr.bf16.mxu1 %v4749_v3 }
  0xc3   :  { %4355 = vmatprep.subr.msk.bf16.mxu1 %vm138_vm0, %v870_v14  ;;  %2969 = vrot.lane.b32.xlu0 %v4893_v25, %s4756_s0  ;;  %v1709_v31 = vsel %vm1708_vm5, %v1681_v22, %v1683_v19 }
  0xc4   :  { %2975 = vrot.lane.b32.xlu1 %v4871_v21, %s4756_s0  ;;  %v1726_v36 = vsel %vm138_vm0, %v1709_v31, 0 }
  0xc5   :  { %4377 = vmatmul.mubr.msk.bf16.vlgmr.msra.gmra.mrb[8].mxu0 %vm134_vm1, %v5178_v50 }
  0xc6   :  { %v861_v27 = vpop.permute.xlu1 %860  ;;  %v5250_v28 = vpop.permute.xlu0 %1684  ;;  %1605 = vmatpush1.bf16.msra.mxu0 %v1341_v24  ;;  %1636 = vmatprep.mubr.bf16.mxu0 %v4749_v3 }
  0xc7   :  { %v1710_v29 = vsel %vm1708_vm5, %v1683_v19, %v5250_v28  ;;  %2973 = vrot.lane.b32.xlu0 %v4885_v23, %s4756_s0 }
  0xc8   :  { %2971 = vrot.lane.b32.xlu1 %v4906_v26, %s4756_s0  ;;  %4383 = vmatprep.subr.msk.bf16.mxu0 %vm138_vm0, %v1710_v29 }
  0xc9   :  { %4349 = vmatmul.mubr.msk.bf16.vlgmr.msra.gmra.mrb[20].mxu1 %vm134_vm1, %v4829_v11  ;;  %v873_v11 = vsel %vm866_vm3, %v5079_v0, %v853_v1 }
  0xca   :  { %969 = vmatpush1.bf16.msra.mxu1 %v890_v48  ;;  %v1691_v33 = vpop.permute.xlu1 %1690  ;;  %v5266_v35 = vpop.permute.xlu0 %1688  ;;  %1000 = vmatprep.mubr.bf16.mxu1 %v4749_v3  ;;  %v902_v0 = vsel %vm138_vm0, %v873_v11, 0 }
  0xcb   :  { %4359 = vmatprep.subr.msk.bf16.mxu1 %vm138_vm0, %v874_v32  ;;  %2977 = vrot.lane.b32.xlu0 %v5138_v37, %s4756_s0 }
  0xcc   :  { %3375 = vrot.lane.b32.xlu1 %v4809_v6, %s4757_s27  ;;  %v1713_v6 = vsel %vm1708_vm5, %v5266_v35, %v1691_v33 }
  0xcd   :  { %4381 = vmatmul.mubr.msk.bf16.vlgmr.msra.gmra.mrb[12].mxu0 %vm134_vm1, %v5178_v50 }
  0xce   :  { %v1266_v12 = vpop.permute.xlu1 %1265  ;;  %v5279_v38 = vpop.permute.xlu0 %1692  ;;  %1768 = vmatpush1.bf16.msra.mxu0 %v1726_v36  ;;  %1799 = vmatprep.mubr.bf16.mxu0 %v4749_v3 }
  0xcf   :  { %v1714_v39 = vsel %vm1708_vm5, %v1691_v33, %v5279_v38  ;;  %3373 = vrot.lane.b32.xlu0 %v4806_v5, %s4757_s27  ;;  %v878_v5 = vsel %vm866_vm3, %v861_v27, %v5118_v30  ;;  %v877_v30 = vsel %vm866_vm3, %v5102_v20, %v861_v27  ;;  %v1291_v20 = vsel %vm1287_vm4, %v1266_v12, %v5162_v46 }
  0xd0   :  { %4387 = vmatprep.subr.msk.bf16.mxu0 %vm138_vm0, %v1714_v39  ;;  %3379 = vrot.lane.b32.xlu1 %v4816_v7, %s4757_s27  ;;  %v1738_v7 = vsel %vm138_vm0, %v1713_v6, 0 }
  0xd1   :  { %4356 = vmatmul.mubr.msk.bf16.vlgmr.msra.gmra.mrb[4].mxu1 %vm134_vm1, %v5052_v53 }
  0xd2   :  { %1055 = vmatpush1.bf16.msra.mxu1 %v902_v0  ;;  %v1699_v42 = vpop.permute.xlu1 %1698  ;;  %v5301_v43 = vpop.permute.xlu0 %1696  ;;  %1086 = vmatprep.mubr.bf16.mxu1 %v4749_v3 }
  0xd3   :  { %4363 = vmatprep.subr.msk.bf16.mxu1 %vm138_vm0, %v878_v5  ;;  %3377 = vrot.lane.b32.xlu0 %v4804_v4, %s4757_s27  ;;  %v1717_v4 = vsel %vm1708_vm5, %v5301_v43, %v1699_v42 }
  0xd4   :  { %3383 = vrot.lane.b32.xlu1 %v4822_v10, %s4757_s27  ;;  %v914_v10 = vsel %vm138_vm0, %v877_v30, 0 }
  0xd5   :  { %4384 = vmatmul.mubr.msk.bf16.vlgmr.msra.gmra.mrb[0].mxu0 %vm134_vm1, %v5297_v41 }
  0xd6   :  { %v1274_v44 = vpop.permute.xlu1 %1273  ;;  %v5314_v45 = vpop.permute.xlu0 %1700  ;;  %1854 = vmatpush1.bf16.msra.mxu0 %v1738_v7  ;;  %1885 = vmatprep.mubr.bf16.mxu0 %v4749_v3 }
  0xd7   :  { %v1718_v47 = vsel %vm1708_vm5, %v1699_v42, %v5314_v45  ;;  %3381 = vrot.lane.b32.xlu0 %v4818_v8, %s4757_s27  ;;  %v1750_v8 = vsel %vm138_vm0, %v1717_v4, 0  ;;  %v51_v4 = vld [vmem:[%s6107_s2 + $0x8] sm:$0xff] }
  0xd8   :  { %4391 = vmatprep.subr.msk.bf16.mxu0 %vm138_vm0, %v1718_v47  ;;  %3387 = vrot.lane.b32.xlu1 %v4856_v16, %s4757_s27  ;;  %v1290_v16 = vsel %vm1287_vm4, %v5146_v40, %v1266_v12  ;;  %v1295_v40 = vsel %vm1287_vm4, %v1274_v44, %v5180_v51  ;;  %v50_v47 = vld [vmem:[%s6107_s2] sm:$0xff] }
  0xd9   :  { %4360 = vmatmul.mubr.msk.bf16.vlgmr.msra.gmra.mrb[12].mxu1 %vm134_vm1, %v5052_v53 }
  0xda   :  { %1141 = vmatpush1.bf16.msra.mxu1 %v914_v10  ;;  %v1707_v49 = vpop.permute.xlu1 %1706  ;;  %v5331_v54 = vpop.permute.xlu0 %1704  ;;  %1172 = vmatprep.mubr.bf16.mxu1 %v4749_v3 }
  0xdb   :  { %4370 = vmatprep.subr.msk.bf16.mxu1 %vm138_vm0, %v1291_v20  ;;  %3385 = vrot.lane.b32.xlu0 %v4858_v17, %s4757_s27  ;;  %v1721_v17 = vsel %vm1708_vm5, %v5331_v54, %v1707_v49 }
  0xdc   :  { %3391 = vrot.lane.b32.xlu1 %v4845_v15, %s4757_s27  ;;  %v1311_v15 = vsel %vm138_vm0, %v1290_v16, 0  ;;  %v1762_v57 = vsel %vm138_vm0, %v1721_v17, 0 }
  0xdd   :  { %4388 = vmatmul.mubr.msk.bf16.vlgmr.msra.gmra.mrb[4].mxu0 %vm134_vm1, %v5297_v41 }
  0xde   :  { %v2102_v46 = vpop.permute.xlu1 %2101  ;;  %v1282_v55 = vpop.permute.xlu0 %1281  ;;  %1940 = vmatpush1.bf16.msra.mxu0 %v1750_v8  ;;  %1971 = vmatprep.mubr.bf16.mxu0 %v4749_v3 }
  0xdf   :  { %3389 = vrot.lane.b32.xlu0 %v4860_v18, %s4757_s27  ;;  %4395 = vmatprep.subr.msk.bf16.mxu0 %vm138_vm0, %v1707_v49 }
  0xe0   :  { %3395 = vrot.lane.b32.xlu1 %v4906_v26, %s4757_s27 }
  0xe1   :  { %4364 = vmatmul.mubr.msk.bf16.vlgmr.msra.gmra.mrb[20].mxu1 %vm134_vm1, %v5052_v53  ;;  %v1294_v53 = vsel %vm1287_vm4, %v5182_v52, %v1274_v44  ;;  %v1299_v52 = vsel %vm1287_vm4, %v1282_v55, %v5213_v61  ;;  %v1298_v61 = vsel %vm1287_vm4, %v5197_v34, %v1282_v55  ;;  %v5409_v34 = vld [vmem:[%s6106_s1 + $0x28] sm:$0xff]  }
  0xe2   :  { %1390 = vmatpush1.bf16.msra.mxu1 %v1311_v15  ;;  %v5357_v56 = vpop.permute.xlu1 %2105  ;;  %v2104_v18 = vpop.permute.xlu0 %2103  ;;  %1421 = vmatprep.mubr.bf16.mxu1 %v4749_v3  ;;  %v1335_v9 = vsel %vm138_vm0, %v1298_v61, 0  ;;  %v5499_v15 = vld [vmem:[%s6106_s1 + $0x30] sm:$0xff]  }
  0xe3   :  { %4374 = vmatprep.subr.msk.bf16.mxu1 %vm138_vm0, %v1295_v40  ;;  %3393 = vrot.lane.b32.xlu0 %v4893_v25, %s4757_s27  ;;  %v2131_v26 = vsel %vm2129_vm6, %v2104_v18, %v5357_v56  ;;  %v2130_v25 = vsel %vm2129_vm6, %v2102_v46, %v2104_v18 }
  0xe4   :  { %3399 = vrot.lane.b32.xlu1 %v4871_v21, %s4757_s27  ;;  %v1323_v21 = vsel %vm138_vm0, %v1294_v53, 0 }
  0xe5   :  { %4392 = vmatmul.mubr.msk.bf16.vlgmr.msra.gmra.mrb[8].mxu0 %vm134_vm1, %v5297_v41 }
  0xe6   :  { %v5372_v51 = vpop.permute.xlu1 %2109  ;;  %v1687_v58 = vpop.permute.xlu0 %1686  ;;  %2026 = vmatpush1.bf16.msra.mxu0 %v1762_v57  ;;  %2057 = vmatprep.mubr.bf16.mxu0 %v4749_v3 }
  0xe7   :  { %3397 = vrot.lane.b32.xlu0 %v4885_v23, %s4757_s27  ;;  %4398 = vmatprep.subr.msk.bf16.mxu0 %vm138_vm0, %v2131_v26  ;;  %v2147_v23 = vsel %vm138_vm0, %v2130_v25, 0  ;;  %v1712_v13 = vsel %vm1708_vm5, %v1687_v58, %v5266_v35  ;;  %v1711_v60 = vsel %vm1708_vm5, %v5250_v28, %v1687_v58 }
  0xe8   :  { %v1732_v48 = vsel %vm138_vm0, %v1711_v60, 0  ;;  %3794 = vperm.xlu1 %4719, %v50_v47  }
  0xe9   :  { %4371 = vmatmul.mubr.msk.bf16.vlgmr.msra.gmra.mrb[4].mxu1 %vm134_vm1, %v5178_v50 }
  0xea   :  { %1476 = vmatpush1.bf16.msra.mxu1 %v1323_v21  ;;  %v5384_v59 = vpop.permute.xlu1 %2113  ;;  %v2112_v62 = vpop.permute.xlu0 %2111  ;;  %1507 = vmatprep.mubr.bf16.mxu1 %v4749_v3 }
  0xeb   :  { %4378 = vmatprep.subr.msk.bf16.mxu1 %vm138_vm0, %v1299_v52  ;;  %3401 = vrot.lane.b32.xlu0 %v5138_v37, %s4757_s27  ;;  %v2135_v63 = vsel %vm2129_vm6, %v2112_v62, %v5384_v59  ;;  %v2134_v37 = vsel %vm2129_vm6, %v5372_v51, %v2112_v62 }
  0xec   :  { %v2159_v22 = vsel %vm138_vm0, %v2134_v37, 0 }
  0xed   :  { %4396 = vmatmul.mubr.msk.bf16.vlgmr.msra.gmra.mrb[12].mxu0 %vm134_vm1, %v5297_v41 }
  0xee   :  { %v5397_v1 = vpop.permute.xlu1 %2117  ;;  %v1695_v2 = vpop.permute.xlu0 %1694  ;;  %2189 = vmatpush1.bf16.msra.mxu0 %v2147_v23  ;;  %2220 = vmatprep.mubr.bf16.mxu0 %v4749_v3 }
  0xef   :  { %4402 = vmatprep.subr.msk.bf16.mxu0 %vm138_vm0, %v2135_v63  ;;  %v1716_v32 = vsel %vm1708_vm5, %v1695_v2, %v5301_v43  ;;  %v1715_v36 = vsel %vm1708_vm5, %v5279_v38, %v1695_v2  ;;  %3799 = vperm.xlu0 %4720, %v51_v4  }
  0xf0   :  { %v1744_v39 = vsel %vm138_vm0, %v1715_v36, 0 }
  0xf1   :  { %4375 = vmatmul.mubr.msk.bf16.vlgmr.msra.gmra.mrb[12].mxu1 %vm134_vm1, %v5178_v50 }
  0xf2   :  { %1562 = vmatpush1.bf16.msra.mxu1 %v1335_v9  ;;  %v5413_v14 = vpop.permute.xlu1 %2121  ;;  %v2120_v19 = vpop.permute.xlu0 %2119  ;;  %1593 = vmatprep.mubr.bf16.mxu1 %v4749_v3 }
  0xf3   :  { %4385 = vmatprep.subr.msk.bf16.mxu1 %vm138_vm0, %v1712_v13  ;;  %v2139_v24 = vsel %vm2129_vm6, %v2120_v19, %v5413_v14  ;;  %v2138_v31 = vsel %vm2129_vm6, %v5397_v1, %v2120_v19 }
  0xf4   :  { %v2171_v35 = vsel %vm138_vm0, %v2138_v31, 0 }
  0xf5   :  { %4399 = vmatmul.mubr.msk.bf16.vlgmr.msra.gmra.mrb[0].mxu0 %vm134_vm1, %v5409_v34 }
  0xf6   :  { %v5424_v27 = vpop.permute.xlu1 %2125  ;;  %v1703_v29 = vpop.permute.xlu0 %1702  ;;  %2275 = vmatpush1.bf16.msra.mxu0 %v2159_v22  ;;  %2306 = vmatprep.mubr.bf16.mxu0 %v4749_v3 }
  0xf7   :  { %4406 = vmatprep.subr.msk.bf16.mxu0 %vm138_vm0, %v2139_v24  ;;  %v1720_v6 = vsel %vm1708_vm5, %v1703_v29, %v5331_v54  ;;  %v1719_v43 = vsel %vm1708_vm5, %v5314_v45, %v1703_v29 }
  0xf8   :  { %v1756_v45 = vsel %vm138_vm0, %v1719_v43, 0 }
  0xf9   :  { %4379 = vmatmul.mubr.msk.bf16.vlgmr.msra.gmra.mrb[20].mxu1 %vm134_vm1, %v5178_v50 }
  0xfa   :  { %1811 = vmatpush1.bf16.msra.mxu1 %v1732_v48  ;;  %v2108_v28 = vpop.permute.xlu1 %2107  ;;  %1842 = vmatprep.mubr.bf16.mxu1 %v4749_v3  ;;  %v2128_v33 = vpop.permute.xlu0 %2127 }
  0xfb   :  { %4389 = vmatprep.subr.msk.bf16.mxu1 %vm138_vm0, %v1716_v32  ;;  %v2142_v12 = vsel %vm2129_vm6, %v5424_v27, %v2128_v33  ;;  %v2133_v10 = vsel %vm2129_vm6, %v2108_v28, %v5372_v51  ;;  %v2132_v8 = vsel %vm2129_vm6, %v5357_v56, %v2108_v28 }
  0xfc   :  { %v2183_v0 = vsel %vm138_vm0, %v2142_v12, 0  ;;  %v2153_v17 = vsel %vm138_vm0, %v2132_v8, 0 }
  0xfd   :  { %4403 = vmatmul.mubr.msk.bf16.vlgmr.msra.gmra.mrb[4].mxu0 %vm134_vm1, %v5409_v34 }
  0xfe   :  { %v2528_v11 = vpop.permute.xlu1 %2527  ;;  %2361 = vmatpush1.bf16.msra.mxu0 %v2171_v35  ;;  %2392 = vmatprep.mubr.bf16.mxu0 %v4749_v3 }
  0xff   :  { %v2526_v50 = vpop.permute.xlu0 %2525  ;;  %4410 = vmatprep.subr.msk.bf16.mxu0 %vm138_vm0, %v2128_v33 }
 0x100   :  { %v2556_v44 = vsel %vm2555_vm7, %v2526_v50, %v2528_v11 }
 0x101   :  { %4386 = vmatmul.mubr.msk.bf16.vlgmr.msra.gmra.mrb[4].mxu1 %vm134_vm1, %v5297_v41  ;;  %v2574_v49 = vsel %vm138_vm0, %v2556_v44, 0 }
 0x102   :  { %1897 = vmatpush1.bf16.msra.mxu1 %v1744_v39  ;;  %v2116_v38 = vpop.permute.xlu1 %2115  ;;  %1928 = vmatprep.mubr.bf16.mxu1 %v4749_v3  ;;  %v5570_v39 = vld [vmem:[%s6106_s1 + $0x38] sm:$0xff]  }
 0x103   :  { %4393 = vmatprep.subr.msk.bf16.mxu1 %vm138_vm0, %v1720_v6  ;;  %v5454_v5 = vpop.permute.xlu0 %2529  ;;  %v2137_v56 = vsel %vm2129_vm6, %v2116_v38, %v5397_v1  ;;  %v2136_v26 = vsel %vm2129_vm6, %v5384_v59, %v2116_v38 }
 0x104   :  { %v2557_v42 = vsel %vm2555_vm7, %v2528_v11, %v5454_v5  ;;  %v2165_v25 = vsel %vm138_vm0, %v2136_v26, 0 }
 0x105   :  { %4407 = vmatmul.mubr.msk.bf16.vlgmr.msra.gmra.mrb[8].mxu0 %vm134_vm1, %v5409_v34 }
 0x106   :  { %v2536_v7 = vpop.permute.xlu1 %2535  ;;  %2447 = vmatpush1.bf16.msra.mxu0 %v2183_v0  ;;  %2478 = vmatprep.mubr.bf16.mxu0 %v4749_v3 }
 0x107   :  { %4414 = vmatprep.subr.msk.bf16.mxu0 %vm138_vm0, %v2557_v42  ;;  %v5464_v30 = vpop.permute.xlu0 %2533 }
 0x108   :  { %v2560_v55 = vsel %vm2555_vm7, %v5464_v30, %v2536_v7 }
 0x109   :  { %4390 = vmatmul.mubr.msk.bf16.vlgmr.msra.gmra.mrb[12].mxu1 %vm134_vm1, %v5297_v41  ;;  %v2586_v57 = vsel %vm138_vm0, %v2560_v55, 0 }
 0x10a   :  { %1983 = vmatpush1.bf16.msra.mxu1 %v1756_v45  ;;  %v2124_v20 = vpop.permute.xlu1 %2123  ;;  %2014 = vmatprep.mubr.bf16.mxu1 %v4749_v3 }
 0x10b   :  { %4400 = vmatprep.subr.msk.bf16.mxu1 %vm138_vm0, %v2133_v10  ;;  %v2141_v52 = vsel %vm2129_vm6, %v2124_v20, %v5424_v27  ;;  %v2140_v63 = vsel %vm2129_vm6, %v5413_v14, %v2124_v20 }
 0x10c   :  { %v2177_v37 = vsel %vm138_vm0, %v2140_v63, 0 }
 0x10d   :  { %4411 = vmatmul.mubr.msk.bf16.vlgmr.msra.gmra.mrb[12].mxu0 %vm134_vm1, %v5409_v34  ;;  %v5483_v54 = vpop.permute.xlu0 %2537 }
 0x10e   :  { %v2544_v16 = vpop.permute.xlu1 %2543  ;;  %2616 = vmatpush1.bf16.msra.mxu0 %v2574_v49  ;;  %2647 = vmatprep.mubr.bf16.mxu0 %v4749_v3  ;;  %v2561_v46 = vsel %vm2555_vm7, %v2536_v7, %v5483_v54 }
 0x10f   :  { %4418 = vmatprep.subr.msk.bf16.mxu0 %vm138_vm0, %v2561_v46 }
 0x111   :  { %4394 = vmatmul.mubr.msk.bf16.vlgmr.msra.gmra.mrb[20].mxu1 %vm134_vm1, %v5297_v41  ;;  %v2542_v40 = vpop.permute.xlu0 %2541 }
 0x112   :  { %2232 = vmatpush1.bf16.msra.mxu1 %v2153_v17  ;;  %v2532_v18 = vpop.permute.xlu1 %2531  ;;  %2263 = vmatprep.mubr.bf16.mxu1 %v4749_v3  ;;  %v2564_v58 = vsel %vm2555_vm7, %v2542_v40, %v2544_v16 }
 0x113   :  { %4404 = vmatprep.subr.msk.bf16.mxu1 %vm138_vm0, %v2137_v56  ;;  %v2598_v62 = vsel %vm138_vm0, %v2564_v58, 0  ;;  %v2559_v13 = vsel %vm2555_vm7, %v2532_v18, %v5464_v30  ;;  %v2558_v24 = vsel %vm2555_vm7, %v5454_v5, %v2532_v18 }
 0x114   :  { %v2580_v31 = vsel %vm138_vm0, %v2558_v24, 0 }
 0x115   :  { %4415 = vmatmul.mubr.msk.bf16.vlgmr.msra.gmra.mrb[0].mxu0 %vm134_vm1, %v5499_v15  ;;  %v5508_v41 = vpop.permute.xlu0 %2545 }
 0x116   :  { %v2552_v53 = vpop.permute.xlu1 %2551  ;;  %2702 = vmatpush1.bf16.msra.mxu0 %v2586_v57  ;;  %2733 = vmatprep.mubr.bf16.mxu0 %v4749_v3  ;;  %v2565_v51 = vsel %vm2555_vm7, %v2544_v16, %v5508_v41 }
 0x117   :  { %4422 = vmatprep.subr.msk.bf16.mxu0 %vm138_vm0, %v2565_v51 }
 0x119   :  { %4401 = vmatmul.mubr.msk.bf16.vlgmr.msra.gmra.mrb[4].mxu1 %vm134_vm1, %v5409_v34  ;;  %v2550_v21 = vpop.permute.xlu0 %2549 }
 0x11a   :  { %2318 = vmatpush1.bf16.msra.mxu1 %v2165_v25  ;;  %v2540_v59 = vpop.permute.xlu1 %2539  ;;  %2349 = vmatprep.mubr.bf16.mxu1 %v4749_v3  ;;  %v2568_v2 = vsel %vm2555_vm7, %v2550_v21, %v2552_v53 }
 0x11b   :  { %4408 = vmatprep.subr.msk.bf16.mxu1 %vm138_vm0, %v2141_v52  ;;  %v2610_v19 = vsel %vm138_vm0, %v2568_v2, 0  ;;  %v2563_v32 = vsel %vm2555_vm7, %v2540_v59, %v2542_v40  ;;  %v2562_v36 = vsel %vm2555_vm7, %v5483_v54, %v2540_v59 }
 0x11c   :  { %v2592_v12 = vsel %vm138_vm0, %v2562_v36, 0 }
 0x11d   :  { %4419 = vmatmul.mubr.msk.bf16.vlgmr.msra.gmra.mrb[4].mxu0 %vm134_vm1, %v5499_v15  ;;  %v2554_v23 = vpop.permute.xlu0 %2553 }
 0x11e   :  { %v2952_v61 = vpop.permute.xlu1 %2951  ;;  %2788 = vmatpush1.bf16.msra.mxu0 %v2598_v62  ;;  %2819 = vmatprep.mubr.bf16.mxu0 %v4749_v3  ;;  %v2569_v1 = vsel %vm2555_vm7, %v2552_v53, %v2554_v23 }
 0x11f   :  { %4426 = vmatprep.subr.msk.bf16.mxu0 %vm138_vm0, %v2569_v1 }
 0x121   :  { %4405 = vmatmul.mubr.msk.bf16.vlgmr.msra.gmra.mrb[12].mxu1 %vm134_vm1, %v5409_v34  ;;  %v2950_v9 = vpop.permute.xlu0 %2949 }
 0x122   :  { %2404 = vmatpush1.bf16.msra.mxu1 %v2177_v37  ;;  %v2548_v14 = vpop.permute.xlu1 %2547  ;;  %2435 = vmatprep.mubr.bf16.mxu1 %v4749_v3  ;;  %v2980_v29 = vsel %vm2979_vm8, %v2950_v9, %v2952_v61  ;;  %v4744_v37 = vld [vmem:[%s6106_s1 + $0x40] sm:$0xff]  }
 0x123   :  { %4416 = vmatprep.subr.msk.bf16.mxu1 %vm138_vm0, %v2559_v13  ;;  %v2998_v33 = vsel %vm138_vm0, %v2980_v29, 0  ;;  %v2567_v38 = vsel %vm2555_vm7, %v2548_v14, %v2550_v21  ;;  %v2566_v43 = vsel %vm2555_vm7, %v5508_v41, %v2548_v14 }
 0x124   :  { %v2604_v4 = vsel %vm138_vm0, %v2566_v43, 0 }
 0x125   :  { %4423 = vmatmul.mubr.msk.bf16.vlgmr.msra.gmra.mrb[8].mxu0 %vm134_vm1, %v5499_v15  ;;  %v2954_v22 = vpop.permute.xlu0 %2953 }
 0x126   :  { %2874 = vmatpush1.bf16.msra.mxu0 %v2610_v19  ;;  %2905 = vmatprep.mubr.bf16.mxu0 %v4749_v3  ;;  %v2960_v60 = vpop.permute.xlu1 %2959  ;;  %v2981_v27 = vsel %vm2979_vm8, %v2952_v61, %v2954_v22 }
 0x127   :  { %4429 = vmatprep.subr.msk.bf16.mxu0 %vm138_vm0, %v2981_v27 }
 0x129   :  { %4409 = vmatmul.mubr.msk.bf16.vlgmr.msra.gmra.mrb[20].mxu1 %vm134_vm1, %v5409_v34  ;;  %v2958_v48 = vpop.permute.xlu0 %2957 }
 0x12a   :  { %2659 = vmatpush1.bf16.msra.mxu1 %v2580_v31  ;;  %2690 = vmatprep.mubr.bf16.mxu1 %v4749_v3  ;;  %v2956_v28 = vpop.permute.xlu1 %2955  ;;  %v2984_v50 = vsel %vm2979_vm8, %v2958_v48, %v2960_v60 }
 0x12b   :  { %4420 = vmatprep.subr.msk.bf16.mxu1 %vm138_vm0, %v2563_v32  ;;  %v3010_v5 = vsel %vm138_vm0, %v2984_v50, 0  ;;  %v2983_v44 = vsel %vm2979_vm8, %v2956_v28, %v2958_v48  ;;  %v2982_v54 = vsel %vm2979_vm8, %v2954_v22, %v2956_v28 }
 0x12c   :  { %v3004_v17 = vsel %vm138_vm0, %v2982_v54, 0 }
 0x12d   :  { %4427 = vmatmul.mubr.msk.bf16.vlgmr.msra.gmra.mrb[12].mxu0 %vm134_vm1, %v5499_v15  ;;  %v2962_v35 = vpop.permute.xlu0 %2961 }
 0x12e   :  { %3040 = vmatpush1.bf16.msra.mxu0 %v2998_v33  ;;  %3071 = vmatprep.mubr.bf16.mxu0 %v4749_v3  ;;  %v2968_v34 = vpop.permute.xlu1 %2967  ;;  %v2985_v11 = vsel %vm2979_vm8, %v2960_v60, %v2962_v35 }
 0x12f   :  { %4433 = vmatprep.subr.msk.bf16.mxu0 %vm138_vm0, %v2985_v11 }
 0x131   :  { %4417 = vmatmul.mubr.msk.bf16.vlgmr.msra.gmra.mrb[4].mxu1 %vm134_vm1, %v5499_v15  ;;  %v2966_v6 = vpop.permute.xlu0 %2965 }
 0x132   :  { %2745 = vmatpush1.bf16.msra.mxu1 %v2592_v12  ;;  %2776 = vmatprep.mubr.bf16.mxu1 %v4749_v3  ;;  %v2964_v0 = vpop.permute.xlu1 %2963  ;;  %v2988_v47 = vsel %vm2979_vm8, %v2966_v6, %v2968_v34 }
 0x133   :  { %4424 = vmatprep.subr.msk.bf16.mxu1 %vm138_vm0, %v2567_v38  ;;  %v3022_v20 = vsel %vm138_vm0, %v2988_v47, 0  ;;  %v2987_v46 = vsel %vm2979_vm8, %v2964_v0, %v2966_v6  ;;  %v2986_v41 = vsel %vm2979_vm8, %v2962_v35, %v2964_v0 }
 0x134   :  { %v3016_v58 = vsel %vm138_vm0, %v2986_v41, 0  ;;  %v5691_v41 = vld [vmem:[%s6108_s3] sm:$0xff] }
 0x135   :  { %4430 = vmatmul.mubr.msk.bf16.vlgmr.msra.gmra.mrb[0].mxu0 %vm134_vm1, %v5570_v39  ;;  %v2970_v42 = vpop.permute.xlu0 %2969 }
 0x136   :  { %3126 = vmatpush1.bf16.msra.mxu0 %v3010_v5  ;;  %3157 = vmatprep.mubr.bf16.mxu0 %v4749_v3  ;;  %v2976_v7 = vpop.permute.xlu1 %2975  ;;  %v2989_v30 = vsel %vm2979_vm8, %v2968_v34, %v2970_v42 }
 0x137   :  { %4437 = vmatprep.subr.msk.bf16.mxu0 %vm138_vm0, %v2989_v30 }
 0x139   :  { %4421 = vmatmul.mubr.msk.bf16.vlgmr.msra.gmra.mrb[12].mxu1 %vm134_vm1, %v5499_v15  ;;  %v2974_v45 = vpop.permute.xlu0 %2973 }
 0x13a   :  { %2831 = vmatpush1.bf16.msra.mxu1 %v2604_v4  ;;  %2862 = vmatprep.mubr.bf16.mxu1 %v4749_v3  ;;  %v2972_v10 = vpop.permute.xlu1 %2971  ;;  %v2992_v55 = vsel %vm2979_vm8, %v2974_v45, %v2976_v7 }
 0x13b   :  { %4431 = vmatprep.subr.msk.bf16.mxu1 %vm138_vm0, %v2983_v44  ;;  %v3034_v18 = vsel %vm138_vm0, %v2992_v55, 0  ;;  %v2991_v53 = vsel %vm2979_vm8, %v2972_v10, %v2974_v45  ;;  %v2990_v62 = vsel %vm2979_vm8, %v2970_v42, %v2972_v10 }
 0x13c   :  { %v3028_v2 = vsel %vm138_vm0, %v2990_v62, 0 }
 0x13d   :  { %4434 = vmatmul.mubr.msk.bf16.vlgmr.msra.gmra.mrb[4].mxu0 %vm134_vm1, %v5570_v39  ;;  %v2978_v49 = vpop.permute.xlu0 %2977 }
 0x13e   :  { %3212 = vmatpush1.bf16.msra.mxu0 %v3022_v20  ;;  %3243 = vmatprep.mubr.bf16.mxu0 %v4749_v3  ;;  %v2993_v8 = vsel %vm2979_vm8, %v2976_v7, %v2978_v49  ;;  %v3376_v16 = vpop.permute.xlu1 %3375 }
 0x13f   :  { %4441 = vmatprep.subr.msk.bf16.mxu0 %vm138_vm0, %v2993_v8 }
 0x141   :  { %4425 = vmatmul.mubr.msk.bf16.vlgmr.msra.gmra.mrb[20].mxu1 %vm134_vm1, %v5499_v15  ;;  %v3374_v40 = vpop.permute.xlu0 %3373 }
 0x142   :  { %3083 = vmatpush1.bf16.msra.mxu1 %v3004_v17  ;;  %3114 = vmatprep.mubr.bf16.mxu1 %v4749_v3  ;;  %v3380_v56 = vpop.permute.xlu1 %3379  ;;  %v3404_v51 = vsel %vm3403_vm9, %v3374_v40, %v3376_v16 }
 0x143   :  { %4435 = vmatprep.subr.msk.bf16.mxu1 %vm138_vm0, %v2987_v46  ;;  %v3422_v52 = vsel %vm138_vm0, %v3404_v51, 0 }
 0x145   :  { %4438 = vmatmul.mubr.msk.bf16.vlgmr.msra.gmra.mrb[8].mxu0 %vm134_vm1, %v5570_v39  ;;  %v3378_v57 = vpop.permute.xlu0 %3377 }
 0x146   :  { %3298 = vmatpush1.bf16.msra.mxu0 %v3034_v18  ;;  %3329 = vmatprep.mubr.bf16.mxu0 %v4749_v3  ;;  %v3405_v15 = vsel %vm3403_vm9, %v3376_v16, %v3378_v57  ;;  %v3384_v26 = vpop.permute.xlu1 %3383  ;;  %v3406_v14 = vsel %vm3403_vm9, %v3378_v57, %v3380_v56 }
 0x147   :  { %4444 = vmatprep.subr.msk.bf16.mxu0 %vm138_vm0, %v3405_v15  ;;  %v3428_v31 = vsel %vm138_vm0, %v3406_v14, 0 }
 0x149   :  { %4432 = vmatmul.mubr.msk.bf16.vlgmr.msra.gmra.mrb[4].mxu1 %vm134_vm1, %v5570_v39  ;;  %v3382_v25 = vpop.permute.xlu0 %3381 }
 0x14a   :  { %3169 = vmatpush1.bf16.msra.mxu1 %v3016_v58  ;;  %3200 = vmatprep.mubr.bf16.mxu1 %v4749_v3  ;;  %v3388_v21 = vpop.permute.xlu1 %3387  ;;  %v3407_v61 = vsel %vm3403_vm9, %v3380_v56, %v3382_v25  ;;  %v3408_v1 = vsel %vm3403_vm9, %v3382_v25, %v3384_v26 }
 0x14b   :  { %4439 = vmatprep.subr.msk.bf16.mxu1 %vm138_vm0, %v2991_v53  ;;  %v3434_v13 = vsel %vm138_vm0, %v3408_v1, 0 }
 0x14d   :  { %4442 = vmatmul.mubr.msk.bf16.vlgmr.msra.gmra.mrb[12].mxu0 %vm134_vm1, %v5570_v39  ;;  %v3386_v59 = vpop.permute.xlu0 %3385 }
 0x14e   :  { %3464 = vmatpush1.bf16.msra.mxu0 %v3422_v52  ;;  %3495 = vmatprep.mubr.bf16.mxu0 %v4749_v3  ;;  %v3409_v23 = vsel %vm3403_vm9, %v3384_v26, %v3386_v59  ;;  %v3392_v63 = vpop.permute.xlu1 %3391  ;;  %v3410_v34 = vsel %vm3403_vm9, %v3386_v59, %v3388_v21 }
 0x14f   :  { %4448 = vmatprep.subr.msk.bf16.mxu0 %vm138_vm0, %v3409_v23  ;;  %v3440_v12 = vsel %vm138_vm0, %v3410_v34, 0 }
 0x151   :  { %4436 = vmatmul.mubr.msk.bf16.vlgmr.msra.gmra.mrb[12].mxu1 %vm134_vm1, %v5570_v39  ;;  %v3390_v9 = vpop.permute.xlu0 %3389 }
 0x152   :  { %3255 = vmatpush1.bf16.msra.mxu1 %v3028_v2  ;;  %3286 = vmatprep.mubr.bf16.mxu1 %v4749_v3  ;;  %v3396_v22 = vpop.permute.xlu1 %3395  ;;  %v3411_v32 = vsel %vm3403_vm9, %v3388_v21, %v3390_v9  ;;  %v3412_v28 = vsel %vm3403_vm9, %v3390_v9, %v3392_v63 }
 0x153   :  { %4446 = vmatprep.subr.msk.bf16.mxu1 %vm138_vm0, %v3407_v61  ;;  %v3446_v35 = vsel %vm138_vm0, %v3412_v28, 0 }
 0x154   :  { %v215_v19 = vpop.f32.mrb[0].mxu1 }
 0x155   :  { %v217_v24 = vpop.f32.mrb[1].mxu1  ;;  %4445 = vmatmul.mubr.msk.bf16.vlgmr.msra.gmra.mrb[0].mxu0 %vm134_vm1, %v4744_v37  ;;  %v3394_v60 = vpop.permute.xlu0 %3393 }
 0x156   :  { %v219_v27 = vpop.f32.mrb[2].mxu1  ;;  %3550 = vmatpush1.bf16.msra.mxu0 %v3434_v13  ;;  %3581 = vmatprep.mubr.bf16.mxu0 %v4749_v3  ;;  %v3413_v29 = vsel %vm3403_vm9, %v3392_v63, %v3394_v60  ;;  %v3400_v36 = vpop.permute.xlu1 %3399  ;;  %v3414_v0 = vsel %vm3403_vm9, %v3394_v60, %v3396_v22 }
 0x157   :  { %v221_v48 = vpop.f32.mrb[3].mxu1  ;;  %4452 = vmatprep.subr.msk.bf16.mxu0 %vm138_vm0, %v3413_v29  ;;  %v3452_v7 = vsel %vm138_vm0, %v3414_v0, 0 }
 0x159   :  { %4440 = vmatmul.mubr.msk.bf16.vlgmr.msra.gmra.mrb[20].mxu1 %vm134_vm1, %v5570_v39  ;;  %v3398_v33 = vpop.permute.xlu0 %3397 }
 0x15a   :  { %3507 = vmatpush1.bf16.msra.mxu1 %v3428_v31  ;;  %3538 = vmatprep.mubr.bf16.mxu1 %v4749_v3  ;;  %v3415_v39 = vsel %vm3403_vm9, %v3396_v22, %v3398_v33  ;;  %v3416_v6 = vsel %vm3403_vm9, %v3398_v33, %v3400_v36 }
 0x15b   :  { %4450 = vmatprep.subr.msk.bf16.mxu1 %vm138_vm0, %v3411_v32  ;;  %v3458_v38 = vsel %vm138_vm0, %v3416_v6, 0 }
 0x15d   :  { %4449 = vmatmul.mubr.msk.bf16.vlgmr.msra.gmra.mrb[4].mxu0 %vm134_vm1, %v4744_v37  ;;  %v3402_v11 = vpop.permute.xlu0 %3401 }
 0x15e   :  { %3636 = vmatpush1.bf16.msra.mxu0 %v3446_v35  ;;  %3667 = vmatprep.mubr.bf16.mxu0 %v4749_v3  ;;  %v3417_v50 = vsel %vm3403_vm9, %v3400_v36, %v3402_v11 }
 0x15f   :  { %4456 = vmatprep.subr.msk.bf16.mxu0 %vm138_vm0, %v3417_v50 }
 0x161   :  { %4447 = vmatmul.mubr.msk.bf16.vlgmr.msra.gmra.mrb[4].mxu1 %vm134_vm1, %v4744_v37 }
 0x162   :  { %3593 = vmatpush1.bf16.msra.mxu1 %v3440_v12  ;;  %3624 = vmatprep.mubr.bf16.mxu1 %v4749_v3 }
 0x163   :  { %4454 = vmatprep.subr.msk.bf16.mxu1 %vm138_vm0, %v3415_v39 }
 0x164   :  { %v301_v5 = vpop.f32.mrb[8].mxu1 }
 0x165   :  { %v303_v42 = vpop.f32.mrb[9].mxu1  ;;  %4453 = vmatmul.mubr.msk.bf16.vlgmr.msra.gmra.mrb[8].mxu0 %vm134_vm1, %v4744_v37 }
 0x166   :  { %v305_v43 = vpop.f32.mrb[10].mxu1  ;;  %3722 = vmatpush1.bf16.msra.mxu0 %v3458_v38  ;;  %3753 = vmatprep.mubr.bf16.mxu0 %v4749_v3 }
 0x167   :  { %v307_v30 = vpop.f32.mrb[11].mxu1  ;;  %v5694_v26 = vpop.permute.xlu1 %3794 }
 0x169   :  { %4451 = vmatmul.mubr.msk.bf16.vlgmr.msra.gmra.mrb[12].mxu1 %vm134_vm1, %v4744_v37 }
 0x16a   :  { %3679 = vmatpush1.bf16.msra.mxu1 %v3452_v7  ;;  %3710 = vmatprep.mubr.bf16.mxu1 %v4749_v3  ;;  %v3834_v3 = vlaneseq }
 0x16c   :  { %v5685_v8 = vshrl.u32 %v3834_v3, 7 }
 0x16d   :  { %4457 = vmatmul.mubr.msk.bf16.vlgmr.msra.gmra.mrb[12].mxu0 %vm134_vm1, %v4744_v37 }
 0x16e   :  { %v3836_v56 = vsub.s32 0, %v5685_v8  ;;  %v3840_v15 = vsub.s32 1, %v5685_v8  ;;  %v5696_v51 = vpop.permute.xlu0 %3799  ;;  %v3844_v59 = vsub.s32 2, %v5685_v8  ;;  %v3848_v23 = vsub.s32 3, %v5685_v8 }
 0x16f   :  { %v3852_v2 = vsub.s32 4, %v5685_v8  ;;  %v3856_v13 = vsub.s32 5, %v5685_v8  ;;  %v3860_v12 = vsub.s32 6, %v5685_v8  ;;  %v3864_v39 = vsub.s32 7, %v5685_v8 }
 0x170   :  { %v5699_v58 = vrot.slane %v5691_v41, %v3836_v56  ;;  %v5710_v52 = vrot.slane %v5691_v41, %v3840_v15 }
 0x171   :  { %4455 = vmatmul.mubr.msk.bf16.vlgmr.msra.gmra.mrb[20].mxu1 %vm134_vm1, %v4744_v37  ;;  %v5743_v33 = vrot.slane %v5691_v41, %v3852_v2  ;;  %v5751_v34 = vrot.slane %v5691_v41, %v3856_v13 }
 0x174   :  { %v5669_v44 = vpop.f32.mrb[16].mxu1 }
 0x175   :  { %v5671_v47 = vpop.f32.mrb[17].mxu1 }
 0x176   :  { %v5673_v4 = vpop.f32.mrb[18].mxu1 }
 0x177   :  { %v5675_v45 = vpop.f32.mrb[19].mxu1 }
 0x184   :  { %v5677_v10 = vpop.f32.mrb[24].mxu1 }
 0x185   :  { %v5679_v20 = vpop.f32.mrb[25].mxu1 }
 0x186   :  { %v5681_v49 = vpop.f32.mrb[26].mxu1 }
 0x187   :  { %v5683_v54 = vpop.f32.mrb[27].mxu1 }
 0x228   :  { %v3497_v16 = vpop.f32.mrb[0].mxu0 }
 0x229   :  { %v4486_v46 = vadd.f32 %v3497_v16, %v215_v19  ;;  %v3499_v55 = vpop.f32.mrb[1].mxu0 }
 0x22a   :  { %v4487_v17 = vadd.f32 %v3499_v55, %v217_v24  ;;  %v3501_v40 = vpop.f32.mrb[2].mxu0  ;;  %v5725_v24 = vrot.slane %v5691_v41, %v3844_v59 }
 0x22b   :  { %v4488_v18 = vadd.f32 %v3501_v40, %v219_v27  ;;  %v3503_v57 = vpop.f32.mrb[3].mxu0  ;;  %v5702_v25 = vadd.f32 %v4486_v46, %v5694_v26 }
 0x22c   :  { %v4489_v53 = vadd.f32 %v3503_v57, %v221_v48  ;;  %v5705_v21 = vadd.f32 %v4487_v17, %v5694_v26  ;;  %v5734_v48 = vrot.slane %v5691_v41, %v3848_v23 }
 0x22d   :  { %v5715_v63 = vadd.f32 %v4488_v18, %v5696_v51  ;;  %v3904_v60 = vmul.f32 %v5699_v58, %v5702_v25 }
 0x22e   :  { %v5718_v61 = vadd.f32 %v4489_v53, %v5696_v51  ;;  %v3905_v27 = vmul.f32 %v5710_v52, %v5705_v21 }
 0x22f   :  { %v3918_v32 = vmul.f32 %v5699_v58, %v5715_v63 }
 0x230   :  { %v3583_v62 = vpop.f32.mrb[4].mxu0  ;;  %v3919_v28 = vmul.f32 %v5710_v52, %v5718_v61  ;;  %v3932_v0 = vadd.f32 %v3905_v27, %v3904_v60 }
 0x231   :  { %v4490_v1 = vadd.f32 %v3583_v62, %v301_v5  ;;  %v3585_v37 = vpop.f32.mrb[5].mxu0 }
 0x232   :  { %v4491_v9 = vadd.f32 %v3585_v37, %v303_v42  ;;  %v3587_v14 = vpop.f32.mrb[6].mxu0  ;;  %v3949_v3 = vadd.f32 %v3919_v28, %v3918_v32 }
 0x233   :  { %v4492_v19 = vadd.f32 %v3587_v14, %v305_v43  ;;  %v3589_v22 = vpop.f32.mrb[7].mxu0  ;;  %v5759_v6 = vadd.f32 %v4490_v1, %v5694_v26  ;;  %v5769_v43 = vld [vmem:[%s6108_s3 + $0x8] sm:$0x3f] }
 0x234   :  { %v4493_v29 = vadd.f32 %v3589_v22, %v307_v30  ;;  %v3540_v31 = vpop.f32.mrb[4].mxu1  ;;  %v5772_v7 = vadd.f32 %v4491_v9, %v5694_v26  ;;  %v5791_v1 = vrot.slane %v5769_v43, %v3836_v56  ;;  %v5800_v27 = vrot.slane %v5769_v43, %v3840_v15 }
 0x235   :  { %v5746_v35 = vadd.f32 %v5694_v26, %v3540_v31  ;;  %v3542_v36 = vpop.f32.mrb[5].mxu1  ;;  %v5780_v55 = vadd.f32 %v4492_v19, %v5696_v51  ;;  %v3908_v14 = vmul.f32 %v5743_v33, %v5759_v6  ;;  %v5804_v31 = vrot.slane %v5691_v41, %v3860_v12 }
 0x236   :  { %v5754_v11 = vadd.f32 %v5694_v26, %v3542_v36  ;;  %v3544_v50 = vpop.f32.mrb[6].mxu1  ;;  %v5786_v53 = vadd.f32 %v4493_v29, %v5696_v51  ;;  %v3909_v32 = vmul.f32 %v5751_v34, %v5772_v7 }
 0x237   :  { %v3906_v38 = vmul.f32 %v5725_v24, %v5746_v35  ;;  %v5764_v5 = vadd.f32 %v5696_v51, %v3544_v50  ;;  %v3546_v42 = vpop.f32.mrb[7].mxu1 }
 0x238   :  { %v3907_v30 = vmul.f32 %v5734_v48, %v5754_v11  ;;  %v5777_v16 = vadd.f32 %v5696_v51, %v3546_v42  ;;  %v3669_v46 = vpop.f32.mrb[8].mxu0  ;;  %6118 = vst [vmem:[#allocation4_spill] sm:$0xff] %v5786_v53  ;;  %v3923_v15 = vmul.f32 %v5751_v34, %v5786_v53 }
 0x239   :  { %6116 = vst [vmem:[#allocation2_spill] sm:$0xff] %v5764_v5  ;;  %v3933_v17 = vadd.f32 %v3932_v0, %v3906_v38  ;;  %v3920_v40 = vmul.f32 %v5725_v24, %v5764_v5  ;;  %v4494_v18 = vadd.f32 %v3669_v46, %v5669_v44  ;;  %v3671_v57 = vpop.f32.mrb[9].mxu0 }
 0x23a   :  { %6117 = vst [vmem:[#allocation3_spill] sm:$0xff] %v5777_v16  ;;  %v3921_v62 = vmul.f32 %v5734_v48, %v5777_v16  ;;  %v4495_v37 = vadd.f32 %v3671_v57, %v5671_v47  ;;  %v3673_v9 = vpop.f32.mrb[10].mxu0  ;;  %v5807_v47 = vrot.slane %v5691_v41, %v3864_v39  ;;  %v5824_v39 = vrot.slane %v5769_v43, %v3852_v2 }
 0x23b   :  { %v3934_v19 = vadd.f32 %v3933_v17, %v3907_v30  ;;  %v3950_v22 = vadd.f32 %v3949_v3, %v3920_v40  ;;  %v4496_v44 = vadd.f32 %v3673_v9, %v5673_v4  ;;  %v3675_v60 = vpop.f32.mrb[11].mxu0  ;;  %v3922_v4 = vmul.f32 %v5743_v33, %v5780_v55 }
 0x23c   :  { %v4497_v29 = vadd.f32 %v3675_v60, %v5675_v45  ;;  %v3626_v56 = vpop.f32.mrb[12].mxu1  ;;  %v5827_v0 = vadd.f32 %v4494_v18, %v5694_v26  ;;  %v5833_v46 = vadd.f32 %v4495_v37, %v5694_v26 }
 0x23d   :  { %v3935_v28 = vadd.f32 %v3934_v19, %v3908_v14  ;;  %v3951_v36 = vadd.f32 %v3950_v22, %v3921_v62  ;;  %v3628_v50 = vpop.f32.mrb[13].mxu1  ;;  %v5816_v45 = vadd.f32 %v5694_v26, %v3626_v56  ;;  %v5843_v18 = vadd.f32 %v4496_v44, %v5696_v51 }
 0x23e   :  { %v5819_v12 = vadd.f32 %v5694_v26, %v3628_v50  ;;  %v3630_v41 = vpop.f32.mrb[14].mxu1  ;;  %v5849_v19 = vadd.f32 %v4497_v29, %v5696_v51  ;;  %v3912_v29 = vmul.f32 %v5791_v1, %v5827_v0 }
 0x23f   :  { %v3952_v38 = vadd.f32 %v3951_v36, %v3922_v4  ;;  %v3936_v42 = vadd.f32 %v3935_v28, %v3909_v32  ;;  %v5830_v30 = vadd.f32 %v5696_v51, %v3630_v41  ;;  %v3632_v3 = vpop.f32.mrb[15].mxu1  ;;  %v3910_v17 = vmul.f32 %v5804_v31, %v5816_v45 }
 0x240   :  { %v3911_v40 = vmul.f32 %v5807_v47, %v5819_v12  ;;  %v5840_v2 = vadd.f32 %v5696_v51, %v3632_v3  ;;  %v3755_v57 = vpop.f32.mrb[12].mxu0  ;;  %v5858_v36 = vrot.slane %v5769_v43, %v3844_v59  ;;  %v3913_v59 = vmul.f32 %v5800_v27, %v5833_v46 }
 0x241   :  { %6119 = vst [vmem:[#allocation5_spill] sm:$0xff] %v5830_v30  ;;  %v3924_v62 = vmul.f32 %v5804_v31, %v5830_v30  ;;  %v3953_v9 = vadd.f32 %v3952_v38, %v3923_v15  ;;  %v4498_v37 = vadd.f32 %v3755_v57, %v5677_v10  ;;  %v3757_v14 = vpop.f32.mrb[13].mxu0  ;;  %v3937_v22 = vadd.f32 %v3936_v42, %v3910_v17 }
 0x242   :  { %v3925_v60 = vmul.f32 %v5807_v47, %v5840_v2  ;;  %v4499_v56 = vadd.f32 %v3757_v14, %v5679_v20  ;;  %v3759_v32 = vpop.f32.mrb[14].mxu0  ;;  %v5863_v10 = vrot.slane %v5769_v43, %v3856_v13  ;;  %v3926_v41 = vmul.f32 %v5791_v1, %v5843_v18 }
 0x243   :  { %v3954_v4 = vadd.f32 %v3953_v9, %v3924_v62  ;;  %v4500_v44 = vadd.f32 %v3759_v32, %v5681_v49  ;;  %v3761_v28 = vpop.f32.mrb[15].mxu0  ;;  %v3938_v50 = vadd.f32 %v3937_v22, %v3911_v40  ;;  %v5871_v49 = vrot.slane %v5769_v43, %v3848_v23 }
 0x244   :  { %v4501_v20 = vadd.f32 %v3761_v28, %v5683_v54  ;;  %v3712_v15 = vpop.f32.mrb[20].mxu1  ;;  %v3927_v54 = vmul.f32 %v5800_v27, %v5849_v19  ;;  %v5883_v8 = vadd.f32 %v4498_v37, %v5694_v26  ;;  %v5889_v40 = vadd.f32 %v4499_v56, %v5694_v26 }
 0x245   :  { %v3955_v13 = vadd.f32 %v3954_v4, %v3925_v60  ;;  %v5878_v38 = vadd.f32 %v5694_v26, %v3712_v15  ;;  %v3714_v42 = vpop.f32.mrb[21].mxu1  ;;  %v3939_v3 = vadd.f32 %v3938_v50, %v3912_v29 }
 0x246   :  { %v5886_v23 = vadd.f32 %v5694_v26, %v3714_v42  ;;  %v3716_v43 = vpop.f32.mrb[22].mxu1  ;;  %v5897_v14 = vadd.f32 %v4501_v20, %v5696_v51  ;;  %v5905_v26 = vadd.f32 %v4500_v44, %v5696_v51  ;;  %v3917_v50 = vmul.f32 %v5863_v10, %v5889_v40 }
 0x247   :  { %v3956_v17 = vadd.f32 %v3955_v13, %v3926_v41  ;;  %v3914_v57 = vmul.f32 %v5858_v36, %v5878_v38  ;;  %v5894_v62 = vadd.f32 %v5696_v51, %v3716_v43  ;;  %v3718_v9 = vpop.f32.mrb[23].mxu1  ;;  %v3940_v37 = vadd.f32 %v3939_v3, %v3913_v59 }
 0x248   :  { %v3915_v22 = vmul.f32 %v5871_v49, %v5886_v23  ;;  %v5902_v60 = vadd.f32 %v5696_v51, %v3718_v9  ;;  %v3916_v20 = vmul.f32 %v5824_v39, %v5883_v8  ;;  %v3931_v51 = vmul.f32 %v5863_v10, %v5897_v14 }
 0x249   :  { %v3928_v56 = vmul.f32 %v5858_v36, %v5894_v62  ;;  %v3957_v32 = vadd.f32 %v3956_v17, %v3927_v54  ;;  %v3941_v4 = vadd.f32 %v3940_v37, %v3914_v57  ;;  %v3930_v44 = vmul.f32 %v5824_v39, %v5905_v26 }
 0x24a   :  { %v3929_v28 = vmul.f32 %v5871_v49, %v5902_v60  ;;  %v3945_v13 = vsel %vm3944_vm10, %v3917_v50, 0.0  ;;  %v3961_v3 = vsel %vm3944_vm10, %v3931_v51, 0.0 }
 0x24b   :  { %v3958_v29 = vadd.f32 %v3957_v32, %v3928_v56  ;;  %v3942_v15 = vadd.f32 %v3941_v4, %v3915_v22 }
 0x24d   :  { %v3959_v59 = vadd.f32 %v3958_v29, %v3929_v28  ;;  %v3943_v41 = vadd.f32 %v3942_v15, %v3916_v20 }
 0x24f   :  { %v3960_v42 = vadd.f32 %v3959_v59, %v3930_v44  ;;  %v3946_v54 = vadd.f32 %v3945_v13, %v3943_v41 }
 0x251   :  { %v3962_v43 = vadd.f32 %v3961_v3, %v3960_v42  ;;  %3947 = vadd.xlane.f32.xlu1 %v3946_v54 }
 0x253   :  { %3963 = vadd.xlane.f32.xlu0 %v3962_v43 }
 0x2de   :  { %v3948_v17 = vpop.xlane.xlu1 %3947 }
 0x2df   :  { %v5921_v57 = vmul.f32 0.0025510204, %v3948_v17 }
 0x2e0   :  { %v3964_v4 = vpop.xlane.xlu0 %3963 }
 0x2e1   :  { %v3968_v9 = vsub.f32 %v5702_v25, %v5921_v57  ;;  %v3969_v37 = vsub.f32 %v5705_v21, %v5921_v57  ;;  %v3970_v22 = vsub.f32 %v5746_v35, %v5921_v57  ;;  %v3971_v28 = vsub.f32 %v5754_v11, %v5921_v57 }
 0x2e2   :  { %v3972_v29 = vsub.f32 %v5759_v6, %v5921_v57  ;;  %v5936_v20 = vmul.f32 0.0025510204, %v3964_v4  ;;  %v3973_v44 = vsub.f32 %v5772_v7, %v5921_v57  ;;  %v3974_v41 = vsub.f32 %v5816_v45, %v5921_v57 }
 0x2e3   :  { %v3996_v56 = vmul.f32 %v3968_v9, %v5699_v58  ;;  %v3997_v32 = vmul.f32 %v3969_v37, %v5710_v52  ;;  %v3998_v50 = vmul.f32 %v3970_v22, %v5725_v24  ;;  %v3999_v59 = vmul.f32 %v3971_v28, %v5734_v48 }
 0x2e4   :  { %v4000_v13 = vmul.f32 %v3972_v29, %v5743_v33  ;;  %v3982_v3 = vsub.f32 %v5715_v63, %v5936_v20  ;;  %v3983_v43 = vsub.f32 %v5718_v61, %v5936_v20  ;;  %v3975_v17 = vsub.f32 %v5819_v12, %v5921_v57 }
 0x2e5   :  { %v4024_v15 = vmul.f32 %v3996_v56, %v3996_v56  ;;  %v4025_v51 = vmul.f32 %v3997_v32, %v3997_v32  ;;  %v4026_v42 = vmul.f32 %v3998_v50, %v3998_v50  ;;  %v4001_v9 = vmul.f32 %v3973_v44, %v5751_v34 }
 0x2e6   :  { %v4027_v37 = vmul.f32 %v3999_v59, %v3999_v59  ;;  %v3976_v56 = vsub.f32 %v5827_v0, %v5921_v57  ;;  %v4002_v32 = vmul.f32 %v3974_v41, %v5804_v31  ;;  %v4028_v4 = vmul.f32 %v4000_v13, %v4000_v13 }
 0x2e7   :  { %v4052_v54 = vadd.f32 %v4025_v51, %v4024_v15  ;;  %v3984_v29 = vsub.f32 %v5764_v5, %v5936_v20  ;;  %v4010_v50 = vmul.f32 %v3982_v3, %v5699_v58  ;;  %v4011_v15 = vmul.f32 %v3983_v43, %v5710_v52 }
 0x2e8   :  { %v3977_v51 = vsub.f32 %v5833_v46, %v5921_v57  ;;  %v4003_v44 = vmul.f32 %v3975_v17, %v5807_v47  ;;  %v4029_v59 = vmul.f32 %v4001_v9, %v4001_v9  ;;  %v3985_v41 = vsub.f32 %v5777_v16, %v5936_v20 }
 0x2e9   :  { %v4053_v22 = vadd.f32 %v4052_v54, %v4026_v42  ;;  %v3978_v54 = vsub.f32 %v5878_v38, %v5921_v57  ;;  %v3979_v13 = vsub.f32 %v5886_v23, %v5921_v57  ;;  %v4004_v58 = vmul.f32 %v3976_v56, %v5791_v1 }
 0x2ea   :  { %v4030_v3 = vmul.f32 %v4002_v32, %v4002_v32  ;;  %v3986_v43 = vsub.f32 %v5780_v55, %v5936_v20  ;;  %v4012_v17 = vmul.f32 %v3984_v29, %v5725_v24  ;;  %v4038_v9 = vmul.f32 %v4010_v50, %v4010_v50 }
 0x2eb   :  { %v4054_v28 = vadd.f32 %v4053_v22, %v4027_v37  ;;  %v4039_v37 = vmul.f32 %v4011_v15, %v4011_v15  ;;  %v3981_v22 = vsub.f32 %v5889_v40, %v5921_v57  ;;  %v3987_v5 = vsub.f32 %v5786_v53, %v5936_v20 }
 0x2ec   :  { %v4013_v56 = vmul.f32 %v3985_v41, %v5734_v48  ;;  %v3980_v32 = vsub.f32 %v5883_v8, %v5921_v57  ;;  %v4032_v24 = vmul.f32 %v4004_v58, %v4004_v58  ;;  %v3988_v50 = vsub.f32 %v5830_v30, %v5936_v20 }
 0x2ed   :  { %v4055_v42 = vadd.f32 %v4054_v28, %v4028_v4  ;;  %v4005_v4 = vmul.f32 %v3977_v51, %v5800_v27  ;;  %v4031_v28 = vmul.f32 %v4003_v44, %v4003_v44  ;;  %v4014_v15 = vmul.f32 %v3986_v43, %v5743_v33 }
 0x2ee   :  { %v4040_v51 = vmul.f32 %v4012_v17, %v4012_v17  ;;  %v4068_v44 = vadd.f32 %v4039_v37, %v4038_v9  ;;  %v3989_v41 = vsub.f32 %v5840_v2, %v5936_v20  ;;  %v4041_v58 = vmul.f32 %v4013_v56, %v4013_v56 }
 0x2ef   :  { %v4056_v52 = vadd.f32 %v4055_v42, %v4029_v59  ;;  %v4006_v59 = vmul.f32 %v3978_v54, %v5858_v36  ;;  %v4007_v42 = vmul.f32 %v3979_v13, %v5871_v49  ;;  %v4015_v54 = vmul.f32 %v3987_v5, %v5751_v34 }
 0x2f0   :  { %v3990_v33 = vsub.f32 %v5843_v18, %v5936_v20  ;;  %v4016_v13 = vmul.f32 %v3988_v50, %v5804_v31  ;;  %v4042_v43 = vmul.f32 %v4014_v15, %v4014_v15  ;;  %v4017_v34 = vmul.f32 %v3989_v41, %v5807_v47 }
 0x2f1   :  { %v4057_v16 = vadd.f32 %v4056_v52, %v4030_v3  ;;  %v4009_v3 = vmul.f32 %v3981_v22, %v5863_v10  ;;  %v4033_v52 = vmul.f32 %v4005_v4, %v4005_v4  ;;  %v4034_v30 = vmul.f32 %v4006_v59, %v4006_v59 }
 0x2f2   :  { %v4035_v9 = vmul.f32 %v4007_v42, %v4007_v42  ;;  %v3991_v4 = vsub.f32 %v5849_v19, %v5936_v20  ;;  %v4043_v5 = vmul.f32 %v4015_v54, %v4015_v54  ;;  %v4044_v31 = vmul.f32 %v4016_v13, %v4016_v13 }
 0x2f3   :  { %v4058_v29 = vadd.f32 %v4057_v16, %v4031_v28  ;;  %v4069_v16 = vadd.f32 %v4068_v44, %v4040_v51  ;;  %v4008_v28 = vmul.f32 %v3980_v32, %v5824_v39  ;;  %v4037_v37 = vmul.f32 %v4009_v3, %v4009_v3 }
 0x2f4   :  { %v4045_v47 = vmul.f32 %v4017_v34, %v4017_v34  ;;  %v3995_v3 = vsub.f32 %v5897_v14, %v5936_v20 }
 0x2f5   :  { %v4059_v48 = vadd.f32 %v4058_v29, %v4032_v24  ;;  %v4070_v17 = vadd.f32 %v4069_v16, %v4041_v58  ;;  %v4036_v32 = vmul.f32 %v4008_v28, %v4008_v28  ;;  %v3992_v24 = vsub.f32 %v5894_v62, %v5936_v20 }
 0x2f6   :  { %v4018_v29 = vmul.f32 %v3990_v33, %v5791_v1  ;;  %v4064_v51 = vsel %vm3944_vm10, %v4037_v37, 0.0 }
 0x2f7   :  { %v4060_v53 = vadd.f32 %v4059_v48, %v4033_v52  ;;  %v4071_v56 = vadd.f32 %v4070_v17, %v4042_v43  ;;  %v3994_v52 = vsub.f32 %v5905_v26, %v5936_v20  ;;  %v4020_v1 = vmul.f32 %v3992_v24, %v5858_v36 }
 0x2f8   :  { %v4046_v48 = vmul.f32 %v4018_v29, %v4018_v29 }
 0x2f9   :  { %v4061_v22 = vadd.f32 %v4060_v53, %v4034_v30  ;;  %v4072_v50 = vadd.f32 %v4071_v56, %v4043_v5  ;;  %v3993_v53 = vsub.f32 %v5902_v60, %v5936_v20  ;;  %v4019_v30 = vmul.f32 %v3991_v4, %v5800_v27 }
 0x2fa   :  { %v4023_v27 = vmul.f32 %v3995_v3, %v5863_v10  ;;  %v4022_v28 = vmul.f32 %v3994_v52, %v5824_v39  ;;  %v4048_v33 = vmul.f32 %v4020_v1, %v4020_v1  ;;  %v4090_v39 = vld [vmem:[%s6109_s4] sm:$0xff] }
 0x2fb   :  { %v4062_v59 = vadd.f32 %v4061_v22, %v4035_v9  ;;  %v4073_v44 = vadd.f32 %v4072_v50, %v4044_v31  ;;  %v4021_v54 = vmul.f32 %v3993_v53, %v5871_v49  ;;  %v4047_v58 = vmul.f32 %v4019_v30, %v4019_v30  ;;  %v4094_v31 = vld [vmem:[%s6110_s5] sm:$0xff] }
 0x2fc   :  { %v4051_v9 = vmul.f32 %v4023_v27, %v4023_v27  ;;  %v4050_v37 = vmul.f32 %v4022_v28, %v4022_v28 }
 0x2fd   :  { %v4063_v15 = vadd.f32 %v4062_v59, %v4036_v32  ;;  %v4074_v41 = vadd.f32 %v4073_v44, %v4045_v47  ;;  %v4049_v43 = vmul.f32 %v4021_v54, %v4021_v54  ;;  %v4095_v47 = vld [vmem:[%s6110_s5 + $0x8] sm:$0xff] }
 0x2fe   :  { %v4080_v36 = vsel %vm3944_vm10, %v4051_v9, 0.0 }
 0x2ff   :  { %v4065_v42 = vadd.f32 %v4064_v51, %v4063_v15  ;;  %v4075_v16 = vadd.f32 %v4074_v41, %v4046_v48  ;;  %v4091_v51 = vld [vmem:[%s6109_s4 + $0x8] sm:$0xff] }
 0x301   :  { %4066 = vadd.xlane.f32.xlu1 %v4065_v42  ;;  %v4076_v13 = vadd.f32 %v4075_v16, %v4047_v58 }
 0x303   :  { %v4077_v17 = vadd.f32 %v4076_v13, %v4048_v33 }
 0x305   :  { %v4078_v22 = vadd.f32 %v4077_v17, %v4049_v43 }
 0x307   :  { %v4079_v4 = vadd.f32 %v4078_v22, %v4050_v37 }
 0x309   :  { %v4081_v34 = vadd.f32 %v4080_v36, %v4079_v4 }
 0x30b   :  { %4082 = vadd.xlane.f32.xlu0 %v4081_v34 }
 0x38e   :  { %v4067_v5 = vpop.xlane.xlu1 %4066 }
 0x38f   :  { %v4084_v49 = vmul.f32 0.0025510204, %v4067_v5 }
 0x391   :  { %v4086_v56 = vadd.f32 1e-05, %v4084_v49 }
 0x393   :  { %4745 = vrsqrt.f32 %v4086_v56 }
 0x398   :  { %v4083_v32 = vpop.xlane.xlu0 %4082 }
 0x399   :  { %v4085_v10 = vmul.f32 0.0025510204, %v4083_v32 }
 0x39b   :  { %v4087_v24 = vadd.f32 1e-05, %v4085_v10 }
 0x39d   :  { %v4746_v59 = vpop.eup %4745  ;;  %4747 = vrsqrt.f32 %v4087_v24 }
 0x39e   :  { %v4092_v29 = vmul.f32 %v4746_v59, %v4090_v39 }
 0x3a0   :  { %4102 = vperm.xlu1 %4719, %v4092_v29   ;;  %v4096_v50 = vmul.f32 %v4092_v29, %v5921_v57 }
 0x3a2   :  { %v4098_v15 = vsub.f32 %v4094_v31, %v4096_v50 }
 0x3a4   :  { %4140 = vperm.xlu1 %4719, %v4098_v15  }
 0x3a7   :  { %v4748_v53 = vpop.eup %4747 }
 0x3a8   :  { %v4093_v30 = vmul.f32 %v4748_v53, %v4091_v51 }
 0x3aa   :  { %4107 = vperm.xlu0 %4720, %v4093_v30   ;;  %v4097_v44 = vmul.f32 %v4093_v30, %v5936_v20 }
 0x3ac   :  { %v4099_v42 = vsub.f32 %v4095_v47, %v4097_v44 }
 0x3ae   :  { %4145 = vperm.xlu1 %4719, %v4099_v42  }
 0x41f   :  { %v4103_v3 = vpop.permute.xlu1 %4102 }
 0x420   :  { %v4110_v57 = vmul.f32 %v4103_v3, %v5702_v25  ;;  %v4111_v52 = vmul.f32 %v4103_v3, %v5705_v21  ;;  %v4112_v1 = vmul.f32 %v4103_v3, %v5746_v35  ;;  %v4113_v48 = vmul.f32 %v4103_v3, %v5754_v11 }
 0x421   :  { %v4114_v41 = vmul.f32 %v4103_v3, %v5759_v6  ;;  %v4115_v54 = vmul.f32 %v4103_v3, %v5772_v7  ;;  %v4116_v58 = vmul.f32 %v4103_v3, %v5816_v45  ;;  %v4117_v20 = vmul.f32 %v4103_v3, %v5819_v12 }
 0x422   :  { %v4118_v16 = vmul.f32 %v4103_v3, %v5827_v0  ;;  %v4119_v27 = vmul.f32 %v4103_v3, %v5833_v46  ;;  %v4120_v25 = vmul.f32 %v4103_v3, %v5878_v38  ;;  %v4121_v21 = vmul.f32 %v4103_v3, %v5886_v23 }
 0x423   :  { %v4122_v35 = vmul.f32 %v4103_v3, %v5883_v8  ;;  %v4123_v11 = vmul.f32 %v4103_v3, %v5889_v40  ;;  %v4141_v28 = vpop.permute.xlu1 %4140 }
 0x424   :  { %v4148_v6 = vadd.f32 %v4141_v28, %v4110_v57  ;;  %v4149_v33 = vadd.f32 %v4141_v28, %v4111_v52  ;;  %v4150_v7 = vadd.f32 %v4141_v28, %v4112_v1  ;;  %v4151_v13 = vadd.f32 %v4141_v28, %v4113_v48  ;;  %v6122_v57 = vld [vmem:[#allocation2_spill] sm:$0xff]  ;;  %v6123_v52 = vld [vmem:[#allocation3_spill] sm:$0xff]  ;;  %v6124_v48 = vld [vmem:[#allocation4_spill] sm:$0xff] }
 0x425   :  { %v4152_v45 = vadd.f32 %v4141_v28, %v4114_v41  ;;  %v4153_v43 = vadd.f32 %v4141_v28, %v4115_v54  ;;  %v4154_v12 = vadd.f32 %v4141_v28, %v4116_v58  ;;  %v4155_v17 = vadd.f32 %v4141_v28, %v4117_v20  ;;  %v6125_v54 = vld [vmem:[#allocation5_spill] sm:$0xff] }
 0x426   :  { %v4156_v0 = vadd.f32 %v4141_v28, %v4118_v16  ;;  %v4157_v9 = vadd.f32 %v4141_v28, %v4119_v27  ;;  %v4158_v46 = vadd.f32 %v4141_v28, %v4120_v25  ;;  %v4159_v37 = vadd.f32 %v4141_v28, %v4121_v21 }
 0x427   :  { %v4160_v38 = vadd.f32 %v4141_v28, %v4122_v35  ;;  %v4161_v22 = vadd.f32 %v4141_v28, %v4123_v11  ;;  %v4176_v23 = vmax.f32 %v4148_v6, 0.0  ;;  %v4177_v4 = vmax.f32 %v4149_v33, 0.0 }
 0x428   :  { %v4178_v8 = vmax.f32 %v4150_v7, 0.0  ;;  %v4179_v36 = vmax.f32 %v4151_v13, 0.0  ;;  %v4180_v40 = vmax.f32 %v4152_v45, 0.0  ;;  %v4181_v34 = vmax.f32 %v4153_v43, 0.0 }
 0x429   :  { %v4182_v5 = vmax.f32 %v4154_v12, 0.0  ;;  %v4183_v49 = vmax.f32 %v4155_v17, 0.0  ;;  %v4184_v56 = vmax.f32 %v4156_v0, 0.0  ;;  %v4185_v32 = vmax.f32 %v4157_v9, 0.0  ;;  %v4108_v53 = vpop.permute.xlu0 %4107 }
 0x42a   :  { %v4186_v39 = vmax.f32 %v4158_v46, 0.0  ;;  %v4187_v10 = vmax.f32 %v4159_v37, 0.0  ;;  %v4188_v59 = vmax.f32 %v4160_v38, 0.0  ;;  %v4189_v24 = vmax.f32 %v4161_v22, 0.0 }
 0x42b   :  { %v4472_v29 = vpack.c.bf16 %v4177_v4, %v4176_v23  ;;  %v4473_v31 = vpack.c.bf16 %v4179_v36, %v4178_v8  ;;  %v4474_v50 = vpack.c.bf16 %v4181_v34, %v4180_v40  ;;  %v4475_v15 = vpack.c.bf16 %v4183_v49, %v4182_v5 }
 0x42c   :  { %v4476_v30 = vpack.c.bf16 %v4185_v32, %v4184_v56  ;;  %v4477_v47 = vpack.c.bf16 %v4187_v10, %v4186_v39  ;;  %v4478_v44 = vpack.c.bf16 %v4189_v24, %v4188_v59  ;;  %v4124_v42 = vmul.f32 %v4108_v53, %v5715_v63 }
 0x42d   :  { %v4125_v3 = vmul.f32 %v4108_v53, %v5718_v61  ;;  %4288 = vst [vmem:[%s6111_s6] sm:$0xff] %v4472_v29  ;;  %4289 = vst [vmem:[%s6111_s6 + $0x8] sm:$0xff] %v4473_v31  ;;  %v4126_v63 = vmul.f32 %v4108_v53, %v6122_v57  ;;  %v4127_v61 = vmul.f32 %v4108_v53, %v6123_v52  ;;  %v4146_v11 = vpop.permute.xlu1 %4145 }
 0x42e   :  { %4290 = vst [vmem:[%s6111_s6 + $0x10] sm:$0xff] %v4474_v50  ;;  %4291 = vst [vmem:[%s6111_s6 + $0x18] sm:$0xff] %v4475_v15  ;;  %v4128_v1 = vmul.f32 %v4108_v53, %v5780_v55  ;;  %v4129_v41 = vmul.f32 %v4108_v53, %v6124_v48  ;;  %v4130_v58 = vmul.f32 %v4108_v53, %v6125_v54 }
 0x42f   :  { %4292 = vst [vmem:[%s6111_s6 + $0x20] sm:$0xff] %v4476_v30  ;;  %4293 = vst [vmem:[%s6111_s6 + $0x28] sm:$0xff] %v4477_v47  ;;  %v4131_v55 = vmul.f32 %v4108_v53, %v5840_v2  ;;  %v4132_v20 = vmul.f32 %v4108_v53, %v5843_v18  ;;  %v4133_v16 = vmul.f32 %v4108_v53, %v5849_v19 }
 0x430   :  { %4296 = vst.msk [vmem:[%s6111_s6 + $0x30] sm:$0xff] %vm6041_vm12, %v4478_v44  ;;  %v4134_v27 = vmul.f32 %v4108_v53, %v5894_v62  ;;  %v4135_v25 = vmul.f32 %v4108_v53, %v5902_v60  ;;  %v4136_v21 = vmul.f32 %v4108_v53, %v5905_v26  ;;  %v4137_v35 = vmul.f32 %v4108_v53, %v5897_v14 }
 0x431   :  { %v4162_v28 = vadd.f32 %v4146_v11, %v4124_v42  ;;  %v4163_v6 = vadd.f32 %v4146_v11, %v4125_v3  ;;  %v4164_v33 = vadd.f32 %v4146_v11, %v4126_v63  ;;  %v4165_v7 = vadd.f32 %v4146_v11, %v4127_v61 }
 0x432   :  { %v4166_v13 = vadd.f32 %v4146_v11, %v4128_v1  ;;  %v4167_v45 = vadd.f32 %v4146_v11, %v4129_v41  ;;  %v4168_v2 = vadd.f32 %v4146_v11, %v4130_v58  ;;  %v4169_v43 = vadd.f32 %v4146_v11, %v4131_v55 }
 0x433   :  { %v4170_v18 = vadd.f32 %v4146_v11, %v4132_v20  ;;  %v4171_v12 = vadd.f32 %v4146_v11, %v4133_v16  ;;  %v4172_v19 = vadd.f32 %v4146_v11, %v4134_v27  ;;  %v4173_v17 = vadd.f32 %v4146_v11, %v4135_v25 }
 0x434   :  { %v4174_v62 = vadd.f32 %v4146_v11, %v4136_v21  ;;  %v4175_v0 = vadd.f32 %v4146_v11, %v4137_v35  ;;  %v4190_v60 = vmax.f32 %v4162_v28, 0.0  ;;  %v4191_v9 = vmax.f32 %v4163_v6, 0.0 }
 0x435   :  { %v4192_v26 = vmax.f32 %v4164_v33, 0.0  ;;  %v4193_v46 = vmax.f32 %v4165_v7, 0.0  ;;  %v4194_v14 = vmax.f32 %v4166_v13, 0.0  ;;  %v4195_v37 = vmax.f32 %v4167_v45, 0.0 }
 0x436   :  { %v4196_v38 = vmax.f32 %v4168_v2, 0.0  ;;  %v4197_v22 = vmax.f32 %v4169_v43, 0.0  ;;  %v4198_v23 = vmax.f32 %v4170_v18, 0.0  ;;  %v4199_v4 = vmax.f32 %v4171_v12, 0.0 }
 0x437   :  { %v4200_v8 = vmax.f32 %v4172_v19, 0.0  ;;  %v4201_v36 = vmax.f32 %v4173_v17, 0.0  ;;  %v4202_v40 = vmax.f32 %v4174_v62, 0.0  ;;  %v4203_v34 = vmax.f32 %v4175_v0, 0.0 }
 0x438   :  { %v4479_v5 = vpack.c.bf16 %v4191_v9, %v4190_v60  ;;  %v4480_v49 = vpack.c.bf16 %v4193_v46, %v4192_v26  ;;  %v4481_v56 = vpack.c.bf16 %v4195_v37, %v4194_v14  ;;  %v4482_v32 = vpack.c.bf16 %v4197_v22, %v4196_v38 }
 0x439   :  { %v4483_v39 = vpack.c.bf16 %v4199_v4, %v4198_v23  ;;  %v4484_v10 = vpack.c.bf16 %v4201_v36, %v4200_v8  ;;  %v4485_v59 = vpack.c.bf16 %v4203_v34, %v4202_v40 }
 0x43a   :  { %4297 = vst [vmem:[%s6111_s6 + $0x38] sm:$0xff] %v4479_v5  ;;  %4298 = vst [vmem:[%s6111_s6 + $0x40] sm:$0xff] %v4480_v49 }
 0x43b   :  { %4299 = vst [vmem:[%s6111_s6 + $0x48] sm:$0xff] %v4481_v56  ;;  %4300 = vst [vmem:[%s6111_s6 + $0x50] sm:$0xff] %v4482_v32 }
 0x43c   :  { %4301 = vst [vmem:[%s6111_s6 + $0x58] sm:$0xff] %v4483_v39  ;;  %4302 = vst [vmem:[%s6111_s6 + $0x60] sm:$0xff] %v4484_v10 }
 0x43d   :  { %4303 = vst.msk [vmem:[%s6111_s6 + $0x68] sm:$0xff] %vm6041_vm12, %v4485_v59 }

// kernel: forward.7
= control target key start
LH: loop header
LB: loop body
LE: loop exit
PB: predicated region body
PF: predicated region fallthrough
CT: control target
= control target key end

     0   :  { %v2031_v1 = vmov 0   ;;  %s2032_s25 = smov 127   ;;  %s2033_s30 = smov 126   ;;  %vm102_vm0 = vcmask 1039360   ;;  %vm110_vm1 = vcmask 130048   ;;  %vm367_vm2 = vcmask 1031168   ;;  %s2502_s0 = inlined_call_operand.vmem [shape: bf16[16,512], index: 0, kind: input, shape index: {}]   ;;  %s2503_s1 = inlined_call_operand.vmem [shape: bf16[9,32,16], index: 1, kind: input, shape index: {}]   ;;  %s2504_s2 = inlined_call_operand.vmem [shape: f32[32,1], index: 2, kind: input, shape index: {}]   ;;  %s2505_s3 = inlined_call_operand.vmem [shape: f32[1,478], index: 3, kind: input, shape index: {}]   ;;  %s2506_s4 = inlined_call_operand.vmem [shape: f32[32,1], index: 4, kind: input, shape index: {}]   ;;  %s2507_s5 = inlined_call_operand.vmem [shape: f32[32,1], index: 5, kind: input, shape index: {}]   ;;  %s2508_s6 = inlined_call_operand.vmem [shape: bf16[1,32,478], index: 6, kind: output, shape index: {}]  }
   0x1   :  { %v2078_v0 = vld [vmem:[%s2502_s0 + $0x4] ss:$16 sps:$4 sm:$0xff]   ;;  %202 = vmatprep.mubr.bf16.mxu1 %v2031_v1  ;;  %149 = vmatprep.mubr.bf16.mxu0 %v2031_v1  ;;  %v2085_v2 = vld [vmem:[%s2502_s0] ss:$16 sps:$4 sm:$0xff]   ;;  %v2093_v3 = vld [vmem:[%s2502_s0 + $0x8] ss:$16 sps:$4 sm:$0xff]  }
   0x2   :  { %1997 = vset.pattern.permute.xlu0 %v2031_v1  ;;  %1998 = vset.pattern.permute.xlu1 %v2031_v1  ;;  %v2004_v4 = vld [vmem:[%s2502_s0 + $0xc] ss:$16 sps:$4 sm:$0xff]   ;;  %s2034_s7 = smov 112   ;;  %s2035_s0 = smov 111   ;;  %v2005_v12 = vld [vmem:[%s2503_s1 + $0x10] sm:$0xff]   ;;  %v64_v18 = vld [vmem:[%s2504_s2] sm:$0xff] }
   0x3   :  { %96 = vrot.lane.b32.xlu0 %v2078_v0, %s2032_s25  ;;  %94 = vrot.lane.b32.xlu1 %v2085_v2, %s2032_s25  ;;  %s2036_s8 = smov 110   ;;  %s2037_s9 = smov 96   ;;  %v2006_v17 = vld [vmem:[%s2503_s1 + $0x18] sm:$0xff]   ;;  %v65_v19 = vld [vmem:[%s2504_s2 + $0x8] sm:$0xff]  ;;  %vm521_vm3 = vcmask 916480   ;;  %vm675_vm4 = vcmask 908288  }
   0x4   :  { %s2038_s10 = smov 95   ;;  %s2039_s11 = smov 94   ;;  %v67_v22 = vld [vmem:[%s2504_s2 + $0x18] sm:$0xff]  ;;  %v66_v23 = vld [vmem:[%s2504_s2 + $0x10] sm:$0xff]  ;;  %v2007_v24 = vld [vmem:[%s2503_s1] sm:$0xff]   ;;  %vm829_vm5 = vcmask 900096  }
   0x5   :  { %v2008_v30 = vld [vmem:[%s2503_s1 + $0x8] sm:$0xff]   ;;  %v2009_v33 = vld [vmem:[%s2503_s1 + $0x20] sm:$0xff]   ;;  %v2011_v42 = vld [vmem:[%s2503_s1 + $0x30] sm:$0xff]   ;;  %vm983_vm6 = vcmask 785408   ;;  %vm1137_vm7 = vcmask 777216   ;;  %vm1291_vm8 = vcmask 769024  }
   0x6   :  { %v2010_v39 = vld [vmem:[%s2503_s1 + $0x28] sm:$0xff]   ;;  %v2012_v48 = vld [vmem:[%s2503_s1 + $0x38] sm:$0xff]   ;;  %v2013_v51 = vld [vmem:[%s2503_s1 + $0x40] sm:$0xff]   ;;  %vm1772_vm9 = vcmask 1043456   ;;  %vm1773_vm10 = vcmask 769028  }
   0x7   :  { %98 = vrot.lane.b32.xlu0 %v2093_v3, %s2032_s25  ;;  %100 = vrot.lane.b32.xlu1 %v2004_v4, %s2032_s25  ;;  %v2014_v57 = vld [vmem:[%s2503_s1 + $0x48] sm:$0xff]   ;;  %v2015_v60 = vld [vmem:[%s2503_s1 + $0x50] sm:$0xff]   ;;  %vm2458_vm11 = vmor %vm1773_vm10, %vm1772_vm9 }
   0xb   :  { %361 = vrot.lane.b32.xlu0 %v2078_v0, %s2033_s30  ;;  %363 = vrot.lane.b32.xlu1 %v2093_v3, %s2033_s30 }
   0xf   :  { %359 = vrot.lane.b32.xlu0 %v2085_v2, %s2033_s30  ;;  %365 = vrot.lane.b32.xlu1 %v2004_v4, %s2033_s30 }
  0x13   :  { %515 = vrot.lane.b32.xlu0 %v2078_v0, %s2034_s7  ;;  %517 = vrot.lane.b32.xlu1 %v2093_v3, %s2034_s7 }
  0x17   :  { %513 = vrot.lane.b32.xlu0 %v2085_v2, %s2034_s7  ;;  %519 = vrot.lane.b32.xlu1 %v2004_v4, %s2034_s7 }
  0x1b   :  { %669 = vrot.lane.b32.xlu0 %v2078_v0, %s2035_s0  ;;  %671 = vrot.lane.b32.xlu1 %v2093_v3, %s2035_s0 }
  0x1f   :  { %667 = vrot.lane.b32.xlu0 %v2085_v2, %s2035_s0  ;;  %673 = vrot.lane.b32.xlu1 %v2004_v4, %s2035_s0 }
  0x23   :  { %823 = vrot.lane.b32.xlu0 %v2078_v0, %s2036_s8  ;;  %825 = vrot.lane.b32.xlu1 %v2093_v3, %s2036_s8 }
  0x27   :  { %821 = vrot.lane.b32.xlu0 %v2085_v2, %s2036_s8  ;;  %827 = vrot.lane.b32.xlu1 %v2004_v4, %s2036_s8 }
  0x2b   :  { %977 = vrot.lane.b32.xlu0 %v2078_v0, %s2037_s9  ;;  %979 = vrot.lane.b32.xlu1 %v2093_v3, %s2037_s9 }
  0x2f   :  { %975 = vrot.lane.b32.xlu0 %v2085_v2, %s2037_s9  ;;  %981 = vrot.lane.b32.xlu1 %v2004_v4, %s2037_s9 }
  0x33   :  { %1131 = vrot.lane.b32.xlu0 %v2078_v0, %s2038_s10  ;;  %1133 = vrot.lane.b32.xlu1 %v2093_v3, %s2038_s10 }
  0x37   :  { %1129 = vrot.lane.b32.xlu0 %v2085_v2, %s2038_s10  ;;  %1135 = vrot.lane.b32.xlu1 %v2004_v4, %s2038_s10 }
  0x3b   :  { %1285 = vrot.lane.b32.xlu0 %v2078_v0, %s2039_s11  ;;  %1287 = vrot.lane.b32.xlu1 %v2093_v3, %s2039_s11 }
  0x3f   :  { %1283 = vrot.lane.b32.xlu0 %v2085_v2, %s2039_s11  ;;  %1289 = vrot.lane.b32.xlu1 %v2004_v4, %s2039_s11 }
  0x43   :  { %1429 = vperm.xlu0 %1997, %v64_v18   ;;  %1434 = vperm.xlu1 %1998, %v65_v19   ;;  %v2021_v18 = vld [vmem:[%s2503_s1 + $0x80] sm:$0xff]   ;;  %v2022_v19 = vld [vmem:[%s2503_s1 + $0x88] sm:$0xff]  }
  0x47   :  { %1444 = vperm.xlu0 %1997, %v67_v22   ;;  %1439 = vperm.xlu1 %1998, %v66_v23   ;;  %v1463_v23 = vld [vmem:[%s2505_s3] sm:$0xf] }
  0x75   :  { %v97_v5 = vpop.permute.xlu0 %96  ;;  %v95_v6 = vpop.permute.xlu1 %94 }
  0x76   :  { %v103_v11 = vsel %vm102_vm0, %v95_v6, %v97_v5  ;;  %v2017_v6 = vld [vmem:[%s2503_s1 + $0x60] sm:$0xff]  }
  0x79   :  { %v99_v7 = vpop.permute.xlu0 %98  ;;  %v101_v8 = vpop.permute.xlu1 %100 }
  0x7a   :  { %v104_v9 = vsel %vm102_vm0, %v97_v5, %v99_v7  ;;  %170 = vmatprep.subr.bf16.mxu1 %v101_v8  ;;  %v105_v10 = vsel %vm102_vm0, %v99_v7, %v101_v8 }
  0x7b   :  { %117 = vmatprep.subr.bf16.mxu0 %v104_v9  ;;  %171 = vmatpush1.bf16.msra.mxu1 %v105_v10 }
  0x7c   :  { %118 = vmatpush1.bf16.msra.mxu0 %v103_v11  ;;  %296 = vmatprep.subr.bf16.mxu1 %v2004_v4 }
  0x7d   :  { %243 = vmatprep.subr.bf16.mxu0 %v2078_v0  ;;  %v362_v13 = vpop.permute.xlu0 %361  ;;  %v364_v14 = vpop.permute.xlu1 %363 }
  0x7e   :  { %1794 = vmatmul.mubr.msk.bf16.vlgmr.msra.gmra.mrb[0].mxu1 %vm110_vm1, %v2005_v12  ;;  %v369_v15 = vsel %vm367_vm2, %v362_v13, %v364_v14 }
  0x7f   :  { %1792 = vmatmul.mubr.msk.bf16.vlgmr.msra.gmra.mrb[0].mxu0 %vm110_vm1, %v2005_v12  ;;  %297 = vmatpush1.bf16.msra.mxu1 %v2093_v3  ;;  %v2016_v3 = vld [vmem:[%s2503_s1 + $0x58] sm:$0xff]   ;;  %v2018_v12 = vld [vmem:[%s2503_s1 + $0x68] sm:$0xff]  }
  0x80   :  { %244 = vmatpush1.bf16.msra.mxu0 %v2085_v2  ;;  %212 = vmatprep.mubr.bf16.mxu1 %v2031_v1 }
  0x81   :  { %159 = vmatprep.mubr.bf16.mxu0 %v2031_v1  ;;  %381 = vmatprep.subr.bf16.mxu0 %v369_v15  ;;  %v366_v16 = vpop.permute.xlu1 %365  ;;  %v360_v21 = vpop.permute.xlu0 %359 }
  0x82   :  { %434 = vmatprep.subr.bf16.mxu1 %v366_v16  ;;  %v368_v25 = vsel %vm367_vm2, %v360_v21, %v362_v13  ;;  %v370_v26 = vsel %vm367_vm2, %v364_v14, %v366_v16  ;;  %v2019_v14 = vld [vmem:[%s2503_s1 + $0x70] sm:$0xff]  }
  0x85   :  { %v518_v20 = vpop.permute.xlu1 %517  ;;  %v516_v27 = vpop.permute.xlu0 %515 }
  0x86   :  { %1795 = vmatmul.mubr.msk.bf16.gmra.mrb[4].mxu1 %vm110_vm1, %v2006_v17  ;;  %v523_v28 = vsel %vm521_vm3, %v516_v27, %v518_v20 }
  0x87   :  { %1793 = vmatmul.mubr.msk.bf16.gmra.mrb[4].mxu0 %vm110_vm1, %v2006_v17  ;;  %328 = vmatprep.mubr.bf16.mxu1 %v2031_v1  ;;  %v2020_v17 = vld [vmem:[%s2503_s1 + $0x78] sm:$0xff]  }
  0x88   :  { %275 = vmatprep.mubr.bf16.mxu0 %v2031_v1 }
  0x89   :  { %v520_v29 = vpop.permute.xlu1 %519  ;;  %v514_v32 = vpop.permute.xlu0 %513 }
  0x8a   :  { %v522_v34 = vsel %vm521_vm3, %v514_v32, %v516_v27  ;;  %v524_v35 = vsel %vm521_vm3, %v518_v20, %v520_v29  ;;  %v1465_v20 = vlaneseq }
  0x8c   :  { %v1466_v21 = vshrl.u32 %v1465_v20, 7 }
  0x8d   :  { %v672_v31 = vpop.permute.xlu1 %671  ;;  %v670_v36 = vpop.permute.xlu0 %669 }
  0x8e   :  { %1800 = vmatmul.mubr.msk.bf16.vlgmr.msra.gmra.mrb[0].mxu1 %vm110_vm1, %v2007_v24  ;;  %v677_v37 = vsel %vm675_vm4, %v670_v36, %v672_v31  ;;  %v1467_v22 = vsub.s32 0, %v1466_v21  ;;  %v1475_v27 = vsub.s32 2, %v1466_v21 }
  0x8f   :  { %1798 = vmatmul.mubr.msk.bf16.vlgmr.msra.gmra.mrb[0].mxu0 %vm110_vm1, %v2007_v24  ;;  %435 = vmatpush1.bf16.msra.mxu1 %v370_v26  ;;  %v1471_v24 = vsub.s32 1, %v1466_v21 }
  0x90   :  { %382 = vmatpush1.bf16.msra.mxu0 %v368_v25  ;;  %338 = vmatprep.mubr.bf16.mxu1 %v2031_v1  ;;  %v1479_v25 = vsub.s32 3, %v1466_v21 }
  0x91   :  { %285 = vmatprep.mubr.bf16.mxu0 %v2031_v1  ;;  %535 = vmatprep.subr.bf16.mxu0 %v523_v28  ;;  %v674_v38 = vpop.permute.xlu1 %673  ;;  %v668_v41 = vpop.permute.xlu0 %667 }
  0x92   :  { %588 = vmatprep.subr.bf16.mxu1 %v520_v29  ;;  %v676_v43 = vsel %vm675_vm4, %v668_v41, %v670_v36  ;;  %v678_v44 = vsel %vm675_vm4, %v672_v31, %v674_v38  ;;  %v2286_v31 = vrot.slane %v1463_v23, %v1471_v24 }
  0x95   :  { %v826_v40 = vpop.permute.xlu1 %825  ;;  %v824_v45 = vpop.permute.xlu0 %823 }
  0x96   :  { %1801 = vmatmul.mubr.msk.bf16.gmra.mrb[4].mxu1 %vm110_vm1, %v2008_v30  ;;  %v831_v46 = vsel %vm829_vm5, %v824_v45, %v826_v40 }
  0x97   :  { %1799 = vmatmul.mubr.msk.bf16.gmra.mrb[4].mxu0 %vm110_vm1, %v2008_v30  ;;  %466 = vmatprep.mubr.bf16.mxu1 %v2031_v1 }
  0x98   :  { %413 = vmatprep.mubr.bf16.mxu0 %v2031_v1 }
  0x99   :  { %v828_v47 = vpop.permute.xlu1 %827  ;;  %v822_v50 = vpop.permute.xlu0 %821 }
  0x9a   :  { %v830_v52 = vsel %vm829_vm5, %v822_v50, %v824_v45  ;;  %v832_v53 = vsel %vm829_vm5, %v826_v40, %v828_v47 }
  0x9d   :  { %v980_v49 = vpop.permute.xlu1 %979  ;;  %v978_v54 = vpop.permute.xlu0 %977 }
  0x9e   :  { %1806 = vmatmul.mubr.msk.bf16.vlgmr.msra.gmra.mrb[0].mxu1 %vm110_vm1, %v2009_v33  ;;  %v985_v55 = vsel %vm983_vm6, %v978_v54, %v980_v49 }
  0x9f   :  { %1804 = vmatmul.mubr.msk.bf16.vlgmr.msra.gmra.mrb[0].mxu0 %vm110_vm1, %v2009_v33  ;;  %589 = vmatpush1.bf16.msra.mxu1 %v524_v35  ;;  %v2290_v35 = vrot.slane %v1463_v23, %v1479_v25 }
  0xa0   :  { %536 = vmatpush1.bf16.msra.mxu0 %v522_v34  ;;  %476 = vmatprep.mubr.bf16.mxu1 %v2031_v1 }
  0xa1   :  { %423 = vmatprep.mubr.bf16.mxu0 %v2031_v1  ;;  %689 = vmatprep.subr.bf16.mxu0 %v677_v37  ;;  %v982_v56 = vpop.permute.xlu1 %981  ;;  %v976_v59 = vpop.permute.xlu0 %975  ;;  %v2294_v37 = vrot.slane %v1463_v23, %v1475_v27 }
  0xa2   :  { %742 = vmatprep.subr.bf16.mxu1 %v674_v38  ;;  %v984_v61 = vsel %vm983_vm6, %v976_v59, %v978_v54  ;;  %v986_v62 = vsel %vm983_vm6, %v980_v49, %v982_v56 }
  0xa5   :  { %v1134_v58 = vpop.permute.xlu1 %1133  ;;  %v1132_v63 = vpop.permute.xlu0 %1131 }
  0xa6   :  { %1807 = vmatmul.mubr.msk.bf16.gmra.mrb[4].mxu1 %vm110_vm1, %v2010_v39  ;;  %v1139_v0 = vsel %vm1137_vm7, %v1132_v63, %v1134_v58 }
  0xa7   :  { %1805 = vmatmul.mubr.msk.bf16.gmra.mrb[4].mxu0 %vm110_vm1, %v2010_v39  ;;  %620 = vmatprep.mubr.bf16.mxu1 %v2031_v1 }
  0xa8   :  { %567 = vmatprep.mubr.bf16.mxu0 %v2031_v1 }
  0xa9   :  { %v1136_v2 = vpop.permute.xlu1 %1135  ;;  %v1130_v5 = vpop.permute.xlu0 %1129 }
  0xaa   :  { %v1138_v7 = vsel %vm1137_vm7, %v1130_v5, %v1132_v63  ;;  %v1140_v8 = vsel %vm1137_vm7, %v1134_v58, %v1136_v2 }
  0xad   :  { %v1288_v4 = vpop.permute.xlu1 %1287  ;;  %v1286_v9 = vpop.permute.xlu0 %1285 }
  0xae   :  { %1812 = vmatmul.mubr.msk.bf16.vlgmr.msra.gmra.mrb[0].mxu1 %vm110_vm1, %v2011_v42  ;;  %v1293_v10 = vsel %vm1291_vm8, %v1286_v9, %v1288_v4 }
  0xaf   :  { %1810 = vmatmul.mubr.msk.bf16.vlgmr.msra.gmra.mrb[0].mxu0 %vm110_vm1, %v2011_v42  ;;  %743 = vmatpush1.bf16.msra.mxu1 %v678_v44 }
  0xb0   :  { %690 = vmatpush1.bf16.msra.mxu0 %v676_v43  ;;  %630 = vmatprep.mubr.bf16.mxu1 %v2031_v1 }
  0xb1   :  { %577 = vmatprep.mubr.bf16.mxu0 %v2031_v1  ;;  %843 = vmatprep.subr.bf16.mxu0 %v831_v46  ;;  %v1290_v11 = vpop.permute.xlu1 %1289  ;;  %v1284_v13 = vpop.permute.xlu0 %1283 }
  0xb2   :  { %896 = vmatprep.subr.bf16.mxu1 %v828_v47  ;;  %v1292_v15 = vsel %vm1291_vm8, %v1284_v13, %v1286_v9  ;;  %v1294_v16 = vsel %vm1291_vm8, %v1288_v4, %v1290_v11 }
  0xb6   :  { %1813 = vmatmul.mubr.msk.bf16.gmra.mrb[4].mxu1 %vm110_vm1, %v2012_v48 }
  0xb7   :  { %1811 = vmatmul.mubr.msk.bf16.gmra.mrb[4].mxu0 %vm110_vm1, %v2012_v48  ;;  %774 = vmatprep.mubr.bf16.mxu1 %v2031_v1 }
  0xb8   :  { %721 = vmatprep.mubr.bf16.mxu0 %v2031_v1 }
  0xbe   :  { %1818 = vmatmul.mubr.msk.bf16.vlgmr.msra.gmra.mrb[0].mxu1 %vm110_vm1, %v2013_v51 }
  0xbf   :  { %1816 = vmatmul.mubr.msk.bf16.vlgmr.msra.gmra.mrb[0].mxu0 %vm110_vm1, %v2013_v51  ;;  %897 = vmatpush1.bf16.msra.mxu1 %v832_v53 }
  0xc0   :  { %844 = vmatpush1.bf16.msra.mxu0 %v830_v52  ;;  %784 = vmatprep.mubr.bf16.mxu1 %v2031_v1 }
  0xc1   :  { %731 = vmatprep.mubr.bf16.mxu0 %v2031_v1  ;;  %997 = vmatprep.subr.bf16.mxu0 %v985_v55 }
  0xc2   :  { %1050 = vmatprep.subr.bf16.mxu1 %v982_v56  ;;  %v1430_v26 = vpop.permute.xlu0 %1429  ;;  %v1435_v28 = vpop.permute.xlu1 %1434 }
  0xc6   :  { %1819 = vmatmul.mubr.msk.bf16.gmra.mrb[4].mxu1 %vm110_vm1, %v2014_v57  ;;  %v1445_v55 = vpop.permute.xlu0 %1444  ;;  %v1440_v56 = vpop.permute.xlu1 %1439 }
  0xc7   :  { %1817 = vmatmul.mubr.msk.bf16.gmra.mrb[4].mxu0 %vm110_vm1, %v2014_v57  ;;  %928 = vmatprep.mubr.bf16.mxu1 %v2031_v1 }
  0xc8   :  { %875 = vmatprep.mubr.bf16.mxu0 %v2031_v1 }
  0xce   :  { %1824 = vmatmul.mubr.msk.bf16.vlgmr.msra.gmra.mrb[0].mxu1 %vm110_vm1, %v2015_v60 }
  0xcf   :  { %1822 = vmatmul.mubr.msk.bf16.vlgmr.msra.gmra.mrb[0].mxu0 %vm110_vm1, %v2015_v60  ;;  %1051 = vmatpush1.bf16.msra.mxu1 %v986_v62 }
  0xd0   :  { %998 = vmatpush1.bf16.msra.mxu0 %v984_v61  ;;  %938 = vmatprep.mubr.bf16.mxu1 %v2031_v1 }
  0xd1   :  { %885 = vmatprep.mubr.bf16.mxu0 %v2031_v1  ;;  %1151 = vmatprep.subr.bf16.mxu0 %v1139_v0 }
  0xd2   :  { %1204 = vmatprep.subr.bf16.mxu1 %v1136_v2 }
  0xd6   :  { %1825 = vmatmul.mubr.msk.bf16.gmra.mrb[4].mxu1 %vm110_vm1, %v2016_v3 }
  0xd7   :  { %1823 = vmatmul.mubr.msk.bf16.gmra.mrb[4].mxu0 %vm110_vm1, %v2016_v3  ;;  %1082 = vmatprep.mubr.bf16.mxu1 %v2031_v1 }
  0xd8   :  { %1029 = vmatprep.mubr.bf16.mxu0 %v2031_v1 }
  0xde   :  { %1830 = vmatmul.mubr.msk.bf16.vlgmr.msra.gmra.mrb[0].mxu1 %vm110_vm1, %v2017_v6 }
  0xdf   :  { %1828 = vmatmul.mubr.msk.bf16.vlgmr.msra.gmra.mrb[0].mxu0 %vm110_vm1, %v2017_v6  ;;  %1205 = vmatpush1.bf16.msra.mxu1 %v1140_v8 }
  0xe0   :  { %1152 = vmatpush1.bf16.msra.mxu0 %v1138_v7  ;;  %1092 = vmatprep.mubr.bf16.mxu1 %v2031_v1 }
  0xe1   :  { %1039 = vmatprep.mubr.bf16.mxu0 %v2031_v1  ;;  %1305 = vmatprep.subr.bf16.mxu0 %v1293_v10 }
  0xe2   :  { %1358 = vmatprep.subr.bf16.mxu1 %v1290_v11 }
  0xe6   :  { %1831 = vmatmul.mubr.msk.bf16.gmra.mrb[4].mxu1 %vm110_vm1, %v2018_v12 }
  0xe7   :  { %1829 = vmatmul.mubr.msk.bf16.gmra.mrb[4].mxu0 %vm110_vm1, %v2018_v12  ;;  %1236 = vmatprep.mubr.bf16.mxu1 %v2031_v1 }
  0xe8   :  { %1183 = vmatprep.mubr.bf16.mxu0 %v2031_v1 }
  0xee   :  { %1836 = vmatmul.mubr.msk.bf16.vlgmr.msra.gmra.mrb[0].mxu1 %vm110_vm1, %v2019_v14 }
  0xef   :  { %1834 = vmatmul.mubr.msk.bf16.vlgmr.msra.gmra.mrb[0].mxu0 %vm110_vm1, %v2019_v14  ;;  %1359 = vmatpush1.bf16.msra.mxu1 %v1294_v16 }
  0xf0   :  { %1306 = vmatpush1.bf16.msra.mxu0 %v1292_v15  ;;  %1246 = vmatprep.mubr.bf16.mxu1 %v2031_v1 }
  0xf1   :  { %1193 = vmatprep.mubr.bf16.mxu0 %v2031_v1 }
  0xf6   :  { %1837 = vmatmul.mubr.msk.bf16.gmra.mrb[4].mxu1 %vm110_vm1, %v2020_v17 }
  0xf7   :  { %1835 = vmatmul.mubr.msk.bf16.gmra.mrb[4].mxu0 %vm110_vm1, %v2020_v17  ;;  %1390 = vmatprep.mubr.bf16.mxu1 %v2031_v1 }
  0xf8   :  { %1337 = vmatprep.mubr.bf16.mxu0 %v2031_v1 }
  0xfe   :  { %1842 = vmatmul.mubr.msk.bf16.vlgmr.msra.gmra.mrb[0].mxu1 %vm110_vm1, %v2021_v18 }
  0xff   :  { %1840 = vmatmul.mubr.msk.bf16.vlgmr.msra.gmra.mrb[0].mxu0 %vm110_vm1, %v2021_v18  ;;  %1400 = vmatprep.mubr.bf16.mxu1 %v2031_v1 }
 0x100   :  { %1347 = vmatprep.mubr.bf16.mxu0 %v2031_v1  ;;  %v2284_v1 = vrot.slane %v1463_v23, %v1467_v22 }
 0x106   :  { %1843 = vmatmul.mubr.msk.bf16.gmra.mrb[4].mxu1 %vm110_vm1, %v2022_v19 }
 0x107   :  { %1841 = vmatmul.mubr.msk.bf16.gmra.mrb[4].mxu0 %vm110_vm1, %v2022_v19 }
 0x1d1   :  { %v1392_v29 = vpop.f32.mrb[0].mxu1 }
 0x1d2   :  { %v1339_v30 = vpop.f32.mrb[0].mxu0  ;;  %v1394_v33 = vpop.f32.mrb[1].mxu1  ;;  %v2292_v36 = vadd.f32 %v1430_v26, %v1392_v29 }
 0x1d3   :  { %v2288_v32 = vadd.f32 %v1430_v26, %v1339_v30  ;;  %v1341_v34 = vpop.f32.mrb[1].mxu0  ;;  %v2296_v38 = vadd.f32 %v1430_v26, %v1394_v33  ;;  %v1396_v40 = vpop.f32.mrb[2].mxu1 }
 0x1d4   :  { %v2298_v39 = vadd.f32 %v1430_v26, %v1341_v34  ;;  %v1343_v41 = vpop.f32.mrb[2].mxu0  ;;  %v1398_v44 = vpop.f32.mrb[3].mxu1  ;;  %v2306_v47 = vadd.f32 %v1435_v28, %v1396_v40  ;;  %v1487_v52 = vmul.f32 %v2294_v37, %v2292_v36 }
 0x1d5   :  { %v1485_v42 = vmul.f32 %v2284_v1, %v2288_v32  ;;  %v2302_v43 = vadd.f32 %v1435_v28, %v1343_v41  ;;  %v1345_v45 = vpop.f32.mrb[3].mxu0  ;;  %v2308_v48 = vadd.f32 %v1435_v28, %v1398_v44  ;;  %v1488_v51 = vmul.f32 %v2290_v35, %v2296_v38 }
 0x1d6   :  { %v1486_v46 = vmul.f32 %v2286_v31, %v2298_v39  ;;  %v2310_v49 = vadd.f32 %v1435_v28, %v1345_v45  ;;  %v1491_v58 = vmul.f32 %v2294_v37, %v2306_v47 }
 0x1d7   :  { %v1489_v50 = vmul.f32 %v2284_v1, %v2302_v43  ;;  %v1492_v57 = vmul.f32 %v2290_v35, %v2308_v48  ;;  %v1504_v4 = vsel %vm1291_vm8, %v1488_v51, 0.0 }
 0x1d8   :  { %v1490_v53 = vmul.f32 %v2286_v31, %v2310_v49  ;;  %v1501_v54 = vadd.f32 %v1486_v46, %v1485_v42 }
 0x1d9   :  { %v1402_v59 = vpop.f32.mrb[4].mxu1  ;;  %v1510_v16 = vsel %vm1291_vm8, %v1492_v57, 0.0 }
 0x1da   :  { %v1349_v60 = vpop.f32.mrb[4].mxu0  ;;  %v1502_v61 = vadd.f32 %v1501_v54, %v1487_v52  ;;  %v1508_v62 = vadd.f32 %v1490_v53, %v1489_v50  ;;  %v2324_v63 = vadd.f32 %v1440_v56, %v1402_v59  ;;  %v1404_v2 = vpop.f32.mrb[5].mxu1 }
 0x1db   :  { %v2326_v0 = vadd.f32 %v1440_v56, %v1349_v60  ;;  %v1351_v3 = vpop.f32.mrb[5].mxu0  ;;  %v2329_v5 = vadd.f32 %v1440_v56, %v1404_v2  ;;  %v1406_v7 = vpop.f32.mrb[6].mxu1 }
 0x1dc   :  { %v2331_v6 = vadd.f32 %v1440_v56, %v1351_v3  ;;  %v1353_v8 = vpop.f32.mrb[6].mxu0  ;;  %v1505_v9 = vadd.f32 %v1504_v4, %v1502_v61  ;;  %v1509_v10 = vadd.f32 %v1508_v62, %v1491_v58  ;;  %v2335_v12 = vadd.f32 %v1445_v55, %v1406_v7  ;;  %v1408_v14 = vpop.f32.mrb[7].mxu1 }
 0x1dd   :  { %v1493_v11 = vmul.f32 %v2284_v1, %v2326_v0  ;;  %v2337_v13 = vadd.f32 %v1445_v55, %v1353_v8  ;;  %v1355_v15 = vpop.f32.mrb[7].mxu0  ;;  %v2342_v18 = vadd.f32 %v1445_v55, %v1408_v14  ;;  %v1496_v22 = vmul.f32 %v2290_v35, %v2329_v5 }
 0x1de   :  { %v1494_v17 = vmul.f32 %v2286_v31, %v2331_v6  ;;  %v2344_v19 = vadd.f32 %v1445_v55, %v1355_v15  ;;  %1506 = vadd.xlane.f32.xlu1 %v1505_v9  ;;  %v1511_v20 = vadd.f32 %v1510_v16, %v1509_v10  ;;  %v1495_v23 = vmul.f32 %v2294_v37, %v2324_v63 }
 0x1df   :  { %v1497_v21 = vmul.f32 %v2284_v1, %v2337_v13  ;;  %v1500_v26 = vmul.f32 %v2290_v35, %v2342_v18  ;;  %v1499_v27 = vmul.f32 %v2294_v37, %v2335_v12  ;;  %v1516_v30 = vsel %vm1291_vm8, %v1496_v22, 0.0 }
 0x1e0   :  { %v1498_v24 = vmul.f32 %v2286_v31, %v2344_v19  ;;  %1512 = vadd.xlane.f32.xlu0 %v1511_v20  ;;  %v1514_v25 = vadd.f32 %v1494_v17, %v1493_v11 }
 0x1e1   :  { %v1522_v40 = vsel %vm1291_vm8, %v1500_v26, 0.0 }
 0x1e2   :  { %v1515_v28 = vadd.f32 %v1514_v25, %v1495_v23  ;;  %v1520_v29 = vadd.f32 %v1498_v24, %v1497_v21 }
 0x1e4   :  { %v1517_v33 = vadd.f32 %v1516_v30, %v1515_v28  ;;  %v1521_v34 = vadd.f32 %v1520_v29, %v1499_v27 }
 0x1e6   :  { %1518 = vadd.xlane.f32.xlu0 %v1517_v33  ;;  %v1523_v41 = vadd.f32 %v1522_v40, %v1521_v34 }
 0x1e8   :  { %1524 = vadd.xlane.f32.xlu1 %v1523_v41 }
 0x26b   :  { %v1507_v42 = vpop.xlane.xlu1 %1506 }
 0x26c   :  { %v2360_v44 = vmul.f32 0.010204081, %v1507_v42 }
 0x26d   :  { %v1513_v45 = vpop.xlane.xlu0 %1512 }
 0x26e   :  { %v2362_v46 = vmul.f32 0.010204081, %v1513_v45  ;;  %v1531_v50 = vsub.f32 %v2288_v32, %v2360_v44  ;;  %v1532_v51 = vsub.f32 %v2298_v39, %v2360_v44  ;;  %v1533_v52 = vsub.f32 %v2292_v36, %v2360_v44 }
 0x26f   :  { %v1534_v53 = vsub.f32 %v2296_v38, %v2360_v44 }
 0x270   :  { %v1547_v54 = vmul.f32 %v1531_v50, %v2284_v1  ;;  %v1548_v55 = vmul.f32 %v1532_v51, %v2286_v31  ;;  %v1549_v56 = vmul.f32 %v1533_v52, %v2294_v37  ;;  %v1535_v57 = vsub.f32 %v2302_v43, %v2362_v46 }
 0x271   :  { %v1550_v58 = vmul.f32 %v1534_v53, %v2290_v35  ;;  %v1536_v59 = vsub.f32 %v2310_v49, %v2362_v46  ;;  %v1537_v60 = vsub.f32 %v2306_v47, %v2362_v46  ;;  %v1538_v61 = vsub.f32 %v2308_v48, %v2362_v46 }
 0x272   :  { %v1563_v62 = vmul.f32 %v1547_v54, %v1547_v54  ;;  %v1564_v2 = vmul.f32 %v1548_v55, %v1548_v55  ;;  %v1551_v3 = vmul.f32 %v1535_v57, %v2284_v1  ;;  %v1565_v14 = vmul.f32 %v1549_v56, %v1549_v56 }
 0x273   :  { %v1519_v4 = vpop.xlane.xlu0 %1518  ;;  %v1566_v7 = vmul.f32 %v1550_v58, %v1550_v58  ;;  %v1552_v8 = vmul.f32 %v1536_v59, %v2286_v31  ;;  %v1553_v9 = vmul.f32 %v1537_v60, %v2294_v37  ;;  %v1554_v10 = vmul.f32 %v1538_v61, %v2290_v35 }
 0x274   :  { %v2388_v11 = vmul.f32 0.010204081, %v1519_v4  ;;  %v1579_v15 = vadd.f32 %v1564_v2, %v1563_v62  ;;  %v1567_v16 = vmul.f32 %v1551_v3, %v1551_v3 }
 0x275   :  { %v1525_v17 = vpop.xlane.xlu1 %1524  ;;  %v1581_v20 = vsel %vm1291_vm8, %v1566_v7, 0.0  ;;  %v1568_v21 = vmul.f32 %v1552_v8, %v1552_v8  ;;  %v1569_v22 = vmul.f32 %v1553_v9, %v1553_v9  ;;  %v1570_v23 = vmul.f32 %v1554_v10, %v1554_v10 }
 0x276   :  { %v2391_v24 = vmul.f32 0.010204081, %v1525_v17  ;;  %v1580_v25 = vadd.f32 %v1579_v15, %v1565_v14  ;;  %v1539_v26 = vsub.f32 %v2326_v0, %v2388_v11  ;;  %v1540_v27 = vsub.f32 %v2331_v6, %v2388_v11 }
 0x277   :  { %v1585_v28 = vadd.f32 %v1568_v21, %v1567_v16  ;;  %v1587_v29 = vsel %vm1291_vm8, %v1570_v23, 0.0  ;;  %v1541_v30 = vsub.f32 %v2324_v63, %v2388_v11  ;;  %v1542_v33 = vsub.f32 %v2329_v5, %v2388_v11 }
 0x278   :  { %v1582_v34 = vadd.f32 %v1581_v20, %v1580_v25  ;;  %v1555_v40 = vmul.f32 %v1539_v26, %v2284_v1  ;;  %v1556_v41 = vmul.f32 %v1540_v27, %v2286_v31  ;;  %v1543_v42 = vsub.f32 %v2337_v13, %v2391_v24 }
 0x279   :  { %v1586_v45 = vadd.f32 %v1585_v28, %v1569_v22  ;;  %v1557_v50 = vmul.f32 %v1541_v30, %v2294_v37  ;;  %v1558_v51 = vmul.f32 %v1542_v33, %v2290_v35  ;;  %v1544_v52 = vsub.f32 %v2344_v19, %v2391_v24  ;;  %v1615_v30 = vld [vmem:[%s2506_s4] sm:$0xff] }
 0x27a   :  { %1583 = vadd.xlane.f32.xlu0 %v1582_v34  ;;  %v1571_v53 = vmul.f32 %v1555_v40, %v1555_v40  ;;  %v1572_v54 = vmul.f32 %v1556_v41, %v1556_v41  ;;  %v1545_v55 = vsub.f32 %v2335_v12, %v2391_v24  ;;  %v1546_v56 = vsub.f32 %v2342_v18, %v2391_v24  ;;  %v1616_v41 = vld [vmem:[%s2506_s4 + $0x8] sm:$0xff] }
 0x27b   :  { %v1588_v57 = vadd.f32 %v1587_v29, %v1586_v45  ;;  %v1573_v58 = vmul.f32 %v1557_v50, %v1557_v50  ;;  %v1574_v59 = vmul.f32 %v1558_v51, %v1558_v51  ;;  %v1559_v60 = vmul.f32 %v1543_v42, %v2284_v1  ;;  %v1623_v51 = vld [vmem:[%s2507_s5] sm:$0xff] }
 0x27c   :  { %v1591_v61 = vadd.f32 %v1572_v54, %v1571_v53  ;;  %v1560_v62 = vmul.f32 %v1544_v52, %v2286_v31  ;;  %v1561_v2 = vmul.f32 %v1545_v55, %v2294_v37  ;;  %v1562_v3 = vmul.f32 %v1546_v56, %v2290_v35  ;;  %v1624_v52 = vld [vmem:[%s2507_s5 + $0x8] sm:$0xff]  ;;  %v1617_v54 = vld [vmem:[%s2506_s4 + $0x10] sm:$0xff] }
 0x27d   :  { %1589 = vadd.xlane.f32.xlu1 %v1588_v57  ;;  %v1575_v4 = vmul.f32 %v1559_v60, %v1559_v60  ;;  %v1593_v9 = vsel %vm1291_vm8, %v1574_v59, 0.0 }
 0x27e   :  { %v1592_v7 = vadd.f32 %v1591_v61, %v1573_v58  ;;  %v1576_v8 = vmul.f32 %v1560_v62, %v1560_v62  ;;  %v1578_v10 = vmul.f32 %v1562_v3, %v1562_v3  ;;  %v1577_v15 = vmul.f32 %v1561_v2, %v1561_v2  ;;  %v1626_v62 = vld [vmem:[%s2507_s5 + $0x18] sm:$0xff] }
 0x280   :  { %v1594_v14 = vadd.f32 %v1593_v9, %v1592_v7  ;;  %v1597_v16 = vadd.f32 %v1576_v8, %v1575_v4  ;;  %v1599_v1 = vsel %vm1291_vm8, %v1578_v10, 0.0 }
 0x282   :  { %1595 = vadd.xlane.f32.xlu0 %v1594_v14  ;;  %v1598_v17 = vadd.f32 %v1597_v16, %v1577_v15 }
 0x284   :  { %v1600_v20 = vadd.f32 %v1599_v1, %v1598_v17 }
 0x286   :  { %1601 = vadd.xlane.f32.xlu1 %v1600_v20 }
 0x307   :  { %v1584_v31 = vpop.xlane.xlu0 %1583 }
 0x308   :  { %v1603_v37 = vmul.f32 0.010204081, %v1584_v31 }
 0x30a   :  { %v1607_v21 = vadd.f32 1e-05, %v1603_v37  ;;  %v1590_v35 = vpop.xlane.xlu1 %1589 }
 0x30b   :  { %v1604_v22 = vmul.f32 0.010204081, %v1590_v35 }
 0x30c   :  { %2023 = vrsqrt.f32 %v1607_v21 }
 0x30d   :  { %v1608_v23 = vadd.f32 1e-05, %v1604_v22 }
 0x30f   :  { %2025 = vrsqrt.f32 %v1608_v23  ;;  %v1596_v25 = vpop.xlane.xlu0 %1595 }
 0x310   :  { %v1605_v26 = vmul.f32 0.010204081, %v1596_v25 }
 0x312   :  { %v1609_v27 = vadd.f32 1e-05, %v1605_v26 }
 0x313   :  { %v1602_v28 = vpop.xlane.xlu1 %1601 }
 0x314   :  { %2027 = vrsqrt.f32 %v1609_v27  ;;  %v1606_v29 = vmul.f32 0.010204081, %v1602_v28 }
 0x316   :  { %v2024_v33 = vpop.eup %2023  ;;  %v1610_v34 = vadd.f32 1e-05, %v1606_v29 }
 0x317   :  { %v1619_v40 = vmul.f32 %v2024_v33, %v1615_v30 }
 0x318   :  { %2029 = vrsqrt.f32 %v1610_v34 }
 0x319   :  { %v2026_v42 = vpop.eup %2025  ;;  %1637 = vperm.xlu0 %1997, %v1619_v40   ;;  %v1627_v50 = vmul.f32 %v1619_v40, %v2360_v44  ;;  %v1618_v44 = vld [vmem:[%s2506_s4 + $0x18] sm:$0xff] }
 0x31a   :  { %v1620_v45 = vmul.f32 %v2026_v42, %v1616_v41 }
 0x31b   :  { %v1631_v56 = vsub.f32 %v1623_v51, %v1627_v50 }
 0x31c   :  { %1642 = vperm.xlu1 %1998, %v1620_v45   ;;  %v1628_v53 = vmul.f32 %v1620_v45, %v2362_v46  ;;  %v1625_v46 = vld [vmem:[%s2507_s5 + $0x10] sm:$0xff] }
 0x31e   :  { %v2028_v55 = vpop.eup %2027  ;;  %v1632_v57 = vsub.f32 %v1624_v52, %v1628_v53 }
 0x31f   :  { %v1621_v58 = vmul.f32 %v2028_v55, %v1617_v54 }
 0x320   :  { %1673 = vperm.xlu1 %1998, %v1631_v56   ;;  %1678 = vperm.xlu0 %1997, %v1632_v57  }
 0x321   :  { %v1629_v60 = vmul.f32 %v1621_v58, %v2388_v11 }
 0x322   :  { %v2030_v59 = vpop.eup %2029 }
 0x323   :  { %v1622_v61 = vmul.f32 %v2030_v59, %v1618_v44  ;;  %v1633_v3 = vsub.f32 %v1625_v46, %v1629_v60 }
 0x324   :  { %1647 = vperm.xlu1 %1998, %v1621_v58  }
 0x325   :  { %1652 = vperm.xlu0 %1997, %v1622_v61   ;;  %v1630_v2 = vmul.f32 %v1622_v61, %v2391_v24 }
 0x327   :  { %v1634_v4 = vsub.f32 %v1626_v62, %v1630_v2 }
 0x328   :  { %1683 = vperm.xlu1 %1998, %v1633_v3  }
 0x329   :  { %1688 = vperm.xlu0 %1997, %v1634_v4  }
 0x398   :  { %v1638_v7 = vpop.permute.xlu0 %1637 }
 0x399   :  { %v1655_v15 = vmul.f32 %v1638_v7, %v2288_v32  ;;  %v1656_v24 = vmul.f32 %v1638_v7, %v2298_v39  ;;  %v1657_v16 = vmul.f32 %v1638_v7, %v2292_v36  ;;  %v1658_v17 = vmul.f32 %v1638_v7, %v2296_v38 }
 0x39b   :  { %v1643_v8 = vpop.permute.xlu1 %1642 }
 0x39c   :  { %v1659_v11 = vmul.f32 %v1643_v8, %v2302_v43  ;;  %v1660_v9 = vmul.f32 %v1643_v8, %v2310_v49  ;;  %v1661_v10 = vmul.f32 %v1643_v8, %v2306_v47  ;;  %v1662_v14 = vmul.f32 %v1643_v8, %v2308_v48 }
 0x39f   :  { %v1679_v1 = vpop.permute.xlu0 %1678  ;;  %v1674_v20 = vpop.permute.xlu1 %1673 }
 0x3a0   :  { %v1695_v31 = vadd.f32 %v1679_v1, %v1659_v11  ;;  %v1696_v37 = vadd.f32 %v1679_v1, %v1660_v9  ;;  %v1697_v21 = vadd.f32 %v1679_v1, %v1661_v10  ;;  %v1698_v43 = vadd.f32 %v1679_v1, %v1662_v14 }
 0x3a1   :  { %v1691_v35 = vadd.f32 %v1674_v20, %v1655_v15  ;;  %v1692_v49 = vadd.f32 %v1674_v20, %v1656_v24  ;;  %v1693_v22 = vadd.f32 %v1674_v20, %v1657_v16  ;;  %v1694_v47 = vadd.f32 %v1674_v20, %v1658_v17 }
 0x3a2   :  { %v1711_v23 = vmax.f32 %v1695_v31, 0.0  ;;  %v1712_v48 = vmax.f32 %v1696_v37, 0.0  ;;  %v1713_v25 = vmax.f32 %v1697_v21, 0.0  ;;  %v1714_v32 = vmax.f32 %v1698_v43, 0.0 }
 0x3a3   :  { %v1707_v38 = vmax.f32 %v1691_v35, 0.0  ;;  %v1708_v39 = vmax.f32 %v1692_v49, 0.0  ;;  %v1709_v26 = vmax.f32 %v1693_v22, 0.0  ;;  %v1710_v27 = vmax.f32 %v1694_v47, 0.0  ;;  %v1648_v28 = vpop.permute.xlu1 %1647 }
 0x3a4   :  { %v1854_v29 = vpack.c.bf16 %v1712_v48, %v1711_v23  ;;  %v1855_v30 = vpack.c.bf16 %v1714_v32, %v1713_v25  ;;  %v1653_v33 = vpop.permute.xlu0 %1652  ;;  %v1663_v41 = vmul.f32 %v1648_v28, %v2326_v0  ;;  %v1664_v42 = vmul.f32 %v1648_v28, %v2331_v6 }
 0x3a5   :  { %v1852_v34 = vpack.c.bf16 %v1708_v39, %v1707_v38  ;;  %v1853_v40 = vpack.c.bf16 %v1710_v27, %v1709_v26  ;;  %v1665_v45 = vmul.f32 %v1648_v28, %v2324_v63  ;;  %v1666_v50 = vmul.f32 %v1648_v28, %v2329_v5 }
 0x3a6   :  { %1776 = vst [vmem:[%s2508_s6 + $0x10] sm:$0xff] %v1854_v29  ;;  %1777 = vst.msk [vmem:[%s2508_s6 + $0x18] sm:$0xff] %vm2458_vm11, %v1855_v30  ;;  %v1667_v51 = vmul.f32 %v1653_v33, %v2337_v13  ;;  %v1668_v0 = vmul.f32 %v1653_v33, %v2344_v19  ;;  %v1669_v6 = vmul.f32 %v1653_v33, %v2335_v12 }
 0x3a7   :  { %1771 = vst [vmem:[%s2508_s6] sm:$0xff] %v1852_v34  ;;  %1775 = vst.msk [vmem:[%s2508_s6 + $0x8] sm:$0xff] %vm2458_vm11, %v1853_v40  ;;  %v1670_v63 = vmul.f32 %v1653_v33, %v2342_v18  ;;  %v1684_v52 = vpop.permute.xlu1 %1683 }
 0x3a8   :  { %v1689_v5 = vpop.permute.xlu0 %1688  ;;  %v1699_v53 = vadd.f32 %v1684_v52, %v1663_v41  ;;  %v1700_v54 = vadd.f32 %v1684_v52, %v1664_v42  ;;  %v1701_v55 = vadd.f32 %v1684_v52, %v1665_v45  ;;  %v1702_v56 = vadd.f32 %v1684_v52, %v1666_v50 }
 0x3a9   :  { %v1703_v57 = vadd.f32 %v1689_v5, %v1667_v51  ;;  %v1704_v58 = vadd.f32 %v1689_v5, %v1668_v0  ;;  %v1705_v44 = vadd.f32 %v1689_v5, %v1669_v6  ;;  %v1706_v59 = vadd.f32 %v1689_v5, %v1670_v63 }
 0x3aa   :  { %v1715_v60 = vmax.f32 %v1699_v53, 0.0  ;;  %v1716_v61 = vmax.f32 %v1700_v54, 0.0  ;;  %v1717_v46 = vmax.f32 %v1701_v55, 0.0  ;;  %v1718_v13 = vmax.f32 %v1702_v56, 0.0 }
 0x3ab   :  { %v1719_v62 = vmax.f32 %v1703_v57, 0.0  ;;  %v1720_v19 = vmax.f32 %v1704_v58, 0.0  ;;  %v1721_v2 = vmax.f32 %v1705_v44, 0.0  ;;  %v1722_v12 = vmax.f32 %v1706_v59, 0.0 }
 0x3ac   :  { %v1856_v3 = vpack.c.bf16 %v1716_v61, %v1715_v60  ;;  %v1857_v18 = vpack.c.bf16 %v1718_v13, %v1717_v46 }
 0x3ad   :  { %v1858_v4 = vpack.c.bf16 %v1720_v19, %v1719_v62  ;;  %v1859_v7 = vpack.c.bf16 %v1722_v12, %v1721_v2 }
 0x3ae   :  { %1778 = vst [vmem:[%s2508_s6 + $0x20] sm:$0xff] %v1856_v3  ;;  %1779 = vst.msk [vmem:[%s2508_s6 + $0x28] sm:$0xff] %vm2458_vm11, %v1857_v18 }
 0x3af   :  { %1780 = vst [vmem:[%s2508_s6 + $0x30] sm:$0xff] %v1858_v4  ;;  %1781 = vst.msk [vmem:[%s2508_s6 + $0x38] sm:$0xff] %vm2458_vm11, %v1859_v7 }

// kernel: forward.8
= control target key start
LH: loop header
LB: loop body
LE: loop exit
PB: predicated region body
PF: predicated region fallthrough
CT: control target
= control target key end

     0   :  { %s895_s25 = smov 118   ;;  %v896_v4 = vmov 0   ;;  %s897_s30 = smov 127   ;;  %vm339_vm0 = vcmask 965632   ;;  %vm77_vm1 = vcmask 1039360   ;;  %vm409_vm2 = vcmask 957440   ;;  %s1105_s0 = inlined_call_operand.vmem [shape: bf16[32,162], index: 0, kind: input, shape index: {}]   ;;  %s1106_s1 = inlined_call_operand.vmem [shape: bf16[9,16,32], index: 1, kind: input, shape index: {}]   ;;  %s1107_s2 = inlined_call_operand.vmem [shape: f32[16,1], index: 2, kind: input, shape index: {}]   ;;  %s1108_s3 = inlined_call_operand.vmem [shape: f32[1,142], index: 3, kind: input, shape index: {}]   ;;  %s1109_s4 = inlined_call_operand.vmem [shape: f32[16,1], index: 4, kind: input, shape index: {}]   ;;  %s1110_s5 = inlined_call_operand.vmem [shape: f32[16,1], index: 5, kind: input, shape index: {}]   ;;  %s1111_s6 = inlined_call_operand.vmem [shape: bf16[1,16,142], index: 6, kind: output, shape index: {}]  }
   0x1   :  { %v942_v0 = vld [vmem:[%s1105_s0 + $0x10] ss:$8 sps:$4 sm:$0xff]   ;;  %v947_v1 = vld [vmem:[%s1105_s0] ss:$8 sps:$4 sm:$0xff]   ;;  %v953_v2 = vld [vmem:[%s1105_s0 + $0x14] ss:$8 sps:$4 sm:$0xff]   ;;  %381 = vmatprep.mubr.bf16.mxu0 %v896_v4  ;;  %120 = vmatprep.mubr.bf16.mxu1 %v896_v4 }
   0x2   :  { %335 = vrot.lane.b32.xlu1 %v942_v0, %s895_s25  ;;  %v958_v3 = vld [vmem:[%s1105_s0 + $0x4] ss:$8 sps:$4 sm:$0xff]   ;;  %331 = vrot.lane.b32.xlu0 %v947_v1, %s895_s25  ;;  %s898_s0 = smov 117   ;;  %s899_s7 = smov 110   ;;  %vm84_vm3 = vcmask 261120   ;;  %vm479_vm4 = vcmask 900096  }
   0x3   :  { %874 = vset.pattern.permute.xlu0 %v896_v4  ;;  %875 = vset.pattern.permute.xlu1 %v896_v4  ;;  %s900_s8 = smov 126   ;;  %s901_s9 = smov 109   ;;  %v47_v5 = vld [vmem:[%s1107_s2 + $0x8] sm:$0xff]  ;;  %v46_v6 = vld [vmem:[%s1107_s2] sm:$0xff]  ;;  %vm199_vm5 = vcmask 1031168   ;;  %v886_v38 = vld [vmem:[%s1106_s1 + $0x30] sm:$0xff]  }
   0x4   :  { %s902_s10 = smov 119   ;;  %s903_s11 = smov 108   ;;  %v882_v16 = vld [vmem:[%s1106_s1 + $0x20] sm:$0xff]   ;;  %v883_v23 = vld [vmem:[%s1106_s1 + $0x8] sm:$0xff]   ;;  %vm549_vm6 = vcmask 891904   ;;  %v887_v45 = vld [vmem:[%s1106_s1 + $0x10] sm:$0xff]  }
   0x5   :  { %v884_v27 = vld [vmem:[%s1106_s1 + $0x28] sm:$0xff]   ;;  %v885_v34 = vld [vmem:[%s1106_s1] sm:$0xff]   ;;  %v888_v49 = vld [vmem:[%s1106_s1 + $0x38] sm:$0xff]   ;;  %vm269_vm7 = vcmask 973824   ;;  %vm619_vm8 = vcmask 883712   ;;  %vm706_vm9 = vcmask 113664  }
   0x6   :  { %337 = vrot.lane.b32.xlu1 %v953_v2, %s895_s25  ;;  %333 = vrot.lane.b32.xlu0 %v958_v3, %s895_s25  ;;  %v889_v59 = vld [vmem:[%s1106_s1 + $0x18] sm:$0xff]   ;;  %v890_v63 = vld [vmem:[%s1106_s1 + $0x40] sm:$0xff]   ;;  %vm798_vm10 = vcmask 1043456   ;;  %vm799_vm11 = vcmask 113668  }
   0x7   :  { %vm800_vm12 = vmor %vm799_vm11, %vm798_vm10 }
   0xa   :  { %71 = vrot.lane.b32.xlu1 %v958_v3, %s897_s30  ;;  %69 = vrot.lane.b32.xlu0 %v947_v1, %s897_s30 }
   0xe   :  { %403 = vrot.lane.b32.xlu1 %v958_v3, %s898_s0  ;;  %401 = vrot.lane.b32.xlu0 %v947_v1, %s898_s0 }
  0x12   :  { %75 = vrot.lane.b32.xlu1 %v953_v2, %s897_s30  ;;  %73 = vrot.lane.b32.xlu0 %v942_v0, %s897_s30 }
  0x16   :  { %407 = vrot.lane.b32.xlu1 %v953_v2, %s898_s0  ;;  %405 = vrot.lane.b32.xlu0 %v942_v0, %s898_s0 }
  0x1a   :  { %473 = vrot.lane.b32.xlu1 %v958_v3, %s899_s7  ;;  %471 = vrot.lane.b32.xlu0 %v947_v1, %s899_s7 }
  0x1e   :  { %477 = vrot.lane.b32.xlu1 %v953_v2, %s899_s7  ;;  %475 = vrot.lane.b32.xlu0 %v942_v0, %s899_s7 }
  0x22   :  { %193 = vrot.lane.b32.xlu1 %v958_v3, %s900_s8  ;;  %191 = vrot.lane.b32.xlu0 %v947_v1, %s900_s8 }
  0x26   :  { %543 = vrot.lane.b32.xlu1 %v958_v3, %s901_s9  ;;  %541 = vrot.lane.b32.xlu0 %v947_v1, %s901_s9 }
  0x2a   :  { %197 = vrot.lane.b32.xlu1 %v953_v2, %s900_s8  ;;  %195 = vrot.lane.b32.xlu0 %v942_v0, %s900_s8 }
  0x2e   :  { %547 = vrot.lane.b32.xlu1 %v953_v2, %s901_s9  ;;  %545 = vrot.lane.b32.xlu0 %v942_v0, %s901_s9 }
  0x32   :  { %263 = vrot.lane.b32.xlu1 %v958_v3, %s902_s10  ;;  %261 = vrot.lane.b32.xlu0 %v947_v1, %s902_s10 }
  0x36   :  { %613 = vrot.lane.b32.xlu1 %v958_v3, %s903_s11  ;;  %611 = vrot.lane.b32.xlu0 %v947_v1, %s903_s11 }
  0x3a   :  { %267 = vrot.lane.b32.xlu1 %v953_v2, %s902_s10  ;;  %265 = vrot.lane.b32.xlu0 %v942_v0, %s902_s10 }
  0x3e   :  { %617 = vrot.lane.b32.xlu1 %v953_v2, %s903_s11  ;;  %615 = vrot.lane.b32.xlu0 %v942_v0, %s903_s11 }
  0x42   :  { %683 = vperm.xlu1 %875, %v47_v5   ;;  %678 = vperm.xlu0 %874, %v46_v6  }
  0x74   :  { %v336_v7 = vpop.permute.xlu1 %335  ;;  %v332_v8 = vpop.permute.xlu0 %331 }
  0x78   :  { %v338_v9 = vpop.permute.xlu1 %337  ;;  %v334_v10 = vpop.permute.xlu0 %333 }
  0x79   :  { %349 = vmatprep.subr.bf16.mxu0 %v334_v10  ;;  %v340_v11 = vsel %vm339_vm0, %v332_v8, %v334_v10  ;;  %v341_v15 = vsel %vm339_vm0, %v336_v7, %v338_v9  ;;  %v690_v7 = vld [vmem:[%s1108_s3] sm:$0x3] }
  0x7a   :  { %350 = vmatpush1.bf16.msra.mxu0 %v340_v11 }
  0x7b   :  { %351 = vmatprep.subr.bf16.mxu0 %v338_v9 }
  0x7c   :  { %v72_v12 = vpop.permute.xlu1 %71  ;;  %v70_v13 = vpop.permute.xlu0 %69 }
  0x7d   :  { %88 = vmatprep.subr.bf16.mxu1 %v72_v12  ;;  %v78_v14 = vsel %vm77_vm1, %v70_v13, %v72_v12 }
  0x7e   :  { %89 = vmatpush1.bf16.msra.mxu1 %v78_v14  ;;  %352 = vmatpush1.bf16.msra.mxu0 %v341_v15 }
  0x80   :  { %v404_v17 = vpop.permute.xlu1 %403  ;;  %v402_v18 = vpop.permute.xlu0 %401 }
  0x81   :  { %419 = vmatprep.subr.bf16.mxu0 %v404_v17  ;;  %v410_v19 = vsel %vm409_vm2, %v402_v18, %v404_v17  ;;  %820 = vmatmul.mubr.msk.bf16.vlgmr.msra.gmra.mrb[0].mxu0 %vm84_vm3, %v882_v16 }
  0x82   :  { %420 = vmatpush1.bf16.msra.mxu0 %v410_v19  ;;  %451 = vmatprep.mubr.bf16.mxu0 %v896_v4 }
  0x84   :  { %v76_v20 = vpop.permute.xlu1 %75  ;;  %v74_v21 = vpop.permute.xlu0 %73 }
  0x85   :  { %90 = vmatprep.subr.bf16.mxu1 %v76_v20  ;;  %v79_v22 = vsel %vm77_vm1, %v74_v21, %v76_v20 }
  0x86   :  { %91 = vmatpush1.bf16.msra.mxu1 %v79_v22 }
  0x87   :  { %143 = vmatprep.subr.bf16.mxu1 %v958_v3 }
  0x88   :  { %v408_v24 = vpop.permute.xlu1 %407  ;;  %v406_v25 = vpop.permute.xlu0 %405 }
  0x89   :  { %421 = vmatprep.subr.bf16.mxu0 %v408_v24  ;;  %v411_v26 = vsel %vm409_vm2, %v406_v25, %v408_v24  ;;  %812 = vmatmul.mubr.msk.bf16.vlgmr.msra.gmra.mrb[0].mxu1 %vm84_vm3, %v883_v23 }
  0x8a   :  { %422 = vmatpush1.bf16.msra.mxu0 %v411_v26  ;;  %144 = vmatpush1.bf16.msra.mxu1 %v947_v1 }
  0x8b   :  { %145 = vmatprep.subr.bf16.mxu1 %v953_v2  ;;  %175 = vmatprep.mubr.bf16.mxu1 %v896_v4 }
  0x8c   :  { %v474_v28 = vpop.permute.xlu1 %473  ;;  %v472_v29 = vpop.permute.xlu0 %471 }
  0x8d   :  { %489 = vmatprep.subr.bf16.mxu0 %v474_v28  ;;  %v480_v30 = vsel %vm479_vm4, %v472_v29, %v474_v28  ;;  %822 = vmatmul.mubr.msk.bf16.vlgmr.msra.gmra.mrb[0].mxu0 %vm84_vm3, %v884_v27 }
  0x8e   :  { %490 = vmatpush1.bf16.msra.mxu0 %v480_v30  ;;  %146 = vmatpush1.bf16.msra.mxu1 %v942_v0  ;;  %v692_v0 = vlaneseq }
  0x8f   :  { %521 = vmatprep.mubr.bf16.mxu0 %v896_v4 }
  0x90   :  { %v478_v31 = vpop.permute.xlu1 %477  ;;  %v476_v32 = vpop.permute.xlu0 %475  ;;  %v693_v1 = vshrl.u32 %v692_v0, 7 }
  0x91   :  { %491 = vmatprep.subr.bf16.mxu0 %v478_v31  ;;  %v481_v33 = vsel %vm479_vm4, %v476_v32, %v478_v31 }
  0x92   :  { %492 = vmatpush1.bf16.msra.mxu0 %v481_v33  ;;  %v698_v5 = vsub.s32 1, %v693_v1  ;;  %v694_v8 = vsub.s32 0, %v693_v1 }
  0x94   :  { %v194_v35 = vpop.permute.xlu1 %193  ;;  %v192_v36 = vpop.permute.xlu0 %191  ;;  %v699_v16 = vrot.slane %v690_v7, %v698_v5  ;;  %v695_v20 = vrot.slane %v690_v7, %v694_v8 }
  0x95   :  { %209 = vmatprep.subr.bf16.mxu1 %v194_v35  ;;  %v200_v37 = vsel %vm199_vm5, %v192_v36, %v194_v35  ;;  %814 = vmatmul.mubr.msk.bf16.vlgmr.msra.gmra.mrb[0].mxu1 %vm84_vm3, %v885_v34 }
  0x96   :  { %210 = vmatpush1.bf16.msra.mxu1 %v200_v37  ;;  %241 = vmatprep.mubr.bf16.mxu1 %v896_v4 }
  0x98   :  { %v544_v39 = vpop.permute.xlu1 %543  ;;  %v542_v40 = vpop.permute.xlu0 %541 }
  0x99   :  { %559 = vmatprep.subr.bf16.mxu0 %v544_v39  ;;  %v550_v41 = vsel %vm549_vm6, %v542_v40, %v544_v39  ;;  %824 = vmatmul.mubr.msk.bf16.vlgmr.msra.gmra.mrb[0].mxu0 %vm84_vm3, %v886_v38 }
  0x9a   :  { %560 = vmatpush1.bf16.msra.mxu0 %v550_v41  ;;  %591 = vmatprep.mubr.bf16.mxu0 %v896_v4 }
  0x9c   :  { %v198_v42 = vpop.permute.xlu1 %197  ;;  %v196_v43 = vpop.permute.xlu0 %195 }
  0x9d   :  { %211 = vmatprep.subr.bf16.mxu1 %v198_v42  ;;  %v201_v44 = vsel %vm199_vm5, %v196_v43, %v198_v42 }
  0x9e   :  { %212 = vmatpush1.bf16.msra.mxu1 %v201_v44 }
  0xa0   :  { %v548_v46 = vpop.permute.xlu1 %547  ;;  %v546_v47 = vpop.permute.xlu0 %545 }
  0xa1   :  { %561 = vmatprep.subr.bf16.mxu0 %v548_v46  ;;  %v551_v48 = vsel %vm549_vm6, %v546_v47, %v548_v46  ;;  %816 = vmatmul.mubr.msk.bf16.vlgmr.msra.gmra.mrb[0].mxu1 %vm84_vm3, %v887_v45 }
  0xa2   :  { %562 = vmatpush1.bf16.msra.mxu0 %v551_v48  ;;  %311 = vmatprep.mubr.bf16.mxu1 %v896_v4 }
  0xa4   :  { %v264_v50 = vpop.permute.xlu1 %263  ;;  %v262_v51 = vpop.permute.xlu0 %261 }
  0xa5   :  { %279 = vmatprep.subr.bf16.mxu1 %v264_v50  ;;  %v270_v52 = vsel %vm269_vm7, %v262_v51, %v264_v50  ;;  %826 = vmatmul.mubr.msk.bf16.vlgmr.msra.gmra.mrb[0].mxu0 %vm84_vm3, %v888_v49 }
  0xa6   :  { %280 = vmatpush1.bf16.msra.mxu1 %v270_v52  ;;  %661 = vmatprep.mubr.bf16.mxu0 %v896_v4 }
  0xa8   :  { %v614_v53 = vpop.permute.xlu1 %613  ;;  %v612_v54 = vpop.permute.xlu0 %611 }
  0xa9   :  { %629 = vmatprep.subr.bf16.mxu0 %v614_v53  ;;  %v620_v55 = vsel %vm619_vm8, %v612_v54, %v614_v53 }
  0xaa   :  { %630 = vmatpush1.bf16.msra.mxu0 %v620_v55 }
  0xac   :  { %v268_v56 = vpop.permute.xlu1 %267  ;;  %v266_v57 = vpop.permute.xlu0 %265 }
  0xad   :  { %281 = vmatprep.subr.bf16.mxu1 %v268_v56  ;;  %v271_v58 = vsel %vm269_vm7, %v266_v57, %v268_v56 }
  0xae   :  { %282 = vmatpush1.bf16.msra.mxu1 %v271_v58 }
  0xb0   :  { %v618_v60 = vpop.permute.xlu1 %617  ;;  %v616_v61 = vpop.permute.xlu0 %615 }
  0xb1   :  { %631 = vmatprep.subr.bf16.mxu0 %v618_v60  ;;  %v621_v62 = vsel %vm619_vm8, %v616_v61, %v618_v60  ;;  %818 = vmatmul.mubr.msk.bf16.vlgmr.msra.gmra.mrb[0].mxu1 %vm84_vm3, %v889_v59  ;;  %v744_v59 = vld [vmem:[%s1109_s4] sm:$0xff]  ;;  %v745_v61 = vld [vmem:[%s1109_s4 + $0x8] sm:$0xff] }
  0xb2   :  { %632 = vmatpush1.bf16.msra.mxu0 %v621_v62 }
  0xb5   :  { %828 = vmatmul.mubr.msk.bf16.vlgmr.msra.gmra.mrb[0].mxu0 %vm84_vm3, %v890_v63 }
  0xc1   :  { %v679_v10 = vpop.permute.xlu0 %678  ;;  %v684_v15 = vpop.permute.xlu1 %683 }
 0x184   :  { %v313_v2 = vpop.f32.mrb[0].mxu1 }
 0x185   :  { %v315_v3 = vpop.f32.mrb[1].mxu1 }
 0x186   :  { %v317_v4 = vpop.f32.mrb[2].mxu1 }
 0x187   :  { %v319_v6 = vpop.f32.mrb[3].mxu1 }
 0x188   :  { %v663_v9 = vpop.f32.mrb[0].mxu0 }
 0x189   :  { %v833_v11 = vadd.f32 %v663_v9, %v313_v2  ;;  %v665_v12 = vpop.f32.mrb[1].mxu0  ;;  %v749_v2 = vld [vmem:[%s1110_s5 + $0x8] sm:$0xff] }
 0x18a   :  { %v834_v13 = vadd.f32 %v665_v12, %v315_v3  ;;  %v667_v14 = vpop.f32.mrb[2].mxu0  ;;  %v748_v3 = vld [vmem:[%s1110_s5] sm:$0xff] }
 0x18b   :  { %v835_v17 = vadd.f32 %v667_v14, %v317_v4  ;;  %v1063_v18 = vadd.f32 %v833_v11, %v679_v10  ;;  %v669_v19 = vpop.f32.mrb[3].mxu0 }
 0x18c   :  { %v1065_v21 = vadd.f32 %v834_v13, %v679_v10  ;;  %v836_v22 = vadd.f32 %v669_v19, %v319_v6 }
 0x18d   :  { %v1067_v23 = vadd.f32 %v835_v17, %v684_v15  ;;  %v702_v26 = vmul.f32 %v695_v20, %v1063_v18 }
 0x18e   :  { %v1069_v24 = vadd.f32 %v836_v22, %v684_v15  ;;  %v703_v25 = vmul.f32 %v699_v16, %v1065_v21 }
 0x18f   :  { %v704_v30 = vmul.f32 %v695_v20, %v1067_v23 }
 0x190   :  { %v707_v27 = vsel %vm706_vm9, %v703_v25, 0.0  ;;  %v705_v28 = vmul.f32 %v699_v16, %v1069_v24 }
 0x191   :  { %v708_v29 = vadd.f32 %v707_v27, %v702_v26 }
 0x192   :  { %v711_v31 = vsel %vm706_vm9, %v705_v28, 0.0 }
 0x193   :  { %709 = vadd.xlane.f32.xlu1 %v708_v29  ;;  %v712_v32 = vadd.f32 %v711_v31, %v704_v30 }
 0x195   :  { %713 = vadd.xlane.f32.xlu0 %v712_v32 }
 0x220   :  { %v710_v33 = vpop.xlane.xlu1 %709 }
 0x221   :  { %v716_v34 = vmul.f32 0.010204081, %v710_v33 }
 0x222   :  { %v714_v35 = vpop.xlane.xlu0 %713 }
 0x223   :  { %v718_v36 = vsub.f32 %v1063_v18, %v716_v34  ;;  %v719_v37 = vsub.f32 %v1065_v21, %v716_v34  ;;  %v717_v38 = vmul.f32 0.010204081, %v714_v35 }
 0x225   :  { %v720_v39 = vsub.f32 %v1067_v23, %v717_v38  ;;  %v721_v40 = vsub.f32 %v1069_v24, %v717_v38  ;;  %v722_v41 = vmul.f32 %v718_v36, %v695_v20  ;;  %v723_v42 = vmul.f32 %v719_v37, %v699_v16 }
 0x227   :  { %v726_v43 = vmul.f32 %v722_v41, %v722_v41  ;;  %v727_v44 = vmul.f32 %v723_v42, %v723_v42  ;;  %v724_v45 = vmul.f32 %v720_v39, %v695_v20  ;;  %v725_v46 = vmul.f32 %v721_v40, %v699_v16 }
 0x229   :  { %v730_v47 = vsel %vm706_vm9, %v727_v44, 0.0  ;;  %v728_v48 = vmul.f32 %v724_v45, %v724_v45  ;;  %v729_v49 = vmul.f32 %v725_v46, %v725_v46 }
 0x22a   :  { %v731_v50 = vadd.f32 %v730_v47, %v726_v43 }
 0x22b   :  { %v734_v51 = vsel %vm706_vm9, %v729_v49, 0.0 }
 0x22c   :  { %732 = vadd.xlane.f32.xlu0 %v731_v50  ;;  %v735_v52 = vadd.f32 %v734_v51, %v728_v48 }
 0x22e   :  { %736 = vadd.xlane.f32.xlu1 %v735_v52 }
 0x2b9   :  { %v733_v53 = vpop.xlane.xlu0 %732 }
 0x2ba   :  { %v738_v54 = vmul.f32 0.010204081, %v733_v53 }
 0x2bb   :  { %v737_v55 = vpop.xlane.xlu1 %736 }
 0x2bc   :  { %v740_v56 = vadd.f32 1e-05, %v738_v54  ;;  %v739_v57 = vmul.f32 0.010204081, %v737_v55 }
 0x2be   :  { %891 = vrsqrt.f32 %v740_v56  ;;  %v741_v58 = vadd.f32 1e-05, %v739_v57 }
 0x2c0   :  { %893 = vrsqrt.f32 %v741_v58 }
 0x2c8   :  { %v892_v60 = vpop.eup %891 }
 0x2c9   :  { %v746_v62 = vmul.f32 %v892_v60, %v744_v59 }
 0x2ca   :  { %v894_v63 = vpop.eup %893 }
 0x2cb   :  { %756 = vperm.xlu0 %874, %v746_v62   ;;  %v747_v0 = vmul.f32 %v894_v63, %v745_v61  ;;  %v750_v1 = vmul.f32 %v746_v62, %v716_v34 }
 0x2cd   :  { %761 = vperm.xlu1 %875, %v747_v0   ;;  %v751_v4 = vmul.f32 %v747_v0, %v717_v38  ;;  %v752_v6 = vsub.f32 %v748_v3, %v750_v1 }
 0x2cf   :  { %v753_v5 = vsub.f32 %v749_v2, %v751_v4 }
 0x2d1   :  { %775 = vperm.xlu0 %874, %v753_v5   ;;  %770 = vperm.xlu1 %875, %v752_v6  }
 0x34a   :  { %v757_v7 = vpop.permute.xlu0 %756 }
 0x34b   :  { %v764_v9 = vmul.f32 %v757_v7, %v1063_v18  ;;  %v765_v10 = vmul.f32 %v757_v7, %v1065_v21 }
 0x34c   :  { %v762_v8 = vpop.permute.xlu1 %761 }
 0x34d   :  { %v766_v11 = vmul.f32 %v762_v8, %v1067_v23  ;;  %v767_v12 = vmul.f32 %v762_v8, %v1069_v24 }
 0x350   :  { %v776_v13 = vpop.permute.xlu0 %775  ;;  %v771_v14 = vpop.permute.xlu1 %770 }
 0x351   :  { %v780_v15 = vadd.f32 %v776_v13, %v766_v11  ;;  %v781_v16 = vadd.f32 %v776_v13, %v767_v12  ;;  %v778_v17 = vadd.f32 %v771_v14, %v764_v9  ;;  %v779_v19 = vadd.f32 %v771_v14, %v765_v10 }
 0x353   :  { %v784_v20 = vmax.f32 %v780_v15, 0.0  ;;  %v785_v22 = vmax.f32 %v781_v16, 0.0  ;;  %v782_v25 = vmax.f32 %v778_v17, 0.0  ;;  %v783_v26 = vmax.f32 %v779_v19, 0.0 }
 0x355   :  { %v832_v18 = vpack.c.bf16 %v785_v22, %v784_v20  ;;  %v831_v27 = vpack.c.bf16 %v783_v26, %v782_v25 }
 0x357   :  { %802 = vst.msk [vmem:[%s1111_s6 + $0x8] sm:$0xff] %vm800_vm12, %v832_v18  ;;  %801 = vst.msk [vmem:[%s1111_s6] sm:$0xff] %vm800_vm12, %v831_v27 }

// kernel: forward.9
= control target key start
LH: loop header
LB: loop body
LE: loop exit
PB: predicated region body
PF: predicated region fallthrough
CT: control target
= control target key end

     0   :  { %v1197_v41 = vmov 0.0   ;;  %vm1198_vm0 = vmmov 0   ;;  %vm450_vm1 = vcmask 130048   ;;  %vm614_vm2 = vcmask 64512   ;;  %s1449_s1 = inlined_call_operand.vmem [shape: bf16[784,8], index: 1, kind: input, shape index: {}]   ;;  %s1450_s0 = inlined_call_operand.vmem [shape: bf16[8,784], index: 0, kind: input, shape index: {}]   ;;  %s1451_s3 = inlined_call_operand.vmem [shape: f32[8,784], index: 3, kind: input, shape index: {}]   ;;  %s1452_s2 = inlined_call_operand.vmem [shape: f32[1,8], index: 2, kind: input, shape index: {}]   ;;  %s1453_s5 = inlined_call_operand.vmem [shape: f32[8,8], index: 5, kind: output, shape index: {0}]   ;;  %s1454_s4 = inlined_call_operand.vmem [shape: f32[1,784], index: 4, kind: input, shape index: {}]   ;;  %s1455_s6 = inlined_call_operand.vmem [shape: bf16[8,784], index: 6, kind: output, shape index: {1}]  }
   0x1   :  { %v1141_v0 = vld [vmem:[%s1449_s1 + $0x40] sm:$0xff]   ;;  %v1145_v4 = vld [vmem:[%s1449_s1 + $0x48] sm:$0xff]   ;;  %v1149_v8 = vld [vmem:[%s1449_s1 + $0x50] sm:$0xff]   ;;  %vm978_vm3 = vcmask 125952  }
   0x2   :  { %v1142_v1 = vld [vmem:[%s1449_s1] sm:$0xff]   ;;  %1058 = vmatprep.subr.bf16.mxu0 %v1141_v0  ;;  %v1146_v5 = vld [vmem:[%s1449_s1 + $0x8] sm:$0xff]   ;;  %v1150_v9 = vld [vmem:[%s1449_s1 + $0x10] sm:$0xff]  }
   0x3   :  { %v1143_v2 = vld [vmem:[%s1449_s1 + $0xc0] sm:$0xff]   ;;  %1059 = vmatpush3.bf16.msra.mxu0 %v1142_v1  ;;  %v1147_v6 = vld [vmem:[%s1449_s1 + $0xc8] sm:$0xff]   ;;  %v1151_v10 = vld [vmem:[%s1449_s1 + $0xd0] sm:$0xff]  }
   0x4   :  { %v1144_v3 = vld [vmem:[%s1449_s1 + $0x80] sm:$0xff]   ;;  %1080 = vmatprep.subr.bf16.mxu1 %v1143_v2  ;;  %1060 = vmatprep.subr.bf16.mxu0 %v1145_v4  ;;  %v1148_v7 = vld [vmem:[%s1449_s1 + $0x88] sm:$0xff]   ;;  %v1152_v11 = vld [vmem:[%s1449_s1 + $0x90] sm:$0xff]  }
   0x5   :  { %1081 = vmatpush3.bf16.msra.mxu1 %v1144_v3  ;;  %v1153_v12 = vld [vmem:[%s1449_s1 + $0x58] sm:$0xff]   ;;  %v1157_v16 = vld [vmem:[%s1449_s1 + $0x60] sm:$0xff]   ;;  %v1161_v20 = vld [vmem:[%s1449_s1 + $0x68] sm:$0xff]  }
   0x6   :  { %1082 = vmatprep.subr.bf16.mxu1 %v1147_v6  ;;  %v1154_v13 = vld [vmem:[%s1449_s1 + $0x18] sm:$0xff]   ;;  %v1158_v17 = vld [vmem:[%s1449_s1 + $0x20] sm:$0xff]   ;;  %v1162_v21 = vld [vmem:[%s1449_s1 + $0x28] sm:$0xff]  }
   0x7   :  { %1061 = vmatpush3.bf16.msra.mxu0 %v1146_v5  ;;  %v1155_v14 = vld [vmem:[%s1449_s1 + $0xd8] sm:$0xff]   ;;  %v1159_v18 = vld [vmem:[%s1449_s1 + $0xe0] sm:$0xff]   ;;  %v1163_v22 = vld [vmem:[%s1449_s1 + $0xe8] sm:$0xff]  }
   0x8   :  { %1062 = vmatprep.subr.bf16.mxu0 %v1149_v8  ;;  %v1156_v15 = vld [vmem:[%s1449_s1 + $0x98] sm:$0xff]   ;;  %v1160_v19 = vld [vmem:[%s1449_s1 + $0xa0] sm:$0xff]   ;;  %v1164_v23 = vld [vmem:[%s1449_s1 + $0xa8] sm:$0xff]  }
   0x9   :  { %1083 = vmatpush3.bf16.msra.mxu1 %v1148_v7  ;;  %v1165_v24 = vld [vmem:[%s1449_s1 + $0x70] sm:$0xff]   ;;  %v1169_v28 = vld [vmem:[%s1449_s1 + $0x78] sm:$0xff]   ;;  %v23_v31 = vld [vmem:[%s1450_s0] sm:$0xff] }
   0xa   :  { %1084 = vmatprep.subr.bf16.mxu1 %v1151_v10  ;;  %v1166_v25 = vld [vmem:[%s1449_s1 + $0x30] sm:$0xff]   ;;  %v1170_v29 = vld [vmem:[%s1449_s1 + $0x38] sm:$0xff]   ;;  %v989_v32 = vcombine.low %v23_v31, %v23_v31  ;;  %v990_v33 = vcombine.high %v23_v31, %v23_v31  ;;  %v1176_v35 = vld [vmem:[%s1449_s1 + $0x140] sm:$0xff]  }
   0xb   :  { %1063 = vmatpush3.bf16.msra.mxu0 %v1150_v9  ;;  %v1167_v26 = vld [vmem:[%s1449_s1 + $0xf0] sm:$0xff]   ;;  %v1171_v30 = vld [vmem:[%s1449_s1 + $0xf8] sm:$0xff]   ;;  %v24_v36 = vld [vmem:[%s1450_s0 + $0x8] sm:$0xff] }
   0xc   :  { %1064 = vmatprep.subr.bf16.mxu0 %v1153_v12  ;;  %v1168_v27 = vld [vmem:[%s1449_s1 + $0xb0] sm:$0xff]   ;;  %v1175_v34 = vld [vmem:[%s1449_s1 + $0xb8] sm:$0xff]   ;;  %486 = vmatprep.mubr.bf16.mxu0 %v990_v33  ;;  %v991_v37 = vcombine.low %v24_v36, %v24_v36  ;;  %v992_v38 = vcombine.high %v24_v36, %v24_v36  ;;  %v1179_v39 = vld [vmem:[%s1449_s1 + $0x100] sm:$0xff]  }
   0xd   :  { %1085 = vmatpush3.bf16.msra.mxu1 %v1152_v11  ;;  %v1180_v40 = vld [vmem:[%s1449_s1 + $0x148] sm:$0xff]   ;;  %v1182_v43 = vld [vmem:[%s1449_s1 + $0x150] sm:$0xff]   ;;  %v1184_v45 = vld [vmem:[%s1449_s1 + $0x158] sm:$0xff]  }
   0xe   :  { %1086 = vmatprep.subr.bf16.mxu1 %v1155_v14  ;;  %526 = vmatprep.mubr.bf16.mxu1 %v992_v38  ;;  %v1181_v42 = vld [vmem:[%s1449_s1 + $0x108] sm:$0xff]   ;;  %v1183_v44 = vld [vmem:[%s1449_s1 + $0x110] sm:$0xff]   ;;  %v1185_v46 = vld [vmem:[%s1449_s1 + $0x118] sm:$0xff]  }
   0xf   :  { %1065 = vmatpush3.bf16.msra.mxu0 %v1154_v13  ;;  %v1186_v47 = vld [vmem:[%s1449_s1 + $0x160] sm:$0xff]   ;;  %v1188_v49 = vld [vmem:[%s1449_s1 + $0x168] sm:$0xff]   ;;  %v25_v51 = vld [vmem:[%s1450_s0 + $0x10] sm:$0xff] }
  0x10   :  { %1066 = vmatprep.subr.bf16.mxu0 %v1157_v16  ;;  %v1187_v48 = vld [vmem:[%s1449_s1 + $0x120] sm:$0xff]   ;;  %v1174_v52 = vld [vmem:[%s1450_s0 + $0x18] ss:$0 sps:$4 sm:$0xff]   ;;  %v994_v53 = vcombine.high %v25_v51, %v25_v51  ;;  %v1189_v54 = vld [vmem:[%s1449_s1 + $0x128] sm:$0xff]   ;;  %v993_v59 = vcombine.low %v25_v51, %v25_v51 }
  0x11   :  { %1087 = vmatpush3.bf16.msra.mxu1 %v1156_v15  ;;  %v1194_v50 = vld [vmem:[%s1449_s1 + $0x180] sm:$0xff]   ;;  %v1190_v55 = vld [vmem:[%s1449_s1 + $0x170] sm:$0xff]   ;;  %v1192_v57 = vld [vmem:[%s1449_s1 + $0x178] sm:$0xff]  }
  0x12   :  { %1088 = vmatprep.subr.bf16.mxu1 %v1159_v18  ;;  %v1191_v56 = vld [vmem:[%s1449_s1 + $0x130] sm:$0xff]   ;;  %v1193_v58 = vld [vmem:[%s1449_s1 + $0x138] sm:$0xff]   ;;  %v617_v60 = vld [vmem:[%s1451_s3 + $0x8] sm:$0xff] }
  0x13   :  { %1067 = vmatpush3.bf16.msra.mxu0 %v1158_v17  ;;  %v616_v61 = vld [vmem:[%s1451_s3] sm:$0xff]  ;;  %v619_v62 = vld [vmem:[%s1451_s3 + $0x18] sm:$0xff] }
  0x14   :  { %1068 = vmatprep.subr.bf16.mxu0 %v1161_v20  ;;  %v988_v0 = vld [vmem:[%s1452_s2] ss:$0 sm:$0xff] }
  0x15   :  { %1089 = vmatpush3.bf16.msra.mxu1 %v1160_v19 }
  0x16   :  { %1090 = vmatprep.subr.bf16.mxu1 %v1163_v22 }
  0x17   :  { %1069 = vmatpush3.bf16.msra.mxu0 %v1162_v21 }
  0x18   :  { %1070 = vmatprep.subr.bf16.mxu0 %v1165_v24  ;;  %v621_v24 = vld [vmem:[%s1451_s3 + $0x28] sm:$0xff] }
  0x19   :  { %1091 = vmatpush3.bf16.msra.mxu1 %v1164_v23  ;;  %v618_v23 = vld [vmem:[%s1451_s3 + $0x10] sm:$0xff] }
  0x1a   :  { %1092 = vmatprep.subr.bf16.mxu1 %v1167_v26  ;;  %v622_v26 = vld [vmem:[%s1451_s3 + $0x30] sm:$0xff] }
  0x1b   :  { %1071 = vmatpush3.bf16.msra.mxu0 %v1166_v25  ;;  %v620_v25 = vld [vmem:[%s1451_s3 + $0x20] sm:$0xff] }
  0x1c   :  { %1072 = vmatprep.subr.bf16.mxu0 %v1169_v28 }
  0x1d   :  { %1093 = vmatpush3.bf16.msra.mxu1 %v1168_v27  ;;  %v625_v27 = vlaneseq }
  0x1e   :  { %1094 = vmatprep.subr.bf16.mxu1 %v1171_v30  ;;  %v623_v30 = vld [vmem:[%s1454_s4] sm:$0x7f] }
  0x1f   :  { %1073 = vmatpush3.bf16.msra.mxu0 %v1170_v29  ;;  %v626_v28 = vshrl.u32 %v625_v27, 7 }
  0x20   :  { %1102 = vmatprep.subr.bf16.mxu0 %v1176_v35 }
  0x21   :  { %1095 = vmatpush3.bf16.msra.mxu1 %v1175_v34  ;;  %v627_v29 = vsub.s32 0, %v626_v28  ;;  %v631_v31 = vsub.s32 1, %v626_v28  ;;  %v635_v33 = vsub.s32 2, %v626_v28  ;;  %v639_v35 = vsub.s32 3, %v626_v28 }
  0x22   :  { %487 = vmatmul.mubr.bf16.vlgmr.msra.gmra.mrb[0].mxu0 %v989_v32  ;;  %1128 = vmatprep.subr.bf16.mxu1 %v1197_v41 }
  0x23   :  { %1103 = vmatpush3.bf16.msra.mxu0 %v1179_v39  ;;  %566 = vmatprep.mubr.bf16.mxu0 %v994_v53  ;;  %v628_v32 = vrot.slane %v623_v30, %v627_v29  ;;  %v632_v34 = vrot.slane %v623_v30, %v631_v31  ;;  %v636_v39 = vrot.slane %v623_v30, %v635_v33 }
  0x24   :  { %527 = vmatmul.mubr.bf16.vlgmr.msra.gmra.mrb[0].mxu1 %v991_v37  ;;  %1104 = vmatprep.subr.bf16.mxu0 %v1180_v40  ;;  %v643_v40 = vsub.s32 4, %v626_v28 }
  0x25   :  { %1130 = vmatprep.mubr.msk.bf16.mxu1 %vm1198_vm0, %v1197_v41  ;;  %1129 = vmatpush3.bf16.msra.mxu1 %v1194_v50 }
  0x26   :  { %663 = vmatprep.subr.mxu1 %v617_v60 }
  0x27   :  { %1105 = vmatpush3.bf16.msra.mxu0 %v1181_v42  ;;  %v640_v42 = vrot.slane %v623_v30, %v639_v35 }
  0x28   :  { %1106 = vmatprep.subr.bf16.mxu0 %v1182_v43  ;;  %v647_v43 = vsub.s32 5, %v626_v28 }
  0x2a   :  { %v648_v51 = vrot.slane %v623_v30, %v647_v43 }
  0x2b   :  { %1107 = vmatpush3.bf16.msra.mxu0 %v1183_v44 }
  0x2c   :  { %1108 = vmatprep.subr.bf16.mxu0 %v1184_v45  ;;  %1131 = vmatmul.mubr.msk.bf16.vlgmr.msra.gmra.mrb[4].mxu1 %vm450_vm1, %v1174_v52 }
  0x2d   :  { %727 = vmatprep.mubr.f32.mxu1 %v1197_v41  ;;  %664 = vmatpush1.msra.mxu1 %v616_v61 }
  0x2e   :  { %734 = vmatprep.subr.mxu1 %v619_v62 }
  0x2f   :  { %1109 = vmatpush3.bf16.msra.mxu0 %v1185_v46 }
  0x30   :  { %1110 = vmatprep.subr.bf16.mxu0 %v1186_v47 }
  0x33   :  { %1111 = vmatpush3.bf16.msra.mxu0 %v1187_v48  ;;  %v644_v48 = vrot.slane %v623_v30, %v643_v40 }
  0x34   :  { %1112 = vmatprep.subr.bf16.mxu0 %v1188_v49  ;;  %v651_v49 = vsub.s32 6, %v626_v28 }
  0x37   :  { %1113 = vmatpush3.bf16.msra.mxu0 %v1189_v54 }
  0x38   :  { %1114 = vmatprep.subr.bf16.mxu0 %v1190_v55 }
  0x3b   :  { %1115 = vmatpush3.bf16.msra.mxu0 %v1191_v56  ;;  %v652_v56 = vrot.slane %v623_v30, %v651_v49 }
  0x3c   :  { %1116 = vmatprep.subr.bf16.mxu0 %v1192_v57 }
  0x3f   :  { %1117 = vmatpush3.bf16.msra.mxu0 %v1193_v58 }
  0x42   :  { %567 = vmatmul.mubr.bf16.vlgmr.msra.gmra.mrb[4].mxu0 %v993_v59 }
  0xf5   :  { %v1074_v63 = vpop.f32.mrb[0].mxu0 }
  0xf6   :  { %v1075_v1 = vpop.f32.mrb[1].mxu0 }
  0xf7   :  { %v1076_v2 = vadd.f32 %v1075_v1, %v1074_v63  ;;  %v1077_v3 = vpop.f32.mrb[2].mxu0  ;;  %v1096_v4 = vpop.f32.mrb[0].mxu1 }
  0xf8   :  { %v1078_v5 = vpop.f32.mrb[3].mxu0  ;;  %v1097_v7 = vpop.f32.mrb[1].mxu1 }
  0xf9   :  { %v489_v6 = vadd.f32 %v1076_v2, %v988_v0  ;;  %v1098_v8 = vadd.f32 %v1097_v7, %v1096_v4  ;;  %v1099_v9 = vpop.f32.mrb[2].mxu1 }
  0xfa   :  { %v1100_v10 = vpop.f32.mrb[3].mxu1 }
  0xfb   :  { %v529_v11 = vadd.f32 %v1098_v8, %v489_v6 }
  0xff   :  { %v608_v12 = vpop.f32.mrb[4].mxu1 }
 0x100   :  { %v1132_v13 = vpop.f32.mrb[5].mxu1 }
 0x101   :  { %v611_v14 = vpop.f32.mrb[6].mxu1 }
 0x102   :  { %v1133_v15 = vpop.f32.mrb[7].mxu1 }
 0x115   :  { %v1118_v16 = vpop.f32.mrb[4].mxu0 }
 0x116   :  { %v1119_v17 = vpop.f32.mrb[5].mxu0 }
 0x117   :  { %v1120_v18 = vadd.f32 %v1119_v17, %v1118_v16  ;;  %v1121_v19 = vpop.f32.mrb[6].mxu0 }
 0x118   :  { %v1122_v20 = vpop.f32.mrb[7].mxu0 }
 0x119   :  { %v569_v21 = vadd.f32 %v1120_v18, %v529_v11 }
 0x11b   :  { %v609_v22 = vadd.f32 %v608_v12, %v569_v21 }
 0x11d   :  { %615 = vst.msk [vmem:[%s1453_s5] sm:$0xff] %vm614_vm2, %v609_v22  ;;  %1046 = vmatmul.mubr.msk.f32.vlgmr.msra.gmra.mrb[8].mxu1 %vm614_vm2, %v609_v22 }
 0x11e   :  { %735 = vmatpush1.msra.mxu1 %v618_v23  ;;  %798 = vmatprep.mubr.f32.mxu1 %v1197_v41 }
 0x11f   :  { %805 = vmatprep.subr.mxu1 %v621_v24 }
 0x121   :  { %1047 = vmatmul.mubr.msk.f32.vlgmr.msra.gmra.mrb[10].mxu1 %vm614_vm2, %v609_v22 }
 0x122   :  { %806 = vmatpush1.msra.mxu1 %v620_v25  ;;  %869 = vmatprep.mubr.f32.mxu1 %v1197_v41 }
 0x123   :  { %1134 = vmatprep.subr.mxu1 %v1197_v41 }
 0x125   :  { %1048 = vmatmul.mubr.msk.f32.vlgmr.msra.gmra.mrb[12].mxu1 %vm614_vm2, %v609_v22 }
 0x126   :  { %1135 = vmatpush3.msra.mxu1 %v622_v26  ;;  %1136 = vmatprep.mubr.msk.f32.mxu1 %vm1198_vm0, %v1197_v41 }
 0x129   :  { %1137 = vmatmul.mubr.msk.f32.vlgmr.msra.gmra.mrb[14].mxu1 %vm614_vm2, %v609_v22 }
 0x1f0   :  { %v729_v36 = vpop.f32.mrb[8].mxu1 }
 0x1f1   :  { %v730_v37 = vadd.f32 %v729_v36, %v628_v32  ;;  %v731_v38 = vpop.f32.mrb[9].mxu1 }
 0x1f2   :  { %v732_v41 = vadd.f32 %v731_v38, %v632_v34 }
 0x1f4   :  { %v1054_v44 = vpack.c.bf16 %v732_v41, %v730_v37  ;;  %v800_v45 = vpop.f32.mrb[10].mxu1 }
 0x1f5   :  { %v801_v46 = vadd.f32 %v800_v45, %v636_v39  ;;  %v802_v47 = vpop.f32.mrb[11].mxu1 }
 0x1f6   :  { %975 = vst [vmem:[%s1455_s6] sm:$0xff] %v1054_v44  ;;  %v803_v50 = vadd.f32 %v802_v47, %v640_v42 }
 0x1f8   :  { %v1055_v52 = vpack.c.bf16 %v803_v50, %v801_v46  ;;  %v871_v53 = vpop.f32.mrb[12].mxu1 }
 0x1f9   :  { %v872_v54 = vadd.f32 %v871_v53, %v644_v48  ;;  %v873_v55 = vpop.f32.mrb[13].mxu1 }
 0x1fa   :  { %976 = vst [vmem:[%s1455_s6 + $0x8] sm:$0xff] %v1055_v52  ;;  %v874_v57 = vadd.f32 %v873_v55, %v648_v51 }
 0x1fc   :  { %v1056_v58 = vpack.c.bf16 %v874_v57, %v872_v54  ;;  %v942_v59 = vpop.f32.mrb[14].mxu1 }
 0x1fd   :  { %v943_v60 = vadd.f32 %v942_v59, %v652_v56  ;;  %v1138_v61 = vpop.f32.mrb[15].mxu1 }
 0x1fe   :  { %977 = vst [vmem:[%s1455_s6 + $0x10] sm:$0xff] %v1056_v58 }
 0x1ff   :  { %v1057_v62 = vpack.c.bf16 %v943_v60, %v943_v60 }
 0x201   :  { %979 = vst.msk [vmem:[%s1455_s6 + $0x18] sm:$0xf] %vm978_vm3, %v1057_v62 }

// kernel: forward.10
= control target key start
LH: loop header
LB: loop body
LE: loop exit
PB: predicated region body
PF: predicated region fallthrough
CT: control target
= control target key end

     0   :  { %v1485_v1 = vmov 0   ;;  %s1486_s23 = smov 126   ;;  %s1487_s24 = smov 127   ;;  %vm77_vm0 = vcmask 1039360   ;;  %vm330_vm1 = vcmask 1031168   ;;  %vm81_vm2 = vcmask 130048   ;;  %s1837_s0 = inlined_call_operand.vmem [shape: bf16[16,162], index: 0, kind: input, shape index: {}]   ;;  %s1838_s1 = inlined_call_operand.vmem [shape: bf16[16,16,16], index: 1, kind: input, shape index: {}]   ;;  %s1839_s2 = inlined_call_operand.vmem [shape: f32[16,1], index: 2, kind: input, shape index: {}]   ;;  %s1840_s3 = inlined_call_operand.vmem [shape: f32[1,142], index: 3, kind: input, shape index: {}]   ;;  %s1841_s4 = inlined_call_operand.vmem [shape: f32[16,1], index: 4, kind: input, shape index: {}]   ;;  %s1842_s5 = inlined_call_operand.vmem [shape: f32[16,1], index: 5, kind: input, shape index: {}]   ;;  %s1843_s6 = inlined_call_operand.vmem [shape: bf16[4,16,142], index: 6, kind: output, shape index: {}]  }
   0x1   :  { %v1430_v0 = vld [vmem:[%s1837_s0] ss:$8 sps:$4 sm:$0xff]   ;;  %117 = vmatprep.mubr.bf16.mxu0 %v1485_v1  ;;  %369 = vmatprep.mubr.bf16.mxu1 %v1485_v1  ;;  %v1432_v2 = vld [vmem:[%s1837_s0 + $0x4] ss:$8 sps:$4 sm:$0xff]   ;;  %s1488_s27 = smov 119   ;;  %s1489_s28 = smov 118   ;;  %v1011_v45 = vlaneseq }
   0x2   :  { %1428 = vset.pattern.permute.xlu0 %v1485_v1  ;;  %1429 = vset.pattern.permute.xlu1 %v1485_v1  ;;  %s1490_s29 = smov 117   ;;  %s1491_s30 = smov 110   ;;  %v58_v3 = vld [vmem:[%s1839_s2] sm:$0xff]  ;;  %v59_v4 = vld [vmem:[%s1839_s2 + $0x8] sm:$0xff]  ;;  %vm190_vm3 = vcmask 973824   ;;  %vm253_vm4 = vcmask 965632  }
   0x3   :  { %326 = vrot.lane.b32.xlu1 %v1430_v0, %s1486_s23  ;;  %73 = vrot.lane.b32.xlu0 %v1430_v0, %s1487_s24  ;;  %s1492_s7 = smov 109   ;;  %s1493_s8 = smov 108   ;;  %v1433_v11 = vld [vmem:[%s1838_s1 + $0x68] sm:$0xff]   ;;  %v1434_v12 = vld [vmem:[%s1838_s1 + $0x60] sm:$0xff]   ;;  %vm495_vm5 = vcmask 957440   ;;  %vm664_vm6 = vcmask 900096  }
   0x4   :  { %v1435_v17 = vld [vmem:[%s1838_s1 + $0x78] sm:$0xff]   ;;  %v1436_v18 = vld [vmem:[%s1838_s1 + $0x70] sm:$0xff]   ;;  %v1439_v26 = vld [vmem:[%s1838_s1 + $0x28] sm:$0xff]   ;;  %vm727_vm7 = vcmask 891904   ;;  %vm951_vm8 = vcmask 883712   ;;  %v1012_v46 = vshrl.u32 %v1011_v45, 7 }
   0x5   :  { %v1437_v23 = vld [vmem:[%s1838_s1 + $0x38] sm:$0xff]   ;;  %v1438_v24 = vld [vmem:[%s1838_s1 + $0x30] sm:$0xff]   ;;  %v1440_v27 = vld [vmem:[%s1838_s1 + $0x20] sm:$0xff]   ;;  %vm1025_vm9 = vcmask 113664   ;;  %vm1261_vm10 = vcmask 1043456   ;;  %vm1262_vm11 = vcmask 113668  }
   0x6   :  { %v1441_v29 = vld [vmem:[%s1838_s1 + $0x48] sm:$0xff]   ;;  %v1442_v30 = vld [vmem:[%s1838_s1 + $0x40] sm:$0xff]   ;;  %v1443_v34 = vld [vmem:[%s1838_s1 + $0x58] sm:$0xff]   ;;  %v1017_v47 = vsub.s32 1, %v1012_v46  ;;  %v1013_v49 = vsub.s32 0, %v1012_v46 }
   0x7   :  { %328 = vrot.lane.b32.xlu1 %v1432_v2, %s1486_s23  ;;  %75 = vrot.lane.b32.xlu0 %v1432_v2, %s1487_s24  ;;  %v1444_v35 = vld [vmem:[%s1838_s1 + $0x50] sm:$0xff]   ;;  %v1445_v40 = vld [vmem:[%s1838_s1 + $0x18] sm:$0xff]   ;;  %vm1793_vm12 = vmor %vm1262_vm11, %vm1261_vm10 }
   0x8   :  { %v1446_v41 = vld [vmem:[%s1838_s1 + $0x10] sm:$0xff]   ;;  %v1447_v43 = vld [vmem:[%s1838_s1 + $0x8] sm:$0xff]   ;;  %v1448_v44 = vld [vmem:[%s1838_s1] sm:$0xff]  }
   0x9   :  { %v1009_v48 = vld [vmem:[%s1840_s3] sm:$0x3] }
   0xa   :  { %v1626_v54 = vrot.slane %v1009_v48, %v1017_v47  ;;  %v1630_v58 = vrot.slane %v1009_v48, %v1013_v49 }
   0xb   :  { %188 = vrot.lane.b32.xlu1 %v1432_v2, %s1488_s27  ;;  %186 = vrot.lane.b32.xlu0 %v1430_v0, %s1488_s27 }
   0xf   :  { %251 = vrot.lane.b32.xlu1 %v1432_v2, %s1489_s28  ;;  %249 = vrot.lane.b32.xlu0 %v1430_v0, %s1489_s28 }
  0x13   :  { %493 = vrot.lane.b32.xlu1 %v1432_v2, %s1490_s29  ;;  %491 = vrot.lane.b32.xlu0 %v1430_v0, %s1490_s29 }
  0x17   :  { %662 = vrot.lane.b32.xlu1 %v1432_v2, %s1491_s30  ;;  %660 = vrot.lane.b32.xlu0 %v1430_v0, %s1491_s30 }
  0x1b   :  { %725 = vrot.lane.b32.xlu1 %v1432_v2, %s1492_s7  ;;  %723 = vrot.lane.b32.xlu0 %v1430_v0, %s1492_s7 }
  0x1f   :  { %949 = vrot.lane.b32.xlu1 %v1432_v2, %s1493_s8  ;;  %947 = vrot.lane.b32.xlu0 %v1430_v0, %s1493_s8 }
  0x23   :  { %309 = vperm.xlu0 %1428, %v58_v3   ;;  %314 = vperm.xlu1 %1429, %v59_v4  }
  0x75   :  { %v327_v5 = vpop.permute.xlu1 %326  ;;  %v74_v6 = vpop.permute.xlu0 %73 }
  0x79   :  { %v329_v7 = vpop.permute.xlu1 %328  ;;  %v76_v8 = vpop.permute.xlu0 %75 }
  0x7a   :  { %85 = vmatprep.subr.bf16.mxu0 %v76_v8  ;;  %337 = vmatprep.subr.bf16.mxu1 %v329_v7  ;;  %v78_v9 = vsel %vm77_vm0, %v74_v6, %v76_v8  ;;  %v331_v10 = vsel %vm330_vm1, %v327_v5, %v329_v7 }
  0x7b   :  { %86 = vmatpush1.bf16.msra.mxu0 %v78_v9  ;;  %338 = vmatpush1.bf16.msra.mxu1 %v331_v10 }
  0x7c   :  { %388 = vmatprep.subr.bf16.mxu1 %v76_v8  ;;  %138 = vmatprep.subr.bf16.mxu0 %v1432_v2 }
  0x7d   :  { %v189_v13 = vpop.permute.xlu1 %188  ;;  %v187_v14 = vpop.permute.xlu0 %186 }
  0x7e   :  { %1318 = vmatmul.mubr.msk.bf16.vlgmr.msra.gmra.mrb[0].mxu0 %vm81_vm2, %v1433_v11  ;;  %1326 = vmatmul.mubr.msk.bf16.vlgmr.msra.gmra.mrb[0].mxu1 %vm81_vm2, %v1434_v12  ;;  %v191_v19 = vsel %vm190_vm3, %v187_v14, %v189_v13 }
  0x7f   :  { %139 = vmatpush1.bf16.msra.mxu0 %v1430_v0  ;;  %389 = vmatpush1.bf16.msra.mxu1 %v78_v9 }
  0x80   :  { %420 = vmatprep.mubr.bf16.mxu1 %v1485_v1  ;;  %170 = vmatprep.mubr.bf16.mxu0 %v1485_v1 }
  0x81   :  { %197 = vmatprep.subr.bf16.mxu0 %v189_v13  ;;  %v252_v15 = vpop.permute.xlu1 %251  ;;  %v250_v16 = vpop.permute.xlu0 %249 }
  0x82   :  { %439 = vmatprep.subr.bf16.mxu1 %v252_v15  ;;  %v254_v20 = vsel %vm253_vm4, %v250_v16, %v252_v15 }
  0x85   :  { %v494_v21 = vpop.permute.xlu1 %493  ;;  %v492_v22 = vpop.permute.xlu0 %491 }
  0x86   :  { %v496_v25 = vsel %vm495_vm5, %v492_v22, %v494_v21 }
  0x89   :  { %v663_v28 = vpop.permute.xlu1 %662  ;;  %v661_v32 = vpop.permute.xlu0 %660 }
  0x8a   :  { %1320 = vmatmul.mubr.msk.bf16.vlgmr.msra.gmra.mrb[0].mxu0 %vm81_vm2, %v1435_v17  ;;  %1328 = vmatmul.mubr.msk.bf16.vlgmr.msra.gmra.mrb[0].mxu1 %vm81_vm2, %v1436_v18  ;;  %v665_v36 = vsel %vm664_vm6, %v661_v32, %v663_v28 }
  0x8b   :  { %198 = vmatpush1.bf16.msra.mxu0 %v191_v19  ;;  %440 = vmatpush1.bf16.msra.mxu1 %v254_v20 }
  0x8c   :  { %260 = vmatprep.subr.bf16.mxu0 %v252_v15  ;;  %229 = vmatprep.mubr.bf16.mxu0 %v1485_v1 }
  0x8d   :  { %471 = vmatprep.mubr.bf16.mxu1 %v1485_v1  ;;  %502 = vmatprep.subr.bf16.mxu1 %v494_v21  ;;  %v726_v31 = vpop.permute.xlu1 %725  ;;  %v724_v33 = vpop.permute.xlu0 %723 }
  0x8e   :  { %v728_v37 = vsel %vm727_vm7, %v724_v33, %v726_v31 }
  0x91   :  { %v950_v38 = vpop.permute.xlu1 %949  ;;  %v948_v39 = vpop.permute.xlu0 %947 }
  0x92   :  { %v952_v42 = vsel %vm951_vm8, %v948_v39, %v950_v38 }
  0x96   :  { %1322 = vmatmul.mubr.msk.bf16.vlgmr.msra.gmra.mrb[0].mxu0 %vm81_vm2, %v1437_v23  ;;  %1330 = vmatmul.mubr.msk.bf16.vlgmr.msra.gmra.mrb[0].mxu1 %vm81_vm2, %v1438_v24 }
  0x97   :  { %261 = vmatpush1.bf16.msra.mxu0 %v254_v20  ;;  %503 = vmatpush1.bf16.msra.mxu1 %v496_v25 }
  0x98   :  { %561 = vmatprep.subr.bf16.mxu0 %v252_v15  ;;  %793 = vmatprep.subr.bf16.mxu1 %v494_v21 }
  0x99   :  { %292 = vmatprep.mubr.bf16.mxu0 %v1485_v1  ;;  %534 = vmatprep.mubr.bf16.mxu1 %v1485_v1 }
  0xa2   :  { %1324 = vmatmul.mubr.msk.bf16.vlgmr.msra.gmra.mrb[0].mxu0 %vm81_vm2, %v1439_v26  ;;  %1332 = vmatmul.mubr.msk.bf16.vlgmr.msra.gmra.mrb[0].mxu1 %vm81_vm2, %v1440_v27  ;;  %v310_v50 = vpop.permute.xlu0 %309  ;;  %v315_v51 = vpop.permute.xlu1 %314 }
  0xa3   :  { %562 = vmatpush1.bf16.msra.mxu0 %v254_v20  ;;  %794 = vmatpush1.bf16.msra.mxu1 %v496_v25 }
  0xa4   :  { %612 = vmatprep.subr.bf16.mxu0 %v189_v13  ;;  %844 = vmatprep.subr.bf16.mxu1 %v252_v15 }
  0xa5   :  { %593 = vmatprep.mubr.bf16.mxu0 %v1485_v1  ;;  %825 = vmatprep.mubr.bf16.mxu1 %v1485_v1 }
  0xaa   :  { %1334 = vmatmul.mubr.msk.bf16.vlgmr.msra.gmra.mrb[4].mxu0 %vm81_vm2, %v1441_v29  ;;  %1342 = vmatmul.mubr.msk.bf16.vlgmr.msra.gmra.mrb[4].mxu1 %vm81_vm2, %v1442_v30 }
  0xab   :  { %613 = vmatpush1.bf16.msra.mxu0 %v191_v19  ;;  %845 = vmatpush1.bf16.msra.mxu1 %v254_v20 }
  0xac   :  { %644 = vmatprep.mubr.bf16.mxu0 %v1485_v1  ;;  %876 = vmatprep.mubr.bf16.mxu1 %v1485_v1 }
  0xad   :  { %671 = vmatprep.subr.bf16.mxu0 %v663_v28  ;;  %895 = vmatprep.subr.bf16.mxu1 %v726_v31 }
  0xb6   :  { %1336 = vmatmul.mubr.msk.bf16.vlgmr.msra.gmra.mrb[4].mxu0 %vm81_vm2, %v1443_v34  ;;  %1344 = vmatmul.mubr.msk.bf16.vlgmr.msra.gmra.mrb[4].mxu1 %vm81_vm2, %v1444_v35 }
  0xb7   :  { %672 = vmatpush1.bf16.msra.mxu0 %v665_v36  ;;  %896 = vmatpush1.bf16.msra.mxu1 %v728_v37 }
  0xb8   :  { %734 = vmatprep.subr.bf16.mxu0 %v726_v31  ;;  %703 = vmatprep.mubr.bf16.mxu0 %v1485_v1 }
  0xb9   :  { %927 = vmatprep.mubr.bf16.mxu1 %v1485_v1  ;;  %958 = vmatprep.subr.bf16.mxu1 %v950_v38 }
  0xc2   :  { %1338 = vmatmul.mubr.msk.bf16.vlgmr.msra.gmra.mrb[4].mxu0 %vm81_vm2, %v1445_v40  ;;  %1346 = vmatmul.mubr.msk.bf16.vlgmr.msra.gmra.mrb[4].mxu1 %vm81_vm2, %v1446_v41 }
  0xc3   :  { %735 = vmatpush1.bf16.msra.mxu0 %v728_v37  ;;  %959 = vmatpush1.bf16.msra.mxu1 %v952_v42 }
  0xc4   :  { %766 = vmatprep.mubr.bf16.mxu0 %v1485_v1  ;;  %990 = vmatprep.mubr.bf16.mxu1 %v1485_v1 }
  0xce   :  { %1340 = vmatmul.mubr.msk.bf16.vlgmr.msra.gmra.mrb[4].mxu0 %vm81_vm2, %v1447_v43  ;;  %1348 = vmatmul.mubr.msk.bf16.vlgmr.msra.gmra.mrb[4].mxu1 %vm81_vm2, %v1448_v44 }
 0x175   :  { %v294_v52 = vpop.f32.mrb[0].mxu0  ;;  %v536_v53 = vpop.f32.mrb[0].mxu1 }
 0x176   :  { %v296_v55 = vpop.f32.mrb[1].mxu0  ;;  %v538_v56 = vpop.f32.mrb[1].mxu1  ;;  %v1628_v57 = vadd.f32 %v310_v50, %v294_v52  ;;  %v1632_v59 = vadd.f32 %v536_v53, %v310_v50 }
 0x177   :  { %v1634_v60 = vadd.f32 %v310_v50, %v296_v55  ;;  %v1636_v61 = vadd.f32 %v538_v56, %v310_v50  ;;  %v298_v62 = vpop.f32.mrb[2].mxu0  ;;  %v540_v63 = vpop.f32.mrb[2].mxu1 }
 0x178   :  { %v300_v0 = vpop.f32.mrb[3].mxu0  ;;  %v542_v1 = vpop.f32.mrb[3].mxu1  ;;  %v1646_v6 = vadd.f32 %v315_v51, %v298_v62  ;;  %v1648_v7 = vadd.f32 %v540_v63, %v315_v51  ;;  %v1021_v8 = vmul.f32 %v1630_v58, %v1628_v57  ;;  %v1034_v9 = vmul.f32 %v1630_v58, %v1632_v59 }
 0x179   :  { %v1638_v2 = vadd.f32 %v315_v51, %v300_v0  ;;  %v1640_v3 = vadd.f32 %v542_v1, %v315_v51  ;;  %v1022_v4 = vmul.f32 %v1626_v54, %v1634_v60  ;;  %v1035_v5 = vmul.f32 %v1626_v54, %v1636_v61 }
 0x17a   :  { %v1036_v18 = vmul.f32 %v1630_v58, %v1648_v7  ;;  %v1023_v19 = vmul.f32 %v1630_v58, %v1646_v6 }
 0x17b   :  { %v1026_v10 = vsel %vm1025_vm9, %v1022_v4, 0.0  ;;  %v1038_v11 = vsel %vm1025_vm9, %v1035_v5, 0.0  ;;  %v1037_v12 = vmul.f32 %v1626_v54, %v1640_v3  ;;  %v1024_v13 = vmul.f32 %v1626_v54, %v1638_v2 }
 0x17c   :  { %v1027_v14 = vadd.f32 %v1026_v10, %v1021_v8  ;;  %v1039_v15 = vadd.f32 %v1038_v11, %v1034_v9 }
 0x17d   :  { %v1042_v16 = vsel %vm1025_vm9, %v1037_v12, 0.0  ;;  %v1030_v17 = vsel %vm1025_vm9, %v1024_v13, 0.0 }
 0x17e   :  { %1028 = vadd.xlane.f32.xlu1 %v1027_v14  ;;  %1040 = vadd.xlane.f32.xlu0 %v1039_v15  ;;  %v1043_v20 = vadd.f32 %v1042_v16, %v1036_v18  ;;  %v1031_v21 = vadd.f32 %v1030_v17, %v1023_v19 }
 0x182   :  { %1044 = vadd.xlane.f32.xlu1 %v1043_v20  ;;  %1032 = vadd.xlane.f32.xlu0 %v1031_v21 }
 0x1a1   :  { %v768_v22 = vpop.f32.mrb[4].mxu0  ;;  %v992_v23 = vpop.f32.mrb[4].mxu1 }
 0x1a2   :  { %v1666_v24 = vadd.f32 %v768_v22, %v310_v50  ;;  %v770_v25 = vpop.f32.mrb[5].mxu0  ;;  %v994_v26 = vpop.f32.mrb[5].mxu1  ;;  %v1682_v38 = vadd.f32 %v992_v23, %v310_v50 }
 0x1a3   :  { %v1668_v27 = vadd.f32 %v770_v25, %v310_v50  ;;  %v1670_v28 = vadd.f32 %v994_v26, %v310_v50  ;;  %v772_v29 = vpop.f32.mrb[6].mxu0  ;;  %v996_v30 = vpop.f32.mrb[6].mxu1 }
 0x1a4   :  { %v1672_v31 = vadd.f32 %v772_v29, %v315_v51  ;;  %v774_v32 = vpop.f32.mrb[7].mxu0  ;;  %v998_v33 = vpop.f32.mrb[7].mxu1  ;;  %v1048_v39 = vmul.f32 %v1630_v58, %v1666_v24  ;;  %v1691_v43 = vadd.f32 %v996_v30, %v315_v51  ;;  %v1062_v49 = vmul.f32 %v1630_v58, %v1682_v38 }
 0x1a5   :  { %v1674_v34 = vadd.f32 %v774_v32, %v315_v51  ;;  %v1676_v35 = vadd.f32 %v998_v33, %v315_v51  ;;  %v1049_v36 = vmul.f32 %v1626_v54, %v1668_v27  ;;  %v1063_v37 = vmul.f32 %v1626_v54, %v1670_v28 }
 0x1a6   :  { %v1050_v45 = vmul.f32 %v1630_v58, %v1672_v31  ;;  %v1064_v51 = vmul.f32 %v1630_v58, %v1691_v43 }
 0x1a7   :  { %v1052_v40 = vsel %vm1025_vm9, %v1049_v36, 0.0  ;;  %v1051_v41 = vmul.f32 %v1626_v54, %v1674_v34  ;;  %v1065_v42 = vmul.f32 %v1626_v54, %v1676_v35  ;;  %v1066_v47 = vsel %vm1025_vm9, %v1063_v37, 0.0 }
 0x1a8   :  { %v1053_v44 = vadd.f32 %v1052_v40, %v1048_v39  ;;  %v1067_v52 = vadd.f32 %v1066_v47, %v1062_v49 }
 0x1a9   :  { %v1056_v46 = vsel %vm1025_vm9, %v1051_v41, 0.0  ;;  %v1070_v50 = vsel %vm1025_vm9, %v1065_v42, 0.0 }
 0x1aa   :  { %1054 = vadd.xlane.f32.xlu0 %v1053_v44  ;;  %v1057_v48 = vadd.f32 %v1056_v46, %v1050_v45  ;;  %v1071_v53 = vadd.f32 %v1070_v50, %v1064_v51 }
 0x1ac   :  { %1058 = vadd.xlane.f32.xlu1 %v1057_v48 }
 0x1ae   :  { %1068 = vadd.xlane.f32.xlu0 %v1067_v52 }
 0x1b0   :  { %1072 = vadd.xlane.f32.xlu1 %v1071_v53 }
 0x20b   :  { %v1041_v55 = vpop.xlane.xlu0 %1040  ;;  %v1029_v56 = vpop.xlane.xlu1 %1028 }
 0x20c   :  { %v1046_v1 = vadd.f32 %v1041_v55, %v1029_v56 }
 0x20f   :  { %v1033_v62 = vpop.xlane.xlu0 %1032  ;;  %v1045_v63 = vpop.xlane.xlu1 %1044 }
 0x210   :  { %v1047_v5 = vadd.f32 %v1045_v63, %v1033_v62 }
 0x237   :  { %v1055_v0 = vpop.xlane.xlu0 %1054 }
 0x238   :  { %v1060_v8 = vadd.f32 %v1055_v0, %v1046_v1 }
 0x239   :  { %v1059_v4 = vpop.xlane.xlu1 %1058 }
 0x23a   :  { %v1061_v10 = vadd.f32 %v1059_v4, %v1047_v5 }
 0x23b   :  { %v1069_v9 = vpop.xlane.xlu0 %1068 }
 0x23c   :  { %v1074_v11 = vadd.f32 %v1069_v9, %v1060_v8 }
 0x23d   :  { %v1073_v12 = vpop.xlane.xlu1 %1072 }
 0x23e   :  { %v1702_v13 = vmul.f32 0.0025510204, %v1074_v11  ;;  %v1075_v14 = vadd.f32 %v1073_v12, %v1061_v10 }
 0x240   :  { %v1704_v15 = vmul.f32 0.0025510204, %v1075_v14  ;;  %v1079_v16 = vsub.f32 %v1628_v57, %v1702_v13  ;;  %v1080_v17 = vsub.f32 %v1634_v60, %v1702_v13  ;;  %v1099_v18 = vsub.f32 %v1632_v59, %v1702_v13 }
 0x241   :  { %v1100_v19 = vsub.f32 %v1636_v61, %v1702_v13  ;;  %v1121_v20 = vsub.f32 %v1666_v24, %v1702_v13  ;;  %v1122_v21 = vsub.f32 %v1668_v27, %v1702_v13  ;;  %v1143_v22 = vsub.f32 %v1682_v38, %v1702_v13 }
 0x242   :  { %v1083_v23 = vmul.f32 %v1079_v16, %v1630_v58  ;;  %v1084_v25 = vmul.f32 %v1080_v17, %v1626_v54  ;;  %v1081_v26 = vsub.f32 %v1646_v6, %v1704_v15  ;;  %v1082_v29 = vsub.f32 %v1638_v2, %v1704_v15 }
 0x243   :  { %v1103_v30 = vmul.f32 %v1099_v18, %v1630_v58  ;;  %v1104_v32 = vmul.f32 %v1100_v19, %v1626_v54  ;;  %v1101_v33 = vsub.f32 %v1648_v7, %v1704_v15  ;;  %v1102_v36 = vsub.f32 %v1640_v3, %v1704_v15 }
 0x244   :  { %v1087_v37 = vmul.f32 %v1083_v23, %v1083_v23  ;;  %v1088_v39 = vmul.f32 %v1084_v25, %v1084_v25  ;;  %v1085_v40 = vmul.f32 %v1081_v26, %v1630_v58  ;;  %v1086_v41 = vmul.f32 %v1082_v29, %v1626_v54 }
 0x245   :  { %v1107_v42 = vmul.f32 %v1103_v30, %v1103_v30  ;;  %v1108_v44 = vmul.f32 %v1104_v32, %v1104_v32  ;;  %v1105_v45 = vmul.f32 %v1101_v33, %v1630_v58  ;;  %v1106_v46 = vmul.f32 %v1102_v36, %v1626_v54 }
 0x246   :  { %v1091_v47 = vsel %vm1025_vm9, %v1088_v39, 0.0  ;;  %v1089_v48 = vmul.f32 %v1085_v40, %v1085_v40  ;;  %v1090_v49 = vmul.f32 %v1086_v41, %v1086_v41  ;;  %v1125_v50 = vmul.f32 %v1121_v20, %v1630_v58 }
 0x247   :  { %v1092_v52 = vadd.f32 %v1091_v47, %v1087_v37  ;;  %v1111_v51 = vsel %vm1025_vm9, %v1108_v44, 0.0  ;;  %v1110_v53 = vmul.f32 %v1106_v46, %v1106_v46  ;;  %v1109_v62 = vmul.f32 %v1105_v45, %v1105_v45 }
 0x248   :  { %v1095_v55 = vsel %vm1025_vm9, %v1090_v49, 0.0  ;;  %v1112_v56 = vadd.f32 %v1111_v51, %v1107_v42  ;;  %v1126_v63 = vmul.f32 %v1122_v21, %v1626_v54  ;;  %v1129_v1 = vmul.f32 %v1125_v50, %v1125_v50 }
 0x249   :  { %1093 = vadd.xlane.f32.xlu0 %v1092_v52  ;;  %v1096_v0 = vadd.f32 %v1095_v55, %v1089_v48  ;;  %v1123_v4 = vsub.f32 %v1672_v31, %v1704_v15  ;;  %v1124_v5 = vsub.f32 %v1674_v34, %v1704_v15  ;;  %v1115_v8 = vsel %vm1025_vm9, %v1110_v53, 0.0 }
 0x24a   :  { %v1130_v9 = vmul.f32 %v1126_v63, %v1126_v63  ;;  %v1144_v10 = vsub.f32 %v1670_v28, %v1702_v13  ;;  %v1147_v11 = vmul.f32 %v1143_v22, %v1630_v58  ;;  %v1145_v16 = vsub.f32 %v1691_v43, %v1704_v15 }
 0x24b   :  { %1097 = vadd.xlane.f32.xlu1 %v1096_v0  ;;  %v1127_v12 = vmul.f32 %v1123_v4, %v1630_v58  ;;  %v1128_v14 = vmul.f32 %v1124_v5, %v1626_v54  ;;  %v1146_v17 = vsub.f32 %v1676_v35, %v1704_v15  ;;  %v1116_v20 = vadd.f32 %v1115_v8, %v1109_v62  ;;  %v1171_v4 = vld [vmem:[%s1841_s4] sm:$0xff]  ;;  %v1172_v8 = vld [vmem:[%s1841_s4 + $0x8] sm:$0xff] }
 0x24c   :  { %v1133_v18 = vsel %vm1025_vm9, %v1130_v9, 0.0  ;;  %v1148_v19 = vmul.f32 %v1144_v10, %v1626_v54  ;;  %v1149_v22 = vmul.f32 %v1145_v16, %v1630_v58  ;;  %v1151_v32 = vmul.f32 %v1147_v11, %v1147_v11  ;;  %v1175_v16 = vld [vmem:[%s1842_s5] sm:$0xff] }
 0x24d   :  { %1113 = vadd.xlane.f32.xlu0 %v1112_v56  ;;  %v1131_v21 = vmul.f32 %v1127_v12, %v1127_v12  ;;  %v1132_v23 = vmul.f32 %v1128_v14, %v1128_v14  ;;  %v1150_v26 = vmul.f32 %v1146_v17, %v1626_v54  ;;  %v1134_v29 = vadd.f32 %v1133_v18, %v1129_v1  ;;  %v1176_v14 = vld [vmem:[%s1842_s5 + $0x8] sm:$0xff] }
 0x24e   :  { %v1152_v25 = vmul.f32 %v1148_v19, %v1148_v19  ;;  %v1153_v39 = vmul.f32 %v1149_v22, %v1149_v22 }
 0x24f   :  { %1117 = vadd.xlane.f32.xlu1 %v1116_v20  ;;  %v1137_v30 = vsel %vm1025_vm9, %v1132_v23, 0.0  ;;  %v1154_v36 = vmul.f32 %v1150_v26, %v1150_v26 }
 0x250   :  { %v1155_v33 = vsel %vm1025_vm9, %v1152_v25, 0.0  ;;  %v1138_v37 = vadd.f32 %v1137_v30, %v1131_v21 }
 0x251   :  { %1135 = vadd.xlane.f32.xlu0 %v1134_v29  ;;  %v1159_v40 = vsel %vm1025_vm9, %v1154_v36, 0.0  ;;  %v1156_v41 = vadd.f32 %v1155_v33, %v1151_v32 }
 0x252   :  { %v1160_v58 = vadd.f32 %v1159_v40, %v1153_v39 }
 0x253   :  { %1139 = vadd.xlane.f32.xlu1 %v1138_v37 }
 0x255   :  { %1157 = vadd.xlane.f32.xlu0 %v1156_v41 }
 0x257   :  { %1161 = vadd.xlane.f32.xlu1 %v1160_v58 }
 0x2d6   :  { %v1094_v42 = vpop.xlane.xlu0 %1093 }
 0x2d8   :  { %v1098_v54 = vpop.xlane.xlu1 %1097 }
 0x2da   :  { %v1114_v44 = vpop.xlane.xlu0 %1113 }
 0x2db   :  { %v1119_v47 = vadd.f32 %v1114_v44, %v1094_v42 }
 0x2dc   :  { %v1118_v45 = vpop.xlane.xlu1 %1117 }
 0x2dd   :  { %v1120_v49 = vadd.f32 %v1118_v45, %v1098_v54 }
 0x2de   :  { %v1136_v46 = vpop.xlane.xlu0 %1135 }
 0x2df   :  { %v1141_v50 = vadd.f32 %v1136_v46, %v1119_v47 }
 0x2e0   :  { %v1140_v48 = vpop.xlane.xlu1 %1139 }
 0x2e1   :  { %v1142_v51 = vadd.f32 %v1140_v48, %v1120_v49 }
 0x2e2   :  { %v1158_v52 = vpop.xlane.xlu0 %1157 }
 0x2e3   :  { %v1163_v53 = vadd.f32 %v1158_v52, %v1141_v50 }
 0x2e4   :  { %v1162_v55 = vpop.xlane.xlu1 %1161 }
 0x2e5   :  { %v1165_v56 = vmul.f32 0.0025510204, %v1163_v53  ;;  %v1164_v62 = vadd.f32 %v1162_v55, %v1142_v51 }
 0x2e7   :  { %v1167_v63 = vadd.f32 1e-05, %v1165_v56  ;;  %v1166_v0 = vmul.f32 0.0025510204, %v1164_v62 }
 0x2e9   :  { %1449 = vrsqrt.f32 %v1167_v63  ;;  %v1168_v1 = vadd.f32 1e-05, %v1166_v0 }
 0x2eb   :  { %1451 = vrsqrt.f32 %v1168_v1 }
 0x2f3   :  { %v1450_v5 = vpop.eup %1449 }
 0x2f4   :  { %v1173_v9 = vmul.f32 %v1450_v5, %v1171_v4 }
 0x2f5   :  { %v1452_v10 = vpop.eup %1451 }
 0x2f6   :  { %1183 = vperm.xlu0 %1428, %v1173_v9   ;;  %v1174_v11 = vmul.f32 %v1452_v10, %v1172_v8  ;;  %v1177_v12 = vmul.f32 %v1173_v9, %v1702_v13 }
 0x2f8   :  { %1188 = vperm.xlu1 %1429, %v1174_v11   ;;  %v1178_v17 = vmul.f32 %v1174_v11, %v1704_v15  ;;  %v1179_v19 = vsub.f32 %v1175_v16, %v1177_v12 }
 0x2fa   :  { %v1180_v18 = vsub.f32 %v1176_v14, %v1178_v17 }
 0x2fc   :  { %1202 = vperm.xlu0 %1428, %v1180_v18   ;;  %1197 = vperm.xlu1 %1429, %v1179_v19  }
 0x375   :  { %v1184_v20 = vpop.permute.xlu0 %1183 }
 0x376   :  { %v1192_v41 = vmul.f32 %v1184_v20, %v1634_v60  ;;  %v1225_v60 = vmul.f32 %v1184_v20, %v1682_v38 }
 0x377   :  { %v1189_v21 = vpop.permute.xlu1 %1188 }
 0x378   :  { %v1193_v23 = vmul.f32 %v1189_v21, %v1646_v6  ;;  %v1194_v13 = vmul.f32 %v1189_v21, %v1638_v2  ;;  %v1211_v22 = vmul.f32 %v1189_v21, %v1648_v7  ;;  %v1212_v25 = vmul.f32 %v1189_v21, %v1640_v3 }
 0x379   :  { %v1219_v29 = vmul.f32 %v1189_v21, %v1672_v31  ;;  %v1220_v33 = vmul.f32 %v1189_v21, %v1674_v34  ;;  %v1227_v37 = vmul.f32 %v1189_v21, %v1691_v43  ;;  %v1228_v6 = vmul.f32 %v1189_v21, %v1676_v35 }
 0x37a   :  { %v1191_v3 = vmul.f32 %v1184_v20, %v1628_v57  ;;  %v1209_v34 = vmul.f32 %v1184_v20, %v1632_v59  ;;  %v1210_v43 = vmul.f32 %v1184_v20, %v1636_v61  ;;  %v1217_v35 = vmul.f32 %v1184_v20, %v1666_v24 }
 0x37b   :  { %v1203_v26 = vpop.permute.xlu0 %1202  ;;  %v1198_v7 = vpop.permute.xlu1 %1197  ;;  %v1218_v57 = vmul.f32 %v1184_v20, %v1668_v27  ;;  %v1226_v59 = vmul.f32 %v1184_v20, %v1670_v28 }
 0x37c   :  { %v1207_v30 = vadd.f32 %v1203_v26, %v1193_v23  ;;  %v1208_v32 = vadd.f32 %v1203_v26, %v1194_v13  ;;  %v1215_v15 = vadd.f32 %v1211_v22, %v1203_v26  ;;  %v1216_v36 = vadd.f32 %v1212_v25, %v1203_v26 }
 0x37d   :  { %v1223_v39 = vadd.f32 %v1219_v29, %v1203_v26  ;;  %v1224_v2 = vadd.f32 %v1220_v33, %v1203_v26  ;;  %v1231_v40 = vadd.f32 %v1227_v37, %v1203_v26  ;;  %v1232_v31 = vadd.f32 %v1228_v6, %v1203_v26 }
 0x37e   :  { %1453 = vtanh.f32 %v1207_v30  ;;  %v1205_v58 = vadd.f32 %v1198_v7, %v1191_v3  ;;  %v1206_v42 = vadd.f32 %v1198_v7, %v1192_v41  ;;  %v1213_v54 = vadd.f32 %v1209_v34, %v1198_v7 }
 0x37f   :  { %1455 = vtanh.f32 %v1208_v32  ;;  %v1214_v44 = vadd.f32 %v1210_v43, %v1198_v7  ;;  %v1221_v45 = vadd.f32 %v1217_v35, %v1198_v7  ;;  %v1222_v46 = vadd.f32 %v1218_v57, %v1198_v7 }
 0x380   :  { %1457 = vtanh.f32 %v1215_v15  ;;  %v1229_v47 = vadd.f32 %v1225_v60, %v1198_v7  ;;  %v1230_v27 = vadd.f32 %v1226_v59, %v1198_v7 }
 0x381   :  { %1459 = vtanh.f32 %v1216_v36 }
 0x382   :  { %1461 = vtanh.f32 %v1223_v39 }
 0x383   :  { %1463 = vtanh.f32 %v1224_v2 }
 0x384   :  { %1465 = vtanh.f32 %v1231_v40 }
 0x385   :  { %1467 = vtanh.f32 %v1232_v31 }
 0x386   :  { %1469 = vtanh.f32 %v1205_v58 }
 0x387   :  { %1471 = vtanh.f32 %v1206_v42 }
 0x388   :  { %v1454_v61 = vpop.eup %1453  ;;  %1473 = vtanh.f32 %v1213_v54 }
 0x389   :  { %v1456_v48 = vpop.eup %1455  ;;  %1475 = vtanh.f32 %v1214_v44 }
 0x38a   :  { %v1458_v49 = vpop.eup %1457  ;;  %v1364_v50 = vpack.c.bf16 %v1456_v48, %v1454_v61  ;;  %1477 = vtanh.f32 %v1221_v45 }
 0x38b   :  { %v1460_v38 = vpop.eup %1459  ;;  %1479 = vtanh.f32 %v1222_v46 }
 0x38c   :  { %v1462_v52 = vpop.eup %1461  ;;  %1265 = vst.msk [vmem:[%s1843_s6 + $0x8] sm:$0xff] %vm1793_vm12, %v1364_v50  ;;  %v1366_v28 = vpack.c.bf16 %v1460_v38, %v1458_v49  ;;  %1481 = vtanh.f32 %v1229_v47 }
 0x38d   :  { %v1464_v51 = vpop.eup %1463  ;;  %1483 = vtanh.f32 %v1230_v27 }
 0x38e   :  { %v1466_v53 = vpop.eup %1465  ;;  %1354 = vst.msk [vmem:[%s1843_s6 + $0x18] sm:$0xff] %vm1793_vm12, %v1366_v28  ;;  %v1368_v55 = vpack.c.bf16 %v1464_v51, %v1462_v52 }
 0x38f   :  { %v1468_v56 = vpop.eup %1467 }
 0x390   :  { %v1470_v62 = vpop.eup %1469  ;;  %1358 = vst.msk [vmem:[%s1843_s6 + $0x28] sm:$0xff] %vm1793_vm12, %v1368_v55  ;;  %v1370_v63 = vpack.c.bf16 %v1468_v56, %v1466_v53 }
 0x391   :  { %v1472_v0 = vpop.eup %1471 }
 0x392   :  { %v1474_v1 = vpop.eup %1473  ;;  %1362 = vst.msk [vmem:[%s1843_s6 + $0x38] sm:$0xff] %vm1793_vm12, %v1370_v63  ;;  %v1363_v4 = vpack.c.bf16 %v1472_v0, %v1470_v62 }
 0x393   :  { %v1476_v5 = vpop.eup %1475 }
 0x394   :  { %v1478_v8 = vpop.eup %1477  ;;  %1264 = vst.msk [vmem:[%s1843_s6] sm:$0xff] %vm1793_vm12, %v1363_v4  ;;  %v1365_v9 = vpack.c.bf16 %v1476_v5, %v1474_v1 }
 0x395   :  { %v1480_v10 = vpop.eup %1479 }
 0x396   :  { %v1482_v11 = vpop.eup %1481  ;;  %1353 = vst.msk [vmem:[%s1843_s6 + $0x10] sm:$0xff] %vm1793_vm12, %v1365_v9  ;;  %v1367_v12 = vpack.c.bf16 %v1480_v10, %v1478_v8 }
 0x397   :  { %v1484_v14 = vpop.eup %1483 }
 0x398   :  { %1357 = vst.msk [vmem:[%s1843_s6 + $0x20] sm:$0xff] %vm1793_vm12, %v1367_v12  ;;  %v1369_v16 = vpack.c.bf16 %v1484_v14, %v1482_v11 }
 0x39a   :  { %1361 = vst.msk [vmem:[%s1843_s6 + $0x30] sm:$0xff] %vm1793_vm12, %v1369_v16 }

// kernel: forward.11
= control target key start
LH: loop header
LB: loop body
LE: loop exit
PB: predicated region body
PF: predicated region fallthrough
CT: control target
= control target key end

     0   :  { %v1782_v1 = vmov 0   ;;  %s1783_s16 = smov 127   ;;  %s1784_s21 = smov 112   ;;  %vm60_vm0 = vcmask 1039360   ;;  %vm68_vm1 = vcmask 130048   ;;  %vm251_vm2 = vcmask 916480   ;;  %s2139_s0 = inlined_call_operand.vmem [shape: bf16[16,512], index: 0, kind: input, shape index: {}]   ;;  %s2140_s2 = inlined_call_operand.vmem [shape: f32[8,1], index: 2, kind: input, shape index: {}]   ;;  %s2141_s1 = inlined_call_operand.vmem [shape: bf16[16,8,16], index: 1, kind: input, shape index: {}]   ;;  %s2142_s3 = inlined_call_operand.vmem [shape: f32[4,8,478], index: 3, kind: output, shape index: {}]  }
   0x1   :  { %v1814_v0 = vld [vmem:[%s2139_s0 + $0x4] ss:$16 sps:$4 sm:$0xff]   ;;  %145 = vmatprep.mubr.bf16.mxu1 %v1782_v1  ;;  %104 = vmatprep.mubr.bf16.mxu0 %v1782_v1  ;;  %v1821_v2 = vld [vmem:[%s2139_s0] ss:$16 sps:$4 sm:$0xff]   ;;  %v1828_v3 = vld [vmem:[%s2139_s0 + $0x8] ss:$16 sps:$4 sm:$0xff]  }
   0x2   :  { %1743 = vset.pattern.permute.xlu0 %v1782_v1  ;;  %52 = vrot.lane.b32.xlu1 %v1821_v2, %s1783_s16  ;;  %v1749_v4 = vld [vmem:[%s2139_s0 + $0xc] ss:$16 sps:$4 sm:$0xff]   ;;  %s1785_s22 = smov 111   ;;  %s1786_s0 = smov 126   ;;  %v35_v5 = vld [vmem:[%s2140_s2] sm:$0xff]  ;;  %vm356_vm3 = vcmask 908288  }
   0x3   :  { %54 = vrot.lane.b32.xlu0 %v1814_v0, %s1783_s16  ;;  %s1787_s23 = smov 110   ;;  %s1788_s24 = smov 96   ;;  %v32_v13 = vld [vmem:[%s2141_s1 + $0x34] sm:$0xf]  ;;  %v34_v19 = vld [vmem:[%s2141_s1 + $0x3c] sm:$0xf] }
   0x4   :  { %s1789_s25 = smov 95   ;;  %s1790_s26 = smov 94   ;;  %v26_v27 = vld [vmem:[%s2141_s1 + $0x1c] sm:$0xf]  ;;  %vm470_vm4 = vcmask 1031168   ;;  %vm745_vm5 = vcmask 900096  }
   0x5   :  { %v24_v35 = vld [vmem:[%s2141_s1 + $0x14] sm:$0xf]  ;;  %v31_v38 = vld [vmem:[%s2141_s1 + $0x30] sm:$0xf]  ;;  %v33_v41 = vld [vmem:[%s2141_s1 + $0x38] sm:$0xf] }
   0x6   :  { %58 = vrot.lane.b32.xlu1 %v1749_v4, %s1783_s16  ;;  %v25_v45 = vld [vmem:[%s2141_s1 + $0x18] sm:$0xf]  ;;  %v23_v48 = vld [vmem:[%s2141_s1 + $0x10] sm:$0xf]  ;;  %vm1024_vm6 = vcmask 785408   ;;  %vm1129_vm7 = vcmask 777216  }
   0x7   :  { %56 = vrot.lane.b32.xlu0 %v1828_v3, %s1783_s16  ;;  %v28_v52 = vld [vmem:[%s2141_s1 + $0x24] sm:$0xf]  ;;  %v30_v57 = vld [vmem:[%s2141_s1 + $0x2c] sm:$0xf]  ;;  %vm1497_vm8 = vcmask 769024  }
   0x8   :  { %v22_v63 = vld [vmem:[%s2141_s1 + $0xc] sm:$0xf] }
   0xa   :  { %247 = vrot.lane.b32.xlu1 %v1828_v3, %s1784_s21 }
   0xb   :  { %245 = vrot.lane.b32.xlu0 %v1814_v0, %s1784_s21 }
   0xe   :  { %249 = vrot.lane.b32.xlu1 %v1749_v4, %s1784_s21 }
   0xf   :  { %243 = vrot.lane.b32.xlu0 %v1821_v2, %s1784_s21 }
  0x12   :  { %352 = vrot.lane.b32.xlu1 %v1828_v3, %s1785_s22 }
  0x13   :  { %350 = vrot.lane.b32.xlu0 %v1814_v0, %s1785_s22 }
  0x16   :  { %354 = vrot.lane.b32.xlu1 %v1749_v4, %s1785_s22 }
  0x17   :  { %348 = vrot.lane.b32.xlu0 %v1821_v2, %s1785_s22 }
  0x1a   :  { %466 = vrot.lane.b32.xlu1 %v1828_v3, %s1786_s0 }
  0x1b   :  { %464 = vrot.lane.b32.xlu0 %v1814_v0, %s1786_s0 }
  0x1e   :  { %468 = vrot.lane.b32.xlu1 %v1749_v4, %s1786_s0 }
  0x1f   :  { %462 = vrot.lane.b32.xlu0 %v1821_v2, %s1786_s0 }
  0x22   :  { %741 = vrot.lane.b32.xlu1 %v1828_v3, %s1787_s23 }
  0x23   :  { %739 = vrot.lane.b32.xlu0 %v1814_v0, %s1787_s23 }
  0x26   :  { %743 = vrot.lane.b32.xlu1 %v1749_v4, %s1787_s23 }
  0x27   :  { %737 = vrot.lane.b32.xlu0 %v1821_v2, %s1787_s23 }
  0x2a   :  { %1020 = vrot.lane.b32.xlu1 %v1828_v3, %s1788_s24 }
  0x2b   :  { %1018 = vrot.lane.b32.xlu0 %v1814_v0, %s1788_s24 }
  0x2e   :  { %1022 = vrot.lane.b32.xlu1 %v1749_v4, %s1788_s24 }
  0x2f   :  { %1016 = vrot.lane.b32.xlu0 %v1821_v2, %s1788_s24 }
  0x32   :  { %1125 = vrot.lane.b32.xlu1 %v1828_v3, %s1789_s25 }
  0x33   :  { %1123 = vrot.lane.b32.xlu0 %v1814_v0, %s1789_s25 }
  0x36   :  { %1127 = vrot.lane.b32.xlu1 %v1749_v4, %s1789_s25 }
  0x37   :  { %1121 = vrot.lane.b32.xlu0 %v1821_v2, %s1789_s25 }
  0x3a   :  { %1493 = vrot.lane.b32.xlu1 %v1828_v3, %s1790_s26 }
  0x3b   :  { %1491 = vrot.lane.b32.xlu0 %v1814_v0, %s1790_s26 }
  0x3e   :  { %1495 = vrot.lane.b32.xlu1 %v1749_v4, %s1790_s26 }
  0x3f   :  { %1489 = vrot.lane.b32.xlu0 %v1821_v2, %s1790_s26 }
  0x43   :  { %455 = vperm.xlu0 %1743, %v35_v5  }
  0x74   :  { %v53_v7 = vpop.permute.xlu1 %52 }
  0x75   :  { %v55_v6 = vpop.permute.xlu0 %54 }
  0x76   :  { %v1868_v12 = vsel %vm60_vm0, %v53_v7, %v55_v6  ;;  %v29_v7 = vld [vmem:[%s2141_s1 + $0x28] sm:$0xf] }
  0x78   :  { %v1859_v9 = vpop.permute.xlu1 %58 }
  0x79   :  { %v57_v8 = vpop.permute.xlu0 %56  ;;  %113 = vmatprep.subr.bf16.mxu1 %v1859_v9 }
  0x7a   :  { %v1861_v10 = vsel %vm60_vm0, %v55_v6, %v57_v8  ;;  %v1866_v11 = vsel %vm60_vm0, %v57_v8, %v1859_v9 }
  0x7b   :  { %72 = vmatprep.subr.bf16.mxu0 %v1861_v10  ;;  %114 = vmatpush1.bf16.msra.mxu1 %v1866_v11 }
  0x7c   :  { %73 = vmatpush1.bf16.msra.mxu0 %v1868_v12  ;;  %202 = vmatprep.subr.bf16.mxu1 %v1749_v4  ;;  %v248_v15 = vpop.permute.xlu1 %247  ;;  %v27_v4 = vld [vmem:[%s2141_s1 + $0x20] sm:$0xf] }
  0x7d   :  { %v246_v14 = vpop.permute.xlu0 %245  ;;  %161 = vmatprep.subr.bf16.mxu0 %v1814_v0 }
  0x7e   :  { %1691 = vmatmul.mubr.msk.bf16.vlgmr.msra.gmra.mrb[0].mxu1 %vm68_vm1, %v32_v13  ;;  %v1879_v16 = vsel %vm251_vm2, %v246_v14, %v248_v15 }
  0x7f   :  { %1690 = vmatmul.mubr.msk.bf16.vlgmr.msra.gmra.mrb[0].mxu0 %vm68_vm1, %v32_v13  ;;  %203 = vmatpush1.bf16.msra.mxu1 %v1828_v3  ;;  %v20_v3 = vld [vmem:[%s2141_s1 + $0x4] sm:$0xf] }
  0x80   :  { %162 = vmatpush1.bf16.msra.mxu0 %v1821_v2  ;;  %234 = vmatprep.mubr.bf16.mxu1 %v1782_v1  ;;  %v1885_v18 = vpop.permute.xlu1 %249 }
  0x81   :  { %v244_v17 = vpop.permute.xlu0 %243  ;;  %262 = vmatprep.subr.bf16.mxu0 %v1879_v16  ;;  %193 = vmatprep.mubr.bf16.mxu0 %v1782_v1  ;;  %v1897_v22 = vsel %vm251_vm2, %v248_v15, %v1885_v18 }
  0x82   :  { %303 = vmatprep.subr.bf16.mxu1 %v1885_v18  ;;  %v1893_v20 = vsel %vm251_vm2, %v244_v17, %v246_v14  ;;  %v19_v14 = vld [vmem:[%s2141_s1] sm:$0xf] }
  0x84   :  { %v353_v23 = vpop.permute.xlu1 %352 }
  0x85   :  { %v351_v21 = vpop.permute.xlu0 %350 }
  0x86   :  { %1693 = vmatmul.mubr.msk.bf16.vlgmr.msra.gmra.mrb[4].mxu1 %vm68_vm1, %v34_v19  ;;  %v1901_v24 = vsel %vm356_vm3, %v351_v21, %v353_v23 }
  0x87   :  { %1692 = vmatmul.mubr.msk.bf16.vlgmr.msra.gmra.mrb[4].mxu0 %vm68_vm1, %v34_v19  ;;  %304 = vmatpush1.bf16.msra.mxu1 %v1897_v22 }
  0x88   :  { %263 = vmatpush1.bf16.msra.mxu0 %v1893_v20  ;;  %335 = vmatprep.mubr.bf16.mxu1 %v1782_v1  ;;  %v1908_v26 = vpop.permute.xlu1 %354 }
  0x89   :  { %v349_v25 = vpop.permute.xlu0 %348  ;;  %367 = vmatprep.subr.bf16.mxu0 %v1901_v24  ;;  %294 = vmatprep.mubr.bf16.mxu0 %v1782_v1  ;;  %v1920_v30 = vsel %vm356_vm3, %v353_v23, %v1908_v26 }
  0x8a   :  { %408 = vmatprep.subr.bf16.mxu1 %v1908_v26  ;;  %v1916_v28 = vsel %vm356_vm3, %v349_v25, %v351_v21 }
  0x8c   :  { %v467_v31 = vpop.permute.xlu1 %466 }
  0x8d   :  { %v465_v29 = vpop.permute.xlu0 %464 }
  0x8e   :  { %1695 = vmatmul.mubr.msk.bf16.vlgmr.msra.gmra.mrb[8].mxu1 %vm68_vm1, %v26_v27  ;;  %v472_v32 = vsel %vm470_vm4, %v465_v29, %v467_v31 }
  0x8f   :  { %1694 = vmatmul.mubr.msk.bf16.vlgmr.msra.gmra.mrb[8].mxu0 %vm68_vm1, %v26_v27  ;;  %409 = vmatpush1.bf16.msra.mxu1 %v1920_v30 }
  0x90   :  { %368 = vmatpush1.bf16.msra.mxu0 %v1916_v28  ;;  %440 = vmatprep.mubr.bf16.mxu1 %v1782_v1  ;;  %v469_v34 = vpop.permute.xlu1 %468 }
  0x91   :  { %481 = vmatprep.subr.bf16.mxu0 %v472_v32  ;;  %v463_v33 = vpop.permute.xlu0 %462  ;;  %399 = vmatprep.mubr.bf16.mxu0 %v1782_v1  ;;  %v473_v37 = vsel %vm470_vm4, %v467_v31, %v469_v34 }
  0x92   :  { %522 = vmatprep.subr.bf16.mxu1 %v469_v34  ;;  %v471_v36 = vsel %vm470_vm4, %v463_v33, %v465_v29 }
  0x94   :  { %v742_v39 = vpop.permute.xlu1 %741 }
  0x95   :  { %v740_v40 = vpop.permute.xlu0 %739 }
  0x96   :  { %1697 = vmatmul.mubr.msk.bf16.vlgmr.msra.gmra.mrb[12].mxu1 %vm68_vm1, %v24_v35  ;;  %v1955_v42 = vsel %vm745_vm5, %v740_v40, %v742_v39 }
  0x97   :  { %1696 = vmatmul.mubr.msk.bf16.vlgmr.msra.gmra.mrb[12].mxu0 %vm68_vm1, %v24_v35  ;;  %523 = vmatpush1.bf16.msra.mxu1 %v473_v37 }
  0x98   :  { %482 = vmatpush1.bf16.msra.mxu0 %v471_v36  ;;  %607 = vmatprep.subr.bf16.mxu1 %v1859_v9  ;;  %v1959_v43 = vpop.permute.xlu1 %743 }
  0x99   :  { %566 = vmatprep.subr.bf16.mxu0 %v1861_v10  ;;  %554 = vmatprep.mubr.bf16.mxu1 %v1782_v1  ;;  %v738_v44 = vpop.permute.xlu0 %737  ;;  %v1975_v47 = vsel %vm745_vm5, %v742_v39, %v1959_v43 }
  0x9a   :  { %513 = vmatprep.mubr.bf16.mxu0 %v1782_v1  ;;  %v1971_v46 = vsel %vm745_vm5, %v738_v44, %v740_v40 }
  0x9c   :  { %v1021_v49 = vpop.permute.xlu1 %1020 }
  0x9d   :  { %v1019_v50 = vpop.permute.xlu0 %1018 }
  0x9e   :  { %1699 = vmatmul.mubr.msk.bf16.vlgmr.msra.gmra.mrb[16].mxu1 %vm68_vm1, %v31_v38  ;;  %v1026_v54 = vsel %vm1024_vm6, %v1019_v50, %v1021_v49 }
  0x9f   :  { %1698 = vmatmul.mubr.msk.bf16.vlgmr.msra.gmra.mrb[16].mxu0 %vm68_vm1, %v31_v38  ;;  %608 = vmatpush1.bf16.msra.mxu1 %v1866_v11  ;;  %v21_v11 = vld [vmem:[%s2141_s1 + $0x8] sm:$0xf] }
  0xa0   :  { %567 = vmatpush1.bf16.msra.mxu0 %v1868_v12  ;;  %692 = vmatprep.subr.bf16.mxu1 %v1908_v26  ;;  %v1023_v51 = vpop.permute.xlu1 %1022 }
  0xa1   :  { %651 = vmatprep.subr.bf16.mxu0 %v1901_v24  ;;  %639 = vmatprep.mubr.bf16.mxu1 %v1782_v1  ;;  %v1017_v53 = vpop.permute.xlu0 %1016  ;;  %v1027_v59 = vsel %vm1024_vm6, %v1021_v49, %v1023_v51 }
  0xa2   :  { %598 = vmatprep.mubr.bf16.mxu0 %v1782_v1  ;;  %v1025_v58 = vsel %vm1024_vm6, %v1017_v53, %v1019_v50 }
  0xa4   :  { %v1126_v55 = vpop.permute.xlu1 %1125 }
  0xa5   :  { %v1124_v56 = vpop.permute.xlu0 %1123 }
  0xa6   :  { %1701 = vmatmul.mubr.msk.bf16.vlgmr.msra.gmra.mrb[20].mxu1 %vm68_vm1, %v33_v41  ;;  %v1131_v60 = vsel %vm1129_vm7, %v1124_v56, %v1126_v55 }
  0xa7   :  { %1700 = vmatmul.mubr.msk.bf16.vlgmr.msra.gmra.mrb[20].mxu0 %vm68_vm1, %v33_v41  ;;  %693 = vmatpush1.bf16.msra.mxu1 %v1920_v30 }
  0xa8   :  { %652 = vmatpush1.bf16.msra.mxu0 %v1916_v28  ;;  %724 = vmatprep.mubr.bf16.mxu1 %v1782_v1  ;;  %v1128_v61 = vpop.permute.xlu1 %1127 }
  0xa9   :  { %756 = vmatprep.subr.bf16.mxu0 %v1955_v42  ;;  %797 = vmatprep.subr.bf16.mxu1 %v1959_v43  ;;  %v1122_v62 = vpop.permute.xlu0 %1121  ;;  %v1132_v2 = vsel %vm1129_vm7, %v1126_v55, %v1128_v61 }
  0xaa   :  { %683 = vmatprep.mubr.bf16.mxu0 %v1782_v1  ;;  %v1130_v0 = vsel %vm1129_vm7, %v1122_v62, %v1124_v56 }
  0xac   :  { %v1494_v5 = vpop.permute.xlu1 %1493 }
  0xad   :  { %v1492_v6 = vpop.permute.xlu0 %1491 }
  0xae   :  { %1703 = vmatmul.mubr.msk.bf16.vlgmr.msra.gmra.mrb[24].mxu1 %vm68_vm1, %v25_v45  ;;  %v1499_v8 = vsel %vm1497_vm8, %v1492_v6, %v1494_v5 }
  0xaf   :  { %1702 = vmatmul.mubr.msk.bf16.vlgmr.msra.gmra.mrb[24].mxu0 %vm68_vm1, %v25_v45  ;;  %798 = vmatpush1.bf16.msra.mxu1 %v1975_v47 }
  0xb0   :  { %757 = vmatpush1.bf16.msra.mxu0 %v1971_v46  ;;  %890 = vmatprep.subr.bf16.mxu1 %v1908_v26  ;;  %v1496_v9 = vpop.permute.xlu1 %1495 }
  0xb1   :  { %849 = vmatprep.subr.bf16.mxu0 %v1901_v24  ;;  %829 = vmatprep.mubr.bf16.mxu1 %v1782_v1  ;;  %v1490_v10 = vpop.permute.xlu0 %1489  ;;  %v1500_v13 = vsel %vm1497_vm8, %v1494_v5, %v1496_v9 }
  0xb2   :  { %788 = vmatprep.mubr.bf16.mxu0 %v1782_v1  ;;  %v1498_v12 = vsel %vm1497_vm8, %v1490_v10, %v1492_v6 }
  0xb6   :  { %1705 = vmatmul.mubr.msk.bf16.vlgmr.msra.gmra.mrb[28].mxu1 %vm68_vm1, %v23_v48 }
  0xb7   :  { %1704 = vmatmul.mubr.msk.bf16.vlgmr.msra.gmra.mrb[28].mxu0 %vm68_vm1, %v23_v48  ;;  %891 = vmatpush1.bf16.msra.mxu1 %v1920_v30 }
  0xb8   :  { %850 = vmatpush1.bf16.msra.mxu0 %v1916_v28  ;;  %975 = vmatprep.subr.bf16.mxu1 %v1885_v18 }
  0xb9   :  { %934 = vmatprep.subr.bf16.mxu0 %v1879_v16  ;;  %922 = vmatprep.mubr.bf16.mxu1 %v1782_v1 }
  0xba   :  { %881 = vmatprep.mubr.bf16.mxu0 %v1782_v1 }
  0xbe   :  { %1707 = vmatmul.mubr.msk.bf16.vlgmr.msra.gmra.mrb[32].mxu1 %vm68_vm1, %v28_v52 }
  0xbf   :  { %1706 = vmatmul.mubr.msk.bf16.vlgmr.msra.gmra.mrb[32].mxu0 %vm68_vm1, %v28_v52  ;;  %976 = vmatpush1.bf16.msra.mxu1 %v1897_v22 }
  0xc0   :  { %935 = vmatpush1.bf16.msra.mxu0 %v1893_v20  ;;  %1007 = vmatprep.mubr.bf16.mxu1 %v1782_v1 }
  0xc1   :  { %1035 = vmatprep.subr.bf16.mxu0 %v1026_v54  ;;  %1076 = vmatprep.subr.bf16.mxu1 %v1023_v51 }
  0xc2   :  { %966 = vmatprep.mubr.bf16.mxu0 %v1782_v1 }
  0xc6   :  { %1709 = vmatmul.mubr.msk.bf16.vlgmr.msra.gmra.mrb[36].mxu1 %vm68_vm1, %v30_v57 }
  0xc7   :  { %1708 = vmatmul.mubr.msk.bf16.vlgmr.msra.gmra.mrb[36].mxu0 %vm68_vm1, %v30_v57  ;;  %1077 = vmatpush1.bf16.msra.mxu1 %v1027_v59 }
  0xc8   :  { %1036 = vmatpush1.bf16.msra.mxu0 %v1025_v58  ;;  %1108 = vmatprep.mubr.bf16.mxu1 %v1782_v1 }
  0xc9   :  { %1140 = vmatprep.subr.bf16.mxu0 %v1131_v60  ;;  %1181 = vmatprep.subr.bf16.mxu1 %v1128_v61 }
  0xca   :  { %1067 = vmatprep.mubr.bf16.mxu0 %v1782_v1 }
  0xce   :  { %1711 = vmatmul.mubr.msk.bf16.vlgmr.msra.gmra.mrb[40].mxu1 %vm68_vm1, %v22_v63 }
  0xcf   :  { %1710 = vmatmul.mubr.msk.bf16.vlgmr.msra.gmra.mrb[40].mxu0 %vm68_vm1, %v22_v63  ;;  %1182 = vmatpush1.bf16.msra.mxu1 %v1132_v2 }
  0xd0   :  { %1141 = vmatpush1.bf16.msra.mxu0 %v1130_v0  ;;  %1274 = vmatprep.subr.bf16.mxu1 %v1959_v43 }
  0xd1   :  { %1233 = vmatprep.subr.bf16.mxu0 %v1955_v42  ;;  %1213 = vmatprep.mubr.bf16.mxu1 %v1782_v1 }
  0xd2   :  { %1172 = vmatprep.mubr.bf16.mxu0 %v1782_v1 }
  0xd6   :  { %1713 = vmatmul.mubr.msk.bf16.vlgmr.msra.gmra.mrb[44].mxu1 %vm68_vm1, %v20_v3 }
  0xd7   :  { %1712 = vmatmul.mubr.msk.bf16.vlgmr.msra.gmra.mrb[44].mxu0 %vm68_vm1, %v20_v3  ;;  %1275 = vmatpush1.bf16.msra.mxu1 %v1975_v47 }
  0xd8   :  { %1234 = vmatpush1.bf16.msra.mxu0 %v1971_v46  ;;  %1359 = vmatprep.subr.bf16.mxu1 %v1908_v26  ;;  %v2069_v46 = vpop.permute.xlu0 %455 }
  0xd9   :  { %1318 = vmatprep.subr.bf16.mxu0 %v1901_v24  ;;  %1306 = vmatprep.mubr.bf16.mxu1 %v1782_v1 }
  0xda   :  { %1265 = vmatprep.mubr.bf16.mxu0 %v1782_v1 }
  0xde   :  { %1715 = vmatmul.mubr.msk.bf16.vlgmr.msra.gmra.mrb[48].mxu1 %vm68_vm1, %v27_v4 }
  0xdf   :  { %1714 = vmatmul.mubr.msk.bf16.vlgmr.msra.gmra.mrb[48].mxu0 %vm68_vm1, %v27_v4  ;;  %1360 = vmatpush1.bf16.msra.mxu1 %v1920_v30 }
  0xe0   :  { %1319 = vmatpush1.bf16.msra.mxu0 %v1916_v28  ;;  %1444 = vmatprep.subr.bf16.mxu1 %v1128_v61 }
  0xe1   :  { %1403 = vmatprep.subr.bf16.mxu0 %v1131_v60  ;;  %1391 = vmatprep.mubr.bf16.mxu1 %v1782_v1 }
  0xe2   :  { %1350 = vmatprep.mubr.bf16.mxu0 %v1782_v1 }
  0xe6   :  { %1717 = vmatmul.mubr.msk.bf16.vlgmr.msra.gmra.mrb[52].mxu1 %vm68_vm1, %v29_v7 }
  0xe7   :  { %1716 = vmatmul.mubr.msk.bf16.vlgmr.msra.gmra.mrb[52].mxu0 %vm68_vm1, %v29_v7  ;;  %1445 = vmatpush1.bf16.msra.mxu1 %v1132_v2 }
  0xe8   :  { %1404 = vmatpush1.bf16.msra.mxu0 %v1130_v0  ;;  %1476 = vmatprep.mubr.bf16.mxu1 %v1782_v1 }
  0xe9   :  { %1508 = vmatprep.subr.bf16.mxu0 %v1499_v8  ;;  %1549 = vmatprep.subr.bf16.mxu1 %v1496_v9 }
  0xea   :  { %1435 = vmatprep.mubr.bf16.mxu0 %v1782_v1 }
  0xee   :  { %1719 = vmatmul.mubr.msk.bf16.vlgmr.msra.gmra.mrb[56].mxu1 %vm68_vm1, %v21_v11 }
  0xef   :  { %1718 = vmatmul.mubr.msk.bf16.vlgmr.msra.gmra.mrb[56].mxu0 %vm68_vm1, %v21_v11  ;;  %1550 = vmatpush1.bf16.msra.mxu1 %v1500_v13 }
  0xf0   :  { %1509 = vmatpush1.bf16.msra.mxu0 %v1498_v12  ;;  %1581 = vmatprep.mubr.bf16.mxu1 %v1782_v1 }
  0xf1   :  { %1540 = vmatprep.mubr.bf16.mxu0 %v1782_v1 }
  0xf6   :  { %1721 = vmatmul.mubr.msk.bf16.vlgmr.msra.gmra.mrb[60].mxu1 %vm68_vm1, %v19_v14 }
  0xf7   :  { %1720 = vmatmul.mubr.msk.bf16.vlgmr.msra.gmra.mrb[60].mxu0 %vm68_vm1, %v19_v14 }
 0x151   :  { %v147_v15 = vpop.f32.mrb[0].mxu1 }
 0x152   :  { %v106_v16 = vpop.f32.mrb[0].mxu0  ;;  %v149_v17 = vpop.f32.mrb[1].mxu1 }
 0x153   :  { %v108_v18 = vpop.f32.mrb[1].mxu0  ;;  %v151_v19 = vpop.f32.mrb[2].mxu1 }
 0x154   :  { %v110_v20 = vpop.f32.mrb[2].mxu0  ;;  %v152_v21 = vpop.f32.mrb[3].mxu1 }
 0x155   :  { %v111_v22 = vpop.f32.mrb[3].mxu0 }
 0x159   :  { %v236_v23 = vpop.f32.mrb[4].mxu1 }
 0x15a   :  { %v195_v24 = vpop.f32.mrb[4].mxu0  ;;  %v237_v25 = vadd.f32 %v236_v23, %v147_v15  ;;  %v238_v26 = vpop.f32.mrb[5].mxu1 }
 0x15b   :  { %v196_v1 = vadd.f32 %v195_v24, %v106_v16  ;;  %v197_v27 = vpop.f32.mrb[5].mxu0  ;;  %v239_v28 = vadd.f32 %v238_v26, %v149_v17  ;;  %v240_v30 = vpop.f32.mrb[6].mxu1 }
 0x15c   :  { %v198_v29 = vadd.f32 %v197_v27, %v108_v18  ;;  %v199_v31 = vpop.f32.mrb[6].mxu0  ;;  %v241_v32 = vpop.f32.mrb[7].mxu1 }
 0x15d   :  { %v200_v33 = vpop.f32.mrb[7].mxu0 }
 0x161   :  { %v337_v34 = vpop.f32.mrb[8].mxu1 }
 0x162   :  { %v296_v35 = vpop.f32.mrb[8].mxu0  ;;  %v346_v36 = vadd.f32 %v337_v34, %v237_v25  ;;  %v339_v38 = vpop.f32.mrb[9].mxu1 }
 0x163   :  { %v344_v37 = vadd.f32 %v296_v35, %v196_v1  ;;  %v298_v39 = vpop.f32.mrb[9].mxu0  ;;  %v347_v40 = vadd.f32 %v339_v38, %v239_v28  ;;  %v341_v42 = vpop.f32.mrb[10].mxu1 }
 0x164   :  { %v345_v41 = vadd.f32 %v298_v39, %v198_v29  ;;  %v300_v43 = vpop.f32.mrb[10].mxu0  ;;  %v342_v44 = vpop.f32.mrb[11].mxu1 }
 0x165   :  { %v301_v45 = vpop.f32.mrb[11].mxu0 }
 0x169   :  { %v442_v47 = vpop.f32.mrb[12].mxu1 }
 0x16a   :  { %v401_v48 = vpop.f32.mrb[12].mxu0  ;;  %v451_v49 = vadd.f32 %v442_v47, %v346_v36  ;;  %v444_v51 = vpop.f32.mrb[13].mxu1 }
 0x16b   :  { %v449_v50 = vadd.f32 %v401_v48, %v344_v37  ;;  %v403_v52 = vpop.f32.mrb[13].mxu0  ;;  %v452_v53 = vadd.f32 %v444_v51, %v347_v40  ;;  %v446_v55 = vpop.f32.mrb[14].mxu1 }
 0x16c   :  { %v450_v54 = vadd.f32 %v403_v52, %v345_v41  ;;  %v405_v56 = vpop.f32.mrb[14].mxu0  ;;  %v460_v58 = vadd.f32 %v2069_v46, %v451_v49  ;;  %v447_v59 = vpop.f32.mrb[15].mxu1 }
 0x16d   :  { %v458_v57 = vadd.f32 %v2069_v46, %v449_v50  ;;  %v406_v60 = vpop.f32.mrb[15].mxu0  ;;  %v461_v61 = vadd.f32 %v2069_v46, %v452_v53 }
 0x16e   :  { %v459_v62 = vadd.f32 %v2069_v46, %v450_v54  ;;  %v1600_v0 = vmul.f32 0.5, %v460_v58 }
 0x16f   :  { %v1598_v63 = vmul.f32 0.5, %v458_v57  ;;  %v1601_v2 = vmul.f32 0.5, %v461_v61 }
 0x170   :  { %v1599_v3 = vmul.f32 0.5, %v459_v62 }
 0x171   :  { %1750 = vtanh.f32 %v1598_v63  ;;  %v556_v4 = vpop.f32.mrb[16].mxu1 }
 0x172   :  { %1752 = vtanh.f32 %v1600_v0  ;;  %v515_v5 = vpop.f32.mrb[16].mxu0  ;;  %v558_v6 = vpop.f32.mrb[17].mxu1 }
 0x173   :  { %1754 = vtanh.f32 %v1601_v2  ;;  %v517_v7 = vpop.f32.mrb[17].mxu0  ;;  %v560_v8 = vpop.f32.mrb[18].mxu1 }
 0x174   :  { %1756 = vtanh.f32 %v1599_v3  ;;  %v519_v9 = vpop.f32.mrb[18].mxu0  ;;  %v561_v10 = vpop.f32.mrb[19].mxu1 }
 0x175   :  { %v520_v11 = vpop.f32.mrb[19].mxu0 }
 0x179   :  { %v641_v12 = vpop.f32.mrb[20].mxu1 }
 0x17a   :  { %v600_v13 = vpop.f32.mrb[20].mxu0  ;;  %v642_v15 = vadd.f32 %v641_v12, %v556_v4  ;;  %v643_v17 = vpop.f32.mrb[21].mxu1 }
 0x17b   :  { %v1751_v14 = vpop.eup %1750  ;;  %v601_v16 = vadd.f32 %v600_v13, %v515_v5  ;;  %v602_v18 = vpop.f32.mrb[21].mxu0  ;;  %v644_v21 = vadd.f32 %v643_v17, %v558_v6 }
 0x17c   :  { %v1753_v19 = vpop.eup %1752  ;;  %v1606_v20 = vadd.f32 1.0, %v1751_v14  ;;  %v603_v22 = vadd.f32 %v602_v18, %v517_v7  ;;  %v645_v23 = vpop.f32.mrb[22].mxu1 }
 0x17d   :  { %v604_v24 = vpop.f32.mrb[22].mxu0  ;;  %v1755_v25 = vpop.eup %1754  ;;  %v1608_v1 = vadd.f32 1.0, %v1753_v19 }
 0x17e   :  { %v646_v26 = vpop.f32.mrb[23].mxu1  ;;  %v605_v27 = vpop.f32.mrb[23].mxu0  ;;  %v1609_v29 = vadd.f32 1.0, %v1755_v25  ;;  %v1610_v30 = vmul.f32 0.5, %v1606_v20 }
 0x17f   :  { %v1757_v28 = vpop.eup %1756  ;;  %v1612_v31 = vmul.f32 0.5, %v1608_v1 }
 0x180   :  { %v1607_v32 = vadd.f32 1.0, %v1757_v28  ;;  %v1613_v33 = vmul.f32 0.5, %v1609_v29  ;;  %1662 = vst [vmem:[%s2142_s3] sm:$0xff] %v1610_v30 }
 0x181   :  { %1664 = vst [vmem:[%s2142_s3 + $0x10] sm:$0xff] %v1612_v31  ;;  %v726_v35 = vpop.f32.mrb[24].mxu1 }
 0x182   :  { %v1611_v34 = vmul.f32 0.5, %v1607_v32  ;;  %1666 = vst.msk [vmem:[%s2142_s3 + $0x18] sm:$0xff] %vm1497_vm8, %v1613_v33  ;;  %v685_v36 = vpop.f32.mrb[24].mxu0  ;;  %v735_v37 = vadd.f32 %v726_v35, %v642_v15  ;;  %v728_v39 = vpop.f32.mrb[25].mxu1 }
 0x183   :  { %v733_v38 = vadd.f32 %v685_v36, %v601_v16  ;;  %v687_v40 = vpop.f32.mrb[25].mxu0  ;;  %v736_v41 = vadd.f32 %v728_v39, %v644_v21  ;;  %v730_v43 = vpop.f32.mrb[26].mxu1 }
 0x184   :  { %1663 = vst [vmem:[%s2142_s3 + $0x8] sm:$0xff] %v1611_v34  ;;  %v734_v42 = vadd.f32 %v687_v40, %v603_v22  ;;  %v689_v44 = vpop.f32.mrb[26].mxu0  ;;  %v731_v45 = vpop.f32.mrb[27].mxu1 }
 0x185   :  { %v690_v47 = vpop.f32.mrb[27].mxu0 }
 0x189   :  { %v831_v48 = vpop.f32.mrb[28].mxu1 }
 0x18a   :  { %v790_v49 = vpop.f32.mrb[28].mxu0  ;;  %v840_v50 = vadd.f32 %v831_v48, %v735_v37  ;;  %v833_v52 = vpop.f32.mrb[29].mxu1 }
 0x18b   :  { %v838_v51 = vadd.f32 %v790_v49, %v733_v38  ;;  %v792_v53 = vpop.f32.mrb[29].mxu0  ;;  %v841_v54 = vadd.f32 %v833_v52, %v736_v41  ;;  %v835_v56 = vpop.f32.mrb[30].mxu1 }
 0x18c   :  { %v839_v55 = vadd.f32 %v792_v53, %v734_v42  ;;  %v794_v57 = vpop.f32.mrb[30].mxu0  ;;  %v844_v58 = vadd.f32 %v840_v50, %v2069_v46  ;;  %v836_v60 = vpop.f32.mrb[31].mxu1 }
 0x18d   :  { %v842_v59 = vadd.f32 %v838_v51, %v2069_v46  ;;  %v795_v61 = vpop.f32.mrb[31].mxu0  ;;  %v845_v62 = vadd.f32 %v841_v54, %v2069_v46 }
 0x18e   :  { %v843_v63 = vadd.f32 %v839_v55, %v2069_v46  ;;  %v1616_v0 = vmul.f32 0.5, %v844_v58 }
 0x18f   :  { %v1614_v2 = vmul.f32 0.5, %v842_v59  ;;  %v1617_v3 = vmul.f32 0.5, %v845_v62 }
 0x190   :  { %v1615_v4 = vmul.f32 0.5, %v843_v63  ;;  %1758 = vtanh.f32 %v1616_v0 }
 0x191   :  { %1760 = vtanh.f32 %v1614_v2  ;;  %v924_v5 = vpop.f32.mrb[32].mxu1 }
 0x192   :  { %v883_v6 = vpop.f32.mrb[32].mxu0  ;;  %1762 = vtanh.f32 %v1617_v3  ;;  %v926_v7 = vpop.f32.mrb[33].mxu1 }
 0x193   :  { %v885_v8 = vpop.f32.mrb[33].mxu0  ;;  %1764 = vtanh.f32 %v1615_v4  ;;  %v928_v9 = vpop.f32.mrb[34].mxu1 }
 0x194   :  { %v887_v10 = vpop.f32.mrb[34].mxu0  ;;  %v929_v11 = vpop.f32.mrb[35].mxu1 }
 0x195   :  { %v888_v12 = vpop.f32.mrb[35].mxu0 }
 0x199   :  { %v1009_v13 = vpop.f32.mrb[36].mxu1 }
 0x19a   :  { %v968_v14 = vpop.f32.mrb[36].mxu0  ;;  %v1759_v15 = vpop.eup %1758  ;;  %v1010_v16 = vadd.f32 %v1009_v13, %v924_v5 }
 0x19b   :  { %v969_v17 = vadd.f32 %v968_v14, %v883_v6  ;;  %v1011_v18 = vpop.f32.mrb[37].mxu1  ;;  %v970_v19 = vpop.f32.mrb[37].mxu0  ;;  %v1624_v21 = vadd.f32 1.0, %v1759_v15 }
 0x19c   :  { %v1761_v20 = vpop.eup %1760  ;;  %v1012_v22 = vadd.f32 %v1011_v18, %v926_v7  ;;  %v971_v23 = vadd.f32 %v970_v19, %v885_v8  ;;  %v1013_v24 = vpop.f32.mrb[38].mxu1 }
 0x19d   :  { %v972_v25 = vpop.f32.mrb[38].mxu0  ;;  %v1763_v1 = vpop.eup %1762  ;;  %v1622_v26 = vadd.f32 1.0, %v1761_v20  ;;  %v1628_v30 = vmul.f32 0.5, %v1624_v21 }
 0x19e   :  { %v1014_v27 = vpop.f32.mrb[39].mxu1  ;;  %v973_v28 = vpop.f32.mrb[39].mxu0  ;;  %v1625_v31 = vadd.f32 1.0, %v1763_v1 }
 0x19f   :  { %v1765_v29 = vpop.eup %1764  ;;  %v1626_v32 = vmul.f32 0.5, %v1622_v26  ;;  %1724 = vst [vmem:[%s2142_s3 + $0x30] sm:$0xff] %v1628_v30 }
 0x1a0   :  { %v1623_v33 = vadd.f32 1.0, %v1765_v29  ;;  %v1629_v34 = vmul.f32 0.5, %v1625_v31 }
 0x1a1   :  { %1722 = vst [vmem:[%s2142_s3 + $0x20] sm:$0xff] %v1626_v32  ;;  %v1110_v36 = vpop.f32.mrb[40].mxu1 }
 0x1a2   :  { %v1627_v35 = vmul.f32 0.5, %v1623_v33  ;;  %1725 = vst.msk [vmem:[%s2142_s3 + $0x38] sm:$0xff] %vm1497_vm8, %v1629_v34  ;;  %v1069_v37 = vpop.f32.mrb[40].mxu0  ;;  %v1119_v38 = vadd.f32 %v1110_v36, %v1010_v16  ;;  %v1112_v40 = vpop.f32.mrb[41].mxu1 }
 0x1a3   :  { %v1117_v39 = vadd.f32 %v1069_v37, %v969_v17  ;;  %v1071_v41 = vpop.f32.mrb[41].mxu0  ;;  %v1120_v42 = vadd.f32 %v1112_v40, %v1012_v22  ;;  %v1114_v44 = vpop.f32.mrb[42].mxu1 }
 0x1a4   :  { %1723 = vst [vmem:[%s2142_s3 + $0x28] sm:$0xff] %v1627_v35  ;;  %v1118_v43 = vadd.f32 %v1071_v41, %v971_v23  ;;  %v1073_v45 = vpop.f32.mrb[42].mxu0  ;;  %v1115_v47 = vpop.f32.mrb[43].mxu1 }
 0x1a5   :  { %v1074_v48 = vpop.f32.mrb[43].mxu0 }
 0x1a9   :  { %v1215_v49 = vpop.f32.mrb[44].mxu1 }
 0x1aa   :  { %v1174_v50 = vpop.f32.mrb[44].mxu0  ;;  %v1224_v51 = vadd.f32 %v1215_v49, %v1119_v38  ;;  %v1217_v53 = vpop.f32.mrb[45].mxu1 }
 0x1ab   :  { %v1222_v52 = vadd.f32 %v1174_v50, %v1117_v39  ;;  %v1176_v54 = vpop.f32.mrb[45].mxu0  ;;  %v1225_v55 = vadd.f32 %v1217_v53, %v1120_v42  ;;  %v1219_v57 = vpop.f32.mrb[46].mxu1 }
 0x1ac   :  { %v1223_v56 = vadd.f32 %v1176_v54, %v1118_v43  ;;  %v1178_v58 = vpop.f32.mrb[46].mxu0  ;;  %v1228_v59 = vadd.f32 %v1224_v51, %v2069_v46  ;;  %v1220_v61 = vpop.f32.mrb[47].mxu1 }
 0x1ad   :  { %v1226_v60 = vadd.f32 %v1222_v52, %v2069_v46  ;;  %v1179_v62 = vpop.f32.mrb[47].mxu0  ;;  %v1229_v63 = vadd.f32 %v1225_v55, %v2069_v46 }
 0x1ae   :  { %v1227_v0 = vadd.f32 %v1223_v56, %v2069_v46  ;;  %v1632_v2 = vmul.f32 0.5, %v1228_v59 }
 0x1af   :  { %v1630_v3 = vmul.f32 0.5, %v1226_v60  ;;  %v1633_v4 = vmul.f32 0.5, %v1229_v63 }
 0x1b0   :  { %v1631_v5 = vmul.f32 0.5, %v1227_v0  ;;  %1766 = vtanh.f32 %v1632_v2 }
 0x1b1   :  { %1768 = vtanh.f32 %v1630_v3  ;;  %v1308_v6 = vpop.f32.mrb[48].mxu1 }
 0x1b2   :  { %v1267_v7 = vpop.f32.mrb[48].mxu0  ;;  %1770 = vtanh.f32 %v1633_v4  ;;  %v1310_v8 = vpop.f32.mrb[49].mxu1 }
 0x1b3   :  { %v1269_v9 = vpop.f32.mrb[49].mxu0  ;;  %1772 = vtanh.f32 %v1631_v5  ;;  %v1312_v10 = vpop.f32.mrb[50].mxu1 }
 0x1b4   :  { %v1271_v11 = vpop.f32.mrb[50].mxu0  ;;  %v1313_v12 = vpop.f32.mrb[51].mxu1 }
 0x1b5   :  { %v1272_v13 = vpop.f32.mrb[51].mxu0 }
 0x1b9   :  { %v1393_v14 = vpop.f32.mrb[52].mxu1 }
 0x1ba   :  { %v1352_v15 = vpop.f32.mrb[52].mxu0  ;;  %v1767_v16 = vpop.eup %1766  ;;  %v1394_v17 = vadd.f32 %v1393_v14, %v1308_v6 }
 0x1bb   :  { %v1353_v18 = vadd.f32 %v1352_v15, %v1267_v7  ;;  %v1395_v19 = vpop.f32.mrb[53].mxu1  ;;  %v1354_v20 = vpop.f32.mrb[53].mxu0  ;;  %v1640_v22 = vadd.f32 1.0, %v1767_v16 }
 0x1bc   :  { %v1769_v21 = vpop.eup %1768  ;;  %v1396_v23 = vadd.f32 %v1395_v19, %v1310_v8  ;;  %v1355_v24 = vadd.f32 %v1354_v20, %v1269_v9  ;;  %v1397_v25 = vpop.f32.mrb[54].mxu1 }
 0x1bd   :  { %v1356_v1 = vpop.f32.mrb[54].mxu0  ;;  %v1771_v26 = vpop.eup %1770  ;;  %v1638_v27 = vadd.f32 1.0, %v1769_v21  ;;  %v1644_v31 = vmul.f32 0.5, %v1640_v22 }
 0x1be   :  { %v1398_v28 = vpop.f32.mrb[55].mxu1  ;;  %v1357_v29 = vpop.f32.mrb[55].mxu0  ;;  %v1641_v32 = vadd.f32 1.0, %v1771_v26 }
 0x1bf   :  { %v1773_v30 = vpop.eup %1772  ;;  %v1642_v33 = vmul.f32 0.5, %v1638_v27  ;;  %1728 = vst [vmem:[%s2142_s3 + $0x50] sm:$0xff] %v1644_v31 }
 0x1c0   :  { %v1639_v34 = vadd.f32 1.0, %v1773_v30  ;;  %v1645_v35 = vmul.f32 0.5, %v1641_v32 }
 0x1c1   :  { %1726 = vst [vmem:[%s2142_s3 + $0x40] sm:$0xff] %v1642_v33  ;;  %v1478_v37 = vpop.f32.mrb[56].mxu1 }
 0x1c2   :  { %v1643_v36 = vmul.f32 0.5, %v1639_v34  ;;  %1729 = vst.msk [vmem:[%s2142_s3 + $0x58] sm:$0xff] %vm1497_vm8, %v1645_v35  ;;  %v1437_v38 = vpop.f32.mrb[56].mxu0  ;;  %v1487_v39 = vadd.f32 %v1478_v37, %v1394_v17  ;;  %v1480_v41 = vpop.f32.mrb[57].mxu1 }
 0x1c3   :  { %v1485_v40 = vadd.f32 %v1437_v38, %v1353_v18  ;;  %v1439_v42 = vpop.f32.mrb[57].mxu0  ;;  %v1488_v43 = vadd.f32 %v1480_v41, %v1396_v23  ;;  %v1482_v45 = vpop.f32.mrb[58].mxu1 }
 0x1c4   :  { %1727 = vst [vmem:[%s2142_s3 + $0x48] sm:$0xff] %v1643_v36  ;;  %v1486_v44 = vadd.f32 %v1439_v42, %v1355_v24  ;;  %v1441_v47 = vpop.f32.mrb[58].mxu0  ;;  %v1483_v48 = vpop.f32.mrb[59].mxu1 }
 0x1c5   :  { %v1442_v49 = vpop.f32.mrb[59].mxu0 }
 0x1c9   :  { %v1583_v50 = vpop.f32.mrb[60].mxu1 }
 0x1ca   :  { %v1542_v51 = vpop.f32.mrb[60].mxu0  ;;  %v1592_v52 = vadd.f32 %v1583_v50, %v1487_v39  ;;  %v1585_v54 = vpop.f32.mrb[61].mxu1 }
 0x1cb   :  { %v1590_v53 = vadd.f32 %v1542_v51, %v1485_v40  ;;  %v1544_v55 = vpop.f32.mrb[61].mxu0  ;;  %v1593_v56 = vadd.f32 %v1585_v54, %v1488_v43  ;;  %v1587_v58 = vpop.f32.mrb[62].mxu1 }
 0x1cc   :  { %v1591_v57 = vadd.f32 %v1544_v55, %v1486_v44  ;;  %v1546_v59 = vpop.f32.mrb[62].mxu0  ;;  %v1596_v60 = vadd.f32 %v1592_v52, %v2069_v46  ;;  %v1588_v62 = vpop.f32.mrb[63].mxu1 }
 0x1cd   :  { %v1594_v61 = vadd.f32 %v1590_v53, %v2069_v46  ;;  %v1547_v63 = vpop.f32.mrb[63].mxu0  ;;  %v1597_v0 = vadd.f32 %v1593_v56, %v2069_v46 }
 0x1ce   :  { %v1595_v2 = vadd.f32 %v1591_v57, %v2069_v46  ;;  %v1648_v3 = vmul.f32 0.5, %v1596_v60 }
 0x1cf   :  { %v1646_v4 = vmul.f32 0.5, %v1594_v61  ;;  %v1649_v5 = vmul.f32 0.5, %v1597_v0 }
 0x1d0   :  { %v1647_v6 = vmul.f32 0.5, %v1595_v2  ;;  %1774 = vtanh.f32 %v1648_v3 }
 0x1d1   :  { %1776 = vtanh.f32 %v1646_v4 }
 0x1d2   :  { %1778 = vtanh.f32 %v1649_v5 }
 0x1d3   :  { %1780 = vtanh.f32 %v1647_v6 }
 0x1da   :  { %v1775_v7 = vpop.eup %1774 }
 0x1db   :  { %v1777_v8 = vpop.eup %1776  ;;  %v1656_v9 = vadd.f32 1.0, %v1775_v7 }
 0x1dc   :  { %v1779_v10 = vpop.eup %1778  ;;  %v1654_v11 = vadd.f32 1.0, %v1777_v8 }
 0x1dd   :  { %v1781_v12 = vpop.eup %1780  ;;  %v1660_v13 = vmul.f32 0.5, %v1656_v9  ;;  %v1657_v14 = vadd.f32 1.0, %v1779_v10 }
 0x1de   :  { %v1658_v15 = vmul.f32 0.5, %v1654_v11  ;;  %v1655_v16 = vadd.f32 1.0, %v1781_v12 }
 0x1df   :  { %1732 = vst [vmem:[%s2142_s3 + $0x70] sm:$0xff] %v1660_v13  ;;  %v1661_v46 = vmul.f32 0.5, %v1657_v14 }
 0x1e0   :  { %1730 = vst [vmem:[%s2142_s3 + $0x60] sm:$0xff] %v1658_v15  ;;  %v1659_v17 = vmul.f32 0.5, %v1655_v16 }
 0x1e1   :  { %1733 = vst.msk [vmem:[%s2142_s3 + $0x78] sm:$0xff] %vm1497_vm8, %v1661_v46 }
 0x1e2   :  { %1731 = vst [vmem:[%s2142_s3 + $0x68] sm:$0xff] %v1659_v17 }

</bundles_post_ra>
